<compile_context>
chip_gen: v7x
topology: tpu7x:2x2x1
jax: 0.10.0
libtpu: 0.0.40
codegen_flags: <defaults>
</compile_context>

<pallas_src>
from functools import partial

import jax
import jax.numpy as jnp
from jax.experimental import pallas as pl
from jax.experimental.pallas import tpu as pltpu

LANE = 128


def _rup(x, m):
    return (x + m - 1) // m * m


# ---------------------------------------------------------------------------
# Fused Inception kernel: one batch element per grid step.
# ---------------------------------------------------------------------------
def _inception_kernel(x_ref, wcomb_ref, bmid_ref, wtaps_ref, w4_ref, bout_ref,
                      o_ref, smid_ref, spool_ref, *, H, W, CIN, CMID, COUT):
    HW = H * W
    f32 = jnp.float32
    bf16 = jnp.bfloat16

    # ---- halo frames: only the thin border strips (interiors overwritten) ---
    smid_ref[0:2, :, :] = jnp.zeros((2, W + 4, CMID), f32)
    smid_ref[2 + H:4 + H, :, :] = jnp.zeros((2, W + 4, CMID), f32)
    smid_ref[2:2 + H, 0:2, :] = jnp.zeros((H, 2, CMID), f32)
    smid_ref[2:2 + H, 2 + W:4 + W, :] = jnp.zeros((H, 2, CMID), f32)

    spool_ref[0:1, :, :] = jnp.full((1, W + 4, CIN), -jnp.inf, f32)
    spool_ref[1 + H:2 + H, :, :] = jnp.full((1, W + 4, CIN), -jnp.inf, f32)
    spool_ref[1:1 + H, 0:2, :] = jnp.full((H, 2, CIN), -jnp.inf, f32)
    spool_ref[1:1 + H, 2 + W:4 + W, :] = jnp.full((H, 2, CIN), -jnp.inf, f32)

    # ---- fused 1x1 convs: [path2a | path3a | path1] in one bf16 matmul ------
    x0 = x_ref[0]                                            # (H, W, CIN) bf16
    xs = x0.reshape(HW, CIN)
    y0 = jnp.dot(xs, wcomb_ref[...], preferred_element_type=f32)  # (HW, CMID+COUT)
    ymid = jnp.maximum(y0[:, :CMID] + bmid_ref[...], 0.0)         # (HW, CMID)
    acc = y0[:, CMID:]                                            # path1, pre-bias

    # ---- zero-padded intermediate (pad=2 covers both the 3x3 and the 5x5) ---
    smid_ref[2:2 + H, 2:2 + W, :] = ymid.reshape(H, W, CMID)

    # ---- path4: 3x3 stride-1 max-pool fused with its 1x1 conv ---------------
    spool_ref[1:1 + H, 2:2 + W, :] = x0.astype(f32)
    pooled = None
    for kh in range(3):
        slab = spool_ref[kh:kh + H, :, :]                    # (H, W+4, CIN)
        for kw in range(3):
            win = slab[:, 1 + kw:1 + kw + W, :]
            pooled = win if pooled is None else jnp.maximum(pooled, win)
    acc = acc + jnp.dot(pooled.reshape(HW, CIN).astype(bf16), w4_ref[...],
                        preferred_element_type=f32)

    # ---- folded path2 (3x3) + path3 (5x5): 25 per-tap K=CMID matmuls --------
    for kh in range(5):
        slab = smid_ref[kh:kh + H, :, :]                     # (H, W+4, CMID)
        for kw in range(5):
            win = slab[:, kw:kw + W, :].reshape(HW, CMID).astype(bf16)
            acc = acc + jnp.dot(win, wtaps_ref[kh * 5 + kw],
                                preferred_element_type=f32)

    # ---- fused bias + ReLU, one lane-dense store of the concatenated output -
    o_ref[...] = jnp.maximum(acc + bout_ref[...], 0.0).reshape(1, H, W, COUT)


# ---------------------------------------------------------------------------
# Weight packing: embed every conv's weights at its path's channel offset in
# shared lane-padded matrices, so all four paths accumulate into disjoint
# column blocks of one output and torch.cat is free.
# ---------------------------------------------------------------------------
def pack_inception_weights(p, in_c, out1, out2, out3, out4):
    f32, bf16 = jnp.float32, jnp.bfloat16
    c2a, c2b = out2
    c3a, c3b = out3
    CIN = _rup(in_c, LANE)
    CMID = _rup(c2a + c3a, LANE)
    cout_real = out1 + c2b + c3b + out4
    COUT = _rup(cout_real, LANE)
    off1, off2, off3, off4 = 0, out1, out1 + c2b, out1 + c2b + c3b

    # fused 1x1 weight: columns [0:CMID] = (w2a | w3a), columns [CMID:] = w1.
    wcomb = jnp.zeros((CIN, CMID + COUT), f32)
    wcomb = wcomb.at[:in_c, 0:c2a].set(p["w2a"][0, 0])
    wcomb = wcomb.at[:in_c, c2a:c2a + c3a].set(p["w3a"][0, 0])
    wcomb = wcomb.at[:in_c, CMID + off1:CMID + off1 + out1].set(p["w1"][0, 0])

    bmid = jnp.zeros((1, CMID), f32)
    bmid = bmid.at[0, 0:c2a].set(p["b2a"][0])
    bmid = bmid.at[0, c2a:c2a + c3a].set(p["b3a"][0])

    # Folded per-tap weights over the 5x5 tap grid: 5x5 conv rows live at
    # mid-channels [c2a:c2a+c3a]; the 3x3 conv occupies the inner 3x3 taps
    # with rows [0:c2a].  Disjoint rows AND disjoint output columns.
    wtaps = jnp.zeros((25, CMID, COUT), f32)
    for kh in range(5):
        for kw in range(5):
            t = kh * 5 + kw
            wtaps = wtaps.at[t, c2a:c2a + c3a, off3:off3 + c3b].set(p["w3b"][kh, kw])
            if 1 <= kh <= 3 and 1 <= kw <= 3:
                wtaps = wtaps.at[t, 0:c2a, off2:off2 + c2b].set(p["w2b"][kh - 1, kw - 1])

    w4e = jnp.zeros((CIN, COUT), f32).at[:in_c, off4:off4 + out4].set(p["w4"][0, 0])

    bout = jnp.zeros((1, COUT), f32)
    bout = bout.at[0, off1:off1 + out1].set(p["b1"][0])
    bout = bout.at[0, off2:off2 + c2b].set(p["b2b"][0])
    bout = bout.at[0, off3:off3 + c3b].set(p["b3b"][0])
    bout = bout.at[0, off4:off4 + out4].set(p["b4"][0])

    return dict(wcomb=wcomb.astype(bf16), bmid=bmid, wtaps=wtaps.astype(bf16),
                w4e=w4e.astype(bf16), bout=bout,
                CIN=CIN, CMID=CMID, COUT=COUT, cout_real=cout_real)


# ---------------------------------------------------------------------------
# Forward wrapper (PyTorch-style NCHW in / NCHW out)
# ---------------------------------------------------------------------------
def inception_forward(x_nchw, params, in_c, out1, out2, out3, out4):
    pk = pack_inception_weights(params, in_c, out1, out2, out3, out4)
    CIN, CMID, COUT = pk["CIN"], pk["CMID"], pk["COUT"]
    N, C, H, W = x_nchw.shape

    # NCHW -> NHWC, channel axis zero-padded to a full 128-lane width, bf16.
    x = jnp.transpose(x_nchw, (0, 2, 3, 1))
    x = jnp.pad(x, ((0, 0), (0, 0), (0, 0), (0, CIN - C))).astype(jnp.bfloat16)

    kernel = partial(_inception_kernel, H=H, W=W, CIN=CIN, CMID=CMID, COUT=COUT)
    out = pl.pallas_call(
        kernel,
        out_shape=jax.ShapeDtypeStruct((N, H, W, COUT), jnp.float32),
        grid=(N,),
        in_specs=[
            pl.BlockSpec((1, H, W, CIN), lambda n: (n, 0, 0, 0)),    # x
            pl.BlockSpec((CIN, CMID + COUT), lambda n: (0, 0)),      # fused 1x1 W
            pl.BlockSpec((1, CMID), lambda n: (0, 0)),               # mid bias
            pl.BlockSpec((25, CMID, COUT), lambda n: (0, 0, 0)),     # folded 3x3+5x5 taps
            pl.BlockSpec((CIN, COUT), lambda n: (0, 0)),             # path4 1x1 W
            pl.BlockSpec((1, COUT), lambda n: (0, 0)),               # concat bias
        ],
        out_specs=pl.BlockSpec((1, H, W, COUT), lambda n: (n, 0, 0, 0)),
        scratch_shapes=[
            pltpu.VMEM((H + 4, W + 4, CMID), jnp.float32),   # zero-padded mid
            pltpu.VMEM((H + 2, W + 4, CIN), jnp.float32),    # -inf padded x (pool)
        ],
        compiler_params=pltpu.CompilerParams(
            dimension_semantics=("parallel",),
            vmem_limit_bytes=48 * 1024 * 1024,
        ),
    )(x, pk["wcomb"], pk["bmid"], pk["wtaps"], pk["w4e"], pk["bout"])

    out = out[..., :pk["cout_real"]]
    return jnp.transpose(out, (0, 3, 1, 2))            # NHWC -> NCHW (cat dim=1)


# ---------------------------------------------------------------------------
# Parameter init (HWIO conv weights, matching the torch module's layer shapes)
# ---------------------------------------------------------------------------
def init_inception_params(key, in_c, out1, out2, out3, out4):
    ks = jax.random.split(key, 6)

    def wb(k, kh, kw, cin, cout):
        kw_, kb_ = jax.random.split(k)
        w = jax.random.normal(kw_, (kh, kw, cin, cout), jnp.float32) * 0.1
        b = jax.random.normal(kb_, (1, cout), jnp.float32) * 0.05
        return w, b

    p = {}
    p["w1"], p["b1"] = wb(ks[0], 1, 1, in_c, out1)
    p["w2a"], p["b2a"] = wb(ks[1], 1, 1, in_c, out2[0])
    p["w2b"], p["b2b"] = wb(ks[2], 3, 3, out2[0], out2[1])
    p["w3a"], p["b3a"] = wb(ks[3], 1, 1, in_c, out3[0])
    p["w3b"], p["b3b"] = wb(ks[4], 5, 5, out3[0], out3[1])
    p["w4"], p["b4"] = wb(ks[5], 1, 1, in_c, out4)
    return p


# ---------------------------------------------------------------------------
# Pure-JAX f32 reference (verification only)
# ---------------------------------------------------------------------------
def _ref_conv_relu(x, w, b, pad):
    y = jax.lax.conv_general_dilated(
        x, w, window_strides=(1, 1), padding=((pad, pad), (pad, pad)),
        dimension_numbers=("NHWC", "HWIO", "NHWC"))
    return jax.nn.relu(y + b.reshape(1, 1, 1, -1))


def _ref_maxpool(x):
    return jax.lax.reduce_window(
        x, -jnp.inf, jax.lax.max, (1, 3, 3, 1), (1, 1, 1, 1),
        padding=((0, 0), (1, 1), (1, 1), (0, 0)))


def _ref_forward(x_nchw, p):
    x = jnp.transpose(x_nchw, (0, 2, 3, 1))
    p1 = _ref_conv_relu(x, p["w1"], p["b1"], 0)
    p2 = _ref_conv_relu(_ref_conv_relu(x, p["w2a"], p["b2a"], 0),
                        p["w2b"], p["b2b"], 1)
    p3 = _ref_conv_relu(_ref_conv_relu(x, p["w3a"], p["b3a"], 0),
                        p["w3b"], p["b3b"], 2)
    p4 = _ref_conv_relu(_ref_maxpool(x), p["w4"], p["b4"], 0)
    out = jnp.concatenate([p1, p2, p3, p4], axis=-1)
    return jnp.transpose(out, (0, 3, 1, 2))


# ---------------------------------------------------------------------------
if __name__ == "__main__":
    key = jax.random.PRNGKey(0)
    k_x, k_p = jax.random.split(key)

    N, in_c, H, W = 2, 4, 16, 16
    out1, out2, out3, out4 = 8, (4, 8), (4, 8), 8

    x = jax.random.normal(k_x, (N, in_c, H, W), jnp.float32)
    params = init_inception_params(k_p, in_c, out1, out2, out3, out4)

    fwd = jax.jit(partial(inception_forward, in_c=in_c, out1=out1,
                          out2=out2, out3=out3, out4=out4))
    y = jax.block_until_ready(fwd(x, params))

    assert y.shape == (N, out1 + out2[1] + out3[1] + out4, H, W), y.shape

    # bf16 matmul operands (f32 accumulation) -> loosened tolerance vs f32 ref.
    y_ref = jax.block_until_ready(_ref_forward(x, params))
    assert jnp.allclose(y, y_ref, atol=3e-2, rtol=3e-2), "mismatch vs reference"

    print("KERNEL_OK")
</pallas_src>

<mosaic_0001>
module attributes {stable_mosaic.version = 11 : i64} {
  func.func @_inception_kernel(%arg0: i32, %arg1: memref<1x16x16x128xbf16, #tpu.memory_space<vmem>>, %arg2: memref<128x256xbf16, #tpu.memory_space<vmem>>, %arg3: memref<1x128xf32, #tpu.memory_space<vmem>>, %arg4: memref<25x128x128xbf16, #tpu.memory_space<vmem>>, %arg5: memref<128x128xbf16, #tpu.memory_space<vmem>>, %arg6: memref<1x128xf32, #tpu.memory_space<vmem>>, %arg7: memref<1x16x16x128xf32, #tpu.memory_space<vmem>>, %arg8: memref<20x20x128xf32, #tpu.memory_space<vmem>>, %arg9: memref<18x20x128xf32, #tpu.memory_space<vmem>>) attributes {dimension_semantics = [#tpu.dimension_semantics<parallel>], iteration_bounds = array<i64: 2>, scalar_prefetch = 0 : i64, scratch_operands = 2 : i64, tpu.core_type = #tpu.core_type<tc>, window_params = [{transform_indices = @transform_0, window_bounds = array<i64: 1, 16, 16, 128>}, {pipeline_mode = #tpu.pipeline_mode<synchronous>, transform_indices = @transform_1, window_bounds = array<i64: 128, 256>}, {pipeline_mode = #tpu.pipeline_mode<synchronous>, transform_indices = @transform_2, window_bounds = array<i64: 1, 128>}, {pipeline_mode = #tpu.pipeline_mode<synchronous>, transform_indices = @transform_3, window_bounds = array<i64: 25, 128, 128>}, {pipeline_mode = #tpu.pipeline_mode<synchronous>, transform_indices = @transform_4, window_bounds = array<i64: 128, 128>}, {pipeline_mode = #tpu.pipeline_mode<synchronous>, transform_indices = @transform_5, window_bounds = array<i64: 1, 128>}, {transform_indices = @transform_6, window_bounds = array<i64: 1, 16, 16, 128>}]} {
    %cst = arith.constant 0.000000e+00 : f32
    %0 = vector.broadcast %cst : f32 to vector<2x20x128xf32>
    %c0 = arith.constant 0 : index
    %c0_0 = arith.constant 0 : index
    %c0_1 = arith.constant 0 : index
    %1 = vector.load %arg8[%c0, %c0_0, %c0_1] : memref<20x20x128xf32, #tpu.memory_space<vmem>>, vector<2x20x128xf32>
    tpu.vector_store %arg8[%c0, %c0_0, %c0_1], %0 {strides = array<i32>} : memref<20x20x128xf32, #tpu.memory_space<vmem>>, vector<2x20x128xf32>,
    %cst_2 = arith.constant 0.000000e+00 : f32
    %2 = vector.broadcast %cst_2 : f32 to vector<2x20x128xf32>
    %c18 = arith.constant 18 : index
    %c0_3 = arith.constant 0 : index
    %c0_4 = arith.constant 0 : index
    %3 = vector.load %arg8[%c18, %c0_3, %c0_4] : memref<20x20x128xf32, #tpu.memory_space<vmem>>, vector<2x20x128xf32>
    tpu.vector_store %arg8[%c18, %c0_3, %c0_4], %2 {strides = array<i32>} : memref<20x20x128xf32, #tpu.memory_space<vmem>>, vector<2x20x128xf32>,
    %cst_5 = arith.constant 0.000000e+00 : f32
    %4 = vector.broadcast %cst_5 : f32 to vector<16x2x128xf32>
    %c2 = arith.constant 2 : index
    %c0_6 = arith.constant 0 : index
    %c0_7 = arith.constant 0 : index
    %5 = vector.load %arg8[%c2, %c0_6, %c0_7] : memref<20x20x128xf32, #tpu.memory_space<vmem>>, vector<16x2x128xf32>
    tpu.vector_store %arg8[%c2, %c0_6, %c0_7], %4 {strides = array<i32>} : memref<20x20x128xf32, #tpu.memory_space<vmem>>, vector<16x2x128xf32>,
    %cst_8 = arith.constant 0.000000e+00 : f32
    %6 = vector.broadcast %cst_8 : f32 to vector<16x2x128xf32>
    %c2_9 = arith.constant 2 : index
    %c18_10 = arith.constant 18 : index
    %c0_11 = arith.constant 0 : index
    %7 = vector.load %arg8[%c2_9, %c18_10, %c0_11] : memref<20x20x128xf32, #tpu.memory_space<vmem>>, vector<16x2x128xf32>
    tpu.vector_store %arg8[%c2_9, %c18_10, %c0_11], %6 {strides = array<i32>} : memref<20x20x128xf32, #tpu.memory_space<vmem>>, vector<16x2x128xf32>,
    %cst_12 = arith.constant 0xFF800000 : f32
    %8 = vector.broadcast %cst_12 : f32 to vector<1x20x128xf32>
    %c0_13 = arith.constant 0 : index
    %c0_14 = arith.constant 0 : index
    %c0_15 = arith.constant 0 : index
    %9 = vector.load %arg9[%c0_13, %c0_14, %c0_15] : memref<18x20x128xf32, #tpu.memory_space<vmem>>, vector<1x20x128xf32>
    tpu.vector_store %arg9[%c0_13, %c0_14, %c0_15], %8 {strides = array<i32>} : memref<18x20x128xf32, #tpu.memory_space<vmem>>, vector<1x20x128xf32>,
    %cst_16 = arith.constant 0xFF800000 : f32
    %10 = vector.broadcast %cst_16 : f32 to vector<1x20x128xf32>
    %c17 = arith.constant 17 : index
    %c0_17 = arith.constant 0 : index
    %c0_18 = arith.constant 0 : index
    %11 = vector.load %arg9[%c17, %c0_17, %c0_18] : memref<18x20x128xf32, #tpu.memory_space<vmem>>, vector<1x20x128xf32>
    tpu.vector_store %arg9[%c17, %c0_17, %c0_18], %10 {strides = array<i32>} : memref<18x20x128xf32, #tpu.memory_space<vmem>>, vector<1x20x128xf32>,
    %cst_19 = arith.constant 0xFF800000 : f32
    %12 = vector.broadcast %cst_19 : f32 to vector<16x2x128xf32>
    %c1 = arith.constant 1 : index
    %c0_20 = arith.constant 0 : index
    %c0_21 = arith.constant 0 : index
    %13 = vector.load %arg9[%c1, %c0_20, %c0_21] : memref<18x20x128xf32, #tpu.memory_space<vmem>>, vector<16x2x128xf32>
    tpu.vector_store %arg9[%c1, %c0_20, %c0_21], %12 {strides = array<i32>} : memref<18x20x128xf32, #tpu.memory_space<vmem>>, vector<16x2x128xf32>,
    %cst_22 = arith.constant 0xFF800000 : f32
    %14 = vector.broadcast %cst_22 : f32 to vector<16x2x128xf32>
    %c1_23 = arith.constant 1 : index
    %c18_24 = arith.constant 18 : index
    %c0_25 = arith.constant 0 : index
    %15 = vector.load %arg9[%c1_23, %c18_24, %c0_25] : memref<18x20x128xf32, #tpu.memory_space<vmem>>, vector<16x2x128xf32>
    tpu.vector_store %arg9[%c1_23, %c18_24, %c0_25], %14 {strides = array<i32>} : memref<18x20x128xf32, #tpu.memory_space<vmem>>, vector<16x2x128xf32>,
    %c0_26 = arith.constant 0 : index
    %c0_27 = arith.constant 0 : index
    %c0_28 = arith.constant 0 : index
    %c0_29 = arith.constant 0 : index
    %16 = vector.load %arg1[%c0_26, %c0_27, %c0_28, %c0_29] : memref<1x16x16x128xbf16, #tpu.memory_space<vmem>>, vector<1x16x16x128xbf16>
    %17 = vector.shape_cast %16 : vector<1x16x16x128xbf16> to vector<16x16x128xbf16>
    %18 = vector.shape_cast %17 : vector<16x16x128xbf16> to vector<256x128xbf16>
    %c0_30 = arith.constant 0 : index
    %c0_31 = arith.constant 0 : index
    %19 = vector.load %arg2[%c0_30, %c0_31] : memref<128x256xbf16, #tpu.memory_space<vmem>>, vector<128x256xbf16>
    %cst_32 = arith.constant dense<0.000000e+00> : vector<256x256xf32>
    %20 = tpu.matmul %18, %19, %cst_32 {dimension_numbers = #tpu.dot_dimension_numbers<[1], [0], [0], [1], [0, 0, 1, 1], [], []>} : vector<256x128xbf16>, vector<128x256xbf16>, vector<256x256xf32> -> vector<256x256xf32>
    %21 = vector.extract_strided_slice %20 {offsets = [0, 0], sizes = [256, 128], strides = [1, 1]} : vector<256x256xf32> to vector<256x128xf32>
    %c0_33 = arith.constant 0 : index
    %c0_34 = arith.constant 0 : index
    %22 = vector.load %arg3[%c0_33, %c0_34] : memref<1x128xf32, #tpu.memory_space<vmem>>, vector<1x128xf32>
    %23 = vector.broadcast %22 : vector<1x128xf32> to vector<256x128xf32>
    %24 = arith.addf %21, %23 : vector<256x128xf32>
    %cst_35 = arith.constant 0.000000e+00 : f32
    %25 = vector.broadcast %cst_35 : f32 to vector<256x128xf32>
    %26 = arith.maximumf %24, %25 : vector<256x128xf32>
    %27 = vector.extract_strided_slice %20 {offsets = [0, 128], sizes = [256, 128], strides = [1, 1]} : vector<256x256xf32> to vector<256x128xf32>
    %28 = vector.shape_cast %26 : vector<256x128xf32> to vector<16x16x128xf32>
    %c2_36 = arith.constant 2 : index
    %c2_37 = arith.constant 2 : index
    %c0_38 = arith.constant 0 : index
    %29 = vector.load %arg8[%c2_36, %c2_37, %c0_38] : memref<20x20x128xf32, #tpu.memory_space<vmem>>, vector<16x16x128xf32>
    tpu.vector_store %arg8[%c2_36, %c2_37, %c0_38], %28 {strides = array<i32>} : memref<20x20x128xf32, #tpu.memory_space<vmem>>, vector<16x16x128xf32>,
    %30 = arith.extf %17 : vector<16x16x128xbf16> to vector<16x16x128xf32>
    %c1_39 = arith.constant 1 : index
    %c2_40 = arith.constant 2 : index
    %c0_41 = arith.constant 0 : index
    %31 = vector.load %arg9[%c1_39, %c2_40, %c0_41] : memref<18x20x128xf32, #tpu.memory_space<vmem>>, vector<16x16x128xf32>
    tpu.vector_store %arg9[%c1_39, %c2_40, %c0_41], %30 {strides = array<i32>} : memref<18x20x128xf32, #tpu.memory_space<vmem>>, vector<16x16x128xf32>,
    %c0_42 = arith.constant 0 : index
    %c0_43 = arith.constant 0 : index
    %c0_44 = arith.constant 0 : index
    %32 = vector.load %arg9[%c0_42, %c0_43, %c0_44] : memref<18x20x128xf32, #tpu.memory_space<vmem>>, vector<16x20x128xf32>
    %33 = vector.extract_strided_slice %32 {offsets = [0, 1, 0], sizes = [16, 16, 128], strides = [1, 1, 1]} : vector<16x20x128xf32> to vector<16x16x128xf32>
    %34 = vector.extract_strided_slice %32 {offsets = [0, 2, 0], sizes = [16, 16, 128], strides = [1, 1, 1]} : vector<16x20x128xf32> to vector<16x16x128xf32>
    %35 = arith.maximumf %33, %34 : vector<16x16x128xf32>
    %36 = vector.extract_strided_slice %32 {offsets = [0, 3, 0], sizes = [16, 16, 128], strides = [1, 1, 1]} : vector<16x20x128xf32> to vector<16x16x128xf32>
    %37 = arith.maximumf %35, %36 : vector<16x16x128xf32>
    %c1_45 = arith.constant 1 : index
    %c0_46 = arith.constant 0 : index
    %c0_47 = arith.constant 0 : index
    %38 = vector.load %arg9[%c1_45, %c0_46, %c0_47] : memref<18x20x128xf32, #tpu.memory_space<vmem>>, vector<16x20x128xf32>
    %39 = vector.extract_strided_slice %38 {offsets = [0, 1, 0], sizes = [16, 16, 128], strides = [1, 1, 1]} : vector<16x20x128xf32> to vector<16x16x128xf32>
    %40 = arith.maximumf %37, %39 : vector<16x16x128xf32>
    %41 = vector.extract_strided_slice %38 {offsets = [0, 2, 0], sizes = [16, 16, 128], strides = [1, 1, 1]} : vector<16x20x128xf32> to vector<16x16x128xf32>
    %42 = arith.maximumf %40, %41 : vector<16x16x128xf32>
    %43 = vector.extract_strided_slice %38 {offsets = [0, 3, 0], sizes = [16, 16, 128], strides = [1, 1, 1]} : vector<16x20x128xf32> to vector<16x16x128xf32>
    %44 = arith.maximumf %42, %43 : vector<16x16x128xf32>
    %c2_48 = arith.constant 2 : index
    %c0_49 = arith.constant 0 : index
    %c0_50 = arith.constant 0 : index
    %45 = vector.load %arg9[%c2_48, %c0_49, %c0_50] : memref<18x20x128xf32, #tpu.memory_space<vmem>>, vector<16x20x128xf32>
    %46 = vector.extract_strided_slice %45 {offsets = [0, 1, 0], sizes = [16, 16, 128], strides = [1, 1, 1]} : vector<16x20x128xf32> to vector<16x16x128xf32>
    %47 = arith.maximumf %44, %46 : vector<16x16x128xf32>
    %48 = vector.extract_strided_slice %45 {offsets = [0, 2, 0], sizes = [16, 16, 128], strides = [1, 1, 1]} : vector<16x20x128xf32> to vector<16x16x128xf32>
    %49 = arith.maximumf %47, %48 : vector<16x16x128xf32>
    %50 = vector.extract_strided_slice %45 {offsets = [0, 3, 0], sizes = [16, 16, 128], strides = [1, 1, 1]} : vector<16x20x128xf32> to vector<16x16x128xf32>
    %51 = arith.maximumf %49, %50 : vector<16x16x128xf32>
    %52 = vector.shape_cast %51 : vector<16x16x128xf32> to vector<256x128xf32>
    %53 = arith.truncf %52 : vector<256x128xf32> to vector<256x128xbf16>
    %c0_51 = arith.constant 0 : index
    %c0_52 = arith.constant 0 : index
    %54 = vector.load %arg5[%c0_51, %c0_52] : memref<128x128xbf16, #tpu.memory_space<vmem>>, vector<128x128xbf16>
    %cst_53 = arith.constant dense<0.000000e+00> : vector<256x128xf32>
    %55 = tpu.matmul %53, %54, %cst_53 {dimension_numbers = #tpu.dot_dimension_numbers<[1], [0], [0], [1], [0, 0, 1, 1], [], []>} : vector<256x128xbf16>, vector<128x128xbf16>, vector<256x128xf32> -> vector<256x128xf32>
    %56 = arith.addf %27, %55 : vector<256x128xf32>
    %c0_54 = arith.constant 0 : index
    %c0_55 = arith.constant 0 : index
    %c0_56 = arith.constant 0 : index
    %57 = vector.load %arg8[%c0_54, %c0_55, %c0_56] : memref<20x20x128xf32, #tpu.memory_space<vmem>>, vector<16x20x128xf32>
    %58 = vector.extract_strided_slice %57 {offsets = [0, 0, 0], sizes = [16, 16, 128], strides = [1, 1, 1]} : vector<16x20x128xf32> to vector<16x16x128xf32>
    %59 = vector.shape_cast %58 : vector<16x16x128xf32> to vector<256x128xf32>
    %60 = arith.truncf %59 : vector<256x128xf32> to vector<256x128xbf16>
    %c0_57 = arith.constant 0 : index
    %c0_58 = arith.constant 0 : index
    %c0_59 = arith.constant 0 : index
    %61 = vector.load %arg4[%c0_57, %c0_58, %c0_59] : memref<25x128x128xbf16, #tpu.memory_space<vmem>>, vector<1x128x128xbf16>
    %62 = vector.shape_cast %61 : vector<1x128x128xbf16> to vector<128x128xbf16>
    %cst_60 = arith.constant dense<0.000000e+00> : vector<256x128xf32>
    %63 = tpu.matmul %60, %62, %cst_60 {dimension_numbers = #tpu.dot_dimension_numbers<[1], [0], [0], [1], [0, 0, 1, 1], [], []>} : vector<256x128xbf16>, vector<128x128xbf16>, vector<256x128xf32> -> vector<256x128xf32>
    %64 = arith.addf %56, %63 : vector<256x128xf32>
    %65 = vector.extract_strided_slice %57 {offsets = [0, 1, 0], sizes = [16, 16, 128], strides = [1, 1, 1]} : vector<16x20x128xf32> to vector<16x16x128xf32>
    %66 = vector.shape_cast %65 : vector<16x16x128xf32> to vector<256x128xf32>
    %67 = arith.truncf %66 : vector<256x128xf32> to vector<256x128xbf16>
    %c1_61 = arith.constant 1 : index
    %c0_62 = arith.constant 0 : index
    %c0_63 = arith.constant 0 : index
    %68 = vector.load %arg4[%c1_61, %c0_62, %c0_63] : memref<25x128x128xbf16, #tpu.memory_space<vmem>>, vector<1x128x128xbf16>
    %69 = vector.shape_cast %68 : vector<1x128x128xbf16> to vector<128x128xbf16>
    %cst_64 = arith.constant dense<0.000000e+00> : vector<256x128xf32>
    %70 = tpu.matmul %67, %69, %cst_64 {dimension_numbers = #tpu.dot_dimension_numbers<[1], [0], [0], [1], [0, 0, 1, 1], [], []>} : vector<256x128xbf16>, vector<128x128xbf16>, vector<256x128xf32> -> vector<256x128xf32>
    %71 = arith.addf %64, %70 : vector<256x128xf32>
    %72 = vector.extract_strided_slice %57 {offsets = [0, 2, 0], sizes = [16, 16, 128], strides = [1, 1, 1]} : vector<16x20x128xf32> to vector<16x16x128xf32>
    %73 = vector.shape_cast %72 : vector<16x16x128xf32> to vector<256x128xf32>
    %74 = arith.truncf %73 : vector<256x128xf32> to vector<256x128xbf16>
    %c2_65 = arith.constant 2 : index
    %c0_66 = arith.constant 0 : index
    %c0_67 = arith.constant 0 : index
    %75 = vector.load %arg4[%c2_65, %c0_66, %c0_67] : memref<25x128x128xbf16, #tpu.memory_space<vmem>>, vector<1x128x128xbf16>
    %76 = vector.shape_cast %75 : vector<1x128x128xbf16> to vector<128x128xbf16>
    %cst_68 = arith.constant dense<0.000000e+00> : vector<256x128xf32>
    %77 = tpu.matmul %74, %76, %cst_68 {dimension_numbers = #tpu.dot_dimension_numbers<[1], [0], [0], [1], [0, 0, 1, 1], [], []>} : vector<256x128xbf16>, vector<128x128xbf16>, vector<256x128xf32> -> vector<256x128xf32>
    %78 = arith.addf %71, %77 : vector<256x128xf32>
    %79 = vector.extract_strided_slice %57 {offsets = [0, 3, 0], sizes = [16, 16, 128], strides = [1, 1, 1]} : vector<16x20x128xf32> to vector<16x16x128xf32>
    %80 = vector.shape_cast %79 : vector<16x16x128xf32> to vector<256x128xf32>
    %81 = arith.truncf %80 : vector<256x128xf32> to vector<256x128xbf16>
    %c3 = arith.constant 3 : index
    %c0_69 = arith.constant 0 : index
    %c0_70 = arith.constant 0 : index
    %82 = vector.load %arg4[%c3, %c0_69, %c0_70] : memref<25x128x128xbf16, #tpu.memory_space<vmem>>, vector<1x128x128xbf16>
    %83 = vector.shape_cast %82 : vector<1x128x128xbf16> to vector<128x128xbf16>
    %cst_71 = arith.constant dense<0.000000e+00> : vector<256x128xf32>
    %84 = tpu.matmul %81, %83, %cst_71 {dimension_numbers = #tpu.dot_dimension_numbers<[1], [0], [0], [1], [0, 0, 1, 1], [], []>} : vector<256x128xbf16>, vector<128x128xbf16>, vector<256x128xf32> -> vector<256x128xf32>
    %85 = arith.addf %78, %84 : vector<256x128xf32>
    %86 = vector.extract_strided_slice %57 {offsets = [0, 4, 0], sizes = [16, 16, 128], strides = [1, 1, 1]} : vector<16x20x128xf32> to vector<16x16x128xf32>
    %87 = vector.shape_cast %86 : vector<16x16x128xf32> to vector<256x128xf32>
    %88 = arith.truncf %87 : vector<256x128xf32> to vector<256x128xbf16>
    %c4 = arith.constant 4 : index
    %c0_72 = arith.constant 0 : index
    %c0_73 = arith.constant 0 : index
    %89 = vector.load %arg4[%c4, %c0_72, %c0_73] : memref<25x128x128xbf16, #tpu.memory_space<vmem>>, vector<1x128x128xbf16>
    %90 = vector.shape_cast %89 : vector<1x128x128xbf16> to vector<128x128xbf16>
    %cst_74 = arith.constant dense<0.000000e+00> : vector<256x128xf32>
    %91 = tpu.matmul %88, %90, %cst_74 {dimension_numbers = #tpu.dot_dimension_numbers<[1], [0], [0], [1], [0, 0, 1, 1], [], []>} : vector<256x128xbf16>, vector<128x128xbf16>, vector<256x128xf32> -> vector<256x128xf32>
    %92 = arith.addf %85, %91 : vector<256x128xf32>
    %c1_75 = arith.constant 1 : index
    %c0_76 = arith.constant 0 : index
    %c0_77 = arith.constant 0 : index
    %93 = vector.load %arg8[%c1_75, %c0_76, %c0_77] : memref<20x20x128xf32, #tpu.memory_space<vmem>>, vector<16x20x128xf32>
    %94 = vector.extract_strided_slice %93 {offsets = [0, 0, 0], sizes = [16, 16, 128], strides = [1, 1, 1]} : vector<16x20x128xf32> to vector<16x16x128xf32>
    %95 = vector.shape_cast %94 : vector<16x16x128xf32> to vector<256x128xf32>
    %96 = arith.truncf %95 : vector<256x128xf32> to vector<256x128xbf16>
    %c5 = arith.constant 5 : index
    %c0_78 = arith.constant 0 : index
    %c0_79 = arith.constant 0 : index
    %97 = vector.load %arg4[%c5, %c0_78, %c0_79] : memref<25x128x128xbf16, #tpu.memory_space<vmem>>, vector<1x128x128xbf16>
    %98 = vector.shape_cast %97 : vector<1x128x128xbf16> to vector<128x128xbf16>
    %cst_80 = arith.constant dense<0.000000e+00> : vector<256x128xf32>
    %99 = tpu.matmul %96, %98, %cst_80 {dimension_numbers = #tpu.dot_dimension_numbers<[1], [0], [0], [1], [0, 0, 1, 1], [], []>} : vector<256x128xbf16>, vector<128x128xbf16>, vector<256x128xf32> -> vector<256x128xf32>
    %100 = arith.addf %92, %99 : vector<256x128xf32>
    %101 = vector.extract_strided_slice %93 {offsets = [0, 1, 0], sizes = [16, 16, 128], strides = [1, 1, 1]} : vector<16x20x128xf32> to vector<16x16x128xf32>
    %102 = vector.shape_cast %101 : vector<16x16x128xf32> to vector<256x128xf32>
    %103 = arith.truncf %102 : vector<256x128xf32> to vector<256x128xbf16>
    %c6 = arith.constant 6 : index
    %c0_81 = arith.constant 0 : index
    %c0_82 = arith.constant 0 : index
    %104 = vector.load %arg4[%c6, %c0_81, %c0_82] : memref<25x128x128xbf16, #tpu.memory_space<vmem>>, vector<1x128x128xbf16>
    %105 = vector.shape_cast %104 : vector<1x128x128xbf16> to vector<128x128xbf16>
    %cst_83 = arith.constant dense<0.000000e+00> : vector<256x128xf32>
    %106 = tpu.matmul %103, %105, %cst_83 {dimension_numbers = #tpu.dot_dimension_numbers<[1], [0], [0], [1], [0, 0, 1, 1], [], []>} : vector<256x128xbf16>, vector<128x128xbf16>, vector<256x128xf32> -> vector<256x128xf32>
    %107 = arith.addf %100, %106 : vector<256x128xf32>
    %108 = vector.extract_strided_slice %93 {offsets = [0, 2, 0], sizes = [16, 16, 128], strides = [1, 1, 1]} : vector<16x20x128xf32> to vector<16x16x128xf32>
    %109 = vector.shape_cast %108 : vector<16x16x128xf32> to vector<256x128xf32>
    %110 = arith.truncf %109 : vector<256x128xf32> to vector<256x128xbf16>
    %c7 = arith.constant 7 : index
    %c0_84 = arith.constant 0 : index
    %c0_85 = arith.constant 0 : index
    %111 = vector.load %arg4[%c7, %c0_84, %c0_85] : memref<25x128x128xbf16, #tpu.memory_space<vmem>>, vector<1x128x128xbf16>
    %112 = vector.shape_cast %111 : vector<1x128x128xbf16> to vector<128x128xbf16>
    %cst_86 = arith.constant dense<0.000000e+00> : vector<256x128xf32>
    %113 = tpu.matmul %110, %112, %cst_86 {dimension_numbers = #tpu.dot_dimension_numbers<[1], [0], [0], [1], [0, 0, 1, 1], [], []>} : vector<256x128xbf16>, vector<128x128xbf16>, vector<256x128xf32> -> vector<256x128xf32>
    %114 = arith.addf %107, %113 : vector<256x128xf32>
    %115 = vector.extract_strided_slice %93 {offsets = [0, 3, 0], sizes = [16, 16, 128], strides = [1, 1, 1]} : vector<16x20x128xf32> to vector<16x16x128xf32>
    %116 = vector.shape_cast %115 : vector<16x16x128xf32> to vector<256x128xf32>
    %117 = arith.truncf %116 : vector<256x128xf32> to vector<256x128xbf16>
    %c8 = arith.constant 8 : index
    %c0_87 = arith.constant 0 : index
    %c0_88 = arith.constant 0 : index
    %118 = vector.load %arg4[%c8, %c0_87, %c0_88] : memref<25x128x128xbf16, #tpu.memory_space<vmem>>, vector<1x128x128xbf16>
    %119 = vector.shape_cast %118 : vector<1x128x128xbf16> to vector<128x128xbf16>
    %cst_89 = arith.constant dense<0.000000e+00> : vector<256x128xf32>
    %120 = tpu.matmul %117, %119, %cst_89 {dimension_numbers = #tpu.dot_dimension_numbers<[1], [0], [0], [1], [0, 0, 1, 1], [], []>} : vector<256x128xbf16>, vector<128x128xbf16>, vector<256x128xf32> -> vector<256x128xf32>
    %121 = arith.addf %114, %120 : vector<256x128xf32>
    %122 = vector.extract_strided_slice %93 {offsets = [0, 4, 0], sizes = [16, 16, 128], strides = [1, 1, 1]} : vector<16x20x128xf32> to vector<16x16x128xf32>
    %123 = vector.shape_cast %122 : vector<16x16x128xf32> to vector<256x128xf32>
    %124 = arith.truncf %123 : vector<256x128xf32> to vector<256x128xbf16>
    %c9 = arith.constant 9 : index
    %c0_90 = arith.constant 0 : index
    %c0_91 = arith.constant 0 : index
    %125 = vector.load %arg4[%c9, %c0_90, %c0_91] : memref<25x128x128xbf16, #tpu.memory_space<vmem>>, vector<1x128x128xbf16>
    %126 = vector.shape_cast %125 : vector<1x128x128xbf16> to vector<128x128xbf16>
    %cst_92 = arith.constant dense<0.000000e+00> : vector<256x128xf32>
    %127 = tpu.matmul %124, %126, %cst_92 {dimension_numbers = #tpu.dot_dimension_numbers<[1], [0], [0], [1], [0, 0, 1, 1], [], []>} : vector<256x128xbf16>, vector<128x128xbf16>, vector<256x128xf32> -> vector<256x128xf32>
    %128 = arith.addf %121, %127 : vector<256x128xf32>
    %c2_93 = arith.constant 2 : index
    %c0_94 = arith.constant 0 : index
    %c0_95 = arith.constant 0 : index
    %129 = vector.load %arg8[%c2_93, %c0_94, %c0_95] : memref<20x20x128xf32, #tpu.memory_space<vmem>>, vector<16x20x128xf32>
    %130 = vector.extract_strided_slice %129 {offsets = [0, 0, 0], sizes = [16, 16, 128], strides = [1, 1, 1]} : vector<16x20x128xf32> to vector<16x16x128xf32>
    %131 = vector.shape_cast %130 : vector<16x16x128xf32> to vector<256x128xf32>
    %132 = arith.truncf %131 : vector<256x128xf32> to vector<256x128xbf16>
    %c10 = arith.constant 10 : index
    %c0_96 = arith.constant 0 : index
    %c0_97 = arith.constant 0 : index
    %133 = vector.load %arg4[%c10, %c0_96, %c0_97] : memref<25x128x128xbf16, #tpu.memory_space<vmem>>, vector<1x128x128xbf16>
    %134 = vector.shape_cast %133 : vector<1x128x128xbf16> to vector<128x128xbf16>
    %cst_98 = arith.constant dense<0.000000e+00> : vector<256x128xf32>
    %135 = tpu.matmul %132, %134, %cst_98 {dimension_numbers = #tpu.dot_dimension_numbers<[1], [0], [0], [1], [0, 0, 1, 1], [], []>} : vector<256x128xbf16>, vector<128x128xbf16>, vector<256x128xf32> -> vector<256x128xf32>
    %136 = arith.addf %128, %135 : vector<256x128xf32>
    %137 = vector.extract_strided_slice %129 {offsets = [0, 1, 0], sizes = [16, 16, 128], strides = [1, 1, 1]} : vector<16x20x128xf32> to vector<16x16x128xf32>
    %138 = vector.shape_cast %137 : vector<16x16x128xf32> to vector<256x128xf32>
    %139 = arith.truncf %138 : vector<256x128xf32> to vector<256x128xbf16>
    %c11 = arith.constant 11 : index
    %c0_99 = arith.constant 0 : index
    %c0_100 = arith.constant 0 : index
    %140 = vector.load %arg4[%c11, %c0_99, %c0_100] : memref<25x128x128xbf16, #tpu.memory_space<vmem>>, vector<1x128x128xbf16>
    %141 = vector.shape_cast %140 : vector<1x128x128xbf16> to vector<128x128xbf16>
    %cst_101 = arith.constant dense<0.000000e+00> : vector<256x128xf32>
    %142 = tpu.matmul %139, %141, %cst_101 {dimension_numbers = #tpu.dot_dimension_numbers<[1], [0], [0], [1], [0, 0, 1, 1], [], []>} : vector<256x128xbf16>, vector<128x128xbf16>, vector<256x128xf32> -> vector<256x128xf32>
    %143 = arith.addf %136, %142 : vector<256x128xf32>
    %144 = vector.extract_strided_slice %129 {offsets = [0, 2, 0], sizes = [16, 16, 128], strides = [1, 1, 1]} : vector<16x20x128xf32> to vector<16x16x128xf32>
    %145 = vector.shape_cast %144 : vector<16x16x128xf32> to vector<256x128xf32>
    %146 = arith.truncf %145 : vector<256x128xf32> to vector<256x128xbf16>
    %c12 = arith.constant 12 : index
    %c0_102 = arith.constant 0 : index
    %c0_103 = arith.constant 0 : index
    %147 = vector.load %arg4[%c12, %c0_102, %c0_103] : memref<25x128x128xbf16, #tpu.memory_space<vmem>>, vector<1x128x128xbf16>
    %148 = vector.shape_cast %147 : vector<1x128x128xbf16> to vector<128x128xbf16>
    %cst_104 = arith.constant dense<0.000000e+00> : vector<256x128xf32>
    %149 = tpu.matmul %146, %148, %cst_104 {dimension_numbers = #tpu.dot_dimension_numbers<[1], [0], [0], [1], [0, 0, 1, 1], [], []>} : vector<256x128xbf16>, vector<128x128xbf16>, vector<256x128xf32> -> vector<256x128xf32>
    %150 = arith.addf %143, %149 : vector<256x128xf32>
    %151 = vector.extract_strided_slice %129 {offsets = [0, 3, 0], sizes = [16, 16, 128], strides = [1, 1, 1]} : vector<16x20x128xf32> to vector<16x16x128xf32>
    %152 = vector.shape_cast %151 : vector<16x16x128xf32> to vector<256x128xf32>
    %153 = arith.truncf %152 : vector<256x128xf32> to vector<256x128xbf16>
    %c13 = arith.constant 13 : index
    %c0_105 = arith.constant 0 : index
    %c0_106 = arith.constant 0 : index
    %154 = vector.load %arg4[%c13, %c0_105, %c0_106] : memref<25x128x128xbf16, #tpu.memory_space<vmem>>, vector<1x128x128xbf16>
    %155 = vector.shape_cast %154 : vector<1x128x128xbf16> to vector<128x128xbf16>
    %cst_107 = arith.constant dense<0.000000e+00> : vector<256x128xf32>
    %156 = tpu.matmul %153, %155, %cst_107 {dimension_numbers = #tpu.dot_dimension_numbers<[1], [0], [0], [1], [0, 0, 1, 1], [], []>} : vector<256x128xbf16>, vector<128x128xbf16>, vector<256x128xf32> -> vector<256x128xf32>
    %157 = arith.addf %150, %156 : vector<256x128xf32>
    %158 = vector.extract_strided_slice %129 {offsets = [0, 4, 0], sizes = [16, 16, 128], strides = [1, 1, 1]} : vector<16x20x128xf32> to vector<16x16x128xf32>
    %159 = vector.shape_cast %158 : vector<16x16x128xf32> to vector<256x128xf32>
    %160 = arith.truncf %159 : vector<256x128xf32> to vector<256x128xbf16>
    %c14 = arith.constant 14 : index
    %c0_108 = arith.constant 0 : index
    %c0_109 = arith.constant 0 : index
    %161 = vector.load %arg4[%c14, %c0_108, %c0_109] : memref<25x128x128xbf16, #tpu.memory_space<vmem>>, vector<1x128x128xbf16>
    %162 = vector.shape_cast %161 : vector<1x128x128xbf16> to vector<128x128xbf16>
    %cst_110 = arith.constant dense<0.000000e+00> : vector<256x128xf32>
    %163 = tpu.matmul %160, %162, %cst_110 {dimension_numbers = #tpu.dot_dimension_numbers<[1], [0], [0], [1], [0, 0, 1, 1], [], []>} : vector<256x128xbf16>, vector<128x128xbf16>, vector<256x128xf32> -> vector<256x128xf32>
    %164 = arith.addf %157, %163 : vector<256x128xf32>
    %c3_111 = arith.constant 3 : index
    %c0_112 = arith.constant 0 : index
    %c0_113 = arith.constant 0 : index
    %165 = vector.load %arg8[%c3_111, %c0_112, %c0_113] : memref<20x20x128xf32, #tpu.memory_space<vmem>>, vector<16x20x128xf32>
    %166 = vector.extract_strided_slice %165 {offsets = [0, 0, 0], sizes = [16, 16, 128], strides = [1, 1, 1]} : vector<16x20x128xf32> to vector<16x16x128xf32>
    %167 = vector.shape_cast %166 : vector<16x16x128xf32> to vector<256x128xf32>
    %168 = arith.truncf %167 : vector<256x128xf32> to vector<256x128xbf16>
    %c15 = arith.constant 15 : index
    %c0_114 = arith.constant 0 : index
    %c0_115 = arith.constant 0 : index
    %169 = vector.load %arg4[%c15, %c0_114, %c0_115] : memref<25x128x128xbf16, #tpu.memory_space<vmem>>, vector<1x128x128xbf16>
    %170 = vector.shape_cast %169 : vector<1x128x128xbf16> to vector<128x128xbf16>
    %cst_116 = arith.constant dense<0.000000e+00> : vector<256x128xf32>
    %171 = tpu.matmul %168, %170, %cst_116 {dimension_numbers = #tpu.dot_dimension_numbers<[1], [0], [0], [1], [0, 0, 1, 1], [], []>} : vector<256x128xbf16>, vector<128x128xbf16>, vector<256x128xf32> -> vector<256x128xf32>
    %172 = arith.addf %164, %171 : vector<256x128xf32>
    %173 = vector.extract_strided_slice %165 {offsets = [0, 1, 0], sizes = [16, 16, 128], strides = [1, 1, 1]} : vector<16x20x128xf32> to vector<16x16x128xf32>
    %174 = vector.shape_cast %173 : vector<16x16x128xf32> to vector<256x128xf32>
    %175 = arith.truncf %174 : vector<256x128xf32> to vector<256x128xbf16>
    %c16 = arith.constant 16 : index
    %c0_117 = arith.constant 0 : index
    %c0_118 = arith.constant 0 : index
    %176 = vector.load %arg4[%c16, %c0_117, %c0_118] : memref<25x128x128xbf16, #tpu.memory_space<vmem>>, vector<1x128x128xbf16>
    %177 = vector.shape_cast %176 : vector<1x128x128xbf16> to vector<128x128xbf16>
    %cst_119 = arith.constant dense<0.000000e+00> : vector<256x128xf32>
    %178 = tpu.matmul %175, %177, %cst_119 {dimension_numbers = #tpu.dot_dimension_numbers<[1], [0], [0], [1], [0, 0, 1, 1], [], []>} : vector<256x128xbf16>, vector<128x128xbf16>, vector<256x128xf32> -> vector<256x128xf32>
    %179 = arith.addf %172, %178 : vector<256x128xf32>
    %180 = vector.extract_strided_slice %165 {offsets = [0, 2, 0], sizes = [16, 16, 128], strides = [1, 1, 1]} : vector<16x20x128xf32> to vector<16x16x128xf32>
    %181 = vector.shape_cast %180 : vector<16x16x128xf32> to vector<256x128xf32>
    %182 = arith.truncf %181 : vector<256x128xf32> to vector<256x128xbf16>
    %c17_120 = arith.constant 17 : index
    %c0_121 = arith.constant 0 : index
    %c0_122 = arith.constant 0 : index
    %183 = vector.load %arg4[%c17_120, %c0_121, %c0_122] : memref<25x128x128xbf16, #tpu.memory_space<vmem>>, vector<1x128x128xbf16>
    %184 = vector.shape_cast %183 : vector<1x128x128xbf16> to vector<128x128xbf16>
    %cst_123 = arith.constant dense<0.000000e+00> : vector<256x128xf32>
    %185 = tpu.matmul %182, %184, %cst_123 {dimension_numbers = #tpu.dot_dimension_numbers<[1], [0], [0], [1], [0, 0, 1, 1], [], []>} : vector<256x128xbf16>, vector<128x128xbf16>, vector<256x128xf32> -> vector<256x128xf32>
    %186 = arith.addf %179, %185 : vector<256x128xf32>
    %187 = vector.extract_strided_slice %165 {offsets = [0, 3, 0], sizes = [16, 16, 128], strides = [1, 1, 1]} : vector<16x20x128xf32> to vector<16x16x128xf32>
    %188 = vector.shape_cast %187 : vector<16x16x128xf32> to vector<256x128xf32>
    %189 = arith.truncf %188 : vector<256x128xf32> to vector<256x128xbf16>
    %c18_124 = arith.constant 18 : index
    %c0_125 = arith.constant 0 : index
    %c0_126 = arith.constant 0 : index
    %190 = vector.load %arg4[%c18_124, %c0_125, %c0_126] : memref<25x128x128xbf16, #tpu.memory_space<vmem>>, vector<1x128x128xbf16>
    %191 = vector.shape_cast %190 : vector<1x128x128xbf16> to vector<128x128xbf16>
    %cst_127 = arith.constant dense<0.000000e+00> : vector<256x128xf32>
    %192 = tpu.matmul %189, %191, %cst_127 {dimension_numbers = #tpu.dot_dimension_numbers<[1], [0], [0], [1], [0, 0, 1, 1], [], []>} : vector<256x128xbf16>, vector<128x128xbf16>, vector<256x128xf32> -> vector<256x128xf32>
    %193 = arith.addf %186, %192 : vector<256x128xf32>
    %194 = vector.extract_strided_slice %165 {offsets = [0, 4, 0], sizes = [16, 16, 128], strides = [1, 1, 1]} : vector<16x20x128xf32> to vector<16x16x128xf32>
    %195 = vector.shape_cast %194 : vector<16x16x128xf32> to vector<256x128xf32>
    %196 = arith.truncf %195 : vector<256x128xf32> to vector<256x128xbf16>
    %c19 = arith.constant 19 : index
    %c0_128 = arith.constant 0 : index
    %c0_129 = arith.constant 0 : index
    %197 = vector.load %arg4[%c19, %c0_128, %c0_129] : memref<25x128x128xbf16, #tpu.memory_space<vmem>>, vector<1x128x128xbf16>
    %198 = vector.shape_cast %197 : vector<1x128x128xbf16> to vector<128x128xbf16>
    %cst_130 = arith.constant dense<0.000000e+00> : vector<256x128xf32>
    %199 = tpu.matmul %196, %198, %cst_130 {dimension_numbers = #tpu.dot_dimension_numbers<[1], [0], [0], [1], [0, 0, 1, 1], [], []>} : vector<256x128xbf16>, vector<128x128xbf16>, vector<256x128xf32> -> vector<256x128xf32>
    %200 = arith.addf %193, %199 : vector<256x128xf32>
    %c4_131 = arith.constant 4 : index
    %c0_132 = arith.constant 0 : index
    %c0_133 = arith.constant 0 : index
    %201 = vector.load %arg8[%c4_131, %c0_132, %c0_133] : memref<20x20x128xf32, #tpu.memory_space<vmem>>, vector<16x20x128xf32>
    %202 = vector.extract_strided_slice %201 {offsets = [0, 0, 0], sizes = [16, 16, 128], strides = [1, 1, 1]} : vector<16x20x128xf32> to vector<16x16x128xf32>
    %203 = vector.shape_cast %202 : vector<16x16x128xf32> to vector<256x128xf32>
    %204 = arith.truncf %203 : vector<256x128xf32> to vector<256x128xbf16>
    %c20 = arith.constant 20 : index
    %c0_134 = arith.constant 0 : index
    %c0_135 = arith.constant 0 : index
    %205 = vector.load %arg4[%c20, %c0_134, %c0_135] : memref<25x128x128xbf16, #tpu.memory_space<vmem>>, vector<1x128x128xbf16>
    %206 = vector.shape_cast %205 : vector<1x128x128xbf16> to vector<128x128xbf16>
    %cst_136 = arith.constant dense<0.000000e+00> : vector<256x128xf32>
    %207 = tpu.matmul %204, %206, %cst_136 {dimension_numbers = #tpu.dot_dimension_numbers<[1], [0], [0], [1], [0, 0, 1, 1], [], []>} : vector<256x128xbf16>, vector<128x128xbf16>, vector<256x128xf32> -> vector<256x128xf32>
    %208 = arith.addf %200, %207 : vector<256x128xf32>
    %209 = vector.extract_strided_slice %201 {offsets = [0, 1, 0], sizes = [16, 16, 128], strides = [1, 1, 1]} : vector<16x20x128xf32> to vector<16x16x128xf32>
    %210 = vector.shape_cast %209 : vector<16x16x128xf32> to vector<256x128xf32>
    %211 = arith.truncf %210 : vector<256x128xf32> to vector<256x128xbf16>
    %c21 = arith.constant 21 : index
    %c0_137 = arith.constant 0 : index
    %c0_138 = arith.constant 0 : index
    %212 = vector.load %arg4[%c21, %c0_137, %c0_138] : memref<25x128x128xbf16, #tpu.memory_space<vmem>>, vector<1x128x128xbf16>
    %213 = vector.shape_cast %212 : vector<1x128x128xbf16> to vector<128x128xbf16>
    %cst_139 = arith.constant dense<0.000000e+00> : vector<256x128xf32>
    %214 = tpu.matmul %211, %213, %cst_139 {dimension_numbers = #tpu.dot_dimension_numbers<[1], [0], [0], [1], [0, 0, 1, 1], [], []>} : vector<256x128xbf16>, vector<128x128xbf16>, vector<256x128xf32> -> vector<256x128xf32>
    %215 = arith.addf %208, %214 : vector<256x128xf32>
    %216 = vector.extract_strided_slice %201 {offsets = [0, 2, 0], sizes = [16, 16, 128], strides = [1, 1, 1]} : vector<16x20x128xf32> to vector<16x16x128xf32>
    %217 = vector.shape_cast %216 : vector<16x16x128xf32> to vector<256x128xf32>
    %218 = arith.truncf %217 : vector<256x128xf32> to vector<256x128xbf16>
    %c22 = arith.constant 22 : index
    %c0_140 = arith.constant 0 : index
    %c0_141 = arith.constant 0 : index
    %219 = vector.load %arg4[%c22, %c0_140, %c0_141] : memref<25x128x128xbf16, #tpu.memory_space<vmem>>, vector<1x128x128xbf16>
    %220 = vector.shape_cast %219 : vector<1x128x128xbf16> to vector<128x128xbf16>
    %cst_142 = arith.constant dense<0.000000e+00> : vector<256x128xf32>
    %221 = tpu.matmul %218, %220, %cst_142 {dimension_numbers = #tpu.dot_dimension_numbers<[1], [0], [0], [1], [0, 0, 1, 1], [], []>} : vector<256x128xbf16>, vector<128x128xbf16>, vector<256x128xf32> -> vector<256x128xf32>
    %222 = arith.addf %215, %221 : vector<256x128xf32>
    %223 = vector.extract_strided_slice %201 {offsets = [0, 3, 0], sizes = [16, 16, 128], strides = [1, 1, 1]} : vector<16x20x128xf32> to vector<16x16x128xf32>
    %224 = vector.shape_cast %223 : vector<16x16x128xf32> to vector<256x128xf32>
    %225 = arith.truncf %224 : vector<256x128xf32> to vector<256x128xbf16>
    %c23 = arith.constant 23 : index
    %c0_143 = arith.constant 0 : index
    %c0_144 = arith.constant 0 : index
    %226 = vector.load %arg4[%c23, %c0_143, %c0_144] : memref<25x128x128xbf16, #tpu.memory_space<vmem>>, vector<1x128x128xbf16>
    %227 = vector.shape_cast %226 : vector<1x128x128xbf16> to vector<128x128xbf16>
    %cst_145 = arith.constant dense<0.000000e+00> : vector<256x128xf32>
    %228 = tpu.matmul %225, %227, %cst_145 {dimension_numbers = #tpu.dot_dimension_numbers<[1], [0], [0], [1], [0, 0, 1, 1], [], []>} : vector<256x128xbf16>, vector<128x128xbf16>, vector<256x128xf32> -> vector<256x128xf32>
    %229 = arith.addf %222, %228 : vector<256x128xf32>
    %230 = vector.extract_strided_slice %201 {offsets = [0, 4, 0], sizes = [16, 16, 128], strides = [1, 1, 1]} : vector<16x20x128xf32> to vector<16x16x128xf32>
    %231 = vector.shape_cast %230 : vector<16x16x128xf32> to vector<256x128xf32>
    %232 = arith.truncf %231 : vector<256x128xf32> to vector<256x128xbf16>
    %c24 = arith.constant 24 : index
    %c0_146 = arith.constant 0 : index
    %c0_147 = arith.constant 0 : index
    %233 = vector.load %arg4[%c24, %c0_146, %c0_147] : memref<25x128x128xbf16, #tpu.memory_space<vmem>>, vector<1x128x128xbf16>
    %234 = vector.shape_cast %233 : vector<1x128x128xbf16> to vector<128x128xbf16>
    %cst_148 = arith.constant dense<0.000000e+00> : vector<256x128xf32>
    %235 = tpu.matmul %232, %234, %cst_148 {dimension_numbers = #tpu.dot_dimension_numbers<[1], [0], [0], [1], [0, 0, 1, 1], [], []>} : vector<256x128xbf16>, vector<128x128xbf16>, vector<256x128xf32> -> vector<256x128xf32>
    %236 = arith.addf %229, %235 : vector<256x128xf32>
    %c0_149 = arith.constant 0 : index
    %c0_150 = arith.constant 0 : index
    %237 = vector.load %arg6[%c0_149, %c0_150] : memref<1x128xf32, #tpu.memory_space<vmem>>, vector<1x128xf32>
    %238 = vector.broadcast %237 : vector<1x128xf32> to vector<256x128xf32>
    %239 = arith.addf %236, %238 : vector<256x128xf32>
    %cst_151 = arith.constant 0.000000e+00 : f32
    %240 = vector.broadcast %cst_151 : f32 to vector<256x128xf32>
    %241 = arith.maximumf %239, %240 : vector<256x128xf32>
    %242 = vector.shape_cast %241 : vector<256x128xf32> to vector<1x16x16x128xf32>
    %c0_152 = arith.constant 0 : index
    %c0_153 = arith.constant 0 : index
    %c0_154 = arith.constant 0 : index
    %c0_155 = arith.constant 0 : index
    %243 = vector.load %arg7[%c0_152, %c0_153, %c0_154, %c0_155] : memref<1x16x16x128xf32, #tpu.memory_space<vmem>>, vector<1x16x16x128xf32>
    tpu.vector_store %arg7[%c0_152, %c0_153, %c0_154, %c0_155], %242 {strides = array<i32>} : memref<1x16x16x128xf32, #tpu.memory_space<vmem>>, vector<1x16x16x128xf32>,
    return
  }
  func.func @transform_0(%arg0: i32) -> (i32, i32, i32, i32) {
    %c0_i32 = arith.constant 0 : i32
    %c0_i32_0 = arith.constant 0 : i32
    %c0_i32_1 = arith.constant 0 : i32
    %c0_i32_2 = arith.constant 0 : i32
    return %arg0, %c0_i32, %c0_i32_0, %c0_i32_1 : i32, i32, i32, i32
  }
  func.func @transform_1(%arg0: i32) -> (i32, i32) {
    %c0_i32 = arith.constant 0 : i32
    %c0_i32_0 = arith.constant 0 : i32
    %c0_i32_1 = arith.constant 0 : i32
    return %c0_i32, %c0_i32_0 : i32, i32
  }
  func.func @transform_2(%arg0: i32) -> (i32, i32) {
    %c0_i32 = arith.constant 0 : i32
    %c0_i32_0 = arith.constant 0 : i32
    %c0_i32_1 = arith.constant 0 : i32
    return %c0_i32, %c0_i32_0 : i32, i32
  }
  func.func @transform_3(%arg0: i32) -> (i32, i32, i32) {
    %c0_i32 = arith.constant 0 : i32
    %c0_i32_0 = arith.constant 0 : i32
    %c0_i32_1 = arith.constant 0 : i32
    %c0_i32_2 = arith.constant 0 : i32
    return %c0_i32, %c0_i32_0, %c0_i32_1 : i32, i32, i32
  }
  func.func @transform_4(%arg0: i32) -> (i32, i32) {
    %c0_i32 = arith.constant 0 : i32
    %c0_i32_0 = arith.constant 0 : i32
    %c0_i32_1 = arith.constant 0 : i32
    return %c0_i32, %c0_i32_0 : i32, i32
  }
  func.func @transform_5(%arg0: i32) -> (i32, i32) {
    %c0_i32 = arith.constant 0 : i32
    %c0_i32_0 = arith.constant 0 : i32
    %c0_i32_1 = arith.constant 0 : i32
    return %c0_i32, %c0_i32_0 : i32, i32
  }
  func.func @transform_6(%arg0: i32) -> (i32, i32, i32, i32) {
    %c0_i32 = arith.constant 0 : i32
    %c0_i32_0 = arith.constant 0 : i32
    %c0_i32_1 = arith.constant 0 : i32
    %c0_i32_2 = arith.constant 0 : i32
    return %arg0, %c0_i32, %c0_i32_0, %c0_i32_1 : i32, i32, i32, i32
  }
}

</mosaic_0001>

<bundles_post_ra>
// kernel: inception_forward.1
= control target key start
LH: loop header
LB: loop body
LE: loop exit
PB: predicated region body
PF: predicated region fallthrough
CT: control target
= control target key end

     0   :  { %s15556_s21 = smov 0   ;;  %s21390_s0 = inlined_call_operand.vmem [shape: bf16[2,16,16,128], index: 0, kind: input, shape index: {}]   ;;  %s21391_s1 = inlined_call_operand.vmem [shape: bf16[128,256], index: 1, kind: input, shape index: {}]   ;;  %s21392_s2 = inlined_call_operand.vmem [shape: f32[1,128], index: 2, kind: input, shape index: {}]   ;;  %s21393_s3 = inlined_call_operand.vmem [shape: bf16[25,128,128], index: 3, kind: input, shape index: {}]   ;;  %s21394_s4 = inlined_call_operand.vmem [shape: bf16[128,128], index: 4, kind: input, shape index: {}]   ;;  %s21395_s5 = inlined_call_operand.vmem [shape: f32[1,128], index: 5, kind: input, shape index: {}]   ;;  %s21396_s6 = inlined_call_operand.vmem [shape: f32[2,16,16,128], index: 6, kind: output, shape index: {}]  }
   0x1 LB: > { %s12531_s22 = sadd.s32 4294967295, %s15515_s21   ;;  %p12535_p0 = scmp.ge.s32.totalorder %s15515_s21, 1  ;;  %s15515_s21 = sphi %s15556_s21, %s16_s21  }
   0x2   : > { %p212_p1 = scmp.lt.s32.totalorder %s15515_s21, 3 }
   0x4   : > { %p213_p2 = pnand %p12535_p0, %p212_p1 }
   0x6   : > { %216 = sbr.rel (%p213_p2) target bundleno = 1488 (0x5d0), region = 44 }
   0xd   : > { %v15053_v0 = vld [vmem:[%s21391_s1 + $0x4] ss:$8 sps:$4 sm:$0xff]   ;;  %v15055_v1 = vld [vmem:[%s21391_s1] ss:$8 sps:$4 sm:$0xff]   ;;  %v15517_v2 = vmov 0   ;;  %p15573_p3 = scmp.lt.s32.totalorder %s12531_s22, 1 }
   0xe   : > { %595 = vmatprep.mubr.bf16.mxu0 %v15517_v2  ;;  %563 = vmatprep.subr.bf16.mxu0 %v15053_v0  ;;  %v15056_v3 = vld [vmem:[%s21391_s1 + $0x14] ss:$8 sps:$4 sm:$0xff]   ;;  %v15058_v4 = vld [vmem:[%s21391_s1 + $0x10] ss:$8 sps:$4 sm:$0xff]   ;;  %v15518_v5 = vmov -inf   ;;  %v15059_v6 = vld [vmem:[%s21394_s4] sm:$0xff]  }
   0xf   : > { %299 = vst [vmem:[#allocation3] sm:$0xff] %v15518_v5  ;;  %301 = vst [vmem:[#allocation3 + $0x10] sm:$0xf] %v15518_v5  ;;  %564 = vmatpush1.bf16.msra.mxu0 %v15055_v1  ;;  %v15060_v7 = vld [vmem:[%s21391_s1 + $0x24] ss:$8 sps:$4 sm:$0xff]   ;;  %13794 = vmatprep.subr.bf16.mxu1 %v15059_v6  ;;  %s22326_s22 = smov (!%p15573_p3, %s12531_s22), 1 }
  0x10   : > { %307 = vst [vmem:[#allocation3 + $0x18] sm:$0x3] %v15518_v5  ;;  %308 = vst [vmem:[#allocation3 + $0x30] sm:$0x3] %v15518_v5  ;;  %565 = vmatprep.subr.bf16.mxu0 %v15056_v3  ;;  %v15063_v8 = vld [vmem:[%s21394_s4 + $0x8] sm:$0xff]   ;;  %13795 = vmatpush3.bf16.msra.mxu1 %v15059_v6  ;;  %v15067_v11 = vld [vmem:[%s21394_s4 + $0x10] sm:$0xff]  }
  0x11   : > { %323 = vst [vmem:[#allocation3 + $0x2a] sm:$0x3] %v15518_v5  ;;  %324 = vst [vmem:[#allocation3 + $0x42] sm:$0x3] %v15518_v5  ;;  %v15062_v9 = vld [vmem:[%s21391_s1 + $0x20] ss:$8 sps:$4 sm:$0xff]   ;;  %13796 = vmatprep.subr.bf16.mxu1 %v15063_v8 }
  0x12   : > { %305 = vst [vmem:[#allocation3 + $0x1a8] sm:$0xf] %v15518_v5  ;;  %309 = vst [vmem:[#allocation3 + $0x48] sm:$0x3] %v15518_v5  ;;  %v15064_v10 = vld [vmem:[%s21391_s1 + $0x34] ss:$8 sps:$4 sm:$0xff]  }
  0x13   : > { %310 = vst [vmem:[#allocation3 + $0x60] sm:$0x3] %v15518_v5  ;;  %311 = vst [vmem:[#allocation3 + $0x78] sm:$0x3] %v15518_v5  ;;  %566 = vmatpush1.bf16.msra.mxu0 %v15058_v4  ;;  %v15607_v12 = vrot.slane %v15518_v5, 1  ;;  %vm1019_vm0 = vcmask 1046528  }
  0x14   : > { %312 = vst [vmem:[#allocation3 + $0x90] sm:$0x3] %v15518_v5  ;;  %313 = vst [vmem:[#allocation3 + $0xa8] sm:$0x3] %v15518_v5  ;;  %567 = vmatprep.subr.bf16.mxu0 %v15060_v7  ;;  %13797 = vmatpush3.bf16.msra.mxu1 %v15063_v8  ;;  %v15066_v13 = vld [vmem:[%s21391_s1 + $0x30] ss:$8 sps:$4 sm:$0xff]  }
  0x15   : > { %314 = vst [vmem:[#allocation3 + $0xc0] sm:$0x3] %v15518_v5  ;;  %315 = vst [vmem:[#allocation3 + $0xd8] sm:$0x3] %v15518_v5  ;;  %13798 = vmatprep.subr.bf16.mxu1 %v15067_v11  ;;  %v15071_v14 = vld [vmem:[%s21394_s4 + $0x18] sm:$0xff]   ;;  %s13168_s26 = sshll.u32 %s22326_s22, 7 }
  0x16   : > { %316 = vst [vmem:[#allocation3 + $0xf0] sm:$0x3] %v15518_v5  ;;  %317 = vst [vmem:[#allocation3 + $0x108] sm:$0x3] %v15518_v5  ;;  %v15616_v15 = vrot.slane %v15518_v5, 2  ;;  %vm1196_vm1 = vcmask 1045504   ;;  %s15627_s9 = scalar_lea.vmem %s21390_s0, %s13168_s26 }
  0x17   : > { %318 = vst [vmem:[#allocation3 + $0x120] sm:$0x3] %v15518_v5  ;;  %319 = vst [vmem:[#allocation3 + $0x138] sm:$0x3] %v15518_v5  ;;  %568 = vmatpush1.bf16.msra.mxu0 %v15062_v9  ;;  %v15068_v16 = vld [vmem:[%s21391_s1 + $0x44] ss:$8 sps:$4 sm:$0xff]  }
  0x18   : > { %320 = vst [vmem:[#allocation3 + $0x150] sm:$0x3] %v15518_v5  ;;  %321 = vst [vmem:[#allocation3 + $0x168] sm:$0x3] %v15518_v5  ;;  %569 = vmatprep.subr.bf16.mxu0 %v15064_v10  ;;  %13799 = vmatpush3.bf16.msra.mxu1 %v15067_v11  ;;  %v15070_v17 = vld [vmem:[%s21391_s1 + $0x40] ss:$8 sps:$4 sm:$0xff]   ;;  %v1325_v27 = vmax.f32 %v15607_v12, %v15616_v15 }
  0x19   : > { %322 = vst [vmem:[#allocation3 + $0x180] sm:$0x3] %v15518_v5  ;;  %325 = vst [vmem:[#allocation3 + $0x5a] sm:$0x3] %v15518_v5  ;;  %13800 = vmatprep.subr.bf16.mxu1 %v15071_v14  ;;  %v15075_v18 = vld [vmem:[%s21394_s4 + $0x20] sm:$0xff]   ;;  %v15079_v22 = vld [vmem:[%s21394_s4 + $0x28] sm:$0xff]  }
  0x1a   : > { %326 = vst [vmem:[#allocation3 + $0x72] sm:$0x3] %v15518_v5  ;;  %327 = vst [vmem:[#allocation3 + $0x8a] sm:$0x3] %v15518_v5  ;;  %v15072_v19 = vld [vmem:[%s21391_s1 + $0x54] ss:$8 sps:$4 sm:$0xff]  }
  0x1b   : > { %328 = vst [vmem:[#allocation3 + $0xa2] sm:$0x3] %v15518_v5  ;;  %329 = vst [vmem:[#allocation3 + $0xba] sm:$0x3] %v15518_v5  ;;  %570 = vmatpush1.bf16.msra.mxu0 %v15066_v13  ;;  %v15074_v20 = vld [vmem:[%s21391_s1 + $0x50] ss:$8 sps:$4 sm:$0xff]  }
  0x1c   : > { %330 = vst [vmem:[#allocation3 + $0xd2] sm:$0x3] %v15518_v5  ;;  %331 = vst [vmem:[#allocation3 + $0xea] sm:$0x3] %v15518_v5  ;;  %571 = vmatprep.subr.bf16.mxu0 %v15068_v16  ;;  %v15639_v21 = vld [vmem:[%s15627_s9] sm:$0xff]   ;;  %13801 = vmatpush3.bf16.msra.mxu1 %v15071_v14  ;;  %v15647_v25 = vld [vmem:[%s15627_s9 + $0x8] sm:$0xff]  }
  0x1d   : > { %332 = vst [vmem:[#allocation3 + $0x102] sm:$0x3] %v15518_v5  ;;  %333 = vst [vmem:[#allocation3 + $0x11a] sm:$0x3] %v15518_v5  ;;  %v859_v23 = vunpack.c.l.bf16 %v15639_v21  ;;  %v860_v24 = vunpack.c.h.bf16 %v15639_v21  ;;  %13802 = vmatprep.subr.bf16.mxu1 %v15075_v18  ;;  %v925_v26 = vld [vmem:[#allocation3 + $0x10] sm:$0xf]  ;;  %v861_v30 = vunpack.c.l.bf16 %v15647_v25  ;;  %v862_v31 = vunpack.c.h.bf16 %v15647_v25 }
  0x1e   : > { %334 = vst [vmem:[#allocation3 + $0x132] sm:$0x3] %v15518_v5  ;;  %335 = vst [vmem:[#allocation3 + $0x14a] sm:$0x3] %v15518_v5  ;;  %v15652_v28 = vld [vmem:[%s15627_s9 + $0x10] sm:$0xff]   ;;  %v1023_v32 = vrot.slane %v925_v26, 1 }
  0x1f   : > { %336 = vst [vmem:[#allocation3 + $0x162] sm:$0x3] %v15518_v5  ;;  %337 = vst [vmem:[#allocation3 + $0x17a] sm:$0x3] %v15518_v5  ;;  %572 = vmatpush1.bf16.msra.mxu0 %v15070_v17  ;;  %v15076_v29 = vld [vmem:[%s21391_s1 + $0x64] ss:$8 sps:$4 sm:$0xff]   ;;  %v863_v38 = vunpack.c.l.bf16 %v15652_v28  ;;  %v864_v39 = vunpack.c.h.bf16 %v15652_v28 }
  0x20   : > { %338 = vst [vmem:[#allocation3 + $0x192] sm:$0x3] %v15518_v5  ;;  %573 = vmatprep.subr.bf16.mxu0 %v15072_v19  ;;  %891 = vst [vmem:[#allocation3 + $0x1a] sm:$0xff] %v859_v23  ;;  %v1200_v33 = vrot.slane %v925_v26, 2  ;;  %v15660_v34 = vld [vmem:[%s15627_s9 + $0x18] sm:$0xff]   ;;  %v15663_v35 = vld [vmem:[%s15627_s9 + $0x20] sm:$0xff]   ;;  %13803 = vmatpush3.bf16.msra.mxu1 %v15075_v18  ;;  %v1024_v44 = vsel %vm1019_vm0, %v15607_v12, %v1023_v32  ;;  %v1150_v45 = vmax.f32 %v925_v26, %v1023_v32 }
  0x21   : > { %892 = vst [vmem:[#allocation3 + $0x22] sm:$0xff] %v860_v24  ;;  %v15078_v36 = vld [vmem:[%s21391_s1 + $0x60] ss:$8 sps:$4 sm:$0xff]   ;;  %v15671_v37 = vld [vmem:[%s21394_s4 + $0x30] sm:$0xff]   ;;  %v865_v40 = vunpack.c.l.bf16 %v15660_v34  ;;  %893 = vst [vmem:[#allocation3 + $0x32] sm:$0xff] %v861_v30  ;;  %v866_v47 = vunpack.c.h.bf16 %v15660_v34  ;;  %13804 = vmatprep.subr.bf16.mxu1 %v15079_v22  ;;  %v867_v50 = vunpack.c.l.bf16 %v15663_v35  ;;  %v868_v51 = vunpack.c.h.bf16 %v15663_v35 }
  0x22   : > { %v349_v41 = vld [vmem:[%s15627_s9 + $0x28] sm:$0xff]   ;;  %v351_v42 = vld [vmem:[%s15627_s9 + $0x30] sm:$0xff]   ;;  %894 = vst [vmem:[#allocation3 + $0x3a] sm:$0xff] %v862_v31  ;;  %v1201_v46 = vsel %vm1196_vm1, %v15616_v15, %v1200_v33  ;;  %v353_v48 = vld [vmem:[%s15627_s9 + $0x38] sm:$0xff]   ;;  %v1327_v52 = vmax.f32 %v1150_v45, %v1200_v33  ;;  %vm3940_vm2 = vcmask 1044480   ;;  %vm4327_vm3 = vcmask 1043456  }
  0x23   : > { %v15080_v43 = vld [vmem:[%s21391_s1 + $0x74] ss:$8 sps:$4 sm:$0xff]   ;;  %v355_v49 = vld [vmem:[%s15627_s9 + $0x40] sm:$0xff]   ;;  %574 = vmatpush1.bf16.msra.mxu0 %v15074_v20  ;;  %895 = vst [vmem:[#allocation3 + $0x4a] sm:$0xff] %v863_v38  ;;  %896 = vst [vmem:[#allocation3 + $0x52] sm:$0xff] %v864_v39  ;;  %v869_v53 = vunpack.c.l.bf16 %v349_v41  ;;  %v870_v54 = vunpack.c.h.bf16 %v349_v41  ;;  %v871_v55 = vunpack.c.l.bf16 %v351_v42  ;;  %v1326_v59 = vmax.f32 %v1024_v44, %v1201_v46 }
  0x24   : > { %897 = vst [vmem:[#allocation3 + $0x62] sm:$0xff] %v865_v40  ;;  %575 = vmatprep.subr.bf16.mxu0 %v15076_v29  ;;  %898 = vst [vmem:[#allocation3 + $0x6a] sm:$0xff] %v866_v47  ;;  %v357_v56 = vld [vmem:[%s15627_s9 + $0x48] sm:$0xff]   ;;  %v359_v57 = vld [vmem:[%s15627_s9 + $0x50] sm:$0xff]   ;;  %v872_v60 = vunpack.c.h.bf16 %v351_v42  ;;  %v873_v61 = vunpack.c.l.bf16 %v353_v48  ;;  %13805 = vmatpush3.bf16.msra.mxu1 %v15079_v22  ;;  %v874_v63 = vunpack.c.h.bf16 %v353_v48  ;;  %v875_v0 = vunpack.c.l.bf16 %v355_v49 }
  0x25   : > { %v15082_v58 = vld [vmem:[%s21391_s1 + $0x70] ss:$8 sps:$4 sm:$0xff]   ;;  %899 = vst [vmem:[#allocation3 + $0x7a] sm:$0xff] %v867_v50  ;;  %900 = vst [vmem:[#allocation3 + $0x82] sm:$0xff] %v868_v51  ;;  %v876_v1 = vunpack.c.h.bf16 %v355_v49  ;;  %13806 = vmatprep.subr.bf16.mxu1 %v15671_v37  ;;  %v877_v6 = vunpack.c.l.bf16 %v357_v56  ;;  %v878_v7 = vunpack.c.h.bf16 %v357_v56  ;;  %v879_v8 = vunpack.c.l.bf16 %v359_v57  ;;  %v15727_v33 = vld [vmem:[%s21393_s3] sm:$0xff]  }
  0x26   : > { %v15085_v62 = vld [vmem:[%s21394_s4 + $0x38] sm:$0xff]   ;;  %901 = vst [vmem:[#allocation3 + $0x92] sm:$0xff] %v869_v53  ;;  %902 = vst [vmem:[#allocation3 + $0x9a] sm:$0xff] %v870_v54  ;;  %v880_v9 = vunpack.c.h.bf16 %v359_v57 }
  0x27   : > { %903 = vst [vmem:[#allocation3 + $0xaa] sm:$0xff] %v871_v55  ;;  %576 = vmatpush1.bf16.msra.mxu0 %v15078_v36  ;;  %v15699_v3 = vld [vmem:[#allocation3 + $0x18] sm:$0xff]  ;;  %904 = vst [vmem:[#allocation3 + $0xb2] sm:$0xff] %v872_v60 }
  0x28   : > { %v15701_v4 = vld [vmem:[#allocation3 + $0x20] sm:$0xff]  ;;  %v1375_v5 = vld [vmem:[#allocation3 + $0x28] sm:$0xf]  ;;  %905 = vst [vmem:[#allocation3 + $0xc2] sm:$0xff] %v873_v61  ;;  %577 = vmatprep.subr.bf16.mxu0 %v15080_v43  ;;  %v1421_v10 = vmax.f32 %v1325_v27, %v15699_v3  ;;  %v1517_v14 = vrot.slane %v15699_v3, 1  ;;  %906 = vst [vmem:[#allocation3 + $0xca] sm:$0xff] %v874_v63  ;;  %13807 = vmatpush3.bf16.msra.mxu1 %v15671_v37 }
  0x29   : > { %v1422_v11 = vmax.f32 %v1326_v59, %v15701_v4  ;;  %v1423_v13 = vmax.f32 %v1327_v52, %v1375_v5  ;;  %907 = vst [vmem:[#allocation3 + $0xda] sm:$0xff] %v875_v0  ;;  %908 = vst [vmem:[#allocation3 + $0xe2] sm:$0xff] %v876_v1  ;;  %v1518_v16 = vrot.slane %v15701_v4, 1  ;;  %v1520_v17 = vrot.slane %v1375_v5, 1  ;;  %v15712_v20 = vld [vmem:[#allocation3 + $0x30] sm:$0xff]  ;;  %v15714_v22 = vld [vmem:[#allocation3 + $0x38] sm:$0xff]  ;;  %13808 = vmatprep.subr.bf16.mxu1 %v15085_v62 }
  0x2a   : > { %v1693_v18 = vrot.slane %v15699_v3, 2  ;;  %v1694_v19 = vrot.slane %v15701_v4, 2  ;;  %909 = vst [vmem:[#allocation3 + $0xf2] sm:$0xff] %v877_v6  ;;  %910 = vst [vmem:[#allocation3 + $0xfa] sm:$0xff] %v878_v7  ;;  %v1696_v12 = vrot.slane %v1375_v5, 2  ;;  %v2014_v23 = vrot.slane %v15712_v20, 1 }
  0x2b   : > { %911 = vst [vmem:[#allocation3 + $0x10a] sm:$0xff] %v879_v8  ;;  %912 = vst [vmem:[#allocation3 + $0x112] sm:$0xff] %v880_v9  ;;  %v1872_v15 = vld [vmem:[#allocation3 + $0x40] sm:$0xf]  ;;  %v15719_v24 = vrot.slane %v15714_v22, 1  ;;  %v2190_v26 = vrot.slane %v15712_v20, 2  ;;  %578 = vmatpush1.bf16.msra.mxu0 %v15082_v58  ;;  %v1519_v27 = vsel %vm1019_vm0, %v1517_v14, %v1518_v16  ;;  %v1521_v29 = vsel %vm1019_vm0, %v1518_v16, %v1520_v17 }
  0x2c   : > { %v1647_v30 = vmax.f32 %v1423_v13, %v1520_v17  ;;  %v2017_v31 = vrot.slane %v1872_v15, 1  ;;  %v928_v32 = vld [vmem:[#allocation3 + $0x28] sm:$0xf]  ;;  %v1645_v36 = vmax.f32 %v1421_v10, %v1519_v27  ;;  %v1646_v37 = vmax.f32 %v1422_v11, %v1521_v29  ;;  %13809 = vmatpush3.bf16.msra.mxu1 %v15085_v62  ;;  %v1378_v52 = vld [vmem:[#allocation3 + $0x40] sm:$0xf]  ;;  %v15762_v10 = vld [vmem:[#allocation3 + $0x50] sm:$0xff] }
  0x2d   : > { %v1695_v38 = vsel %vm1196_vm1, %v1693_v18, %v1694_v19  ;;  %v1697_v39 = vsel %vm1196_vm1, %v1694_v19, %v1696_v12  ;;  %v15733_v41 = vsel %vm1019_vm0, %v2014_v23, %v15719_v24  ;;  %v15738_v43 = vrot.slane %v15714_v22, 2  ;;  %13842 = vmatprep.subr.bf16.mxu1 %v15727_v33  ;;  %v15756_v6 = vld [vmem:[#allocation3 + $0x48] sm:$0xff]  ;;  %v1875_v11 = vld [vmem:[#allocation3 + $0x58] sm:$0xf] }
  0x2e   : > { %v1823_v40 = vmax.f32 %v1647_v30, %v1696_v12  ;;  %v2018_v42 = vsel %vm1019_vm0, %v15719_v24, %v2017_v31  ;;  %596 = vmatmul.mubr.bf16.vlgmr.msra.gmra.mrb[0].mxu0 %v15639_v21  ;;  %v1821_v44 = vmax.f32 %v1645_v36, %v1695_v38  ;;  %v1822_v45 = vmax.f32 %v1646_v37, %v1697_v39  ;;  %v931_v37 = vld [vmem:[#allocation3 + $0x40] sm:$0xf] }
  0x2f   : > { %v2193_v46 = vrot.slane %v1872_v15, 2  ;;  %v1028_v47 = vrot.slane %v928_v32, 1  ;;  %v15743_v49 = vsel %vm1196_vm1, %v2190_v26, %v15738_v43  ;;  %v1151_v50 = vmax.f32 %v15699_v3, %v1519_v27  ;;  %605 = vmatprep.mubr.bf16.mxu0 %v15517_v2 }
  0x30   : > { %v1920_v48 = vmax.f32 %v1823_v40, %v1872_v15  ;;  %v1205_v51 = vrot.slane %v928_v32, 2  ;;  %v1918_v21 = vmax.f32 %v1821_v44, %v15712_v20  ;;  %v1919_v53 = vmax.f32 %v1822_v45, %v15714_v22 }
  0x31   : > { %v2194_v54 = vsel %vm1196_vm1, %v15738_v43, %v2193_v46  ;;  %v1029_v55 = vsel %vm1019_vm0, %v1518_v16, %v1028_v47  ;;  %v1153_v58 = vmax.f32 %v928_v32, %v1028_v47  ;;  %v1328_v62 = vmax.f32 %v1151_v50, %v1695_v38 }
  0x32   : > { %v2144_v56 = vmax.f32 %v1920_v48, %v2017_v31  ;;  %v1152_v57 = vmax.f32 %v15701_v4, %v1029_v55  ;;  %v1206_v59 = vsel %vm1196_vm1, %v1694_v19, %v1205_v51  ;;  %v2142_v60 = vmax.f32 %v1918_v21, %v15733_v41  ;;  %v1381_v55 = vld [vmem:[#allocation3 + $0x58] sm:$0xf] }
  0x33   : > { %v2143_v61 = vmax.f32 %v1919_v53, %v2018_v42  ;;  %v1525_v63 = vrot.slane %v1378_v52, 1  ;;  %v1330_v3 = vmax.f32 %v1153_v58, %v1205_v51  ;;  %v1701_v5 = vrot.slane %v1378_v52, 2 }
  0x34   : > { %v2320_v0 = vmax.f32 %v2144_v56, %v2193_v46  ;;  %v1329_v1 = vmax.f32 %v1152_v57, %v1206_v59  ;;  %v2318_v7 = vmax.f32 %v2142_v60, %v15743_v49  ;;  %v1424_v9 = vmax.f32 %v1328_v62, %v15712_v20  ;;  %v15805_v62 = vld [vmem:[#allocation3 + $0x60] sm:$0xff] }
  0x35   : > { %v2319_v8 = vmax.f32 %v2143_v61, %v2194_v54  ;;  %v1526_v4 = vsel %vm1019_vm0, %v15719_v24, %v1525_v63  ;;  %v1426_v16 = vmax.f32 %v1330_v3, %v1378_v52  ;;  %v1702_v17 = vsel %vm1196_vm1, %v15738_v43, %v1701_v5 }
  0x36   : > { %v2417_v13 = vrot.slane %v2320_v0, 1  ;;  %v1425_v14 = vmax.f32 %v1329_v1, %v15714_v22  ;;  %v2414_v18 = vrot.slane %v2318_v7, 1  ;;  %v1648_v12 = vmax.f32 %v1424_v9, %v15733_v41  ;;  %606 = vmatmul.mubr.bf16.gmra.mrb[4].mxu0 %v15647_v25 }
  0x37   : > { %v2415_v19 = vrot.slane %v2319_v8, 1  ;;  %v2019_v15 = vrot.slane %v15756_v6, 1  ;;  %v1650_v26 = vmax.f32 %v1426_v16, %v1525_v63  ;;  %v15771_v27 = vrot.slane %v15762_v10, 1  ;;  %615 = vmatprep.mubr.bf16.mxu0 %v15517_v2 }
  0x38   : > { %v1649_v23 = vmax.f32 %v1425_v14, %v1526_v4  ;;  %v2022_v29 = vrot.slane %v1875_v11, 1  ;;  %v1824_v32 = vmax.f32 %v1648_v12, %v15743_v49  ;;  %v2195_v36 = vrot.slane %v15756_v6, 2 }
  0x39   : > { %v2416_v30 = vsel %vm1019_vm0, %v2414_v18, %v2415_v19  ;;  %v2418_v31 = vsel %vm1019_vm0, %v2415_v19, %v2417_v13  ;;  %v1826_v25 = vmax.f32 %v1650_v26, %v1701_v5  ;;  %v15780_v40 = vsel %vm1019_vm0, %v2019_v15, %v15771_v27  ;;  %v15808_v5 = vld [vmem:[#allocation3 + $0x68] sm:$0xff] }
  0x3a   : > { %v2526_v38 = vpack.c.bf16 %v2418_v31, %v2416_v30  ;;  %v1825_v39 = vmax.f32 %v1649_v23, %v1702_v17  ;;  %v1921_v42 = vmax.f32 %v1824_v32, %v15756_v6  ;;  %v2023_v44 = vsel %vm1019_vm0, %v15771_v27, %v2022_v29  ;;  %v934_v17 = vld [vmem:[#allocation3 + $0x58] sm:$0xf]  ;;  %v15092_v31 = vld [vmem:[%s21393_s3 + $0x8] sm:$0xff]  }
  0x3b   : > { %v15786_v45 = vrot.slane %v15762_v10, 2  ;;  %v2198_v46 = vrot.slane %v1875_v11, 2  ;;  %v1923_v48 = vmax.f32 %v1826_v25, %v1875_v11  ;;  %v1033_v50 = vrot.slane %v931_v37, 1 }
  0x3c   : > { %13810 = vmatprep.mubr.bf16.mxu1 %v2526_v38  ;;  %v1922_v47 = vmax.f32 %v1825_v39, %v15762_v10  ;;  %v1154_v51 = vmax.f32 %v15712_v20, %v15733_v41  ;;  %v2145_v52 = vmax.f32 %v1921_v42, %v15780_v40  ;;  %v1210_v54 = vrot.slane %v931_v37, 2 }
  0x3d   : > { %v15794_v21 = vsel %vm1196_vm1, %v2195_v36, %v15786_v45  ;;  %v2199_v53 = vsel %vm1196_vm1, %v15786_v45, %v2198_v46  ;;  %v2147_v57 = vmax.f32 %v1923_v48, %v2022_v29  ;;  %v1034_v58 = vsel %vm1019_vm0, %v15719_v24, %v1033_v50 }
  0x3e   : > { %v2146_v56 = vmax.f32 %v1922_v47, %v2023_v44  ;;  %v1156_v59 = vmax.f32 %v931_v37, %v1033_v50  ;;  %v2321_v60 = vmax.f32 %v2145_v52, %v15794_v21  ;;  %v1155_v20 = vmax.f32 %v15714_v22, %v1034_v58  ;;  %616 = vmatmul.mubr.bf16.gmra.mrb[8].mxu0 %v15652_v28 }
  0x3f   : > { %v1211_v41 = vsel %vm1196_vm1, %v15738_v43, %v1210_v54  ;;  %v1331_v61 = vmax.f32 %v1154_v51, %v15743_v49  ;;  %v2323_v0 = vmax.f32 %v2147_v57, %v2198_v46  ;;  %v1530_v3 = vrot.slane %v1381_v55, 1  ;;  %625 = vmatprep.mubr.bf16.mxu0 %v15517_v2  ;;  %v1878_v43 = vld [vmem:[#allocation3 + $0x70] sm:$0xf]  ;;  %v15858_v57 = vld [vmem:[#allocation3 + $0x78] sm:$0xff] }
  0x40   : > { %v2322_v63 = vmax.f32 %v2146_v56, %v2199_v53  ;;  %v1333_v1 = vmax.f32 %v1156_v59, %v1210_v54  ;;  %v2419_v24 = vrot.slane %v2321_v60, 1  ;;  %v1332_v7 = vmax.f32 %v1155_v20, %v1211_v41  ;;  %v1384_v46 = vld [vmem:[#allocation3 + $0x70] sm:$0xf]  ;;  %v15864_v41 = vld [vmem:[#allocation3 + $0x80] sm:$0xff] }
  0x41   : > { %v1427_v22 = vmax.f32 %v1331_v61, %v15756_v6  ;;  %v1706_v8 = vrot.slane %v1381_v55, 2  ;;  %v2422_v49 = vrot.slane %v2323_v0, 1  ;;  %v1531_v28 = vsel %vm1019_vm0, %v15771_v27, %v1530_v3  ;;  %v15866_v61 = vld [vmem:[#allocation3 + $0x88] sm:$0xf] }
  0x42   : > { %v2420_v9 = vrot.slane %v2322_v63, 1  ;;  %v1429_v4 = vmax.f32 %v1333_v1, %v1381_v55  ;;  %v1428_v11 = vmax.f32 %v1332_v7, %v15762_v10  ;;  %v2024_v16 = vrot.slane %v15805_v62, 1  ;;  %v15093_v55 = vld [vmem:[%s21393_s3 + $0x10] sm:$0xff]  }
  0x43   : > { %v1651_v13 = vmax.f32 %v1427_v22, %v15780_v40  ;;  %v1707_v14 = vsel %vm1196_vm1, %v15786_v45, %v1706_v8  ;;  %v15822_v15 = vrot.slane %v15808_v5, 1  ;;  %v2027_v30 = vrot.slane %v1878_v43, 1 }
  0x44   : > { %v2421_v18 = vsel %vm1019_vm0, %v2419_v24, %v2420_v9  ;;  %v2423_v19 = vsel %vm1019_vm0, %v2420_v9, %v2422_v49  ;;  %v1653_v12 = vmax.f32 %v1429_v4, %v1530_v3  ;;  %v1652_v26 = vmax.f32 %v1428_v11, %v1531_v28  ;;  %v937_v11 = vld [vmem:[#allocation3 + $0x70] sm:$0xf] }
  0x45   : > { %v2527_v23 = vpack.c.bf16 %v2423_v19, %v2421_v18  ;;  %v1827_v29 = vmax.f32 %v1651_v13, %v15794_v21  ;;  %v15830_v36 = vsel %vm1019_vm0, %v2024_v16, %v15822_v15  ;;  %v2200_v37 = vrot.slane %v15805_v62, 2 }
  0x46   : > { %v1829_v32 = vmax.f32 %v1653_v12, %v1706_v8  ;;  %v15834_v38 = vrot.slane %v15808_v5, 2  ;;  %v1828_v39 = vmax.f32 %v1652_v26, %v1707_v14  ;;  %v2028_v42 = vsel %vm1019_vm0, %v15822_v15, %v2027_v30  ;;  %626 = vmatmul.mubr.bf16.gmra.mrb[12].mxu0 %v15660_v34 }
  0x47   : > { %13811 = vmatmul.mubr.bf16.vlgmr.msra.gmra.mrb[0].mxu1 %v2527_v23  ;;  %v1924_v25 = vmax.f32 %v1827_v29, %v15805_v62  ;;  %v2203_v44 = vrot.slane %v1878_v43, 2  ;;  %v1038_v50 = vrot.slane %v934_v17, 1  ;;  %v1157_v51 = vmax.f32 %v15756_v6, %v15780_v40  ;;  %635 = vmatprep.mubr.bf16.mxu0 %v15517_v2 }
  0x48   : > { %v1926_v47 = vmax.f32 %v1829_v32, %v1878_v43  ;;  %v15842_v48 = vsel %vm1196_vm1, %v2200_v37, %v15834_v38  ;;  %13843 = vmatpush3.bf16.msra.mxu1 %v15727_v33  ;;  %v1925_v52 = vmax.f32 %v1828_v39, %v15808_v5  ;;  %v1215_v54 = vrot.slane %v934_v17, 2 }
  0x49   : > { %v2148_v53 = vmax.f32 %v1924_v25, %v15830_v36  ;;  %v2204_v34 = vsel %vm1196_vm1, %v15834_v38, %v2203_v44  ;;  %13844 = vmatprep.subr.bf16.mxu1 %v15092_v31  ;;  %v1039_v6 = vsel %vm1019_vm0, %v15771_v27, %v1038_v50  ;;  %v1159_v40 = vmax.f32 %v934_v17, %v1038_v50  ;;  %v1387_v25 = vld [vmem:[#allocation3 + $0x88] sm:$0xf] }
  0x4a   : > { %v2150_v56 = vmax.f32 %v1926_v47, %v2027_v30  ;;  %v1334_v33 = vmax.f32 %v1157_v51, %v15794_v21  ;;  %v2149_v58 = vmax.f32 %v1925_v52, %v2028_v42  ;;  %v1158_v60 = vmax.f32 %v15762_v10, %v1039_v6  ;;  %v15095_v21 = vld [vmem:[%s21393_s3 + $0x18] sm:$0xff]  }
  0x4b   : > { %v2324_v59 = vmax.f32 %v2148_v53, %v15842_v48  ;;  %v1216_v20 = vsel %vm1196_vm1, %v15786_v45, %v1215_v54  ;;  %v1336_v0 = vmax.f32 %v1159_v40, %v1215_v54  ;;  %v1535_v1 = vrot.slane %v1384_v46, 1 }
  0x4c   : > { %v2326_v63 = vmax.f32 %v2150_v56, %v2203_v44  ;;  %v1430_v27 = vmax.f32 %v1334_v33, %v15805_v62  ;;  %13845 = vmatpush3.bf16.msra.mxu1 %v15092_v31  ;;  %v2325_v3 = vmax.f32 %v2149_v58, %v2204_v34  ;;  %v1335_v10 = vmax.f32 %v1158_v60, %v1216_v20  ;;  %v15911_v34 = vld [vmem:[#allocation3 + $0x90] sm:$0xff]  ;;  %v15920_v58 = vld [vmem:[#allocation3 + $0x98] sm:$0xff] }
  0x4d   : > { %v2424_v24 = vrot.slane %v2324_v59, 1  ;;  %v1711_v7 = vrot.slane %v1384_v46, 2  ;;  %13846 = vmatprep.subr.bf16.mxu1 %v15093_v55  ;;  %v1432_v22 = vmax.f32 %v1336_v0, %v1384_v46  ;;  %v1536_v8 = vsel %vm1019_vm0, %v15822_v15, %v1535_v1  ;;  %v1884_v59 = vld [vmem:[#allocation3 + $0xa0] sm:$0xf] }
  0x4e   : > { %v2427_v45 = vrot.slane %v2326_v63, 1  ;;  %v1654_v43 = vmax.f32 %v1430_v27, %v15830_v36  ;;  %v2425_v9 = vrot.slane %v2325_v3, 1  ;;  %v1431_v49 = vmax.f32 %v1335_v10, %v15808_v5  ;;  %636 = vmatmul.mubr.bf16.gmra.mrb[16].mxu0 %v15663_v35 }
  0x4f   : > { %v1712_v4 = vsel %vm1196_vm1, %v15834_v38, %v1711_v7  ;;  %v2029_v28 = vrot.slane %v15858_v57, 1  ;;  %v1656_v13 = vmax.f32 %v1432_v22, %v1535_v1  ;;  %v15882_v16 = vrot.slane %v15864_v41, 1  ;;  %645 = vmatprep.mubr.bf16.mxu0 %v15517_v2  ;;  %v940_v22 = vld [vmem:[#allocation3 + $0x88] sm:$0xf] }
  0x50   : > { %v1830_v14 = vmax.f32 %v1654_v43, %v15842_v48  ;;  %v2032_v17 = vrot.slane %v15866_v61, 1  ;;  %13847 = vmatpush3.bf16.msra.mxu1 %v15093_v55  ;;  %v2426_v18 = vsel %vm1019_vm0, %v2424_v24, %v2425_v9  ;;  %v2428_v19 = vsel %vm1019_vm0, %v2425_v9, %v2427_v45 }
  0x51   : > { %v1655_v12 = vmax.f32 %v1431_v49, %v1536_v8  ;;  %v2205_v23 = vrot.slane %v15858_v57, 2  ;;  %13848 = vmatprep.subr.bf16.mxu1 %v15095_v21  ;;  %v2528_v35 = vpack.c.bf16 %v2428_v19, %v2426_v18  ;;  %v1832_v26 = vmax.f32 %v1656_v13, %v1711_v7  ;;  %v15098_v8 = vld [vmem:[%s21393_s3 + $0x28] sm:$0xff]  }
  0x52   : > { %v1927_v29 = vmax.f32 %v1830_v14, %v15858_v57  ;;  %v15892_v30 = vsel %vm1019_vm0, %v2029_v28, %v15882_v16  ;;  %v2033_v32 = vsel %vm1019_vm0, %v15882_v16, %v2032_v17  ;;  %v15897_v37 = vrot.slane %v15864_v41, 2 }
  0x53   : > { %v1831_v31 = vmax.f32 %v1655_v12, %v1712_v4  ;;  %v2208_v39 = vrot.slane %v15866_v61, 2  ;;  %13814 = vmatprep.mubr.bf16.mxu1 %v2528_v35  ;;  %v1929_v42 = vmax.f32 %v1832_v26, %v15866_v61  ;;  %v1043_v46 = vrot.slane %v937_v11, 1 }
  0x54   : > { %v2151_v44 = vmax.f32 %v1927_v29, %v15892_v30  ;;  %v1160_v47 = vmax.f32 %v15805_v62, %v15830_v36  ;;  %13849 = vmatpush3.bf16.msra.mxu1 %v15095_v21  ;;  %v15907_v51 = vsel %vm1196_vm1, %v2205_v23, %v15897_v37  ;;  %v1220_v53 = vrot.slane %v937_v11, 2 }
  0x55   : > { %v1928_v50 = vmax.f32 %v1831_v31, %v15864_v41  ;;  %v2209_v52 = vsel %vm1196_vm1, %v15897_v37, %v2208_v39  ;;  %v2153_v54 = vmax.f32 %v1929_v42, %v2032_v17  ;;  %v1044_v56 = vsel %vm1019_vm0, %v15822_v15, %v1043_v46  ;;  %v1390_v31 = vld [vmem:[#allocation3 + $0xa0] sm:$0xf] }
  0x56   : > { %v2327_v55 = vmax.f32 %v2151_v44, %v15907_v51  ;;  %v1162_v62 = vmax.f32 %v937_v11, %v1043_v46  ;;  %v1161_v6 = vmax.f32 %v15808_v5, %v1044_v56  ;;  %v1221_v40 = vsel %vm1196_vm1, %v15834_v38, %v1220_v53  ;;  %v15096_v5 = vld [vmem:[%s21393_s3 + $0x20] sm:$0xff]  }
  0x57   : > { %v2152_v36 = vmax.f32 %v1928_v50, %v2033_v32  ;;  %v1337_v33 = vmax.f32 %v1160_v47, %v15842_v48  ;;  %v2329_v60 = vmax.f32 %v2153_v54, %v2208_v39  ;;  %v1540_v63 = vrot.slane %v1387_v25, 1  ;;  %13850 = vmatprep.subr.bf16.mxu1 %v15096_v5 }
  0x58   : > { %v2429_v20 = vrot.slane %v2327_v55, 1  ;;  %v1339_v61 = vmax.f32 %v1162_v62, %v1220_v53  ;;  %v1338_v27 = vmax.f32 %v1161_v6, %v1221_v40  ;;  %v1716_v1 = vrot.slane %v1387_v25, 2  ;;  %13851 = vmatpush3.bf16.msra.mxu1 %v15096_v5  ;;  %v1887_v6 = vld [vmem:[#allocation3 + $0xb8] sm:$0xf] }
  0x59   : > { %v2328_v0 = vmax.f32 %v2152_v36, %v2209_v52  ;;  %v1433_v15 = vmax.f32 %v1337_v33, %v15858_v57  ;;  %v2432_v21 = vrot.slane %v2329_v60, 1  ;;  %v1541_v48 = vsel %vm1019_vm0, %v15882_v16, %v1540_v63  ;;  %13852 = vmatprep.subr.bf16.mxu1 %v15098_v8 }
  0x5a   : > { %v1435_v38 = vmax.f32 %v1339_v61, %v1387_v25  ;;  %v2034_v3 = vrot.slane %v15911_v34, 1  ;;  %v1434_v10 = vmax.f32 %v1338_v27, %v15864_v41  ;;  %v1717_v45 = vsel %vm1196_vm1, %v15897_v37, %v1716_v1 }
  0x5b   : > { %v2430_v24 = vrot.slane %v2328_v0, 1  ;;  %v1657_v7 = vmax.f32 %v1433_v15, %v15892_v30  ;;  %v15937_v9 = vrot.slane %v15920_v58, 1  ;;  %v2037_v49 = vrot.slane %v1884_v59, 1 }
  0x5c   : > { %v1659_v43 = vmax.f32 %v1435_v38, %v1540_v63  ;;  %v2210_v4 = vrot.slane %v15911_v34, 2  ;;  %v1658_v13 = vmax.f32 %v1434_v10, %v1541_v48  ;;  %v15951_v26 = vrot.slane %v15920_v58, 2  ;;  %13853 = vmatpush3.bf16.msra.mxu1 %v15098_v8  ;;  %v943_v38 = vld [vmem:[#allocation3 + $0xa0] sm:$0xf] }
  0x5d   : > { %v2431_v28 = vsel %vm1019_vm0, %v2429_v20, %v2430_v24  ;;  %v2433_v11 = vsel %vm1019_vm0, %v2430_v24, %v2432_v21  ;;  %v1833_v14 = vmax.f32 %v1657_v7, %v15907_v51  ;;  %v15945_v19 = vsel %vm1019_vm0, %v2034_v3, %v15937_v9 }
  0x5e   : > { %v2529_v17 = vpack.c.bf16 %v2433_v11, %v2431_v28  ;;  %v1835_v18 = vmax.f32 %v1659_v43, %v1716_v1  ;;  %v2038_v12 = vsel %vm1019_vm0, %v15937_v9, %v2037_v49  ;;  %v1834_v23 = vmax.f32 %v1658_v13, %v1717_v45 }
  0x5f   : > { %v1930_v35 = vmax.f32 %v1833_v14, %v15911_v34  ;;  %v2213_v29 = vrot.slane %v1884_v59, 2  ;;  %v1048_v39 = vrot.slane %v940_v22, 1  ;;  %v1163_v25 = vmax.f32 %v15858_v57, %v15892_v30  ;;  %v15967_v30 = vld [vmem:[#allocation3 + $0xa8] sm:$0xff] }
  0x60   : > { %13815 = vmatmul.mubr.bf16.gmra.mrb[4].mxu1 %v2529_v17  ;;  %v1932_v32 = vmax.f32 %v1835_v18, %v1884_v59  ;;  %v1225_v42 = vrot.slane %v940_v22, 2  ;;  %v1931_v44 = vmax.f32 %v1834_v23, %v15920_v58  ;;  %v15959_v47 = vsel %vm1196_vm1, %v2210_v4, %v15951_v26  ;;  %v1393_v18 = vld [vmem:[#allocation3 + $0xb8] sm:$0xf] }
  0x61   : > { %v2154_v46 = vmax.f32 %v1930_v35, %v15945_v19  ;;  %v2214_v50 = vsel %vm1196_vm1, %v15951_v26, %v2213_v29  ;;  %v1049_v53 = vsel %vm1019_vm0, %v15882_v16, %v1048_v39  ;;  %v1165_v54 = vmax.f32 %v940_v22, %v1048_v39 }
  0x62   : > { %v2156_v52 = vmax.f32 %v1932_v32, %v2037_v49  ;;  %v1226_v57 = vsel %vm1196_vm1, %v15897_v37, %v1225_v42  ;;  %v2155_v55 = vmax.f32 %v1931_v44, %v2038_v12  ;;  %v1164_v62 = vmax.f32 %v15864_v41, %v1049_v53  ;;  %v15973_v37 = vld [vmem:[#allocation3 + $0xb0] sm:$0xff] }
  0x63   : > { %v2330_v56 = vmax.f32 %v2154_v46, %v15959_v47  ;;  %v1340_v36 = vmax.f32 %v1163_v25, %v15907_v51  ;;  %v1342_v33 = vmax.f32 %v1165_v54, %v1225_v42  ;;  %v1545_v59 = vrot.slane %v1390_v31, 1 }
  0x64   : > { %v2332_v40 = vmax.f32 %v2156_v52, %v2213_v29  ;;  %v1721_v60 = vrot.slane %v1390_v31, 2  ;;  %v2331_v20 = vmax.f32 %v2155_v55, %v2214_v50  ;;  %v1341_v61 = vmax.f32 %v1164_v62, %v1226_v57  ;;  %v16018_v57 = vld [vmem:[#allocation3 + $0xc8] sm:$0xff]  ;;  %v1890_v55 = vld [vmem:[#allocation3 + $0xd0] sm:$0xf] }
  0x65   : > { %v2434_v16 = vrot.slane %v2330_v56, 1  ;;  %v1436_v63 = vmax.f32 %v1340_v36, %v15911_v34  ;;  %v1438_v27 = vmax.f32 %v1342_v33, %v1390_v31  ;;  %v1546_v15 = vsel %vm1019_vm0, %v15937_v9, %v1545_v59 }
  0x66   : > { %v2437_v0 = vrot.slane %v2332_v40, 1  ;;  %v1722_v41 = vsel %vm1196_vm1, %v15951_v26, %v1721_v60  ;;  %v2435_v51 = vrot.slane %v2331_v20, 1  ;;  %v1437_v1 = vmax.f32 %v1341_v61, %v15920_v58 }
  0x67   : > { %v1660_v5 = vmax.f32 %v1436_v63, %v15945_v19  ;;  %v2039_v21 = vrot.slane %v15967_v30, 1  ;;  %v1662_v48 = vmax.f32 %v1438_v27, %v1545_v59  ;;  %v15983_v3 = vrot.slane %v15973_v37, 1  ;;  %v15099_v59 = vld [vmem:[%s21393_s3 + $0x30] sm:$0xff]   ;;  %v946_v27 = vld [vmem:[#allocation3 + $0xb8] sm:$0xf] }
  0x68   : > { %v2042_v24 = vrot.slane %v1887_v6, 1  ;;  %v2215_v10 = vrot.slane %v15967_v30, 2  ;;  %v2436_v7 = vsel %vm1019_vm0, %v2434_v16, %v2435_v51  ;;  %v2438_v45 = vsel %vm1019_vm0, %v2435_v51, %v2437_v0  ;;  %13854 = vmatprep.subr.bf16.mxu1 %v15099_v59 }
  0x69   : > { %v1661_v22 = vmax.f32 %v1437_v1, %v1546_v15  ;;  %v1836_v8 = vmax.f32 %v1660_v5, %v15959_v47  ;;  %v2530_v43 = vpack.c.bf16 %v2438_v45, %v2436_v7  ;;  %v1838_v49 = vmax.f32 %v1662_v48, %v1721_v60  ;;  %v15101_v15 = vld [vmem:[%s21393_s3 + $0x38] sm:$0xff]   ;;  %13855 = vmatpush3.bf16.msra.mxu1 %v15099_v59 }
  0x6a   : > { %v15991_v4 = vsel %vm1019_vm0, %v2039_v21, %v15983_v3  ;;  %v2043_v28 = vsel %vm1019_vm0, %v15983_v3, %v2042_v24  ;;  %v15997_v14 = vrot.slane %v15973_v37, 2  ;;  %v2218_v17 = vrot.slane %v1887_v6, 2  ;;  %13856 = vmatprep.subr.bf16.mxu1 %v15101_v15 }
  0x6b   : > { %v1837_v11 = vmax.f32 %v1661_v22, %v1722_v41  ;;  %v1933_v13 = vmax.f32 %v1836_v8, %v15967_v30  ;;  %13818 = vmatprep.mubr.bf16.mxu1 %v2530_v43  ;;  %v1935_v12 = vmax.f32 %v1838_v49, %v1887_v6  ;;  %v1053_v23 = vrot.slane %v943_v38, 1 }
  0x6c   : > { %v1166_v35 = vmax.f32 %v15911_v34, %v15945_v19  ;;  %v1230_v29 = vrot.slane %v943_v38, 2  ;;  %v16005_v39 = vsel %vm1196_vm1, %v2215_v10, %v15997_v14  ;;  %v2219_v25 = vsel %vm1196_vm1, %v15997_v14, %v2218_v17  ;;  %v16013_v19 = vld [vmem:[#allocation3 + $0xc0] sm:$0xff] }
  0x6d   : > { %v1934_v31 = vmax.f32 %v1837_v11, %v15973_v37  ;;  %v2157_v32 = vmax.f32 %v1933_v13, %v15991_v4  ;;  %v2159_v42 = vmax.f32 %v1935_v12, %v2042_v24  ;;  %v1054_v44 = vsel %vm1019_vm0, %v15937_v9, %v1053_v23  ;;  %v1396_v11 = vld [vmem:[#allocation3 + $0xd0] sm:$0xf]  ;;  %13857 = vmatpush3.bf16.msra.mxu1 %v15101_v15 }
  0x6e   : > { %v1168_v46 = vmax.f32 %v943_v38, %v1053_v23  ;;  %v1231_v34 = vsel %vm1196_vm1, %v15951_v26, %v1230_v29  ;;  %v1167_v53 = vmax.f32 %v15920_v58, %v1054_v44  ;;  %v1343_v54 = vmax.f32 %v1166_v35, %v15959_v47 }
  0x6f   : > { %v2158_v50 = vmax.f32 %v1934_v31, %v2043_v28  ;;  %v2333_v52 = vmax.f32 %v2157_v32, %v16005_v39  ;;  %v2335_v56 = vmax.f32 %v2159_v42, %v2218_v17  ;;  %v1550_v36 = vrot.slane %v1393_v18, 1 }
  0x70   : > { %v1345_v62 = vmax.f32 %v1168_v46, %v1230_v29  ;;  %v1726_v9 = vrot.slane %v1393_v18, 2  ;;  %v1344_v33 = vmax.f32 %v1167_v53, %v1231_v34  ;;  %v1439_v26 = vmax.f32 %v1343_v54, %v15967_v30 }
  0x71   : > { %v2334_v6 = vmax.f32 %v2158_v50, %v2219_v25  ;;  %v2439_v40 = vrot.slane %v2333_v52, 1  ;;  %v2442_v60 = vrot.slane %v2335_v56, 1  ;;  %v1551_v47 = vsel %vm1019_vm0, %v15983_v3, %v1550_v36  ;;  %v1893_v52 = vld [vmem:[#allocation3 + $0xe8] sm:$0xf] }
  0x72   : > { %v1441_v58 = vmax.f32 %v1345_v62, %v1393_v18  ;;  %v1727_v20 = vsel %vm1196_vm1, %v15997_v14, %v1726_v9  ;;  %v1440_v61 = vmax.f32 %v1344_v33, %v15973_v37  ;;  %v1663_v63 = vmax.f32 %v1439_v26, %v15991_v4 }
  0x73   : > { %v2440_v16 = vrot.slane %v2334_v6, 1  ;;  %v2044_v0 = vrot.slane %v16013_v19, 1  ;;  %v16035_v51 = vrot.slane %v16018_v57, 1  ;;  %v2047_v1 = vrot.slane %v1890_v55, 1 }
  0x74   : > { %v1665_v41 = vmax.f32 %v1441_v58, %v1550_v36  ;;  %v2220_v5 = vrot.slane %v16013_v19, 2  ;;  %v1664_v48 = vmax.f32 %v1440_v61, %v1551_v47  ;;  %v1839_v24 = vmax.f32 %v1663_v63, %v16005_v39  ;;  %v949_v58 = vld [vmem:[#allocation3 + $0xd0] sm:$0xf] }
  0x75   : > { %v2441_v21 = vsel %vm1019_vm0, %v2439_v40, %v2440_v16  ;;  %v2443_v38 = vsel %vm1019_vm0, %v2440_v16, %v2442_v60  ;;  %v16043_v45 = vsel %vm1019_vm0, %v2044_v0, %v16035_v51  ;;  %v2048_v22 = vsel %vm1019_vm0, %v16035_v51, %v2047_v1 }
  0x76   : > { %v2531_v10 = vpack.c.bf16 %v2443_v38, %v2441_v21  ;;  %v1841_v7 = vmax.f32 %v1665_v41, %v1726_v9  ;;  %v1840_v8 = vmax.f32 %v1664_v48, %v1727_v20  ;;  %v1936_v43 = vmax.f32 %v1839_v24, %v16013_v19 }
  0x77   : > { %v16049_v49 = vrot.slane %v16018_v57, 2  ;;  %v2223_v28 = vrot.slane %v1890_v55, 2  ;;  %v1058_v17 = vrot.slane %v946_v27, 1  ;;  %v1169_v18 = vmax.f32 %v15967_v30, %v15991_v4  ;;  %v16065_v4 = vld [vmem:[#allocation3 + $0xd8] sm:$0xff] }
  0x78   : > { %13819 = vmatmul.mubr.bf16.gmra.mrb[8].mxu1 %v2531_v10  ;;  %v1938_v13 = vmax.f32 %v1841_v7, %v1890_v55  ;;  %v1235_v12 = vrot.slane %v946_v27, 2  ;;  %v1937_v23 = vmax.f32 %v1840_v8, %v16018_v57  ;;  %v2160_v35 = vmax.f32 %v1936_v43, %v16043_v45  ;;  %v1399_v7 = vld [vmem:[#allocation3 + $0xe8] sm:$0xf] }
  0x79   : > { %v16057_v29 = vsel %vm1196_vm1, %v2220_v5, %v16049_v49  ;;  %v2224_v31 = vsel %vm1196_vm1, %v16049_v49, %v2223_v28  ;;  %v1059_v25 = vsel %vm1019_vm0, %v15983_v3, %v1058_v17  ;;  %v1171_v42 = vmax.f32 %v946_v27, %v1058_v17 }
  0x7a   : > { %v2162_v32 = vmax.f32 %v1938_v13, %v2047_v1  ;;  %v1236_v30 = vsel %vm1196_vm1, %v15997_v14, %v1235_v12  ;;  %v2161_v44 = vmax.f32 %v1937_v23, %v2048_v22  ;;  %v2336_v46 = vmax.f32 %v2160_v35, %v16057_v29  ;;  %v16071_v14 = vld [vmem:[#allocation3 + $0xe0] sm:$0xff] }
  0x7b   : > { %v1170_v34 = vmax.f32 %v15973_v37, %v1059_v25  ;;  %v1346_v50 = vmax.f32 %v1169_v18, %v16005_v39  ;;  %v1348_v54 = vmax.f32 %v1171_v42, %v1235_v12  ;;  %v1555_v55 = vrot.slane %v1396_v11, 1 }
  0x7c   : > { %v2338_v53 = vmax.f32 %v2162_v32, %v2223_v28  ;;  %v1731_v56 = vrot.slane %v1396_v11, 2  ;;  %v2337_v62 = vmax.f32 %v2161_v44, %v2224_v31  ;;  %v2444_v3 = vrot.slane %v2336_v46, 1 }
  0x7d   : > { %v1347_v36 = vmax.f32 %v1170_v34, %v1236_v30  ;;  %v1442_v9 = vmax.f32 %v1346_v50, %v16013_v19  ;;  %v1444_v40 = vmax.f32 %v1348_v54, %v1396_v11  ;;  %v1556_v33 = vsel %vm1019_vm0, %v16035_v51, %v1555_v55  ;;  %v16116_v30 = vld [vmem:[#allocation3 + $0x100] sm:$0xf] }
  0x7e   : > { %v2447_v6 = vrot.slane %v2338_v53, 1  ;;  %v1732_v37 = vsel %vm1196_vm1, %v16049_v49, %v1731_v56  ;;  %v2445_v39 = vrot.slane %v2337_v62, 1  ;;  %v2049_v60 = vrot.slane %v16065_v4, 1 }
  0x7f   : > { %v1443_v26 = vmax.f32 %v1347_v36, %v16018_v57  ;;  %v1666_v59 = vmax.f32 %v1442_v9, %v16043_v45  ;;  %v1668_v47 = vmax.f32 %v1444_v40, %v1555_v55  ;;  %v16081_v20 = vrot.slane %v16071_v14, 1 }
  0x80   : > { %v2052_v16 = vrot.slane %v1893_v52, 1  ;;  %v2225_v61 = vrot.slane %v16065_v4, 2  ;;  %v2446_v63 = vsel %vm1019_vm0, %v2444_v3, %v2445_v39  ;;  %v2448_v0 = vsel %vm1019_vm0, %v2445_v39, %v2447_v6 }
  0x81   : > { %v1667_v27 = vmax.f32 %v1443_v26, %v1556_v33  ;;  %v1842_v15 = vmax.f32 %v1666_v59, %v16057_v29  ;;  %v2532_v41 = vpack.c.bf16 %v2448_v0, %v2446_v63  ;;  %v1844_v1 = vmax.f32 %v1668_v47, %v1731_v56  ;;  %v952_v33 = vld [vmem:[#allocation3 + $0xe8] sm:$0xf] }
  0x82   : > { %v16089_v5 = vsel %vm1019_vm0, %v2049_v60, %v16081_v20  ;;  %v2053_v21 = vsel %vm1019_vm0, %v16081_v20, %v2052_v16  ;;  %v16095_v24 = vrot.slane %v16071_v14, 2  ;;  %v2228_v10 = vrot.slane %v1893_v52, 2 }
  0x83   : > { %v1843_v38 = vmax.f32 %v1667_v27, %v1732_v37  ;;  %v1939_v48 = vmax.f32 %v1842_v15, %v16065_v4  ;;  %13822 = vmatprep.mubr.bf16.mxu1 %v2532_v41  ;;  %v1941_v22 = vmax.f32 %v1844_v1, %v1893_v52  ;;  %v1063_v8 = vrot.slane %v949_v58, 1 }
  0x84   : > { %v1172_v43 = vmax.f32 %v16013_v19, %v16043_v45  ;;  %v1240_v28 = vrot.slane %v949_v58, 2  ;;  %v16103_v17 = vsel %vm1196_vm1, %v2225_v61, %v16095_v24  ;;  %v2229_v18 = vsel %vm1196_vm1, %v16095_v24, %v2228_v10  ;;  %v16111_v45 = vld [vmem:[#allocation3 + $0xf0] sm:$0xff] }
  0x85   : > { %v1940_v11 = vmax.f32 %v1843_v38, %v16071_v14  ;;  %v2163_v13 = vmax.f32 %v1939_v48, %v16089_v5  ;;  %v2165_v12 = vmax.f32 %v1941_v22, %v2052_v16  ;;  %v1064_v23 = vsel %vm1019_vm0, %v16035_v51, %v1063_v8  ;;  %v15106_v51 = vld [vmem:[%s21393_s3 + $0x40] sm:$0xff]  }
  0x86   : > { %v1174_v35 = vmax.f32 %v949_v58, %v1063_v8  ;;  %v1241_v19 = vsel %vm1196_vm1, %v16049_v49, %v1240_v28  ;;  %v1173_v25 = vmax.f32 %v16018_v57, %v1064_v23  ;;  %v1349_v42 = vmax.f32 %v1172_v43, %v16057_v29  ;;  %v15107_v49 = vld [vmem:[%s21393_s3 + $0x48] sm:$0xff]   ;;  %v16125_v29 = vld [vmem:[#allocation3 + $0xf8] sm:$0xff]  ;;  %13890 = vmatprep.subr.bf16.mxu0 %v15106_v51  ;;  %v1402_v38 = vld [vmem:[#allocation3 + $0x100] sm:$0xf] }
  0x87   : > { %v2164_v31 = vmax.f32 %v1940_v11, %v2053_v21  ;;  %v2339_v32 = vmax.f32 %v2163_v13, %v16103_v17  ;;  %v2341_v44 = vmax.f32 %v2165_v12, %v2228_v10  ;;  %v1560_v34 = vrot.slane %v1399_v7, 1  ;;  %13891 = vmatpush3.bf16.msra.mxu0 %v15106_v51  ;;  %v15109_v8 = vld [vmem:[%s21393_s3 + $0x50] sm:$0xff]   ;;  %v15110_v43 = vld [vmem:[%s21393_s3 + $0x58] sm:$0xff]  }
  0x88   : > { %v1351_v46 = vmax.f32 %v1174_v35, %v1240_v28  ;;  %v1736_v50 = vrot.slane %v1399_v7, 2  ;;  %v1350_v54 = vmax.f32 %v1173_v25, %v1241_v19  ;;  %v1445_v57 = vmax.f32 %v1349_v42, %v16065_v4  ;;  %13892 = vmatprep.subr.bf16.mxu0 %v15107_v49  ;;  %v16174_v35 = vld [vmem:[#allocation3 + $0x108] sm:$0xff]  ;;  %v16179_v42 = vld [vmem:[#allocation3 + $0x118] sm:$0xf] }
  0x89   : > { %v2340_v52 = vmax.f32 %v2164_v31, %v2229_v18  ;;  %v2449_v53 = vrot.slane %v2339_v32, 1  ;;  %v2452_v55 = vrot.slane %v2341_v44, 1  ;;  %v1561_v62 = vsel %vm1019_vm0, %v16081_v20, %v1560_v34 }
  0x8a   : > { %v1447_v56 = vmax.f32 %v1351_v46, %v1399_v7  ;;  %v1737_v3 = vsel %vm1196_vm1, %v16095_v24, %v1736_v50  ;;  %v1446_v9 = vmax.f32 %v1350_v54, %v16071_v14  ;;  %v1669_v6 = vmax.f32 %v1445_v57, %v16089_v5 }
  0x8b   : > { %v2450_v36 = vrot.slane %v2340_v52, 1  ;;  %v2054_v40 = vrot.slane %v16111_v45, 1  ;;  %v16135_v39 = vrot.slane %v16125_v29, 1  ;;  %v2057_v26 = vrot.slane %v16116_v30, 1  ;;  %13893 = vmatpush3.bf16.msra.mxu0 %v15107_v49  ;;  %v16182_v49 = vld [vmem:[#allocation3 + $0x110] sm:$0xff] }
  0x8c   : > { %v1671_v37 = vmax.f32 %v1447_v56, %v1560_v34  ;;  %v2230_v59 = vrot.slane %v16111_v45, 2  ;;  %v1670_v47 = vmax.f32 %v1446_v9, %v1561_v62  ;;  %v1845_v16 = vmax.f32 %v1669_v6, %v16103_v17  ;;  %13894 = vmatprep.subr.bf16.mxu0 %v15109_v8  ;;  %v361_v6 = vld [vmem:[%s15627_s9 + $0x58] sm:$0xff]  }
  0x8d   : > { %v2451_v60 = vsel %vm1019_vm0, %v2449_v53, %v2450_v36  ;;  %v2453_v58 = vsel %vm1019_vm0, %v2450_v36, %v2452_v55  ;;  %v16144_v0 = vsel %vm1019_vm0, %v2054_v40, %v16135_v39  ;;  %v2058_v27 = vsel %vm1019_vm0, %v16135_v39, %v2057_v26  ;;  %v15112_v40 = vld [vmem:[%s21393_s3 + $0x60] sm:$0xff]  }
  0x8e   : > { %v2533_v61 = vpack.c.bf16 %v2453_v58, %v2451_v60  ;;  %v1847_v63 = vmax.f32 %v1671_v37, %v1736_v50  ;;  %v1846_v15 = vmax.f32 %v1670_v47, %v1737_v3  ;;  %v1942_v41 = vmax.f32 %v1845_v16, %v16111_v45  ;;  %v955_v58 = vld [vmem:[#allocation3 + $0x100] sm:$0xf] }
  0x8f   : > { %v16150_v1 = vrot.slane %v16125_v29, 2  ;;  %v2233_v21 = vrot.slane %v16116_v30, 2  ;;  %v1068_v10 = vrot.slane %v952_v33, 1  ;;  %v1175_v7 = vmax.f32 %v16065_v4, %v16089_v5  ;;  %13895 = vmatpush3.bf16.msra.mxu0 %v15109_v8 }
  0x90   : > { %13823 = vmatmul.mubr.bf16.gmra.mrb[12].mxu1 %v2533_v61  ;;  %v1944_v48 = vmax.f32 %v1847_v63, %v16116_v30  ;;  %v1245_v22 = vrot.slane %v952_v33, 2  ;;  %v1943_v28 = vmax.f32 %v1846_v15, %v16125_v29  ;;  %v2166_v11 = vmax.f32 %v1942_v41, %v16144_v0  ;;  %13896 = vmatprep.subr.bf16.mxu0 %v15110_v43 }
  0x91   : > { %v16166_v13 = vsel %vm1196_vm1, %v2230_v59, %v16150_v1  ;;  %v2234_v4 = vsel %vm1196_vm1, %v16150_v1, %v2233_v21  ;;  %v1069_v18 = vsel %vm1019_vm0, %v16081_v20, %v1068_v10  ;;  %v1177_v12 = vmax.f32 %v952_v33, %v1068_v10  ;;  %v15113_v33 = vld [vmem:[%s21393_s3 + $0x68] sm:$0xff]  }
  0x92   : > { %v2168_v5 = vmax.f32 %v1944_v48, %v2057_v26  ;;  %v1246_v23 = vsel %vm1196_vm1, %v16095_v24, %v1245_v22  ;;  %v2167_v19 = vmax.f32 %v1943_v28, %v2058_v27  ;;  %v2342_v31 = vmax.f32 %v2166_v11, %v16166_v13  ;;  %v16212_v27 = vld [vmem:[#allocation3 + $0x118] sm:$0xf]  ;;  %v15317_v10 = vld [vmem:[%s15627_s9 + $0x28] sm:$0xff]  }
  0x93   : > { %v1176_v32 = vmax.f32 %v16071_v14, %v1069_v18  ;;  %v1352_v25 = vmax.f32 %v1175_v7, %v16103_v17  ;;  %v1354_v44 = vmax.f32 %v1177_v12, %v1245_v22  ;;  %v1565_v20 = vrot.slane %v1402_v38, 1  ;;  %13897 = vmatpush3.bf16.msra.mxu0 %v15110_v43 }
  0x94   : > { %v2344_v30 = vmax.f32 %v2168_v5, %v2233_v21  ;;  %v1741_v46 = vrot.slane %v1402_v38, 2  ;;  %v2343_v34 = vmax.f32 %v2167_v19, %v2234_v4  ;;  %v2454_v24 = vrot.slane %v2342_v31, 1  ;;  %13898 = vmatprep.subr.bf16.mxu0 %v15112_v40  ;;  %646 = vmatmul.mubr.bf16.gmra.mrb[20].mxu0 %v15317_v10 }
  0x95   : > { %v1353_v50 = vmax.f32 %v1176_v32, %v1246_v23  ;;  %v1448_v51 = vmax.f32 %v1352_v25, %v16111_v45  ;;  %v1450_v14 = vmax.f32 %v1354_v44, %v1402_v38  ;;  %v1566_v17 = vsel %vm1019_vm0, %v16135_v39, %v1565_v20  ;;  %v363_v23 = vld [vmem:[%s15627_s9 + $0x60] sm:$0xff]   ;;  %655 = vmatprep.mubr.bf16.mxu0 %v15517_v2 }
  0x96   : > { %v2457_v52 = vrot.slane %v2344_v30, 1  ;;  %v1742_v53 = vsel %vm1196_vm1, %v16150_v1, %v1741_v46  ;;  %v2455_v54 = vrot.slane %v2343_v34, 1  ;;  %v2059_v56 = vrot.slane %v16174_v35, 1 }
  0x97   : > { %v1449_v57 = vmax.f32 %v1353_v50, %v16125_v29  ;;  %v1672_v55 = vmax.f32 %v1448_v51, %v16144_v0  ;;  %v1674_v62 = vmax.f32 %v1450_v14, %v1565_v20  ;;  %v16192_v3 = vrot.slane %v16182_v49, 1  ;;  %13899 = vmatpush3.bf16.msra.mxu0 %v15112_v40 }
  0x98   : > { %v2062_v36 = vrot.slane %v16179_v42, 1  ;;  %v2235_v9 = vrot.slane %v16174_v35, 2  ;;  %v2456_v37 = vsel %vm1019_vm0, %v2454_v24, %v2455_v54  ;;  %v2458_v26 = vsel %vm1019_vm0, %v2455_v54, %v2457_v52  ;;  %13900 = vmatprep.subr.bf16.mxu0 %v15113_v33 }
  0x99   : > { %v1673_v59 = vmax.f32 %v1449_v57, %v1566_v17  ;;  %v1848_v60 = vmax.f32 %v1672_v55, %v16166_v13  ;;  %v2534_v47 = vpack.c.bf16 %v2458_v26, %v2456_v37  ;;  %v1850_v16 = vmax.f32 %v1674_v62, %v1741_v46  ;;  %v15116_v46 = vld [vmem:[%s21393_s3 + $0x78] sm:$0xff]  }
  0x9a   : > { %v16208_v61 = vsel %vm1019_vm0, %v2059_v56, %v16192_v3  ;;  %v2063_v63 = vsel %vm1019_vm0, %v16192_v3, %v2062_v36  ;;  %v16216_v21 = vrot.slane %v16182_v49, 2  ;;  %v2238_v38 = vrot.slane %v16179_v42, 2 }
  0x9b   : > { %v1849_v15 = vmax.f32 %v1673_v59, %v1742_v53  ;;  %v1945_v41 = vmax.f32 %v1848_v60, %v16174_v35  ;;  %13826 = vmatprep.mubr.bf16.mxu1 %v2534_v47  ;;  %v1947_v48 = vmax.f32 %v1850_v16, %v16179_v42  ;;  %v881_v7 = vunpack.c.l.bf16 %v361_v6  ;;  %v16235_v42 = vld [vmem:[#allocation3 + $0x118] sm:$0xf]  ;;  %13901 = vmatpush3.bf16.msra.mxu0 %v15113_v33 }
  0x9c   : > { %v882_v22 = vunpack.c.h.bf16 %v361_v6  ;;  %v16225_v28 = vsel %vm1196_vm1, %v2235_v9, %v16216_v21  ;;  %v2239_v11 = vsel %vm1196_vm1, %v16216_v21, %v2238_v38  ;;  %v1073_v5 = vrot.slane %v955_v58, 1 }
  0x9d   : > { %v1946_v8 = vmax.f32 %v1849_v15, %v16182_v49  ;;  %v2169_v43 = vmax.f32 %v1945_v41, %v16208_v61  ;;  %v2171_v4 = vmax.f32 %v1947_v48, %v2062_v36  ;;  %913 = vst [vmem:[#allocation3 + $0x122] sm:$0xff] %v881_v7  ;;  %v1178_v18 = vmax.f32 %v16111_v45, %v16144_v0  ;;  %v15115_v0 = vld [vmem:[%s21393_s3 + $0x70] sm:$0xff]  }
  0x9e   : > { %914 = vst [vmem:[#allocation3 + $0x12a] sm:$0xff] %v882_v22  ;;  %v1250_v12 = vrot.slane %v955_v58, 2  ;;  %v1570_v32 = vrot.slane %v16212_v27, 1  ;;  %v1746_v25 = vrot.slane %v16212_v27, 2  ;;  %v1074_v44 = vsel %vm1019_vm0, %v16135_v39, %v1073_v5  ;;  %13902 = vmatprep.subr.bf16.mxu0 %v15115_v0 }
  0x9f   : > { %v2170_v19 = vmax.f32 %v1946_v8, %v2063_v63  ;;  %v2345_v31 = vmax.f32 %v2169_v43, %v16225_v28  ;;  %v2347_v30 = vmax.f32 %v2171_v4, %v2238_v38  ;;  %v1180_v20 = vmax.f32 %v955_v58, %v1073_v5  ;;  %13903 = vmatpush3.bf16.msra.mxu0 %v15115_v0 }
  0xa0   : > { %v1251_v45 = vsel %vm1196_vm1, %v16150_v1, %v1250_v12  ;;  %v1179_v50 = vmax.f32 %v16125_v29, %v1074_v44  ;;  %v1355_v51 = vmax.f32 %v1178_v18, %v16166_v13  ;;  %v1571_v14 = vsel %vm1019_vm0, %v16192_v3, %v1570_v32  ;;  %13904 = vmatprep.subr.bf16.mxu0 %v15116_v46 }
  0xa1   : > { %v2346_v34 = vmax.f32 %v2170_v19, %v2239_v11  ;;  %v2459_v24 = vrot.slane %v2345_v31, 1  ;;  %v2462_v52 = vrot.slane %v2347_v30, 1  ;;  %v1357_v39 = vmax.f32 %v1180_v20, %v1250_v12 }
  0xa2   : > { %v1747_v1 = vsel %vm1196_vm1, %v16216_v21, %v1746_v25  ;;  %v1356_v53 = vmax.f32 %v1179_v50, %v1251_v45  ;;  %v1451_v54 = vmax.f32 %v1355_v51, %v16174_v35  ;;  %v883_v57 = vunpack.c.l.bf16 %v363_v23 }
  0xa3   : > { %v2460_v17 = vrot.slane %v2346_v34, 1  ;;  %v1453_v55 = vmax.f32 %v1357_v39, %v16212_v27  ;;  %v884_v29 = vunpack.c.h.bf16 %v363_v23  ;;  %v1078_v13 = vrot.slane %v16235_v42, 1  ;;  %13905 = vmatpush3.bf16.msra.mxu0 %v15116_v46 }
  0xa4   : > { %v1181_v56 = vmax.f32 %v16174_v35, %v16208_v61  ;;  %v1452_v9 = vmax.f32 %v1356_v53, %v16182_v49  ;;  %v1675_v6 = vmax.f32 %v1451_v54, %v16208_v61  ;;  %v16263_v40 = vld [vmem:[#allocation3 + $0x120] sm:$0xff]  ;;  %915 = vst [vmem:[#allocation3 + $0x13a] sm:$0xff] %v883_v57  ;;  %v1255_v23 = vrot.slane %v16235_v42, 2 }
  0xa5   : > { %v2461_v62 = vsel %vm1019_vm0, %v2459_v24, %v2460_v17  ;;  %v2463_v36 = vsel %vm1019_vm0, %v2460_v17, %v2462_v52  ;;  %v16265_v33 = vld [vmem:[#allocation3 + $0x128] sm:$0xff]  ;;  %v1902_v37 = vld [vmem:[#allocation3 + $0x130] sm:$0xf]  ;;  %v1677_v59 = vmax.f32 %v1453_v55, %v1570_v32  ;;  %v2064_v60 = vrot.slane %v16263_v40, 1  ;;  %916 = vst [vmem:[#allocation3 + $0x142] sm:$0xff] %v884_v29 }
  0xa6   : > { %v2535_v26 = vpack.c.bf16 %v2463_v36, %v2461_v62  ;;  %v16269_v35 = vrot.slane %v16265_v33, 1  ;;  %v1676_v58 = vmax.f32 %v1452_v9, %v1571_v14  ;;  %v1851_v47 = vmax.f32 %v1675_v6, %v16225_v28  ;;  %v1408_v38 = vld [vmem:[#allocation3 + $0x130] sm:$0xf]  ;;  %v16316_v55 = vld [vmem:[%s15627_s9 + $0x68] sm:$0xff]  }
  0xa7   : > { %v2067_v16 = vrot.slane %v1902_v37, 1  ;;  %v2240_v61 = vrot.slane %v16263_v40, 2  ;;  %v1853_v63 = vmax.f32 %v1677_v59, %v1746_v25  ;;  %v16278_v15 = vrot.slane %v16265_v33, 2  ;;  %v961_v36 = vld [vmem:[#allocation3 + $0x130] sm:$0xf] }
  0xa8   : > { %13827 = vmatmul.mubr.bf16.gmra.mrb[16].mxu1 %v2535_v26  ;;  %v16275_v27 = vsel %vm1019_vm0, %v2064_v60, %v16269_v35  ;;  %v2243_v41 = vrot.slane %v1902_v37, 2  ;;  %v1852_v48 = vmax.f32 %v1676_v58, %v1747_v1  ;;  %v1948_v10 = vmax.f32 %v1851_v47, %v16263_v40 }
  0xa9   : > { %v2068_v7 = vsel %vm1019_vm0, %v16269_v35, %v2067_v16  ;;  %v1079_v22 = vsel %vm1019_vm0, %v16192_v3, %v1078_v13  ;;  %v1950_v8 = vmax.f32 %v1853_v63, %v1902_v37  ;;  %v16287_v43 = vsel %vm1196_vm1, %v2240_v61, %v16278_v15 }
  0xaa   : > { %v2244_v11 = vsel %vm1196_vm1, %v16278_v15, %v2243_v41  ;;  %v1182_v4 = vmax.f32 %v16182_v49, %v1079_v22  ;;  %v1949_v5 = vmax.f32 %v1852_v48, %v16265_v33  ;;  %v2172_v18 = vmax.f32 %v1948_v10, %v16275_v27 }
  0xab   : > { %v1183_v12 = vmax.f32 %v16235_v42, %v1078_v13  ;;  %v2174_v19 = vmax.f32 %v1950_v8, %v2067_v16  ;;  %v1358_v3 = vmax.f32 %v1181_v56, %v16225_v28  ;;  %v1575_v31 = vrot.slane %v1408_v38, 1  ;;  %v16300_v20 = vld [vmem:[#allocation3 + $0x138] sm:$0xff] }
  0xac   : > { %v1751_v32 = vrot.slane %v1408_v38, 2  ;;  %v2173_v25 = vmax.f32 %v1949_v5, %v2068_v7  ;;  %v2348_v30 = vmax.f32 %v2172_v18, %v16287_v43  ;;  %v1256_v44 = vsel %vm1196_vm1, %v16216_v21, %v1255_v23  ;;  %v16302_v45 = vld [vmem:[#allocation3 + $0x140] sm:$0xff]  ;;  %v1905_v34 = vld [vmem:[#allocation3 + $0x148] sm:$0xf]  ;;  %v16348_v18 = vld [vmem:[%s15627_s9 + $0x70] sm:$0xff]  }
  0xad   : > { %v1360_v49 = vmax.f32 %v1183_v12, %v1255_v23  ;;  %v2350_v0 = vmax.f32 %v2174_v19, %v2243_v41  ;;  %v1359_v46 = vmax.f32 %v1182_v4, %v1256_v44  ;;  %v1454_v42 = vmax.f32 %v1358_v3, %v16263_v40  ;;  %v16329_v59 = vld [vmem:[#allocation3 + $0x148] sm:$0xf] }
  0xae   : > { %v1576_v28 = vsel %vm1019_vm0, %v16269_v35, %v1575_v31  ;;  %v2349_v24 = vmax.f32 %v2173_v25, %v2244_v11  ;;  %v2464_v50 = vrot.slane %v2348_v30, 1  ;;  %v1752_v21 = vsel %vm1196_vm1, %v16278_v15, %v1751_v32 }
  0xaf   : > { %v1456_v51 = vmax.f32 %v1360_v49, %v1408_v38  ;;  %v2467_v52 = vrot.slane %v2350_v0, 1  ;;  %v1455_v39 = vmax.f32 %v1359_v46, %v16265_v33  ;;  %v1678_v14 = vmax.f32 %v1454_v42, %v16275_v27  ;;  %v15318_v38 = vld [vmem:[%s15627_s9 + $0x30] sm:$0xff]  }
  0xb0   : > { %v2069_v1 = vrot.slane %v16300_v20, 1  ;;  %v2465_v17 = vrot.slane %v2349_v24, 1  ;;  %v16313_v54 = vrot.slane %v16302_v45, 1  ;;  %v2072_v57 = vrot.slane %v1905_v34, 1  ;;  %656 = vmatmul.mubr.bf16.gmra.mrb[24].mxu0 %v15318_v38 }
  0xb1   : > { %v1680_v53 = vmax.f32 %v1456_v51, %v1575_v31  ;;  %v1679_v29 = vmax.f32 %v1455_v39, %v1576_v28  ;;  %v1854_v13 = vmax.f32 %v1678_v14, %v16287_v43  ;;  %v2245_v56 = vrot.slane %v16300_v20, 2  ;;  %v16352_v31 = vld [vmem:[#allocation3 + $0x148] sm:$0xf]  ;;  %665 = vmatprep.mubr.bf16.mxu0 %v15517_v2 }
  0xb2   : > { %v16321_v62 = vrot.slane %v16302_v45, 2  ;;  %v2466_v9 = vsel %vm1019_vm0, %v2464_v50, %v2465_v17  ;;  %v2468_v6 = vsel %vm1019_vm0, %v2465_v17, %v2467_v52  ;;  %v16327_v26 = vsel %vm1019_vm0, %v2069_v1, %v16313_v54 }
  0xb3   : > { %v1856_v37 = vmax.f32 %v1680_v53, %v1751_v32  ;;  %v2536_v60 = vpack.c.bf16 %v2468_v6, %v2466_v9  ;;  %v1855_v58 = vmax.f32 %v1679_v29, %v1752_v21  ;;  %v1951_v47 = vmax.f32 %v1854_v13, %v16300_v20 }
  0xb4   : > { %v2073_v16 = vsel %vm1019_vm0, %v16313_v54, %v2072_v57  ;;  %v16336_v63 = vsel %vm1196_vm1, %v2245_v56, %v16321_v62  ;;  %v2248_v41 = vrot.slane %v1905_v34, 2  ;;  %v885_v7 = vunpack.c.l.bf16 %v16316_v55 }
  0xb5   : > { %v1953_v61 = vmax.f32 %v1856_v37, %v1905_v34  ;;  %13830 = vmatprep.mubr.bf16.mxu1 %v2536_v60  ;;  %v1952_v48 = vmax.f32 %v1855_v58, %v16302_v45  ;;  %v2175_v10 = vmax.f32 %v1951_v47, %v16327_v26  ;;  %v886_v22 = vunpack.c.h.bf16 %v16316_v55 }
  0xb6   : > { %v2249_v11 = vsel %vm1196_vm1, %v16321_v62, %v2248_v41  ;;  %v1083_v4 = vrot.slane %v961_v36, 1  ;;  %v1184_v5 = vmax.f32 %v16263_v40, %v16275_v27  ;;  %917 = vst [vmem:[#allocation3 + $0x152] sm:$0xff] %v885_v7  ;;  %v1260_v19 = vrot.slane %v961_v36, 2 }
  0xb7   : > { %v2177_v8 = vmax.f32 %v1953_v61, %v2072_v57  ;;  %v2176_v12 = vmax.f32 %v1952_v48, %v2073_v16  ;;  %v2351_v23 = vmax.f32 %v2175_v10, %v16336_v63  ;;  %918 = vst [vmem:[#allocation3 + $0x15a] sm:$0xff] %v886_v22  ;;  %v1580_v3 = vrot.slane %v16329_v59, 1 }
  0xb8   : > { %v1084_v25 = vsel %vm1019_vm0, %v16269_v35, %v1083_v4  ;;  %v1186_v30 = vmax.f32 %v961_v36, %v1083_v4  ;;  %v1361_v40 = vmax.f32 %v1184_v5, %v16287_v43  ;;  %v1261_v0 = vsel %vm1196_vm1, %v16278_v15, %v1260_v19 }
  0xb9   : > { %v2353_v32 = vmax.f32 %v2177_v8, %v2248_v41  ;;  %v2352_v27 = vmax.f32 %v2176_v12, %v2249_v11  ;;  %v2469_v44 = vrot.slane %v2351_v23, 1  ;;  %v1185_v49 = vmax.f32 %v16265_v33, %v1084_v25 }
  0xba   : > { %v1363_v42 = vmax.f32 %v1186_v30, %v1260_v19  ;;  %v1457_v28 = vmax.f32 %v1361_v40, %v16300_v20  ;;  %v1581_v34 = vsel %vm1019_vm0, %v16313_v54, %v1580_v3  ;;  %v1756_v35 = vrot.slane %v16329_v59, 2 }
  0xbb   : > { %v2472_v46 = vrot.slane %v2353_v32, 1  ;;  %v2470_v24 = vrot.slane %v2352_v27, 1  ;;  %v1362_v50 = vmax.f32 %v1185_v49, %v1261_v0  ;;  %v887_v43 = vunpack.c.l.bf16 %v16348_v18 }
  0xbc   : > { %v1459_v51 = vmax.f32 %v1363_v42, %v16329_v59  ;;  %v1681_v33 = vmax.f32 %v1457_v28, %v16327_v26  ;;  %v888_v21 = vunpack.c.h.bf16 %v16348_v18  ;;  %v1088_v15 = vrot.slane %v16352_v31, 1 }
  0xbd   : > { %v2471_v52 = vsel %vm1019_vm0, %v2469_v44, %v2470_v24  ;;  %v2473_v39 = vsel %vm1019_vm0, %v2470_v24, %v2472_v46  ;;  %v1458_v14 = vmax.f32 %v1362_v50, %v16302_v45  ;;  %v1757_v1 = vsel %vm1196_vm1, %v16321_v62, %v1756_v35  ;;  %919 = vst [vmem:[#allocation3 + $0x16a] sm:$0xff] %v887_v43  ;;  %v16376_v29 = vld [vmem:[#allocation3 + $0x150] sm:$0xff] }
  0xbe   : > { %v2537_v17 = vpack.c.bf16 %v2473_v39, %v2471_v52  ;;  %v1683_v53 = vmax.f32 %v1459_v51, %v1580_v3  ;;  %v1857_v57 = vmax.f32 %v1681_v33, %v16336_v63  ;;  %v16378_v13 = vld [vmem:[#allocation3 + $0x158] sm:$0xff]  ;;  %v1908_v56 = vld [vmem:[#allocation3 + $0x160] sm:$0xf]  ;;  %920 = vst [vmem:[#allocation3 + $0x172] sm:$0xff] %v888_v21  ;;  %v1089_v36 = vsel %vm1019_vm0, %v16313_v54, %v1088_v15 }
  0xbf   : > { %v1682_v9 = vmax.f32 %v1458_v14, %v1581_v34  ;;  %v2074_v6 = vrot.slane %v16376_v29, 1  ;;  %v16384_v37 = vrot.slane %v16378_v13, 1  ;;  %v2077_v59 = vrot.slane %v1908_v56, 1  ;;  %v1414_v61 = vld [vmem:[#allocation3 + $0x160] sm:$0xf]  ;;  %v16430_v21 = vld [vmem:[%s15627_s9 + $0x78] sm:$0xff]  }
  0xc0   : > { %13831 = vmatmul.mubr.bf16.gmra.mrb[20].mxu1 %v2537_v17  ;;  %v1859_v60 = vmax.f32 %v1683_v53, %v1756_v35  ;;  %v1954_v58 = vmax.f32 %v1857_v57, %v16376_v29  ;;  %v2250_v47 = vrot.slane %v16376_v29, 2  ;;  %v16389_v16 = vrot.slane %v16378_v13, 2 }
  0xc1   : > { %v1858_v41 = vmax.f32 %v1682_v9, %v1757_v1  ;;  %v16393_v54 = vsel %vm1019_vm0, %v2074_v6, %v16384_v37  ;;  %v2078_v38 = vsel %vm1019_vm0, %v16384_v37, %v2077_v59  ;;  %v2253_v48 = vrot.slane %v1908_v56, 2 }
  0xc2   : > { %v1956_v10 = vmax.f32 %v1859_v60, %v1908_v56  ;;  %v2178_v7 = vmax.f32 %v1954_v58, %v16393_v54  ;;  %v16400_v22 = vsel %vm1196_vm1, %v2250_v47, %v16389_v16  ;;  %v1187_v8 = vmax.f32 %v16300_v20, %v16327_v26 }
  0xc3   : > { %v1955_v11 = vmax.f32 %v1858_v41, %v16378_v13  ;;  %v2254_v4 = vsel %vm1196_vm1, %v16389_v16, %v2253_v48  ;;  %v1188_v5 = vmax.f32 %v16302_v45, %v1089_v36  ;;  %v1189_v12 = vmax.f32 %v16352_v31, %v1088_v15  ;;  %v967_v15 = vld [vmem:[#allocation3 + $0x160] sm:$0xf] }
  0xc4   : > { %v2180_v23 = vmax.f32 %v1956_v10, %v2077_v59  ;;  %v2354_v19 = vmax.f32 %v2178_v7, %v16400_v22  ;;  %v1265_v3 = vrot.slane %v16352_v31, 2  ;;  %v1364_v32 = vmax.f32 %v1187_v8, %v16336_v63  ;;  %v16412_v25 = vld [vmem:[#allocation3 + $0x168] sm:$0xff] }
  0xc5   : > { %v2179_v30 = vmax.f32 %v1955_v11, %v2078_v38  ;;  %v1585_v20 = vrot.slane %v1414_v61, 1  ;;  %v1761_v26 = vrot.slane %v1414_v61, 2  ;;  %v16414_v40 = vld [vmem:[#allocation3 + $0x170] sm:$0xff]  ;;  %v2079_v27 = vrot.slane %v16412_v25, 1  ;;  %v1911_v46 = vld [vmem:[#allocation3 + $0x178] sm:$0xf] }
  0xc6   : > { %v2356_v44 = vmax.f32 %v2180_v23, %v2253_v48  ;;  %v2474_v45 = vrot.slane %v2354_v19, 1  ;;  %v1266_v49 = vsel %vm1196_vm1, %v16321_v62, %v1265_v3  ;;  %v1366_v0 = vmax.f32 %v1189_v12, %v1265_v3  ;;  %v1417_v41 = vld [vmem:[#allocation3 + $0x178] sm:$0xf] }
  0xc7   : > { %v2355_v31 = vmax.f32 %v2179_v30, %v2254_v4  ;;  %v1365_v42 = vmax.f32 %v1188_v5, %v1266_v49  ;;  %v1460_v63 = vmax.f32 %v1364_v32, %v16376_v29  ;;  %v1586_v28 = vsel %vm1019_vm0, %v16384_v37, %v1585_v20  ;;  %v16461_v32 = vld [vmem:[#allocation3 + $0x178] sm:$0xf] }
  0xc8   : > { %v2477_v34 = vrot.slane %v2356_v44, 1  ;;  %v1462_v24 = vmax.f32 %v1366_v0, %v1414_v61  ;;  %v1762_v50 = vsel %vm1196_vm1, %v16389_v16, %v1761_v26  ;;  %v16425_v35 = vrot.slane %v16414_v40, 1  ;;  %v15319_v61 = vld [vmem:[%s15627_s9 + $0x38] sm:$0xff]  }
  0xc9   : > { %v2475_v43 = vrot.slane %v2355_v31, 1  ;;  %v1461_v62 = vmax.f32 %v1365_v42, %v16378_v13  ;;  %v1684_v51 = vmax.f32 %v1460_v63, %v16393_v54  ;;  %v2082_v33 = vrot.slane %v1911_v46, 1  ;;  %666 = vmatmul.mubr.bf16.gmra.mrb[28].mxu0 %v15319_v61 }
  0xca   : > { %v1686_v52 = vmax.f32 %v1462_v24, %v1585_v20  ;;  %v16434_v39 = vsel %vm1019_vm0, %v2079_v27, %v16425_v35  ;;  %v2255_v14 = vrot.slane %v16412_v25, 2  ;;  %v16438_v1 = vrot.slane %v16414_v40, 2  ;;  %675 = vmatprep.mubr.bf16.mxu0 %v15517_v2 }
  0xcb   : > { %v2476_v17 = vsel %vm1019_vm0, %v2474_v45, %v2475_v43  ;;  %v2478_v53 = vsel %vm1019_vm0, %v2475_v43, %v2477_v34  ;;  %v1685_v57 = vmax.f32 %v1461_v62, %v1586_v28  ;;  %v1860_v56 = vmax.f32 %v1684_v51, %v16400_v22 }
  0xcc   : > { %v2538_v36 = vpack.c.bf16 %v2478_v53, %v2476_v17  ;;  %v1862_v9 = vmax.f32 %v1686_v52, %v1761_v26  ;;  %v2083_v6 = vsel %vm1019_vm0, %v16425_v35, %v2082_v33  ;;  %v16447_v59 = vsel %vm1196_vm1, %v2255_v14, %v16438_v1 }
  0xcd   : > { %v1861_v60 = vmax.f32 %v1685_v57, %v1762_v50  ;;  %v1957_v58 = vmax.f32 %v1860_v56, %v16412_v25  ;;  %v2258_v47 = vrot.slane %v1911_v46, 2  ;;  %v889_v48 = vunpack.c.l.bf16 %v16430_v21 }
  0xce   : > { %13834 = vmatprep.mubr.bf16.mxu1 %v2538_v36  ;;  %v1959_v38 = vmax.f32 %v1862_v9, %v1911_v46  ;;  %v890_v10 = vunpack.c.h.bf16 %v16430_v21  ;;  %v1093_v7 = vrot.slane %v967_v15, 1  ;;  %v1190_v5 = vmax.f32 %v16376_v29, %v16393_v54 }
  0xcf   : > { %v1958_v8 = vmax.f32 %v1861_v60, %v16414_v40  ;;  %v2181_v11 = vmax.f32 %v1957_v58, %v16434_v39  ;;  %v2259_v4 = vsel %vm1196_vm1, %v16438_v1, %v2258_v47  ;;  %921 = vst [vmem:[#allocation3 + $0x182] sm:$0xff] %v889_v48  ;;  %v1270_v3 = vrot.slane %v967_v15, 2 }
  0xd0   : > { %v2183_v12 = vmax.f32 %v1959_v38, %v2082_v33  ;;  %922 = vst [vmem:[#allocation3 + $0x18a] sm:$0xff] %v890_v10  ;;  %v1094_v23 = vsel %vm1019_vm0, %v16384_v37, %v1093_v7  ;;  %v1192_v19 = vmax.f32 %v967_v15, %v1093_v7  ;;  %v1367_v27 = vmax.f32 %v1190_v5, %v16400_v22 }
  0xd1   : > { %v2182_v30 = vmax.f32 %v1958_v8, %v2083_v6  ;;  %v2357_v20 = vmax.f32 %v2181_v11, %v16447_v59  ;;  %v1191_v26 = vmax.f32 %v16378_v13, %v1094_v23  ;;  %v1271_v54 = vsel %vm1196_vm1, %v16389_v16, %v1270_v3 }
  0xd2   : > { %v2359_v29 = vmax.f32 %v2183_v12, %v2258_v47  ;;  %v1369_v44 = vmax.f32 %v1192_v19, %v1270_v3  ;;  %v1590_v45 = vrot.slane %v1417_v41, 1  ;;  %v1463_v46 = vmax.f32 %v1367_v27, %v16412_v25 }
  0xd3   : > { %v2358_v37 = vmax.f32 %v2182_v30, %v2259_v4  ;;  %v2479_v49 = vrot.slane %v2357_v20, 1  ;;  %v1368_v0 = vmax.f32 %v1191_v26, %v1271_v54  ;;  %v1766_v28 = vrot.slane %v1417_v41, 2  ;;  %v16493_v20 = vld [vmem:[#allocation3 + $0x1a8] sm:$0xf] }
  0xd4   : > { %v2482_v31 = vrot.slane %v2359_v29, 1  ;;  %v1465_v42 = vmax.f32 %v1369_v44, %v1417_v41  ;;  %v1591_v63 = vsel %vm1019_vm0, %v16425_v35, %v1590_v45  ;;  %v1687_v34 = vmax.f32 %v1463_v46, %v16434_v39 }
  0xd5   : > { %v2480_v13 = vrot.slane %v2358_v37, 1  ;;  %v1464_v22 = vmax.f32 %v1368_v0, %v16414_v40  ;;  %v1098_v16 = vrot.slane %v16461_v32, 1  ;;  %v1767_v50 = vsel %vm1196_vm1, %v16438_v1, %v1766_v28 }
  0xd6   : > { %v1689_v24 = vmax.f32 %v1465_v42, %v1590_v45  ;;  %v1193_v43 = vmax.f32 %v16412_v25, %v16434_v39  ;;  %v1275_v62 = vrot.slane %v16461_v32, 2  ;;  %v1863_v52 = vmax.f32 %v1687_v34, %v16447_v59  ;;  %v1912_v14 = vld [vmem:[#allocation3 + $0x180] sm:$0xff] }
  0xd7   : > { %v2481_v51 = vsel %vm1019_vm0, %v2479_v49, %v2480_v13  ;;  %v2483_v33 = vsel %vm1019_vm0, %v2480_v13, %v2482_v31  ;;  %v1688_v15 = vmax.f32 %v1464_v22, %v1591_v63  ;;  %v1913_v17 = vld [vmem:[#allocation3 + $0x188] sm:$0xff]  ;;  %v1914_v53 = vld [vmem:[#allocation3 + $0x190] sm:$0xf]  ;;  %v2084_v36 = vrot.slane %v1912_v14, 1  ;;  %v16498_v42 = vld [vmem:[#allocation3] sm:$0xff] }
  0xd8   : > { %v2539_v57 = vpack.c.bf16 %v2483_v33, %v2481_v51  ;;  %v1865_v56 = vmax.f32 %v1689_v24, %v1766_v28  ;;  %v2085_v9 = vrot.slane %v1913_v17, 1  ;;  %v1960_v60 = vmax.f32 %v1863_v52, %v1912_v14  ;;  %v1420_v39 = vld [vmem:[#allocation3 + $0x190] sm:$0xf]  ;;  %v15321_v52 = vld [vmem:[%s15627_s9 + $0x40] sm:$0xff]  }
  0xd9   : > { %v1864_v6 = vmax.f32 %v1688_v15, %v1767_v50  ;;  %v2087_v58 = vrot.slane %v1914_v53, 1  ;;  %v2260_v25 = vrot.slane %v1912_v14, 2  ;;  %v2261_v41 = vrot.slane %v1913_v17, 2  ;;  %676 = vmatmul.mubr.bf16.gmra.mrb[32].mxu0 %v15321_v52 }
  0xda   : > { %13835 = vmatmul.mubr.bf16.gmra.mrb[24].mxu1 %v2539_v57  ;;  %v1962_v47 = vmax.f32 %v1865_v56, %v1914_v53  ;;  %v2086_v61 = vsel %vm1019_vm0, %v2084_v36, %v2085_v9  ;;  %v2263_v38 = vrot.slane %v1914_v53, 2  ;;  %v1099_v8 = vsel %vm1019_vm0, %v16425_v35, %v1098_v16  ;;  %685 = vmatprep.mubr.bf16.mxu0 %v15517_v2 }
  0xdb   : > { %v1961_v48 = vmax.f32 %v1864_v6, %v1913_v17  ;;  %v2088_v10 = vsel %vm1019_vm0, %v2085_v9, %v2087_v58  ;;  %v2184_v7 = vmax.f32 %v1960_v60, %v2086_v61  ;;  %v2262_v4 = vsel %vm1196_vm1, %v2260_v25, %v2261_v41 }
  0xdc   : > { %v2186_v11 = vmax.f32 %v1962_v47, %v2087_v58  ;;  %v2264_v5 = vsel %vm1196_vm1, %v2261_v41, %v2263_v38  ;;  %v1194_v12 = vmax.f32 %v16414_v40, %v1099_v8  ;;  %v1195_v3 = vmax.f32 %v16461_v32, %v1098_v16  ;;  %v15323_v8 = vld [vmem:[%s15627_s9 + $0x50] sm:$0xff]  }
  0xdd   : > { %v2185_v23 = vmax.f32 %v1961_v48, %v2088_v10  ;;  %v2360_v19 = vmax.f32 %v2184_v7, %v2262_v4  ;;  %v1276_v30 = vsel %vm1196_vm1, %v16438_v1, %v1275_v62  ;;  %v1370_v27 = vmax.f32 %v1193_v43, %v16447_v59 }
  0xde   : > { %v2362_v26 = vmax.f32 %v2186_v11, %v2263_v38  ;;  %v1371_v35 = vmax.f32 %v1194_v12, %v1276_v30  ;;  %v1595_v29 = vrot.slane %v1420_v39, 1  ;;  %v1372_v45 = vmax.f32 %v1195_v3, %v1275_v62  ;;  %v15324_v11 = vld [vmem:[%s15627_s9 + $0x58] sm:$0xff]  }
  0xdf   : > { %v2361_v54 = vmax.f32 %v2185_v23, %v2264_v5  ;;  %v2484_v44 = vrot.slane %v2360_v19, 1  ;;  %v1771_v37 = vrot.slane %v1420_v39, 2  ;;  %v1466_v40 = vmax.f32 %v1370_v27, %v1912_v14  ;;  %v15325_v19 = vld [vmem:[%s15627_s9 + $0x60] sm:$0xff]  }
  0xe0   : > { %v2487_v49 = vrot.slane %v2362_v26, 1  ;;  %v1467_v0 = vmax.f32 %v1371_v35, %v1913_v17  ;;  %v1596_v46 = vsel %vm1019_vm0, %v2085_v9, %v1595_v29  ;;  %v1468_v31 = vmax.f32 %v1372_v45, %v1420_v39  ;;  %v15322_v39 = vld [vmem:[%s15627_s9 + $0x48] sm:$0xff]   ;;  %s13169_s9 = sshll.u32 %s22326_s22, 8 }
  0xe1   : > { %v2485_v32 = vrot.slane %v2361_v54, 1  ;;  %v1772_v1 = vsel %vm1196_vm1, %v2261_v41, %v1771_v37  ;;  %v2089_v59 = vrot.slane %v16498_v42, 1  ;;  %v1690_v63 = vmax.f32 %v1466_v40, %v2086_v61  ;;  %686 = vmatmul.mubr.bf16.gmra.mrb[36].mxu0 %v15322_v39  ;;  %s21293_s26 = scalar_lea.vmem %s21396_s6, %s13169_s9 }
  0xe2   : > { %v1691_v28 = vmax.f32 %v1467_v0, %v1596_v46  ;;  %v2092_v13 = vrot.slane %v16493_v20, 1  ;;  %v2265_v22 = vrot.slane %v16498_v42, 2  ;;  %v1692_v24 = vmax.f32 %v1468_v31, %v1595_v29  ;;  %695 = vmatprep.mubr.bf16.mxu0 %v15517_v2 }
  0xe3   : > { %v2486_v34 = vsel %vm1019_vm0, %v2484_v44, %v2485_v32  ;;  %v2488_v16 = vsel %vm1019_vm0, %v2485_v32, %v2487_v49  ;;  %v1866_v43 = vmax.f32 %v1690_v63, %v2262_v4  ;;  %v2268_v15 = vrot.slane %v16493_v20, 2  ;;  %v16560_v4 = vld [vmem:[%s21392_s2] ss:$0 sm:$0xff] }
  0xe4   : > { %v2540_v50 = vpack.c.bf16 %v2488_v16, %v2486_v34  ;;  %v1867_v62 = vmax.f32 %v1691_v28, %v1772_v1  ;;  %v1868_v51 = vmax.f32 %v1692_v24, %v1771_v37  ;;  %v2093_v33 = vsel %vm1019_vm0, %v2089_v59, %v2092_v13 }
  0xe5   : > { %v1963_v14 = vmax.f32 %v1866_v43, %v16498_v42  ;;  %v2269_v57 = vsel %vm1196_vm1, %v2265_v22, %v2268_v15  ;;  %v15519_v56 = vmov 0.0   ;;  %v15520_v7 = vmov 0.0|0.0  }
  0xe6   : > { %13838 = vmatprep.mubr.bf16.mxu1 %v2540_v50  ;;  %v1964_v17 = vmax.f32 %v1867_v62, %v16498_v42  ;;  %v1965_v53 = vmax.f32 %v1868_v51, %v16493_v20  ;;  %253 = vst [vmem:[#allocation2] sm:$0xff] %v15519_v56  ;;  %255 = vst [vmem:[#allocation2 + $0x10] sm:$0xf] %v15519_v56  ;;  %v16584_v42 = vrot.slane %v15519_v56, 1 }
  0xe7   : > { %258 = vst [vmem:[#allocation2 + $0x28] sm:$0xf] %v15519_v56  ;;  %262 = vst [vmem:[#allocation2 + $0x1c0] sm:$0xf] %v15519_v56  ;;  %v2187_v36 = vmax.f32 %v1963_v14, %v2089_v59 }
  0xe8   : > { %265 = vst [vmem:[#allocation2 + $0x1d8] sm:$0xf] %v15519_v56  ;;  %267 = vst [vmem:[#allocation2 + $0x30] sm:$0x3] %v15519_v56  ;;  %v2188_v9 = vmax.f32 %v1964_v17, %v2093_v33  ;;  %v2189_v6 = vmax.f32 %v1965_v53, %v2092_v13 }
  0xe9   : > { %268 = vst [vmem:[#allocation2 + $0x48] sm:$0x3] %v15519_v56  ;;  %269 = vst [vmem:[#allocation2 + $0x60] sm:$0x3] %v15519_v56  ;;  %v2363_v60 = vmax.f32 %v2187_v36, %v2265_v22  ;;  %696 = vmatmul.mubr.bf16.gmra.mrb[40].mxu0 %v15323_v8 }
  0xea   : > { %270 = vst [vmem:[#allocation2 + $0x78] sm:$0x3] %v15519_v56  ;;  %271 = vst [vmem:[#allocation2 + $0x90] sm:$0x3] %v15519_v56  ;;  %v2364_v58 = vmax.f32 %v2188_v9, %v2269_v57  ;;  %v2365_v25 = vmax.f32 %v2189_v6, %v2268_v15  ;;  %705 = vmatprep.mubr.bf16.mxu0 %v15517_v2 }
  0xeb   : > { %272 = vst [vmem:[#allocation2 + $0xa8] sm:$0x3] %v15519_v56  ;;  %273 = vst [vmem:[#allocation2 + $0xc0] sm:$0x3] %v15519_v56  ;;  %v2489_v47 = vrot.slane %v2363_v60, 1 }
  0xec   : > { %274 = vst [vmem:[#allocation2 + $0xd8] sm:$0x3] %v15519_v56  ;;  %275 = vst [vmem:[#allocation2 + $0xf0] sm:$0x3] %v15519_v56  ;;  %v2490_v61 = vrot.slane %v2364_v58, 1  ;;  %v2492_v41 = vrot.slane %v2365_v25, 1 }
  0xed   : > { %276 = vst [vmem:[#allocation2 + $0x108] sm:$0x3] %v15519_v56  ;;  %277 = vst [vmem:[#allocation2 + $0x120] sm:$0x3] %v15519_v56  ;;  %v2801_v0 = vld [vmem:[#allocation2 + $0x10] sm:$0xf] }
  0xee   : > { %278 = vst [vmem:[#allocation2 + $0x138] sm:$0x3] %v15519_v56  ;;  %279 = vst [vmem:[#allocation2 + $0x150] sm:$0x3] %v15519_v56  ;;  %v2491_v38 = vsel %vm1019_vm0, %v2489_v47, %v2490_v61  ;;  %v2493_v48 = vsel %vm1019_vm0, %v2490_v61, %v2492_v41  ;;  %v3171_v59 = vrot.slane %v2801_v0, 1 }
  0xef   : > { %280 = vst [vmem:[#allocation2 + $0x168] sm:$0x3] %v15519_v56  ;;  %281 = vst [vmem:[#allocation2 + $0x180] sm:$0x3] %v15519_v56  ;;  %v2541_v10 = vpack.c.bf16 %v2493_v48, %v2491_v38  ;;  %v2804_v43 = vld [vmem:[#allocation2 + $0x28] sm:$0xf] }
  0xf0   : > { %282 = vst [vmem:[#allocation2 + $0x198] sm:$0x3] %v15519_v56  ;;  %283 = vst [vmem:[#allocation2 + $0x42] sm:$0x3] %v15519_v56  ;;  %v3172_v52 = vsel %vm1019_vm0, %v16584_v42, %v3171_v59  ;;  %v3176_v6 = vrot.slane %v2804_v43, 1 }
  0xf1   : > { %284 = vst [vmem:[#allocation2 + $0x5a] sm:$0x3] %v15519_v56  ;;  %285 = vst [vmem:[#allocation2 + $0x72] sm:$0x3] %v15519_v56  ;;  %13839 = vmatmul.mubr.bf16.gmra.mrb[28].mxu1 %v2541_v10  ;;  %706 = vmatmul.mubr.bf16.gmra.mrb[44].mxu0 %v15324_v11  ;;  %v3280_v58 = vpack.c.bf16 %v3172_v52, %v16584_v42 }
  0xf2   : > { %286 = vst [vmem:[#allocation2 + $0x8a] sm:$0x3] %v15519_v56  ;;  %287 = vst [vmem:[#allocation2 + $0xa2] sm:$0x3] %v15519_v56  ;;  %13858 = vmatprep.mubr.bf16.mxu1 %v15520_v7  ;;  %715 = vmatprep.mubr.bf16.mxu0 %v15517_v2 }
  0xf3   : > { %288 = vst [vmem:[#allocation2 + $0xba] sm:$0x3] %v15519_v56  ;;  %289 = vst [vmem:[#allocation2 + $0xd2] sm:$0x3] %v15519_v56 }
  0xf4   : > { %290 = vst [vmem:[#allocation2 + $0xea] sm:$0x3] %v15519_v56  ;;  %291 = vst [vmem:[#allocation2 + $0x102] sm:$0x3] %v15519_v56 }
  0xf5   : > { %292 = vst [vmem:[#allocation2 + $0x11a] sm:$0x3] %v15519_v56  ;;  %293 = vst [vmem:[#allocation2 + $0x132] sm:$0x3] %v15519_v56 }
  0xf6   : > { %294 = vst [vmem:[#allocation2 + $0x14a] sm:$0x3] %v15519_v56  ;;  %295 = vst [vmem:[#allocation2 + $0x162] sm:$0x3] %v15519_v56 }
  0xf7   : > { %296 = vst [vmem:[#allocation2 + $0x17a] sm:$0x3] %v15519_v56  ;;  %297 = vst [vmem:[#allocation2 + $0x192] sm:$0x3] %v15519_v56 }
  0xf8   : > { %298 = vst [vmem:[#allocation2 + $0x1aa] sm:$0x3] %v15519_v56 }
  0xf9   : > { %13859 = vmatmul.mubr.bf16.vlgmr.msra.gmra.mrb[32].mxu1 %v15520_v7  ;;  %716 = vmatmul.mubr.bf16.gmra.mrb[48].mxu0 %v15325_v19 }
  0xfa   : > { %725 = vmatprep.mubr.bf16.mxu0 %v15517_v2 }
 0x101   : > { %v597_v5 = vpop.f32.mrb[0].mxu0  ;;  %726 = vmatmul.mubr.bf16.gmra.mrb[52].mxu0 %v16316_v55 }
 0x102   : > { %v763_v12 = vadd.f32 %v16560_v4, %v597_v5  ;;  %v16564_v23 = vpop.f32.mrb[1].mxu0  ;;  %735 = vmatprep.mubr.bf16.mxu0 %v15517_v2 }
 0x103   : > { %v601_v3 = vpop.f32.mrb[2].mxu0 }
 0x104   : > { %v795_v30 = vmax.f32 %v763_v12, 0.0  ;;  %v764_v20 = vadd.f32 %v16560_v4, %v601_v3  ;;  %v16568_v26 = vpop.f32.mrb[3].mxu0 }
 0x106   : > { %827 = vst [vmem:[#allocation2 + $0x32] sm:$0xff] %v795_v30  ;;  %v796_v27 = vmax.f32 %v764_v20, 0.0 }
 0x108   : > { %828 = vst [vmem:[#allocation2 + $0x3a] sm:$0xff] %v796_v27 }
 0x109   : > { %v607_v35 = vpop.f32.mrb[4].mxu0  ;;  %736 = vmatmul.mubr.bf16.gmra.mrb[56].mxu0 %v16348_v18 }
 0x10a   : > { %v765_v29 = vadd.f32 %v16560_v4, %v607_v35  ;;  %v609_v54 = vpop.f32.mrb[5].mxu0  ;;  %745 = vmatprep.mubr.bf16.mxu0 %v15517_v2 }
 0x10b   : > { %v611_v44 = vpop.f32.mrb[6].mxu0 }
 0x10c   : > { %v797_v45 = vmax.f32 %v765_v29, 0.0  ;;  %v766_v37 = vadd.f32 %v16560_v4, %v611_v44  ;;  %v16573_v49 = vpop.f32.mrb[7].mxu0 }
 0x10d   : > { %v16576_v46 = vld [vmem:[#allocation2 + $0x30] sm:$0xff] }
 0x10e   : > { %829 = vst [vmem:[#allocation2 + $0x4a] sm:$0xff] %v797_v45  ;;  %v798_v40 = vmax.f32 %v766_v37, 0.0  ;;  %v3564_v24 = vrot.slane %v16576_v46, 2  ;;  %v3951_v50 = vrot.slane %v16576_v46, 3  ;;  %v4338_v8 = vrot.slane %v16576_v46, 4 }
 0x10f   : > { %v16578_v32 = vld [vmem:[#allocation2 + $0x38] sm:$0xff]  ;;  %v16589_v55 = vld [vmem:[#allocation2 + $0x40] sm:$0xf]  ;;  %v3178_v0 = vrot.slane %v16576_v46, 1 }
 0x110   : > { %830 = vst [vmem:[#allocation2 + $0x52] sm:$0xff] %v798_v40  ;;  %v2849_v31 = vpack.c.bf16 %v16578_v32, %v16576_v46  ;;  %v3565_v62 = vrot.slane %v16578_v32, 2  ;;  %v3567_v51 = vrot.slane %v16589_v55, 2  ;;  %v3952_v33 = vrot.slane %v16578_v32, 3 }
 0x111   : > { %v617_v1 = vpop.f32.mrb[8].mxu0  ;;  %v3954_v15 = vrot.slane %v16589_v55, 3  ;;  %v4339_v61 = vrot.slane %v16578_v32, 4  ;;  %v3179_v38 = vrot.slane %v16578_v32, 1  ;;  %v3181_v12 = vrot.slane %v16589_v55, 1  ;;  %746 = vmatmul.mubr.bf16.gmra.mrb[60].mxu0 %v16430_v21 }
 0x112   : > { %v767_v63 = vadd.f32 %v16560_v4, %v617_v1  ;;  %v16587_v28 = vpop.f32.mrb[9].mxu0  ;;  %13862 = vmatprep.mubr.bf16.mxu1 %v2849_v31  ;;  %v16608_v57 = vsel %vm1196_vm1, %v3564_v24, %v3565_v62  ;;  %v16611_v56 = vsel %vm1196_vm1, %v3565_v62, %v3567_v51  ;;  %v16614_v36 = vsel %vm3940_vm2, %v3951_v50, %v3952_v33 }
 0x113   : > { %v621_v13 = vpop.f32.mrb[10].mxu0  ;;  %v16617_v9 = vsel %vm3940_vm2, %v3952_v33, %v3954_v15  ;;  %13906 = vmatprep.mubr.bf16.mxu0 %v3280_v58  ;;  %v4341_v46 = vrot.slane %v16589_v55, 4 }
 0x114   : > { %v799_v22 = vmax.f32 %v767_v63, 0.0  ;;  %v768_v34 = vadd.f32 %v16560_v4, %v621_v13  ;;  %v16592_v16 = vpop.f32.mrb[11].mxu0  ;;  %v3180_v63 = vsel %vm1019_vm0, %v3178_v0, %v3179_v38  ;;  %v3182_v13 = vsel %vm1019_vm0, %v3179_v38, %v3181_v12 }
 0x115   : > { %v16603_v17 = vld [vmem:[#allocation2 + $0x48] sm:$0xff]  ;;  %v3282_v51 = vpack.c.bf16 %v3182_v13, %v3180_v63  ;;  %v16687_v58 = vsel %vm4327_vm3, %v4339_v61, %v4341_v46 }
 0x116   : > { %831 = vst [vmem:[#allocation2 + $0x62] sm:$0xff] %v799_v22  ;;  %v800_v14 = vmax.f32 %v768_v34, 0.0  ;;  %v3569_v3 = vrot.slane %v16603_v17, 2  ;;  %v3956_v30 = vrot.slane %v16603_v17, 3  ;;  %21643 = vst [vmem:[#allocation5_spill] sm:$0xff] %v16687_v58  ;;  %v3183_v38 = vrot.slane %v16603_v17, 1 }
 0x117   : > { %v16605_v53 = vld [vmem:[#allocation2 + $0x50] sm:$0xff]  ;;  %v16634_v7 = vld [vmem:[#allocation2 + $0x58] sm:$0xf]  ;;  %v4343_v63 = vrot.slane %v16603_v17, 4  ;;  %v6632_v52 = vld [vmem:[#allocation2 + $0x48] sm:$0xff] }
 0x118   : > { %832 = vst [vmem:[#allocation2 + $0x6a] sm:$0xff] %v800_v14  ;;  %v2850_v18 = vpack.c.bf16 %v16605_v53, %v16603_v17  ;;  %v3570_v45 = vrot.slane %v16605_v53, 2  ;;  %v3572_v37 = vrot.slane %v16634_v7, 2  ;;  %v3957_v40 = vrot.slane %v16605_v53, 3 }
 0x119   : > { %v627_v39 = vpop.f32.mrb[12].mxu0  ;;  %v3184_v33 = vrot.slane %v16605_v53, 1  ;;  %v3959_v55 = vrot.slane %v16634_v7, 3  ;;  %v3186_v14 = vrot.slane %v16634_v7, 1  ;;  %v4344_v13 = vrot.slane %v16605_v53, 4 }
 0x11a   : > { %v13812_v25 = vpop.f32.mrb[0].mxu1  ;;  %v769_v48 = vadd.f32 %v16560_v4, %v627_v39  ;;  %v16632_v10 = vpop.f32.mrb[13].mxu0  ;;  %13863 = vmatmul.mubr.bf16.gmra.mrb[36].mxu1 %v2850_v18  ;;  %v16663_v1 = vsel %vm1196_vm1, %v3569_v3, %v3570_v45  ;;  %v16669_v59 = vsel %vm3940_vm2, %v3956_v30, %v3957_v40 }
 0x11b   : > { %v2640_v41 = vpop.f32.mrb[1].mxu1  ;;  %v16628_v2 = vadd.f32 %v13812_v25, %v609_v54  ;;  %v631_v19 = vpop.f32.mrb[14].mxu0 }
 0x11c   : > { %v16638_v11 = vadd.f32 %v2640_v41, %v16564_v23  ;;  %v13813_v5 = vpop.f32.mrb[2].mxu1  ;;  %v801_v35 = vmax.f32 %v769_v48, 0.0  ;;  %v770_v29 = vadd.f32 %v16560_v4, %v631_v19  ;;  %v16647_v54 = vpop.f32.mrb[15].mxu0  ;;  %v16650_v23 = vsel %vm4327_vm3, %v4338_v8, %v4339_v61 }
 0x11d   : > { %v2643_v20 = vpop.f32.mrb[3].mxu1  ;;  %v16644_v27 = vadd.f32 %v13813_v5, %v16573_v49  ;;  %21642 = vst [vmem:[#allocation4_spill] sm:$0xff] %v16650_v23  ;;  %v3177_v49 = vsel %vm1019_vm0, %v16584_v42, %v3176_v6  ;;  %v8547_v22 = vld [vmem:[#allocation2 + $0x60] sm:$0xff]  ;;  %v16692_v41 = vsel %vm3940_vm2, %v3957_v40, %v3959_v55  ;;  %v3185_v61 = vsel %vm1019_vm0, %v3183_v38, %v3184_v33 }
 0x11e   : > { %v16653_v44 = vadd.f32 %v2643_v20, %v16568_v26  ;;  %833 = vst [vmem:[#allocation2 + $0x7a] sm:$0xff] %v801_v35  ;;  %v802_v31 = vmax.f32 %v770_v29, 0.0  ;;  %v16666_v26 = vsel %vm1196_vm1, %v3570_v45, %v3572_v37  ;;  %v3281_v34 = vpack.c.bf16 %v3177_v49, %v16584_v42 }
 0x11f   : > { %v8548_v32 = vld [vmem:[#allocation2 + $0x68] sm:$0xff]  ;;  %v2813_v62 = vld [vmem:[#allocation2 + $0x70] sm:$0xf]  ;;  %v8919_v48 = vrot.slane %v8547_v22, 1  ;;  %v3187_v19 = vsel %vm1019_vm0, %v3184_v33, %v3186_v14 }
 0x120   : > { %834 = vst [vmem:[#allocation2 + $0x82] sm:$0xff] %v802_v31  ;;  %v2851_v43 = vpack.c.bf16 %v8548_v32, %v8547_v22  ;;  %v16689_v25 = vrot.slane %v8548_v32, 1  ;;  %v3191_v39 = vrot.slane %v2813_v62, 1  ;;  %13907 = vmatmul.mubr.bf16.vlgmr.msra.gmra.mrb[64].mxu0 %v3281_v34  ;;  %v3283_v37 = vpack.c.bf16 %v3187_v19, %v3185_v61  ;;  %v4726_v61 = vld [vmem:[#allocation2 + $0x70] sm:$0xf] }
 0x121   : > { %v637_v21 = vpop.f32.mrb[16].mxu0  ;;  %13910 = vmatprep.mubr.bf16.mxu0 %v3282_v51 }
 0x122   : > { %v771_v24 = vadd.f32 %v16560_v4, %v637_v21  ;;  %v16676_v50 = vpop.f32.mrb[17].mxu0  ;;  %13866 = vmatprep.mubr.bf16.mxu1 %v2851_v43  ;;  %21644 = vst [vmem:[#allocation6_spill] sm:$0xff] %v16689_v25  ;;  %v16703_v20 = vsel %vm1019_vm0, %v8919_v48, %v16689_v25  ;;  %v3192_v35 = vsel %vm1019_vm0, %v16689_v25, %v3191_v39  ;;  %v4346_v43 = vrot.slane %v16634_v7, 4 }
 0x123   : > { %v641_v15 = vpop.f32.mrb[18].mxu0  ;;  %21645 = vst [vmem:[#allocation7_spill] sm:$0xff] %v16703_v20  ;;  %v3284_v0 = vpack.c.bf16 %v3192_v35, %v16703_v20 }
 0x124   : > { %v803_v6 = vmax.f32 %v771_v24, 0.0  ;;  %v772_v42 = vadd.f32 %v16560_v4, %v641_v15  ;;  %v16684_v18 = vpop.f32.mrb[19].mxu0  ;;  %v16719_v24 = vsel %vm4327_vm3, %v4343_v63, %v4344_v13  ;;  %v16724_v55 = vsel %vm4327_vm3, %v4344_v13, %v4346_v43 }
 0x125   : > { %v10462_v29 = vld [vmem:[#allocation2 + $0x78] sm:$0xff]  ;;  %21648 = vst [vmem:[#allocation10_spill] sm:$0xff] %v16719_v24  ;;  %21649 = vst [vmem:[#allocation11_spill] sm:$0xff] %v16724_v55  ;;  %v17083_v55 = vld [vmem:[%s21392_s2] ss:$0 sm:$0xff] }
 0x126   : > { %835 = vst [vmem:[#allocation2 + $0x92] sm:$0xff] %v803_v6  ;;  %v804_v8 = vmax.f32 %v772_v42, 0.0  ;;  %v10834_v32 = vrot.slane %v10462_v29, 1 }
 0x127   : > { %v10463_v12 = vld [vmem:[#allocation2 + $0x80] sm:$0xff]  ;;  %v2816_v3 = vld [vmem:[#allocation2 + $0x88] sm:$0xf] }
 0x128   : > { %836 = vst [vmem:[#allocation2 + $0x9a] sm:$0xff] %v804_v8  ;;  %v16707_v45 = vrot.slane %v10463_v12, 1  ;;  %v2852_v40 = vpack.c.bf16 %v10463_v12, %v10462_v29  ;;  %v3196_v49 = vrot.slane %v2816_v3, 1  ;;  %13911 = vmatmul.mubr.bf16.gmra.mrb[68].mxu0 %v3283_v37 }
 0x129   : > { %13914 = vmatprep.mubr.bf16.mxu0 %v3284_v0 }
 0x12a   : > { %21646 = vst [vmem:[#allocation8_spill] sm:$0xff] %v16707_v45  ;;  %13867 = vmatmul.mubr.bf16.gmra.mrb[40].mxu1 %v2852_v40  ;;  %v16714_v46 = vsel %vm1019_vm0, %v10834_v32, %v16707_v45  ;;  %v3197_v22 = vsel %vm1019_vm0, %v16707_v45, %v3196_v49 }
 0x12b   : > { %21647 = vst [vmem:[#allocation9_spill] sm:$0xff] %v16714_v46  ;;  %v3285_v15 = vpack.c.bf16 %v3197_v22, %v16714_v46 }
 0x12d   : > { %v2817_v31 = vld [vmem:[#allocation2 + $0x90] sm:$0xff] }
 0x12e   : > { %v3198_v17 = vrot.slane %v2817_v31, 1  ;;  %v3584_v7 = vrot.slane %v2817_v31, 2  ;;  %v3971_v12 = vrot.slane %v2817_v31, 3  ;;  %v4358_v63 = vrot.slane %v2817_v31, 4  ;;  %v4730_v47 = vld [vmem:[#allocation2 + $0x90] sm:$0xff] }
 0x12f   : > { %v2818_v21 = vld [vmem:[#allocation2 + $0x98] sm:$0xff]  ;;  %v2819_v34 = vld [vmem:[#allocation2 + $0xa0] sm:$0xf]  ;;  %v5882_v46 = vrot.slane %v4730_v47, 3 }
 0x130   : > { %v2853_v62 = vpack.c.bf16 %v2818_v21, %v2817_v31  ;;  %v3199_v51 = vrot.slane %v2818_v21, 1  ;;  %v3201_v53 = vrot.slane %v2819_v34, 1  ;;  %v3587_v35 = vrot.slane %v2819_v34, 2  ;;  %13915 = vmatmul.mubr.bf16.gmra.mrb[72].mxu0 %v3285_v15  ;;  %v4720_v31 = vld [vmem:[#allocation2 + $0x40] sm:$0xf] }
 0x131   : > { %v3972_v29 = vrot.slane %v2818_v21, 3  ;;  %v3974_v40 = vrot.slane %v2819_v34, 3  ;;  %v4359_v13 = vrot.slane %v2818_v21, 4  ;;  %v4361_v22 = vrot.slane %v2819_v34, 4  ;;  %v4722_v34 = vld [vmem:[#allocation2 + $0x50] sm:$0xff] }
 0x132   : > { %13870 = vmatprep.mubr.bf16.mxu1 %v2853_v62  ;;  %v3200_v42 = vsel %vm1019_vm0, %v3198_v17, %v3199_v51  ;;  %v3202_v39 = vsel %vm1019_vm0, %v3199_v51, %v3201_v53  ;;  %v15117_v51 = vld [vmem:[%s21393_s3 + $0x80] sm:$0xff]   ;;  %v4718_v53 = vld [vmem:[#allocation2 + $0x30] sm:$0xff]  ;;  %v4725_v17 = vld [vmem:[#allocation2 + $0x68] sm:$0xff] }
 0x133   : > { %v13816_v33 = vpop.f32.mrb[4].mxu1  ;;  %v3286_v8 = vpack.c.bf16 %v3202_v39, %v3200_v42  ;;  %v16749_v0 = vsel %vm3940_vm2, %v3971_v12, %v3972_v29  ;;  %v16754_v32 = vsel %vm3940_vm2, %v3972_v29, %v3974_v40  ;;  %v16759_v43 = vsel %vm4327_vm3, %v4358_v63, %v4359_v13  ;;  %13938 = vmatprep.subr.bf16.mxu1 %v15117_v51 }
 0x134   : > { %v2656_v14 = vpop.f32.mrb[5].mxu1  ;;  %v16727_v6 = vadd.f32 %v13816_v33, %v16632_v10  ;;  %v3585_v10 = vrot.slane %v2818_v21, 2  ;;  %21650 = vst [vmem:[#allocation12_spill] sm:$0xff] %v16759_v43  ;;  %v16762_v62 = vsel %vm4327_vm3, %v4359_v13, %v4361_v22  ;;  %13939 = vmatpush3.bf16.msra.mxu1 %v15117_v51  ;;  %v4719_v33 = vld [vmem:[#allocation2 + $0x38] sm:$0xff]  ;;  %v4721_v21 = vld [vmem:[#allocation2 + $0x48] sm:$0xff]  ;;  %v5862_v42 = vrot.slane %v4718_v53, 3 }
 0x135   : > { %v16732_v38 = vadd.f32 %v2656_v14, %v16587_v28  ;;  %v13817_v48 = vpop.f32.mrb[6].mxu1  ;;  %13918 = vmatprep.mubr.bf16.mxu0 %v3286_v8  ;;  %21651 = vst [vmem:[#allocation13_spill] sm:$0xff] %v16762_v62  ;;  %v4723_v14 = vld [vmem:[#allocation2 + $0x58] sm:$0xf]  ;;  %v5863_v39 = vrot.slane %v4719_v33, 3  ;;  %v6248_v13 = vrot.slane %v4718_v53, 4 }
 0x136   : > { %v2659_v19 = vpop.f32.mrb[7].mxu1  ;;  %v16737_v3 = vadd.f32 %v13817_v48, %v16647_v54  ;;  %v16743_v28 = vsel %vm1196_vm1, %v3584_v7, %v3585_v10  ;;  %v16746_v49 = vsel %vm1196_vm1, %v3585_v10, %v3587_v35  ;;  %v5865_v48 = vrot.slane %v4720_v31, 3  ;;  %v4724_v51 = vld [vmem:[#allocation2 + $0x60] sm:$0xff]  ;;  %v4727_v53 = vld [vmem:[#allocation2 + $0x78] sm:$0xff] }
 0x137   : > { %v16740_v37 = vadd.f32 %v2659_v19, %v16592_v16  ;;  %v16777_v19 = vsel %vm3940_vm2, %v5862_v42, %v5863_v39  ;;  %v5867_v10 = vrot.slane %v4721_v21, 3  ;;  %v5868_v35 = vrot.slane %v4722_v34, 3 }
 0x138   : > { %21652 = vst [vmem:[#allocation14_spill] sm:$0xff] %v16777_v19  ;;  %v16780_v40 = vsel %vm3940_vm2, %v5863_v39, %v5865_v48  ;;  %v5870_v63 = vrot.slane %v4723_v14, 3  ;;  %v6249_v42 = vrot.slane %v4719_v33, 4  ;;  %v6251_v39 = vrot.slane %v4720_v31, 4  ;;  %v15119_v33 = vld [vmem:[%s21393_s3 + $0x90] sm:$0xff]  }
 0x139   : > { %21653 = vst [vmem:[#allocation15_spill] sm:$0xff] %v16780_v40  ;;  %v6253_v48 = vrot.slane %v4721_v21, 4  ;;  %v6254_v16 = vrot.slane %v4722_v34, 4  ;;  %v5872_v21 = vrot.slane %v4724_v51, 3 }
 0x13a   : > { %v16791_v30 = vsel %vm3940_vm2, %v5868_v35, %v5870_v63 }
 0x13b   : > { %21655 = vst [vmem:[#allocation17_spill] sm:$0xff] %v16791_v30  ;;  %v16808_v31 = vsel %vm4327_vm3, %v6253_v48, %v6254_v16 }
 0x13c   : > { %21658 = vst [vmem:[#allocation20_spill] sm:$0xff] %v16808_v31 }
 0x14b   : > { %v16769_v15 = vpop.f32.mrb[8].mxu1 }
 0x14c   : > { %v2672_v7 = vpop.f32.mrb[9].mxu1 }
 0x14d   : > { %v16772_v8 = vadd.f32 %v2672_v7, %v16676_v50  ;;  %v16774_v12 = vpop.f32.mrb[10].mxu1  ;;  %v16788_v7 = vsel %vm3940_vm2, %v5867_v10, %v5868_v35  ;;  %v6256_v10 = vrot.slane %v4723_v14, 4  ;;  %v16805_v35 = vsel %vm4327_vm3, %v6249_v42, %v6251_v39 }
 0x14e   : > { %v2675_v29 = vpop.f32.mrb[11].mxu1  ;;  %21654 = vst [vmem:[#allocation16_spill] sm:$0xff] %v16788_v7  ;;  %21657 = vst [vmem:[#allocation19_spill] sm:$0xff] %v16805_v35  ;;  %v5875_v14 = vrot.slane %v4726_v61, 3  ;;  %v6258_v50 = vrot.slane %v4724_v51, 4  ;;  %v6261_v39 = vrot.slane %v4726_v61, 4 }
 0x14f   : > { %v16783_v22 = vadd.f32 %v2675_v29, %v16684_v18  ;;  %v15118_v18 = vld [vmem:[%s21393_s3 + $0x88] sm:$0xff]   ;;  %v16799_v29 = vsel %vm4327_vm3, %v6248_v13, %v6249_v42  ;;  %v16813_v63 = vsel %vm4327_vm3, %v6254_v16, %v6256_v10  ;;  %v5873_v13 = vrot.slane %v4725_v17, 3  ;;  %v4728_v51 = vld [vmem:[#allocation2 + $0x80] sm:$0xff] }
 0x150   : > { %21656 = vst [vmem:[#allocation18_spill] sm:$0xff] %v16799_v29  ;;  %13940 = vmatprep.subr.bf16.mxu1 %v15118_v18  ;;  %21659 = vst [vmem:[#allocation21_spill] sm:$0xff] %v16813_v63  ;;  %v6259_v42 = vrot.slane %v4725_v17, 4  ;;  %v15120_v17 = vld [vmem:[%s21393_s3 + $0x98] sm:$0xff]   ;;  %v5878_v16 = vrot.slane %v4728_v51, 3  ;;  %v6264_v34 = vrot.slane %v4728_v51, 4 }
 0x151   : > { %13941 = vmatpush3.bf16.msra.mxu1 %v15118_v18  ;;  %v16818_v48 = vsel %vm3940_vm2, %v5872_v21, %v5873_v13  ;;  %v16821_v54 = vsel %vm3940_vm2, %v5873_v13, %v5875_v14  ;;  %v4729_v21 = vld [vmem:[#allocation2 + $0x88] sm:$0xf]  ;;  %v5877_v13 = vrot.slane %v4727_v53, 3  ;;  %v6263_v14 = vrot.slane %v4727_v53, 4  ;;  %v4732_v51 = vld [vmem:[#allocation2 + $0xa0] sm:$0xf] }
 0x152   : > { %13942 = vmatprep.subr.bf16.mxu1 %v15119_v33  ;;  %21660 = vst [vmem:[#allocation22_spill] sm:$0xff] %v16818_v48  ;;  %21661 = vst [vmem:[#allocation23_spill] sm:$0xff] %v16821_v54  ;;  %v16826_v10 = vsel %vm4327_vm3, %v6258_v50, %v6259_v42  ;;  %v16829_v18 = vsel %vm4327_vm3, %v6259_v42, %v6261_v39  ;;  %v5880_v50 = vrot.slane %v4729_v21, 3  ;;  %v6266_v5 = vrot.slane %v4729_v21, 4  ;;  %v6633_v21 = vld [vmem:[#allocation2 + $0x50] sm:$0xff]  ;;  %v15122_v53 = vld [vmem:[%s21393_s3 + $0xc0] sm:$0xff]  }
 0x153   : > { %21662 = vst [vmem:[#allocation24_spill] sm:$0xff] %v16826_v10  ;;  %21663 = vst [vmem:[#allocation25_spill] sm:$0xff] %v16829_v18  ;;  %v16837_v42 = vsel %vm3940_vm2, %v5877_v13, %v5878_v16  ;;  %v6634_v13 = vld [vmem:[#allocation2 + $0x58] sm:$0xf]  ;;  %v7777_v60 = vrot.slane %v6633_v21, 3  ;;  %v6271_v18 = vrot.slane %v4732_v51, 4  ;;  %13986 = vmatprep.subr.bf16.mxu0 %v15122_v53 }
 0x154   : > { %21664 = vst [vmem:[#allocation26_spill] sm:$0xff] %v16837_v42  ;;  %v16840_v39 = vsel %vm3940_vm2, %v5878_v16, %v5880_v50  ;;  %v16846_v61 = vsel %vm4327_vm3, %v6264_v34, %v6266_v5  ;;  %v15121_v16 = vld [vmem:[%s21393_s3 + $0xa0] sm:$0xff]   ;;  %v7776_v50 = vrot.slane %v6632_v52, 3  ;;  %v8162_v5 = vrot.slane %v6632_v52, 4  ;;  %13987 = vmatpush3.bf16.msra.mxu0 %v15122_v53  ;;  %v6640_v53 = vld [vmem:[#allocation2 + $0x88] sm:$0xf] }
 0x155   : > { %13943 = vmatpush3.bf16.msra.mxu1 %v15119_v33  ;;  %21665 = vst [vmem:[#allocation27_spill] sm:$0xff] %v16840_v39  ;;  %v16843_v33 = vsel %vm4327_vm3, %v6263_v14, %v6264_v34  ;;  %21667 = vst [vmem:[#allocation29_spill] sm:$0xff] %v16846_v61  ;;  %v4731_v14 = vld [vmem:[#allocation2 + $0x98] sm:$0xff]  ;;  %v8163_v34 = vrot.slane %v6633_v21, 4  ;;  %v7779_v45 = vrot.slane %v6634_v13, 3  ;;  %v5885_v21 = vrot.slane %v4732_v51, 3 }
 0x156   : > { %13944 = vmatprep.subr.bf16.mxu1 %v15120_v17  ;;  %21666 = vst [vmem:[#allocation28_spill] sm:$0xff] %v16843_v33  ;;  %v16859_v20 = vsel %vm3940_vm2, %v7776_v50, %v7777_v60  ;;  %v8165_v33 = vrot.slane %v6634_v13, 4  ;;  %v5883_v52 = vrot.slane %v4731_v14, 3  ;;  %v6269_v10 = vrot.slane %v4731_v14, 4 }
 0x157   : > { %21668 = vst [vmem:[#allocation30_spill] sm:$0xff] %v16859_v20  ;;  %v16862_v25 = vsel %vm4327_vm3, %v8162_v5, %v8163_v34  ;;  %v16869_v39 = vsel %vm3940_vm2, %v7777_v60, %v7779_v45  ;;  %v15126_v5 = vld [vmem:[%s21393_s3 + $0xb0] sm:$0xff]   ;;  %v7789_v20 = vrot.slane %v6640_v53, 3 }
 0x158   : > { %21669 = vst [vmem:[#allocation31_spill] sm:$0xff] %v16862_v25  ;;  %21670 = vst [vmem:[#allocation32_spill] sm:$0xff] %v16869_v39  ;;  %v16877_v13 = vsel %vm3940_vm2, %v5882_v46, %v5883_v52  ;;  %v16886_v14 = vsel %vm4327_vm3, %v6269_v10, %v6271_v18  ;;  %v15125_v18 = vld [vmem:[%s21393_s3 + $0xd0] sm:$0xff]   ;;  %v15128_v46 = vld [vmem:[%s21393_s3 + $0xe0] sm:$0xff]   ;;  %v8175_v39 = vrot.slane %v6640_v53, 4 }
 0x159   : > { %13945 = vmatpush3.bf16.msra.mxu1 %v15120_v17  ;;  %v6268_v17 = vrot.slane %v4730_v47, 4  ;;  %v16872_v47 = vsel %vm4327_vm3, %v8163_v34, %v8165_v33  ;;  %21672 = vst [vmem:[#allocation34_spill] sm:$0xff] %v16877_v13  ;;  %21675 = vst [vmem:[#allocation37_spill] sm:$0xff] %v16886_v14  ;;  %v15127_v34 = vld [vmem:[%s21393_s3 + $0xd8] sm:$0xff]  }
 0x15a   : > { %13946 = vmatprep.subr.bf16.mxu1 %v15121_v16  ;;  %21671 = vst [vmem:[#allocation33_spill] sm:$0xff] %v16872_v47 }
 0x15b   : > { %v16883_v51 = vsel %vm4327_vm3, %v6268_v17, %v6269_v10  ;;  %v15123_v17 = vld [vmem:[%s21393_s3 + $0xa8] sm:$0xff]  }
 0x15c   : > { %21674 = vst [vmem:[#allocation36_spill] sm:$0xff] %v16883_v51  ;;  %v15124_v10 = vld [vmem:[%s21393_s3 + $0xc8] sm:$0xff]  }
 0x15d   : > { %13947 = vmatpush3.bf16.msra.mxu1 %v15121_v16  ;;  %v16880_v16 = vsel %vm3940_vm2, %v5883_v52, %v5885_v21  ;;  %13988 = vmatprep.subr.bf16.mxu0 %v15124_v10  ;;  %v6638_v52 = vld [vmem:[#allocation2 + $0x78] sm:$0xff]  ;;  %v6639_v21 = vld [vmem:[#allocation2 + $0x80] sm:$0xff] }
 0x15e   : > { %21673 = vst [vmem:[#allocation35_spill] sm:$0xff] %v16880_v16  ;;  %13948 = vmatprep.subr.bf16.mxu1 %v15123_v17  ;;  %13989 = vmatpush3.bf16.msra.mxu0 %v15124_v10  ;;  %v7786_v10 = vrot.slane %v6638_v52, 3  ;;  %v7787_v33 = vrot.slane %v6639_v21, 3  ;;  %v8172_v45 = vrot.slane %v6638_v52, 4  ;;  %v8173_v25 = vrot.slane %v6639_v21, 4 }
 0x15f   : > { %13990 = vmatprep.subr.bf16.mxu0 %v15125_v18 }
 0x160   : > { %v16921_v51 = vsel %vm3940_vm2, %v7786_v10, %v7787_v33  ;;  %v16924_v14 = vsel %vm4327_vm3, %v8172_v45, %v8173_v25  ;;  %v16930_v52 = vsel %vm3940_vm2, %v7787_v33, %v7789_v20  ;;  %v15130_v10 = vld [vmem:[%s21393_s3 + $0xe8] sm:$0xff]   ;;  %v15131_v33 = vld [vmem:[%s21393_s3 + $0xf0] sm:$0xff]  }
 0x161   : > { %13949 = vmatpush3.bf16.msra.mxu1 %v15123_v17  ;;  %v15129_v17 = vld [vmem:[%s21393_s3 + $0xb8] sm:$0xff]   ;;  %21676 = vst [vmem:[#allocation38_spill] sm:$0xff] %v16921_v51  ;;  %21677 = vst [vmem:[#allocation39_spill] sm:$0xff] %v16924_v14 }
 0x162   : > { %13950 = vmatprep.subr.bf16.mxu1 %v15126_v5  ;;  %13991 = vmatpush3.bf16.msra.mxu0 %v15125_v18  ;;  %21678 = vst [vmem:[#allocation40_spill] sm:$0xff] %v16930_v52 }
 0x163   : > { %v16864_v61 = vpop.f32.mrb[12].mxu1  ;;  %13992 = vmatprep.subr.bf16.mxu0 %v15127_v34 }
 0x164   : > { %v16866_v42 = vpop.f32.mrb[13].mxu1 }
 0x165   : > { %v16874_v50 = vpop.f32.mrb[14].mxu1  ;;  %13951 = vmatpush3.bf16.msra.mxu1 %v15126_v5 }
 0x166   : > { %v16888_v60 = vpop.f32.mrb[15].mxu1  ;;  %13952 = vmatprep.subr.bf16.mxu1 %v15129_v17  ;;  %13993 = vmatpush3.bf16.msra.mxu0 %v15127_v34  ;;  %v16942_v34 = vsel %vm4327_vm3, %v8173_v25, %v8175_v39  ;;  %v15132_v25 = vld [vmem:[%s21393_s3 + $0xf8] sm:$0xff]   ;;  %v15133_v39 = vld [vmem:[%s21393_s3 + $0x100] sm:$0xff]  }
 0x167   : > { %v647_v47 = vpop.f32.mrb[20].mxu0  ;;  %13994 = vmatprep.subr.bf16.mxu0 %v15128_v46  ;;  %21679 = vst [vmem:[#allocation41_spill] sm:$0xff] %v16942_v34 }
 0x168   : > { %v773_v18 = vadd.f32 %v16560_v4, %v647_v47  ;;  %v649_v5 = vpop.f32.mrb[21].mxu0 }
 0x169   : > { %v16927_v13 = vadd.f32 %v16769_v15, %v649_v5  ;;  %v651_v16 = vpop.f32.mrb[22].mxu0  ;;  %13953 = vmatpush3.bf16.msra.mxu1 %v15129_v17 }
 0x16a   : > { %v805_v53 = vmax.f32 %v773_v18, 0.0  ;;  %v774_v47 = vadd.f32 %v16560_v4, %v651_v16  ;;  %v653_v21 = vpop.f32.mrb[23].mxu0  ;;  %13995 = vmatpush3.bf16.msra.mxu0 %v15128_v46  ;;  %14034 = vmatprep.subr.bf16.mxu1 %v15133_v39 }
 0x16b   : > { %v16939_v15 = vadd.f32 %v16774_v12, %v653_v21  ;;  %13996 = vmatprep.subr.bf16.mxu0 %v15130_v10 }
 0x16c   : > { %837 = vst [vmem:[#allocation2 + $0xaa] sm:$0xff] %v805_v53  ;;  %v806_v20 = vmax.f32 %v774_v47, 0.0 }
 0x16e   : > { %838 = vst [vmem:[#allocation2 + $0xb2] sm:$0xff] %v806_v20  ;;  %13997 = vmatpush3.bf16.msra.mxu0 %v15130_v10 }
 0x16f   : > { %13998 = vmatprep.subr.bf16.mxu0 %v15131_v33 }
 0x172   : > { %13999 = vmatpush3.bf16.msra.mxu0 %v15131_v33 }
 0x173   : > { %v2820_v18 = vld [vmem:[#allocation2 + $0xa8] sm:$0xff]  ;;  %14000 = vmatprep.subr.bf16.mxu0 %v15132_v25 }
 0x174   : > { %v3203_v10 = vrot.slane %v2820_v18, 1  ;;  %v3589_v45 = vrot.slane %v2820_v18, 2  ;;  %v3976_v54 = vrot.slane %v2820_v18, 3  ;;  %v4363_v29 = vrot.slane %v2820_v18, 4  ;;  %v6644_v30 = vld [vmem:[#allocation2 + $0xa8] sm:$0xff] }
 0x175   : > { %v2821_v53 = vld [vmem:[#allocation2 + $0xb0] sm:$0xff]  ;;  %v2822_v47 = vld [vmem:[#allocation2 + $0xb8] sm:$0xf] }
 0x176   : > { %v2854_v21 = vpack.c.bf16 %v2821_v53, %v2820_v18  ;;  %v3204_v20 = vrot.slane %v2821_v53, 1  ;;  %v3206_v16 = vrot.slane %v2822_v47, 1  ;;  %v3590_v14 = vrot.slane %v2821_v53, 2  ;;  %14001 = vmatpush3.bf16.msra.mxu0 %v15132_v25  ;;  %v4735_v18 = vld [vmem:[#allocation2 + $0xb8] sm:$0xf]  ;;  %v6645_v19 = vld [vmem:[#allocation2 + $0xb0] sm:$0xff] }
 0x177   : > { %v3592_v52 = vrot.slane %v2822_v47, 2  ;;  %v3977_v31 = vrot.slane %v2821_v53, 3  ;;  %v3979_v63 = vrot.slane %v2822_v47, 3 }
 0x178   : > { %13871 = vmatmul.mubr.bf16.gmra.mrb[44].mxu1 %v2854_v21  ;;  %v3205_v34 = vsel %vm1019_vm0, %v3203_v10, %v3204_v20  ;;  %v3207_v51 = vsel %vm1019_vm0, %v3204_v20, %v3206_v16  ;;  %v16966_v39 = vsel %vm1196_vm1, %v3589_v45, %v3590_v14  ;;  %v4364_v10 = vrot.slane %v2821_v53, 4 }
 0x179   : > { %v3287_v48 = vpack.c.bf16 %v3207_v51, %v3205_v34  ;;  %21680 = vst [vmem:[#allocation42_spill] sm:$0xff] %v16966_v39  ;;  %v16969_v33 = vsel %vm1196_vm1, %v3590_v14, %v3592_v52  ;;  %v16974_v16 = vsel %vm3940_vm2, %v3976_v54, %v3977_v31  ;;  %v16977_v51 = vsel %vm3940_vm2, %v3977_v31, %v3979_v63  ;;  %v4733_v52 = vld [vmem:[#allocation2 + $0xa8] sm:$0xff]  ;;  %v4734_v34 = vld [vmem:[#allocation2 + $0xb0] sm:$0xff] }
 0x17a   : > { %21681 = vst [vmem:[#allocation43_spill] sm:$0xff] %v16974_v16  ;;  %21682 = vst [vmem:[#allocation44_spill] sm:$0xff] %v16977_v51  ;;  %v4366_v45 = vrot.slane %v2822_v47, 4  ;;  %v16982_v25 = vsel %vm4327_vm3, %v4363_v29, %v4364_v10  ;;  %v5887_v20 = vrot.slane %v4733_v52, 3  ;;  %v5888_v31 = vrot.slane %v4734_v34, 3 }
 0x17b   : > { %v16949_v17 = vpop.f32.mrb[16].mxu1  ;;  %13919 = vmatmul.mubr.bf16.gmra.mrb[76].mxu0 %v3287_v48  ;;  %21683 = vst [vmem:[#allocation45_spill] sm:$0xff] %v16982_v25  ;;  %v5890_v21 = vrot.slane %v4735_v18, 3  ;;  %v6273_v14 = vrot.slane %v4733_v52, 4 }
 0x17c   : > { %v16951_v12 = vpop.f32.mrb[17].mxu1  ;;  %v16985_v48 = vsel %vm4327_vm3, %v4364_v10, %v4366_v45  ;;  %v16994_v7 = vsel %vm3940_vm2, %v5887_v20, %v5888_v31  ;;  %v6274_v10 = vrot.slane %v4734_v34, 4  ;;  %v6276_v45 = vrot.slane %v4735_v18, 4  ;;  %v6646_v18 = vld [vmem:[#allocation2 + $0xb8] sm:$0xf] }
 0x17d   : > { %v16959_v46 = vpop.f32.mrb[18].mxu1  ;;  %21684 = vst [vmem:[#allocation46_spill] sm:$0xff] %v16985_v48  ;;  %21686 = vst [vmem:[#allocation48_spill] sm:$0xff] %v16994_v7 }
 0x17e   : > { %v16961_v5 = vpop.f32.mrb[19].mxu1  ;;  %v17006_v20 = vsel %vm4327_vm3, %v6273_v14, %v6274_v10  ;;  %v17009_v34 = vsel %vm4327_vm3, %v6274_v10, %v6276_v45  ;;  %v8185_v14 = vrot.slane %v6646_v18, 4 }
 0x17f   : > { %21689 = vst [vmem:[#allocation51_spill] sm:$0xff] %v17006_v20  ;;  %21690 = vst [vmem:[#allocation52_spill] sm:$0xff] %v17009_v34 }
 0x183   : > { %v657_v53 = vpop.f32.mrb[24].mxu0 }
 0x184   : > { %v775_v63 = vadd.f32 %v16560_v4, %v657_v53  ;;  %v659_v47 = vpop.f32.mrb[25].mxu0  ;;  %v16998_v53 = vsel %vm3940_vm2, %v5888_v31, %v5890_v21  ;;  %v7796_v21 = vrot.slane %v6644_v30, 3  ;;  %v7797_v31 = vrot.slane %v6645_v19, 3 }
 0x185   : > { %v16991_v35 = vadd.f32 %v16866_v42, %v659_v47  ;;  %v661_v29 = vpop.f32.mrb[26].mxu0  ;;  %21687 = vst [vmem:[#allocation49_spill] sm:$0xff] %v16998_v53  ;;  %v8182_v47 = vrot.slane %v6644_v30, 4 }
 0x186   : > { %v807_v54 = vmax.f32 %v775_v63, 0.0  ;;  %v776_v40 = vadd.f32 %v16560_v4, %v661_v29  ;;  %v663_v25 = vpop.f32.mrb[27].mxu0  ;;  %v7799_v29 = vrot.slane %v6646_v18, 3 }
 0x187   : > { %21685 = vst [vmem:[#allocation47_spill] sm:$0xff] %v16991_v35  ;;  %v17001_v52 = vadd.f32 %v16888_v60, %v663_v25  ;;  %v8183_v60 = vrot.slane %v6645_v19, 4  ;;  %v17014_v25 = vsel %vm3940_vm2, %v7796_v21, %v7797_v31 }
 0x188   : > { %839 = vst [vmem:[#allocation2 + $0xc2] sm:$0xff] %v807_v54  ;;  %v808_v63 = vmax.f32 %v776_v40, 0.0  ;;  %21691 = vst [vmem:[#allocation53_spill] sm:$0xff] %v17014_v25  ;;  %v17020_v10 = vsel %vm3940_vm2, %v7797_v31, %v7799_v29 }
 0x189   : > { %21688 = vst [vmem:[#allocation50_spill] sm:$0xff] %v17001_v52  ;;  %v17017_v42 = vsel %vm4327_vm3, %v8182_v47, %v8183_v60  ;;  %21693 = vst [vmem:[#allocation55_spill] sm:$0xff] %v17020_v10  ;;  %v17023_v40 = vsel %vm4327_vm3, %v8183_v60, %v8185_v14 }
 0x18a   : > { %840 = vst [vmem:[#allocation2 + $0xca] sm:$0xff] %v808_v63  ;;  %21692 = vst [vmem:[#allocation54_spill] sm:$0xff] %v17017_v42 }
 0x18b   : > { %21694 = vst [vmem:[#allocation56_spill] sm:$0xff] %v17023_v40 }
 0x18f   : > { %v2823_v63 = vld [vmem:[#allocation2 + $0xc0] sm:$0xff] }
 0x190   : > { %v3208_v31 = vrot.slane %v2823_v63, 1  ;;  %v3594_v60 = vrot.slane %v2823_v63, 2  ;;  %v3981_v14 = vrot.slane %v2823_v63, 3  ;;  %v4368_v4 = vrot.slane %v2823_v63, 4 }
 0x191   : > { %v2824_v47 = vld [vmem:[#allocation2 + $0xc8] sm:$0xff]  ;;  %v2825_v29 = vld [vmem:[#allocation2 + $0xd0] sm:$0xf] }
 0x192   : > { %v2855_v20 = vpack.c.bf16 %v2824_v47, %v2823_v63  ;;  %v3209_v34 = vrot.slane %v2824_v47, 1  ;;  %v3211_v7 = vrot.slane %v2825_v29, 1  ;;  %v3595_v30 = vrot.slane %v2824_v47, 2 }
 0x193   : > { %v17025_v54 = vpop.f32.mrb[20].mxu1  ;;  %v3597_v25 = vrot.slane %v2825_v29, 2  ;;  %v3982_v10 = vrot.slane %v2824_v47, 3  ;;  %v3984_v19 = vrot.slane %v2825_v29, 3  ;;  %v4369_v42 = vrot.slane %v2824_v47, 4  ;;  %v4736_v47 = vld [vmem:[#allocation2 + $0xc0] sm:$0xff] }
 0x194   : > { %v17031_v45 = vpop.f32.mrb[21].mxu1  ;;  %13874 = vmatprep.mubr.bf16.mxu1 %v2855_v20  ;;  %v3210_v40 = vsel %vm1019_vm0, %v3208_v31, %v3209_v34  ;;  %v3212_v53 = vsel %vm1019_vm0, %v3209_v34, %v3211_v7  ;;  %v17040_v52 = vsel %vm1196_vm1, %v3594_v60, %v3595_v30  ;;  %v4371_v35 = vrot.slane %v2825_v29, 4  ;;  %v4737_v20 = vld [vmem:[#allocation2 + $0xc8] sm:$0xff] }
 0x195   : > { %v17033_v18 = vpop.f32.mrb[22].mxu1  ;;  %21695 = vst [vmem:[#allocation57_spill] sm:$0xff] %v17040_v52  ;;  %v3288_v48 = vpack.c.bf16 %v3212_v53, %v3210_v40  ;;  %v17043_v43 = vsel %vm1196_vm1, %v3595_v30, %v3597_v25  ;;  %v17046_v63 = vsel %vm3940_vm2, %v3981_v14, %v3982_v10  ;;  %v17049_v62 = vsel %vm3940_vm2, %v3982_v10, %v3984_v19  ;;  %v4738_v25 = vld [vmem:[#allocation2 + $0xd0] sm:$0xf]  ;;  %v17063_v40 = vld [vmem:[#allocation2 + $0x98] sm:$0xff]  ;;  %v17068_v30 = vld [vmem:[%s21393_s3 + $0x140] sm:$0xff]  }
 0x196   : > { %v17035_v21 = vpop.f32.mrb[23].mxu1  ;;  %21696 = vst [vmem:[#allocation58_spill] sm:$0xff] %v17043_v43  ;;  %21697 = vst [vmem:[#allocation59_spill] sm:$0xff] %v17046_v63  ;;  %v17056_v34 = vsel %vm4327_vm3, %v4368_v4, %v4369_v42  ;;  %v17059_v53 = vsel %vm4327_vm3, %v4369_v42, %v4371_v35  ;;  %v5892_v19 = vrot.slane %v4736_v47, 3  ;;  %v5893_v29 = vrot.slane %v4737_v20, 3  ;;  %14082 = vmatprep.subr.bf16.mxu0 %v17068_v30 }
 0x197   : > { %21698 = vst [vmem:[#allocation60_spill] sm:$0xff] %v17049_v62  ;;  %21699 = vst [vmem:[#allocation61_spill] sm:$0xff] %v17056_v34  ;;  %13922 = vmatprep.mubr.bf16.mxu0 %v3288_v48  ;;  %v5895_v60 = vrot.slane %v4738_v25, 3  ;;  %v6643_v4 = vld [vmem:[#allocation2 + $0xa0] sm:$0xf]  ;;  %v6641_v48 = vld [vmem:[#allocation2 + $0x90] sm:$0xff] }
 0x198   : > { %21700 = vst [vmem:[#allocation62_spill] sm:$0xff] %v17059_v53  ;;  %21701 = vst [vmem:[#allocation63_spill] sm:$0xff] %v17063_v40  ;;  %v17072_v35 = vsel %vm3940_vm2, %v5892_v19, %v5893_v29  ;;  %v7792_v42 = vrot.slane %v17063_v40, 3  ;;  %v6278_v10 = vrot.slane %v4736_v47, 4  ;;  %v6279_v7 = vrot.slane %v4737_v20, 4 }
 0x199   : > { %21702 = vst [vmem:[#allocation64_spill] sm:$0xff] %v17072_v35  ;;  %v17076_v14 = vsel %vm3940_vm2, %v5893_v29, %v5895_v60  ;;  %v6281_v31 = vrot.slane %v4738_v25, 4  ;;  %v7794_v24 = vrot.slane %v6643_v4, 3  ;;  %v7791_v20 = vrot.slane %v6641_v48, 3 }
 0x19a   : > { %21703 = vst [vmem:[#allocation65_spill] sm:$0xff] %v17076_v14  ;;  %v17087_v58 = vsel %vm4327_vm3, %v6278_v10, %v6279_v7  ;;  %v8177_v60 = vrot.slane %v6641_v48, 4 }
 0x19b   : > { %21704 = vst [vmem:[#allocation66_spill] sm:$0xff] %v17087_v58  ;;  %v17090_v47 = vsel %vm4327_vm3, %v6279_v7, %v6281_v31  ;;  %v17105_v31 = vsel %vm3940_vm2, %v7792_v42, %v7794_v24 }
 0x19c   : > { %v667_v34 = vpop.f32.mrb[28].mxu0  ;;  %21705 = vst [vmem:[#allocation67_spill] sm:$0xff] %v17090_v47  ;;  %21709 = vst [vmem:[#allocation71_spill] sm:$0xff] %v17105_v31 }
 0x19d   : > { %v777_v19 = vadd.f32 %v17083_v55, %v667_v34  ;;  %v669_v23 = vpop.f32.mrb[29].mxu0  ;;  %v17099_v34 = vsel %vm3940_vm2, %v7791_v20, %v7792_v42  ;;  %v21458_v20 = vrot.slane %v17063_v40, 4 }
 0x19e   : > { %v17093_v25 = vadd.f32 %v16864_v61, %v669_v23  ;;  %v671_v29 = vpop.f32.mrb[30].mxu0  ;;  %21707 = vst [vmem:[#allocation69_spill] sm:$0xff] %v17099_v34 }
 0x19f   : > { %v809_v4 = vmax.f32 %v777_v19, 0.0  ;;  %v778_v53 = vadd.f32 %v17083_v55, %v671_v29  ;;  %v673_v35 = vpop.f32.mrb[31].mxu0 }
 0x1a0   : > { %21706 = vst [vmem:[#allocation68_spill] sm:$0xff] %v17093_v25  ;;  %v17102_v10 = vadd.f32 %v16874_v50, %v673_v35 }
 0x1a1   : > { %841 = vst [vmem:[#allocation2 + $0xda] sm:$0xff] %v809_v4  ;;  %v810_v23 = vmax.f32 %v778_v53, 0.0 }
 0x1a2   : > { %21708 = vst [vmem:[#allocation70_spill] sm:$0xff] %v17102_v10 }
 0x1a3   : > { %842 = vst [vmem:[#allocation2 + $0xe2] sm:$0xff] %v810_v23  ;;  %v17121_v23 = vsel %vm4327_vm3, %v8177_v60, %v21458_v20 }
 0x1a4   : > { %21710 = vst [vmem:[#allocation72_spill] sm:$0xff] %v17121_v23 }
 0x1a8   : > { %v2826_v29 = vld [vmem:[#allocation2 + $0xd8] sm:$0xff] }
 0x1a9   : > { %v3213_v50 = vrot.slane %v2826_v29, 1  ;;  %v3599_v53 = vrot.slane %v2826_v29, 2  ;;  %v3986_v4 = vrot.slane %v2826_v29, 3  ;;  %v4373_v25 = vrot.slane %v2826_v29, 4 }
 0x1aa   : > { %v2827_v24 = vld [vmem:[#allocation2 + $0xe0] sm:$0xff]  ;;  %v2828_v42 = vld [vmem:[#allocation2 + $0xe8] sm:$0xf] }
 0x1ab   : > { %v2856_v61 = vpack.c.bf16 %v2827_v24, %v2826_v29  ;;  %v3214_v34 = vrot.slane %v2827_v24, 1  ;;  %v3216_v31 = vrot.slane %v2828_v42, 1  ;;  %v3600_v48 = vrot.slane %v2827_v24, 2 }
 0x1ac   : > { %v3602_v47 = vrot.slane %v2828_v42, 2  ;;  %v3987_v14 = vrot.slane %v2827_v24, 3  ;;  %v3989_v10 = vrot.slane %v2828_v42, 3  ;;  %v4374_v40 = vrot.slane %v2827_v24, 4 }
 0x1ad   : > { %v17109_v7 = vpop.f32.mrb[24].mxu1  ;;  %13875 = vmatmul.mubr.bf16.gmra.mrb[48].mxu1 %v2856_v61  ;;  %v3215_v63 = vsel %vm1019_vm0, %v3213_v50, %v3214_v34  ;;  %v3217_v62 = vsel %vm1019_vm0, %v3214_v34, %v3216_v31  ;;  %v17126_v16 = vsel %vm1196_vm1, %v3599_v53, %v3600_v48  ;;  %v4376_v29 = vrot.slane %v2828_v42, 4  ;;  %v677_v50 = vpop.f32.mrb[32].mxu0  ;;  %v6650_v42 = vld [vmem:[#allocation2 + $0xd8] sm:$0xff] }
 0x1ae   : > { %v17111_v19 = vpop.f32.mrb[25].mxu1  ;;  %21711 = vst [vmem:[#allocation73_spill] sm:$0xff] %v17126_v16  ;;  %v3289_v51 = vpack.c.bf16 %v3217_v62, %v3215_v63  ;;  %v17129_v60 = vsel %vm1196_vm1, %v3600_v48, %v3602_v47  ;;  %v17132_v20 = vsel %vm3940_vm2, %v3986_v4, %v3987_v14  ;;  %v17135_v23 = vsel %vm3940_vm2, %v3987_v14, %v3989_v10  ;;  %v4739_v63 = vld [vmem:[#allocation2 + $0xd8] sm:$0xff]  ;;  %v4740_v47 = vld [vmem:[#allocation2 + $0xe0] sm:$0xff]  ;;  %v4741_v10 = vld [vmem:[#allocation2 + $0xe8] sm:$0xf] }
 0x1af   : > { %v17114_v58 = vpop.f32.mrb[26].mxu1  ;;  %21712 = vst [vmem:[#allocation74_spill] sm:$0xff] %v17129_v60  ;;  %21713 = vst [vmem:[#allocation75_spill] sm:$0xff] %v17132_v20  ;;  %v17142_v31 = vsel %vm4327_vm3, %v4373_v25, %v4374_v40  ;;  %v17145_v62 = vsel %vm4327_vm3, %v4374_v40, %v4376_v29  ;;  %v779_v24 = vadd.f32 %v17083_v55, %v677_v50  ;;  %v679_v53 = vpop.f32.mrb[33].mxu0  ;;  %v5897_v4 = vrot.slane %v4739_v63, 3  ;;  %v6651_v14 = vld [vmem:[#allocation2 + $0xe0] sm:$0xff] }
 0x1b0   : > { %v17116_v35 = vpop.f32.mrb[27].mxu1  ;;  %21714 = vst [vmem:[#allocation76_spill] sm:$0xff] %v17135_v23  ;;  %21715 = vst [vmem:[#allocation77_spill] sm:$0xff] %v17142_v31  ;;  %13923 = vmatmul.mubr.bf16.gmra.mrb[80].mxu0 %v3289_v51  ;;  %v5898_v48 = vrot.slane %v4740_v47, 3  ;;  %v5900_v34 = vrot.slane %v4741_v10, 3  ;;  %v17151_v25 = vadd.f32 %v16951_v12, %v679_v53  ;;  %v681_v51 = vpop.f32.mrb[34].mxu0 }
 0x1b1   : > { %21716 = vst [vmem:[#allocation78_spill] sm:$0xff] %v17145_v62  ;;  %v811_v40 = vmax.f32 %v779_v24, 0.0  ;;  %v780_v29 = vadd.f32 %v17083_v55, %v681_v51  ;;  %v683_v61 = vpop.f32.mrb[35].mxu0  ;;  %v6283_v62 = vrot.slane %v4739_v63, 4  ;;  %v6284_v23 = vrot.slane %v4740_v47, 4 }
 0x1b2   : > { %21717 = vst [vmem:[#allocation79_spill] sm:$0xff] %v17151_v25  ;;  %v17155_v20 = vsel %vm3940_vm2, %v5897_v4, %v5898_v48  ;;  %v17158_v31 = vadd.f32 %v16961_v5, %v683_v61  ;;  %v17161_v50 = vsel %vm3940_vm2, %v5898_v48, %v5900_v34  ;;  %v6286_v53 = vrot.slane %v4741_v10, 4  ;;  %v6652_v25 = vld [vmem:[#allocation2 + $0xe8] sm:$0xf] }
 0x1b3   : > { %21718 = vst [vmem:[#allocation80_spill] sm:$0xff] %v17155_v20  ;;  %21720 = vst [vmem:[#allocation82_spill] sm:$0xff] %v17161_v50  ;;  %v812_v12 = vmax.f32 %v780_v29, 0.0  ;;  %v7806_v51 = vrot.slane %v6650_v42, 3  ;;  %v17166_v4 = vsel %vm4327_vm3, %v6283_v62, %v6284_v23  ;;  %v7807_v16 = vrot.slane %v6651_v14, 3 }
 0x1b4   : > { %21719 = vst [vmem:[#allocation81_spill] sm:$0xff] %v17158_v31  ;;  %843 = vst [vmem:[#allocation2 + $0xf2] sm:$0xff] %v811_v40  ;;  %v8192_v60 = vrot.slane %v6650_v42, 4  ;;  %v8193_v5 = vrot.slane %v6651_v14, 4  ;;  %v17169_v61 = vsel %vm4327_vm3, %v6284_v23, %v6286_v53  ;;  %v687_v34 = vpop.f32.mrb[36].mxu0  ;;  %v7809_v48 = vrot.slane %v6652_v25, 3 }
 0x1b5   : > { %21721 = vst [vmem:[#allocation83_spill] sm:$0xff] %v17166_v4  ;;  %844 = vst [vmem:[#allocation2 + $0xfa] sm:$0xff] %v812_v12  ;;  %v17174_v47 = vsel %vm3940_vm2, %v7806_v51, %v7807_v16  ;;  %v781_v62 = vadd.f32 %v17083_v55, %v687_v34  ;;  %v689_v40 = vpop.f32.mrb[37].mxu0  ;;  %v8195_v42 = vrot.slane %v6652_v25, 4 }
 0x1b6   : > { %21722 = vst [vmem:[#allocation84_spill] sm:$0xff] %v17169_v61  ;;  %21723 = vst [vmem:[#allocation85_spill] sm:$0xff] %v17174_v47  ;;  %v17177_v10 = vsel %vm4327_vm3, %v8192_v60, %v8193_v5  ;;  %v17181_v14 = vadd.f32 %v16949_v17, %v689_v40  ;;  %v691_v23 = vpop.f32.mrb[38].mxu0  ;;  %v17184_v29 = vsel %vm3940_vm2, %v7807_v16, %v7809_v48 }
 0x1b7   : > { %21724 = vst [vmem:[#allocation86_spill] sm:$0xff] %v17177_v10  ;;  %21726 = vst [vmem:[#allocation88_spill] sm:$0xff] %v17184_v29  ;;  %v813_v53 = vmax.f32 %v781_v62, 0.0  ;;  %v782_v51 = vadd.f32 %v17083_v55, %v691_v23  ;;  %v693_v63 = vpop.f32.mrb[39].mxu0  ;;  %v17192_v34 = vsel %vm4327_vm3, %v8193_v5, %v8195_v42 }
 0x1b8   : > { %21725 = vst [vmem:[#allocation87_spill] sm:$0xff] %v17181_v14  ;;  %21727 = vst [vmem:[#allocation89_spill] sm:$0xff] %v17192_v34  ;;  %v17197_v17 = vadd.f32 %v16959_v46, %v693_v63 }
 0x1b9   : > { %845 = vst [vmem:[#allocation2 + $0x10a] sm:$0xff] %v813_v53  ;;  %v814_v62 = vmax.f32 %v782_v51, 0.0 }
 0x1ba   : > { %21728 = vst [vmem:[#allocation90_spill] sm:$0xff] %v17197_v17 }
 0x1bb   : > { %v2829_v40 = vld [vmem:[#allocation2 + $0xf0] sm:$0xff]  ;;  %846 = vst [vmem:[#allocation2 + $0x112] sm:$0xff] %v814_v62 }
 0x1bc   : > { %v3218_v23 = vrot.slane %v2829_v40, 1  ;;  %v3604_v24 = vrot.slane %v2829_v40, 2  ;;  %v17205_v60 = vld [vmem:[#allocation2 + $0xf8] sm:$0xff]  ;;  %v17207_v5 = vld [vmem:[#allocation2 + $0x100] sm:$0xf]  ;;  %v3991_v42 = vrot.slane %v2829_v40, 3 }
 0x1bd   : > { %v4378_v47 = vrot.slane %v2829_v40, 4  ;;  %v2857_v46 = vpack.c.bf16 %v17205_v60, %v2829_v40  ;;  %v3219_v63 = vrot.slane %v17205_v60, 1  ;;  %v3221_v16 = vrot.slane %v17207_v5, 1  ;;  %v697_v51 = vpop.f32.mrb[40].mxu0 }
 0x1be   : > { %v3605_v53 = vrot.slane %v17205_v60, 2  ;;  %v3607_v10 = vrot.slane %v17207_v5, 2  ;;  %v3992_v34 = vrot.slane %v17205_v60, 3  ;;  %v3994_v29 = vrot.slane %v17207_v5, 3  ;;  %v699_v62 = vpop.f32.mrb[41].mxu0 }
 0x1bf   : > { %v4379_v61 = vrot.slane %v17205_v60, 4  ;;  %v783_v20 = vadd.f32 %v17083_v55, %v697_v51  ;;  %13878 = vmatprep.mubr.bf16.mxu1 %v2857_v46  ;;  %v3220_v40 = vsel %vm1019_vm0, %v3218_v23, %v3219_v63  ;;  %v3222_v50 = vsel %vm1019_vm0, %v3219_v63, %v3221_v16  ;;  %v701_v14 = vpop.f32.mrb[42].mxu0 }
 0x1c0   : > { %v17221_v31 = vsel %vm1196_vm1, %v3604_v24, %v3605_v53  ;;  %v17224_v17 = vadd.f32 %v17031_v45, %v699_v62  ;;  %v3290_v52 = vpack.c.bf16 %v3222_v50, %v3220_v40  ;;  %v17227_v43 = vsel %vm1196_vm1, %v3605_v53, %v3607_v10  ;;  %v703_v39 = vpop.f32.mrb[43].mxu0 }
 0x1c1   : > { %21729 = vst [vmem:[#allocation91_spill] sm:$0xff] %v17221_v31  ;;  %21731 = vst [vmem:[#allocation93_spill] sm:$0xff] %v17227_v43  ;;  %v17230_v60 = vsel %vm3940_vm2, %v3991_v42, %v3992_v34  ;;  %v815_v46 = vmax.f32 %v783_v20, 0.0  ;;  %v784_v23 = vadd.f32 %v17083_v55, %v701_v14  ;;  %v17236_v16 = vsel %vm3940_vm2, %v3992_v34, %v3994_v29  ;;  %v17244_v42 = vld [vmem:[#allocation2 + $0x108] sm:$0xff] }
 0x1c2   : > { %21730 = vst [vmem:[#allocation92_spill] sm:$0xff] %v17224_v17  ;;  %21732 = vst [vmem:[#allocation94_spill] sm:$0xff] %v17230_v60  ;;  %v17242_v10 = vadd.f32 %v17035_v21, %v703_v39  ;;  %13926 = vmatprep.mubr.bf16.mxu0 %v3290_v52  ;;  %v17249_v14 = vsel %vm4327_vm3, %v4378_v47, %v4379_v61  ;;  %v3223_v34 = vrot.slane %v17244_v42, 1  ;;  %v3609_v39 = vrot.slane %v17244_v42, 2  ;;  %v17259_v53 = vld [vmem:[#allocation2 + $0x110] sm:$0xff] }
 0x1c3   : > { %21733 = vst [vmem:[#allocation95_spill] sm:$0xff] %v17236_v16  ;;  %21735 = vst [vmem:[#allocation97_spill] sm:$0xff] %v17249_v14  ;;  %v17261_v62 = vld [vmem:[#allocation2 + $0x118] sm:$0xf]  ;;  %v3996_v47 = vrot.slane %v17244_v42, 3  ;;  %v3997_v20 = vrot.slane %v17259_v53, 3 }
 0x1c4   : > { %v17186_v12 = vpop.f32.mrb[28].mxu1  ;;  %21734 = vst [vmem:[#allocation96_spill] sm:$0xff] %v17242_v10  ;;  %847 = vst [vmem:[#allocation2 + $0x122] sm:$0xff] %v815_v46  ;;  %v3224_v46 = vrot.slane %v17259_v53, 1 }
 0x1c5   : > { %v17194_v25 = vpop.f32.mrb[29].mxu1 }
 0x1c6   : > { %v17201_v48 = vpop.f32.mrb[30].mxu1 }
 0x1c7   : > { %v17203_v4 = vpop.f32.mrb[31].mxu1 }
 0x1cc   : > { %v13860_v51 = vpop.f32.mrb[32].mxu1 }
 0x1cd   : > { %v17239_v45 = vadd.f32 %v13860_v51, %v16628_v2  ;;  %v2961_v50 = vpop.f32.mrb[33].mxu1  ;;  %v816_v2 = vmax.f32 %v784_v23, 0.0  ;;  %v2858_v51 = vpack.c.bf16 %v17259_v53, %v17244_v42  ;;  %v707_v23 = vpop.f32.mrb[44].mxu0 }
 0x1ce   : > { %v17252_v63 = vadd.f32 %v2961_v50, %v16638_v11  ;;  %v13861_v29 = vpop.f32.mrb[34].mxu1  ;;  %v4381_v11 = vrot.slane %v17207_v5, 4  ;;  %v3610_v50 = vrot.slane %v17259_v53, 2  ;;  %v3999_v5 = vrot.slane %v17261_v62, 3 }
 0x1cf   : > { %v17257_v52 = vadd.f32 %v13861_v29, %v16644_v27  ;;  %v2964_v21 = vpop.f32.mrb[35].mxu1  ;;  %848 = vst [vmem:[#allocation2 + $0x12a] sm:$0xff] %v816_v2  ;;  %v3226_v27 = vrot.slane %v17261_v62, 1  ;;  %v3612_v29 = vrot.slane %v17261_v62, 2  ;;  %13879 = vmatmul.mubr.bf16.gmra.mrb[52].mxu1 %v2858_v51  ;;  %v3225_v2 = vsel %vm1019_vm0, %v3223_v34, %v3224_v46 }
 0x1d0   : > { %v17266_v40 = vadd.f32 %v2964_v21, %v16653_v44  ;;  %v785_v44 = vadd.f32 %v17083_v55, %v707_v23  ;;  %v709_v21 = vpop.f32.mrb[45].mxu0  ;;  %v17280_v10 = vsel %vm4327_vm3, %v4379_v61, %v4381_v11  ;;  %v17286_v31 = vsel %vm1196_vm1, %v3609_v39, %v3610_v50 }
 0x1d1   : > { %v3227_v24 = vsel %vm1019_vm0, %v3224_v46, %v3226_v27  ;;  %21736 = vst [vmem:[#allocation98_spill] sm:$0xff] %v17280_v10  ;;  %v17283_v17 = vadd.f32 %v17025_v54, %v709_v21  ;;  %v711_v60 = vpop.f32.mrb[46].mxu0  ;;  %21738 = vst [vmem:[#allocation100_spill] sm:$0xff] %v17286_v31  ;;  %v17289_v43 = vsel %vm1196_vm1, %v3610_v50, %v3612_v29 }
 0x1d2   : > { %v3291_v16 = vpack.c.bf16 %v3227_v24, %v3225_v2  ;;  %21739 = vst [vmem:[#allocation101_spill] sm:$0xff] %v17289_v43  ;;  %v817_v23 = vmax.f32 %v785_v44, 0.0  ;;  %v786_v51 = vadd.f32 %v17083_v55, %v711_v60  ;;  %v713_v34 = vpop.f32.mrb[47].mxu0  ;;  %v17295_v61 = vsel %vm3940_vm2, %v3996_v47, %v3997_v20  ;;  %v17300_v24 = vld [vmem:[#allocation2 + $0x120] sm:$0xff] }
 0x1d3   : > { %21737 = vst [vmem:[#allocation99_spill] sm:$0xff] %v17283_v17  ;;  %21740 = vst [vmem:[#allocation102_spill] sm:$0xff] %v17295_v61  ;;  %v17298_v54 = vadd.f32 %v17033_v18, %v713_v34  ;;  %v17303_v39 = vsel %vm3940_vm2, %v3997_v20, %v3999_v5  ;;  %v3228_v27 = vrot.slane %v17300_v24, 1  ;;  %v3614_v50 = vrot.slane %v17300_v24, 2 }
 0x1d4   : > { %13927 = vmatmul.mubr.bf16.gmra.mrb[84].mxu0 %v3291_v16  ;;  %21742 = vst [vmem:[#allocation104_spill] sm:$0xff] %v17303_v39  ;;  %849 = vst [vmem:[#allocation2 + $0x13a] sm:$0xff] %v817_v23  ;;  %v818_v60 = vmax.f32 %v786_v51, 0.0  ;;  %v4001_v29 = vrot.slane %v17300_v24, 3  ;;  %v4383_v20 = vrot.slane %v17244_v42, 4  ;;  %v4384_v5 = vrot.slane %v17259_v53, 4 }
 0x1d5   : > { %21741 = vst [vmem:[#allocation103_spill] sm:$0xff] %v17298_v54  ;;  %v717_v51 = vpop.f32.mrb[48].mxu0 }
 0x1d6   : > { %v17311_v18 = vld [vmem:[#allocation2 + $0x128] sm:$0xff]  ;;  %v17313_v16 = vld [vmem:[#allocation2 + $0x130] sm:$0xf]  ;;  %850 = vst [vmem:[#allocation2 + $0x142] sm:$0xff] %v818_v60  ;;  %v17327_v42 = vsel %vm4327_vm3, %v4383_v20, %v4384_v5  ;;  %v787_v53 = vadd.f32 %v17083_v55, %v717_v51  ;;  %v719_v60 = vpop.f32.mrb[49].mxu0 }
 0x1d7   : > { %v2859_v44 = vpack.c.bf16 %v17311_v18, %v17300_v24  ;;  %v3229_v21 = vrot.slane %v17311_v18, 1  ;;  %v3231_v2 = vrot.slane %v17313_v16, 1  ;;  %v3615_v23 = vrot.slane %v17311_v18, 2  ;;  %21743 = vst [vmem:[#allocation105_spill] sm:$0xff] %v17327_v42  ;;  %v721_v10 = vpop.f32.mrb[50].mxu0 }
 0x1d8   : > { %v3617_v34 = vrot.slane %v17313_v16, 2  ;;  %v4002_v11 = vrot.slane %v17311_v18, 3  ;;  %v4004_v47 = vrot.slane %v17313_v16, 3  ;;  %v17336_v14 = vadd.f32 %v17111_v19, %v719_v60 }
 0x1d9   : > { %13882 = vmatprep.mubr.bf16.mxu1 %v2859_v44  ;;  %v3230_v46 = vsel %vm1019_vm0, %v3228_v27, %v3229_v21  ;;  %v3232_v54 = vsel %vm1019_vm0, %v3229_v21, %v3231_v2  ;;  %v17333_v17 = vsel %vm1196_vm1, %v3614_v50, %v3615_v23  ;;  %v819_v51 = vmax.f32 %v787_v53, 0.0  ;;  %v723_v27 = vpop.f32.mrb[51].mxu0 }
 0x1da   : > { %21744 = vst [vmem:[#allocation106_spill] sm:$0xff] %v17333_v17  ;;  %21745 = vst [vmem:[#allocation107_spill] sm:$0xff] %v17336_v14  ;;  %v3292_v61 = vpack.c.bf16 %v3232_v54, %v3230_v46  ;;  %v17339_v39 = vsel %vm1196_vm1, %v3615_v23, %v3617_v34  ;;  %v17342_v20 = vsel %vm3940_vm2, %v4001_v29, %v4002_v11  ;;  %v17355_v54 = vld [vmem:[#allocation2] sm:$0xff]  ;;  %v4386_v2 = vrot.slane %v17261_v62, 4  ;;  %v727_v21 = vpop.f32.mrb[52].mxu0 }
 0x1db   : > { %21746 = vst [vmem:[#allocation108_spill] sm:$0xff] %v17339_v39  ;;  %21747 = vst [vmem:[#allocation109_spill] sm:$0xff] %v17342_v20  ;;  %v788_v44 = vadd.f32 %v17083_v55, %v721_v10  ;;  %v17348_v50 = vsel %vm3940_vm2, %v4002_v11, %v4004_v47  ;;  %v17351_v19 = vadd.f32 %v17116_v35, %v723_v27  ;;  %v17353_v46 = vld [vmem:[#allocation2 + $0x138] sm:$0xff]  ;;  %v17358_v29 = vrot.slane %v17355_v54, 2 }
 0x1dc   : > { %21748 = vst [vmem:[#allocation110_spill] sm:$0xff] %v17348_v50  ;;  %13930 = vmatprep.mubr.bf16.mxu0 %v3292_v61  ;;  %851 = vst [vmem:[#allocation2 + $0x152] sm:$0xff] %v819_v51  ;;  %v3233_v11 = vrot.slane %v17353_v46, 1  ;;  %v3619_v35 = vrot.slane %v17353_v46, 2  ;;  %v4388_v61 = vrot.slane %v17300_v24, 4  ;;  %v4006_v53 = vrot.slane %v17353_v46, 3 }
 0x1dd   : > { %21749 = vst [vmem:[#allocation111_spill] sm:$0xff] %v17351_v19  ;;  %v820_v23 = vmax.f32 %v788_v44, 0.0  ;;  %v17366_v47 = vld [vmem:[#allocation2 + $0x140] sm:$0xff]  ;;  %v17368_v34 = vld [vmem:[#allocation2 + $0x148] sm:$0xf]  ;;  %v17372_v60 = vsel %vm4327_vm3, %v4384_v5, %v4386_v2  ;;  %v4389_v27 = vrot.slane %v17311_v18, 4 }
 0x1de   : > { %21750 = vst [vmem:[#allocation112_spill] sm:$0xff] %v17372_v60  ;;  %v4391_v62 = vrot.slane %v17313_v16, 4  ;;  %v2860_v51 = vpack.c.bf16 %v17366_v47, %v17353_v46  ;;  %v3234_v44 = vrot.slane %v17366_v47, 1  ;;  %v3236_v24 = vrot.slane %v17368_v34, 1 }
 0x1df   : > { %852 = vst [vmem:[#allocation2 + $0x15a] sm:$0xff] %v820_v23  ;;  %v3620_v10 = vrot.slane %v17366_v47, 2  ;;  %v3622_v19 = vrot.slane %v17368_v34, 2  ;;  %v4007_v5 = vrot.slane %v17366_v47, 3  ;;  %v4009_v2 = vrot.slane %v17368_v34, 3  ;;  %v729_v23 = vpop.f32.mrb[53].mxu0 }
 0x1e0   : > { %v789_v16 = vadd.f32 %v17083_v55, %v727_v21  ;;  %13883 = vmatmul.mubr.bf16.gmra.mrb[56].mxu1 %v2860_v51  ;;  %v3235_v14 = vsel %vm1019_vm0, %v3233_v11, %v3234_v44  ;;  %v3237_v20 = vsel %vm1019_vm0, %v3234_v44, %v3236_v24  ;;  %v17393_v17 = vadd.f32 %v17109_v7, %v729_v23  ;;  %v731_v39 = vpop.f32.mrb[54].mxu0 }
 0x1e1   : > { %v17390_v50 = vsel %vm1196_vm1, %v3619_v35, %v3620_v10  ;;  %v3293_v31 = vpack.c.bf16 %v3237_v20, %v3235_v14  ;;  %v17396_v43 = vsel %vm1196_vm1, %v3620_v10, %v3622_v19  ;;  %v17399_v18 = vsel %vm3940_vm2, %v4006_v53, %v4007_v5  ;;  %v733_v11 = vpop.f32.mrb[55].mxu0  ;;  %v17420_v53 = vld [vmem:[#allocation2 + $0x10] sm:$0xf] }
 0x1e2   : > { %21751 = vst [vmem:[#allocation113_spill] sm:$0xff] %v17390_v50  ;;  %21752 = vst [vmem:[#allocation114_spill] sm:$0xff] %v17393_v17  ;;  %v821_v21 = vmax.f32 %v789_v16, 0.0  ;;  %v790_v51 = vadd.f32 %v17083_v55, %v731_v39  ;;  %v17405_v35 = vsel %vm3940_vm2, %v4007_v5, %v4009_v2  ;;  %v17408_v7 = vadd.f32 %v17114_v58, %v733_v11 }
 0x1e3   : > { %21753 = vst [vmem:[#allocation115_spill] sm:$0xff] %v17399_v18  ;;  %21754 = vst [vmem:[#allocation116_spill] sm:$0xff] %v17405_v35  ;;  %13931 = vmatmul.mubr.bf16.gmra.mrb[88].mxu0 %v3293_v31  ;;  %v17410_v14 = vld [vmem:[#allocation2 + $0x150] sm:$0xff]  ;;  %v17415_v19 = vsel %vm4327_vm3, %v4388_v61, %v4389_v27  ;;  %v17418_v39 = vsel %vm4327_vm3, %v4389_v27, %v4391_v62  ;;  %v3557_v24 = vrot.slane %v17420_v53, 2  ;;  %v17428_v5 = vrot.slane %v17355_v54, 3 }
 0x1e4   : > { %21755 = vst [vmem:[#allocation117_spill] sm:$0xff] %v17408_v7  ;;  %21756 = vst [vmem:[#allocation118_spill] sm:$0xff] %v17415_v19  ;;  %v822_v10 = vmax.f32 %v790_v51, 0.0  ;;  %v4393_v2 = vrot.slane %v17353_v46, 4  ;;  %v4394_v27 = vrot.slane %v17366_v47, 4  ;;  %v3238_v16 = vrot.slane %v17410_v14, 1 }
 0x1e5   : > { %21757 = vst [vmem:[#allocation119_spill] sm:$0xff] %v17418_v39  ;;  %853 = vst [vmem:[#allocation2 + $0x16a] sm:$0xff] %v821_v21  ;;  %v737_v51 = vpop.f32.mrb[56].mxu0  ;;  %v4011_v11 = vrot.slane %v17410_v14, 3  ;;  %v3944_v17 = vrot.slane %v17420_v53, 3  ;;  %v3558_v60 = vsel %vm1196_vm1, %v17358_v29, %v3557_v24 }
 0x1e6   : > { %v17423_v58 = vld [vmem:[#allocation2 + $0x158] sm:$0xff]  ;;  %v17425_v31 = vld [vmem:[#allocation2 + $0x160] sm:$0xf]  ;;  %854 = vst [vmem:[#allocation2 + $0x172] sm:$0xff] %v822_v10  ;;  %v17443_v46 = vsel %vm4327_vm3, %v4393_v2, %v4394_v27  ;;  %v791_v44 = vadd.f32 %v17083_v55, %v737_v51  ;;  %v739_v7 = vpop.f32.mrb[57].mxu0 }
 0x1e7   : > { %v2861_v62 = vpack.c.bf16 %v17423_v58, %v17410_v14  ;;  %v3239_v23 = vrot.slane %v17423_v58, 1  ;;  %v3241_v21 = vrot.slane %v17425_v31, 1  ;;  %v4012_v20 = vrot.slane %v17423_v58, 3  ;;  %v741_v42 = vpop.f32.mrb[58].mxu0 }
 0x1e8   : > { %v4014_v61 = vrot.slane %v17425_v31, 3  ;;  %v17450_v39 = vadd.f32 %v17194_v25, %v739_v7 }
 0x1e9   : > { %13886 = vmatprep.mubr.bf16.mxu1 %v2861_v62  ;;  %v3240_v47 = vsel %vm1019_vm0, %v3238_v16, %v3239_v23  ;;  %v3242_v10 = vsel %vm1019_vm0, %v3239_v23, %v3241_v21  ;;  %v17455_v2 = vsel %vm3940_vm2, %v4011_v11, %v4012_v20  ;;  %v823_v62 = vmax.f32 %v791_v44, 0.0  ;;  %v743_v23 = vpop.f32.mrb[59].mxu0  ;;  %v17458_v21 = vld [vmem:[#allocation2 + $0x28] sm:$0xf] }
 0x1ea   : > { %v3294_v19 = vpack.c.bf16 %v3242_v10, %v3240_v47  ;;  %21758 = vst [vmem:[#allocation120_spill] sm:$0xff] %v17450_v39  ;;  %21759 = vst [vmem:[#allocation121_spill] sm:$0xff] %v17455_v2  ;;  %v792_v16 = vadd.f32 %v17083_v55, %v741_v42  ;;  %v3562_v51 = vrot.slane %v17458_v21, 2  ;;  %v17462_v47 = vsel %vm3940_vm2, %v4012_v20, %v4014_v61 }
 0x1eb   : > { %21760 = vst [vmem:[#allocation122_spill] sm:$0xff] %v17458_v21  ;;  %21761 = vst [vmem:[#allocation123_spill] sm:$0xff] %v17462_v47  ;;  %v17467_v24 = vadd.f32 %v17203_v4, %v743_v23  ;;  %v4396_v10 = vrot.slane %v17368_v34, 4  ;;  %v3666_v20 = vpack.c.bf16 %v3558_v60, %v17358_v29  ;;  %v3949_v23 = vrot.slane %v17458_v21, 3 }
 0x1ec   : > { %13934 = vmatprep.mubr.bf16.mxu0 %v3294_v19  ;;  %v17464_v7 = vld [vmem:[#allocation2 + $0x168] sm:$0xff]  ;;  %855 = vst [vmem:[#allocation2 + $0x182] sm:$0xff] %v823_v62  ;;  %v824_v39 = vmax.f32 %v792_v16, 0.0  ;;  %v3945_v19 = vsel %vm3940_vm2, %v17428_v5, %v3944_v17 }
 0x1ed   : > { %v13864_v25 = vpop.f32.mrb[36].mxu1  ;;  %21762 = vst [vmem:[#allocation124_spill] sm:$0xff] %v17467_v24  ;;  %v17478_v18 = vld [vmem:[#allocation2 + $0x170] sm:$0xff]  ;;  %v17480_v4 = vld [vmem:[#allocation2 + $0x178] sm:$0xf]  ;;  %v17490_v62 = vsel %vm4327_vm3, %v4394_v27, %v4396_v10  ;;  %v3243_v60 = vrot.slane %v17464_v7, 1  ;;  %v4053_v2 = vpack.c.bf16 %v3945_v19, %v17428_v5 }
 0x1ee   : > { %v17472_v42 = vadd.f32 %v13864_v25, %v16727_v6  ;;  %v2977_v11 = vpop.f32.mrb[37].mxu1  ;;  %v2862_v17 = vpack.c.bf16 %v17478_v18, %v17464_v7  ;;  %856 = vst [vmem:[#allocation2 + $0x18a] sm:$0xff] %v824_v39  ;;  %v3244_v16 = vrot.slane %v17478_v18, 1  ;;  %v3246_v44 = vrot.slane %v17480_v4, 1  ;;  %v747_v24 = vpop.f32.mrb[60].mxu0 }
 0x1ef   : > { %v13865_v61 = vpop.f32.mrb[38].mxu1  ;;  %v17484_v6 = vadd.f32 %v2977_v11, %v16732_v38  ;;  %v4016_v38 = vrot.slane %v17464_v7, 3  ;;  %v4019_v11 = vrot.slane %v17480_v4, 3  ;;  %v793_v10 = vadd.f32 %v17083_v55, %v747_v24  ;;  %v749_v21 = vpop.f32.mrb[61].mxu0 }
 0x1f0   : > { %v17487_v25 = vadd.f32 %v13865_v61, %v16737_v3  ;;  %v2980_v34 = vpop.f32.mrb[39].mxu1  ;;  %v4017_v3 = vrot.slane %v17478_v18, 3  ;;  %13887 = vmatmul.mubr.bf16.gmra.mrb[60].mxu1 %v2862_v17  ;;  %v3245_v39 = vsel %vm1019_vm0, %v3243_v60, %v3244_v16  ;;  %v3247_v61 = vsel %vm1019_vm0, %v3244_v16, %v3246_v44  ;;  %v751_v50 = vpop.f32.mrb[62].mxu0 }
 0x1f1   : > { %v17501_v27 = vadd.f32 %v2980_v34, %v16740_v37  ;;  %v3295_v47 = vpack.c.bf16 %v3247_v61, %v3245_v39  ;;  %v17508_v35 = vadd.f32 %v17186_v12, %v749_v21  ;;  %13954 = vmatprep.mubr.bf16.mxu1 %v3666_v20  ;;  %v3563_v37 = vsel %vm1196_vm1, %v17358_v29, %v3562_v51  ;;  %v753_v60 = vpop.f32.mrb[63].mxu0  ;;  %v17562_v21 = vld [vmem:[#allocation2 + $0x60] sm:$0xff] }
 0x1f2   : > { %v17513_v34 = vsel %vm3940_vm2, %v4016_v38, %v4017_v3  ;;  %v825_v24 = vmax.f32 %v793_v10, 0.0  ;;  %v794_v17 = vadd.f32 %v17083_v55, %v751_v50  ;;  %v17517_v44 = vsel %vm3940_vm2, %v4017_v3, %v4019_v11  ;;  %v17544_v10 = vld [vmem:[#allocation2 + $0x70] sm:$0xf] }
 0x1f3   : > { %v4398_v19 = vrot.slane %v17410_v14, 4  ;;  %13935 = vmatmul.mubr.bf16.gmra.mrb[92].mxu0 %v3295_v47  ;;  %v17521_v12 = vadd.f32 %v17201_v48, %v753_v60  ;;  %v4399_v20 = vrot.slane %v17423_v58, 4  ;;  %v3667_v50 = vpack.c.bf16 %v3563_v37, %v17358_v29  ;;  %v15134_v29 = vld [vmem:[%s21393_s3 + $0x108] sm:$0xff]   ;;  %v13908_v37 = vpop.f32.mrb[64].mxu0 }
 0x1f4   : > { %857 = vst [vmem:[#allocation2 + $0x19a] sm:$0xff] %v825_v24  ;;  %v826_v55 = vmax.f32 %v794_v17, 0.0  ;;  %14002 = vmatprep.mubr.bf16.mxu0 %v4053_v2  ;;  %v3950_v16 = vsel %vm3940_vm2, %v17428_v5, %v3949_v23  ;;  %v4401_v47 = vrot.slane %v17425_v31, 4  ;;  %v4403_v38 = vrot.slane %v17464_v7, 4  ;;  %v17541_v2 = vld [vmem:[#allocation2 + $0x68] sm:$0xff]  ;;  %v3395_v51 = vpop.f32.mrb[65].mxu0 }
 0x1f5   : > { %v17533_v48 = vsel %vm4327_vm3, %v4398_v19, %v4399_v20  ;;  %v4404_v3 = vrot.slane %v17478_v18, 4  ;;  %v4406_v11 = vrot.slane %v17480_v4, 4  ;;  %v3575_v23 = vrot.slane %v17541_v2, 2 }
 0x1f6   : > { %858 = vst [vmem:[#allocation2 + $0x1a2] sm:$0xff] %v826_v55  ;;  %v3577_v39 = vrot.slane %v17544_v10, 2  ;;  %v17548_v61 = vsel %vm4327_vm3, %v4399_v20, %v4401_v47  ;;  %v4054_v24 = vpack.c.bf16 %v3950_v16, %v17428_v5  ;;  %v17560_v55 = vadd.f32 %v13908_v37, %v17239_v45  ;;  %v15333_v47 = vld [vmem:[%s21393_s3 + $0x100] sm:$0xff]  }
 0x1f7   : > { %v17554_v60 = vsel %vm4327_vm3, %v4403_v38, %v4404_v3  ;;  %v17557_v19 = vsel %vm4327_vm3, %v4404_v3, %v4406_v11  ;;  %v3574_v20 = vrot.slane %v17562_v21, 2  ;;  %v17568_v16 = vadd.f32 %v3395_v51, %v17252_v63  ;;  %v13909_v38 = vpop.f32.mrb[66].mxu0  ;;  %v15135_v51 = vld [vmem:[%s21393_s3 + $0x110] sm:$0xff]  }
 0x1f8   : > { %13955 = vmatmul.mubr.bf16.vlgmr.msra.gmra.mrb[64].mxu1 %v3667_v50  ;;  %v21763_v45 = vpack.c.bf16 %v16611_v56, %v16608_v57  ;;  %v15140_v50 = vld [vmem:[%s21393_s3 + $0x148] sm:$0xff]   ;;  %v17580_v3 = vadd.f32 %v13909_v38, %v17257_v52  ;;  %v3398_v11 = vpop.f32.mrb[67].mxu0  ;;  %v3578_v57 = vsel %vm1196_vm1, %v3575_v23, %v3577_v39  ;;  %v3962_v56 = vrot.slane %v17541_v2, 3  ;;  %v15136_v39 = vld [vmem:[%s21393_s3 + $0x118] sm:$0xff]  }
 0x1f9   : > { %14035 = vmatpush3.bf16.msra.mxu1 %v15333_v47  ;;  %v3576_v63 = vsel %vm1196_vm1, %v3574_v20, %v3575_v23  ;;  %v17587_v37 = vadd.f32 %v3398_v11, %v17266_v40  ;;  %v3964_v47 = vrot.slane %v17544_v10, 3  ;;  %v21765_v52 = vpack.c.bf16 %v16617_v9, %v16614_v36  ;;  %v17597_v40 = vld [vmem:[#allocation2 + $0x80] sm:$0xff]  ;;  %v15141_v36 = vld [vmem:[%s21393_s3 + $0x150] sm:$0xff]   ;;  %v17611_v11 = vld [vmem:[#allocation2 + $0x88] sm:$0xf] }
 0x1fa   : > { %13958 = vmatprep.mubr.bf16.mxu1 %v21763_v45  ;;  %14036 = vmatprep.subr.bf16.mxu1 %v15134_v29  ;;  %v3961_v20 = vrot.slane %v17562_v21, 3  ;;  %v3670_v23 = vpack.c.bf16 %v3578_v57, %v3576_v63  ;;  %v3582_v63 = vrot.slane %v17611_v11, 2  ;;  %v21767_v17 = vpack.c.bf16 %v16666_v26, %v16663_v1 }
 0x1fb   : > { %21764 = vst [vmem:[#allocation125_spill] sm:$0xff] %v17587_v37  ;;  %14003 = vmatmul.mubr.bf16.vlgmr.msra.gmra.mrb[96].mxu0 %v4054_v24  ;;  %v17600_v24 = vrot.slane %v17597_v40, 2  ;;  %v3965_v45 = vsel %vm3940_vm2, %v3962_v56, %v3964_v47  ;;  %v13912_v57 = vpop.f32.mrb[68].mxu0  ;;  %v17622_v47 = vld [vmem:[#allocation2 + $0x78] sm:$0xff] }
 0x1fc   : > { %14006 = vmatprep.mubr.bf16.mxu0 %v21765_v52  ;;  %14083 = vmatpush3.bf16.msra.mxu0 %v17068_v30  ;;  %v3579_v37 = vrot.slane %v17622_v47, 2 }
 0x1fd   : > { %14037 = vmatpush3.bf16.msra.mxu1 %v15134_v29  ;;  %14084 = vmatprep.subr.bf16.mxu0 %v15140_v50  ;;  %v13868_v38 = vpop.f32.mrb[40].mxu1  ;;  %21766 = vst [vmem:[#allocation126_spill] sm:$0xff] %v17600_v24  ;;  %v3963_v29 = vsel %vm3940_vm2, %v3961_v20, %v3962_v56 }
 0x1fe   : > { %14038 = vmatprep.subr.bf16.mxu1 %v15135_v51  ;;  %v3098_v9 = vadd.f32 %v13868_v38, %v16927_v13  ;;  %v2993_v30 = vpop.f32.mrb[41].mxu1  ;;  %v17619_v13 = vadd.f32 %v13912_v57, %v17472_v42  ;;  %v3411_v38 = vpop.f32.mrb[69].mxu0 }
 0x1ff   : > { %v3096_v52 = vadd.f32 %v2993_v30, %v16772_v8  ;;  %v13869_v5 = vpop.f32.mrb[42].mxu1  ;;  %v15143_v8 = vld [vmem:[%s21393_s3 + $0x158] sm:$0xff]   ;;  %v17629_v1 = vadd.f32 %v3411_v38, %v17484_v6  ;;  %v13913_v26 = vpop.f32.mrb[70].mxu0  ;;  %v21769_v6 = vpack.c.bf16 %v16692_v41, %v16669_v59  ;;  %v3583_v30 = vsel %vm1196_vm1, %v17600_v24, %v3582_v63  ;;  %v15139_v41 = vld [vmem:[%s21393_s3 + $0x128] sm:$0xff]  }
 0x200   : > { %13959 = vmatmul.mubr.bf16.gmra.mrb[68].mxu1 %v21767_v17  ;;  %14085 = vmatpush3.bf16.msra.mxu0 %v15140_v50  ;;  %v3099_v20 = vadd.f32 %v13869_v5, %v16939_v15  ;;  %v2996_v56 = vpop.f32.mrb[43].mxu1  ;;  %v4057_v17 = vpack.c.bf16 %v3965_v45, %v3963_v29  ;;  %v3967_v15 = vrot.slane %v17597_v40, 3  ;;  %v3969_v5 = vrot.slane %v17611_v11, 3  ;;  %v15137_v50 = vld [vmem:[%s21393_s3 + $0x120] sm:$0xff]  }
 0x201   : > { %13962 = vmatprep.mubr.bf16.mxu1 %v3670_v23  ;;  %14039 = vmatpush3.bf16.msra.mxu1 %v15135_v51  ;;  %v3097_v42 = vadd.f32 %v2996_v56, %v16783_v22  ;;  %v17638_v51 = vadd.f32 %v13913_v26, %v17487_v25  ;;  %v3414_v23 = vpop.f32.mrb[71].mxu0  ;;  %v3581_v22 = vsel %vm1196_vm1, %v3579_v37, %v17600_v24  ;;  %v3966_v45 = vrot.slane %v17622_v47, 3  ;;  %v15146_v56 = vld [vmem:[%s21393_s3 + $0x168] sm:$0xff]  }
 0x202   : > { %14040 = vmatprep.subr.bf16.mxu1 %v15136_v39  ;;  %14086 = vmatprep.subr.bf16.mxu0 %v15141_v36  ;;  %v17648_v29 = vadd.f32 %v3414_v23, %v17501_v27  ;;  %v3671_v25 = vpack.c.bf16 %v3583_v30, %v3581_v22  ;;  %v3970_v59 = vsel %vm3940_vm2, %v3967_v15, %v3969_v5  ;;  %v15144_v27 = vld [vmem:[%s21393_s3 + $0x160] sm:$0xff]   ;;  %v17681_v5 = vld [vmem:[#allocation2 + $0x110] sm:$0xff]  ;;  %v21780_v30 = vld [vmem:[#allocation57_spill] sm:$0xff] }
 0x203   : > { %21768 = vst [vmem:[#allocation127_spill] sm:$0xff] %v17638_v51  ;;  %14007 = vmatmul.mubr.bf16.gmra.mrb[100].mxu0 %v21769_v6  ;;  %v3968_v57 = vsel %vm3940_vm2, %v3966_v45, %v3967_v15  ;;  %v13916_v37 = vpop.f32.mrb[72].mxu0  ;;  %v21772_v63 = vpack.c.bf16 %v16746_v49, %v16743_v28  ;;  %v21776_v49 = vpack.c.bf16 %v16754_v32, %v16749_v0  ;;  %v21777_v0 = vld [vmem:[#allocation42_spill] sm:$0xff]  ;;  %v5908_v6 = vrot.slane %v17681_v5, 3 }
 0x204   : > { %21770 = vst [vmem:[#allocation128_spill] sm:$0xff] %v17648_v29  ;;  %14010 = vmatprep.mubr.bf16.mxu0 %v4057_v17  ;;  %14087 = vmatpush3.bf16.msra.mxu0 %v15141_v36  ;;  %v17659_v36 = vadd.f32 %v13916_v37, %v3098_v9  ;;  %v4058_v38 = vpack.c.bf16 %v3970_v59, %v3968_v57  ;;  %v15142_v9 = vld [vmem:[%s21393_s3 + $0x130] sm:$0xff]   ;;  %v21779_v22 = vld [vmem:[#allocation58_spill] sm:$0xff] }
 0x205   : > { %14041 = vmatpush3.bf16.msra.mxu1 %v15136_v39  ;;  %14088 = vmatprep.subr.bf16.mxu0 %v15143_v8  ;;  %v3427_v39 = vpop.f32.mrb[73].mxu0  ;;  %v21778_v32 = vpack.c.bf16 %v16969_v33, %v21777_v0  ;;  %v21781_v45 = vpack.c.bf16 %v21779_v22, %v21780_v30  ;;  %v17705_v57 = vld [vmem:[%s21393_s3 + $0x180] sm:$0xff]   ;;  %v21787_v0 = vld [vmem:[#allocation60_spill] sm:$0xff] }
 0x206   : > { %14042 = vmatprep.subr.bf16.mxu1 %v15137_v50  ;;  %21771 = vst [vmem:[#allocation129_spill] sm:$0xff] %v17659_v36  ;;  %v17667_v26 = vadd.f32 %v3427_v39, %v3096_v52  ;;  %v13917_v17 = vpop.f32.mrb[74].mxu0  ;;  %v17679_v52 = vld [vmem:[#allocation2 + $0x108] sm:$0xff]  ;;  %v17708_v59 = vld [vmem:[#allocation2 + $0x120] sm:$0xff]  ;;  %v21783_v39 = vld [vmem:[#allocation44_spill] sm:$0xff] }
 0x207   : > { %v3430_v15 = vpop.f32.mrb[75].mxu0  ;;  %v5907_v23 = vrot.slane %v17679_v52, 3 }
 0x208   : > { %13963 = vmatmul.mubr.bf16.gmra.mrb[72].mxu1 %v3671_v25  ;;  %14089 = vmatpush3.bf16.msra.mxu0 %v15143_v8  ;;  %21773 = vst [vmem:[#allocation130_spill] sm:$0xff] %v17667_v26  ;;  %v17672_v8 = vadd.f32 %v13917_v17, %v3099_v20  ;;  %v17674_v28 = vadd.f32 %v3430_v15, %v3097_v42  ;;  %v15145_v20 = vld [vmem:[%s21393_s3 + $0x138] sm:$0xff]   ;;  %v15147_v42 = vld [vmem:[%s21393_s3 + $0x170] sm:$0xff]   ;;  %v17720_v17 = vld [vmem:[#allocation2 + $0x140] sm:$0xff]  ;;  %v6293_v15 = vrot.slane %v17679_v52, 4 }
 0x209   : > { %13966 = vmatprep.mubr.bf16.mxu1 %v21772_v63  ;;  %14043 = vmatpush3.bf16.msra.mxu1 %v15137_v50  ;;  %v17689_v50 = vld [vmem:[#allocation2 + $0x118] sm:$0xf]  ;;  %v17713_v37 = vsel %vm3940_vm2, %v5907_v23, %v5908_v6  ;;  %v21784_v63 = vld [vmem:[#allocation43_spill] sm:$0xff]  ;;  %v4756_v26 = vld [vmem:[#allocation2 + $0x160] sm:$0xf]  ;;  %v6304_v36 = vrot.slane %v17720_v17, 4 }
 0x20a   : > { %14044 = vmatprep.subr.bf16.mxu1 %v15139_v41  ;;  %14090 = vmatprep.subr.bf16.mxu0 %v15144_v27  ;;  %21774 = vst [vmem:[#allocation131_spill] sm:$0xff] %v17672_v8  ;;  %21775 = vst [vmem:[#allocation132_spill] sm:$0xff] %v17674_v28  ;;  %v15148_v25 = vld [vmem:[%s21393_s3 + $0x178] sm:$0xff]   ;;  %v5910_v33 = vrot.slane %v17689_v50, 3  ;;  %v4753_v23 = vld [vmem:[#allocation2 + $0x148] sm:$0xf] }
 0x20b   : > { %14011 = vmatmul.mubr.bf16.gmra.mrb[104].mxu0 %v4058_v38  ;;  %21782 = vst [vmem:[#allocation42_spill] sm:$0xff] %v17713_v37  ;;  %v21785_v38 = vpack.c.bf16 %v21783_v39, %v21784_v63  ;;  %v5912_v39 = vrot.slane %v17708_v59, 3  ;;  %v21794_v28 = vld [vmem:[#allocation74_spill] sm:$0xff]  ;;  %v21795_v8 = vld [vmem:[#allocation73_spill] sm:$0xff]  ;;  %v21803_v37 = vld [vmem:[#allocation76_spill] sm:$0xff]  ;;  %v5925_v51 = vrot.slane %v4756_v26, 3 }
 0x20c   : > { %14014 = vmatprep.mubr.bf16.mxu0 %v21776_v49  ;;  %14091 = vmatpush3.bf16.msra.mxu0 %v15144_v27  ;;  %v4750_v27 = vld [vmem:[#allocation2 + $0x130] sm:$0xf]  ;;  %v6294_v49 = vrot.slane %v17681_v5, 4 }
 0x20d   : > { %14045 = vmatpush3.bf16.msra.mxu1 %v15139_v41  ;;  %14092 = vmatprep.subr.bf16.mxu0 %v15146_v56  ;;  %v17710_v41 = vld [vmem:[#allocation2 + $0x128] sm:$0xff]  ;;  %v5915_v63 = vrot.slane %v4750_v27, 3 }
 0x20e   : > { %14046 = vmatprep.subr.bf16.mxu1 %v15142_v9 }
 0x210   : > { %13967 = vmatmul.mubr.bf16.gmra.mrb[76].mxu1 %v21778_v32  ;;  %14093 = vmatpush3.bf16.msra.mxu0 %v15146_v56  ;;  %v17718_v56 = vld [vmem:[#allocation2 + $0x138] sm:$0xff]  ;;  %v21788_v32 = vld [vmem:[#allocation59_spill] sm:$0xff] }
 0x211   : > { %13970 = vmatprep.mubr.bf16.mxu1 %v21781_v45  ;;  %14047 = vmatpush3.bf16.msra.mxu1 %v15142_v9  ;;  %v17723_v9 = vsel %vm3940_vm2, %v5908_v6, %v5910_v33  ;;  %v21789_v22 = vpack.c.bf16 %v21787_v0, %v21788_v32  ;;  %v6296_v45 = vrot.slane %v17689_v50, 4  ;;  %v17736_v6 = vld [vmem:[%s21393_s3 + $0x1c0] sm:$0xff]   ;;  %v17739_v33 = vsel %vm4327_vm3, %v6293_v15, %v6294_v49 }
 0x212   : > { %14048 = vmatprep.subr.bf16.mxu1 %v15145_v20  ;;  %14094 = vmatprep.subr.bf16.mxu0 %v15147_v42  ;;  %21786 = vst [vmem:[#allocation58_spill] sm:$0xff] %v17723_v9  ;;  %21790 = vst [vmem:[#allocation57_spill] sm:$0xff] %v17739_v33  ;;  %v5917_v0 = vrot.slane %v17718_v56, 3  ;;  %v5918_v32 = vrot.slane %v17720_v17, 3  ;;  %v21799_v33 = vld [vmem:[#allocation91_spill] sm:$0xff] }
 0x213   : > { %14015 = vmatmul.mubr.bf16.gmra.mrb[108].mxu0 %v21785_v38  ;;  %v5920_v38 = vrot.slane %v4753_v23, 3  ;;  %v21804_v9 = vld [vmem:[#allocation75_spill] sm:$0xff] }
 0x214   : > { %14018 = vmatprep.mubr.bf16.mxu0 %v21789_v22  ;;  %14095 = vmatpush3.bf16.msra.mxu0 %v15147_v42  ;;  %v5913_v42 = vrot.slane %v17710_v41, 3  ;;  %v17750_v22 = vld [vmem:[#allocation2 + $0x150] sm:$0xff]  ;;  %v17768_v15 = vsel %vm3940_vm2, %v5917_v0, %v5918_v32  ;;  %v6303_v0 = vrot.slane %v17718_v56, 4  ;;  %v21805_v29 = vpack.c.bf16 %v21803_v37, %v21804_v9 }
 0x215   : > { %14049 = vmatpush3.bf16.msra.mxu1 %v15145_v20  ;;  %14096 = vmatprep.subr.bf16.mxu0 %v15148_v25  ;;  %v17746_v20 = vsel %vm4327_vm3, %v6294_v49, %v6296_v45  ;;  %v21796_v49 = vpack.c.bf16 %v21794_v28, %v21795_v8  ;;  %v17763_v45 = vld [vmem:[#allocation2 + $0x158] sm:$0xff]  ;;  %21797 = vst [vmem:[#allocation59_spill] sm:$0xff] %v17768_v15  ;;  %v17776_v8 = vld [vmem:[#allocation2 + $0x168] sm:$0xff]  ;;  %v17778_v28 = vld [vmem:[#allocation2 + $0x170] sm:$0xff]  ;;  %v6311_v9 = vrot.slane %v4756_v26, 4 }
 0x216   : > { %14130 = vmatprep.subr.bf16.mxu1 %v17705_v57  ;;  %21791 = vst [vmem:[#allocation44_spill] sm:$0xff] %v17746_v20  ;;  %v17755_v30 = vsel %vm3940_vm2, %v5912_v39, %v5913_v42  ;;  %v17758_v24 = vsel %vm3940_vm2, %v5913_v42, %v5915_v63  ;;  %v6298_v39 = vrot.slane %v17708_v59, 4  ;;  %v6299_v42 = vrot.slane %v17710_v41, 4  ;;  %v21798_v63 = vld [vmem:[#allocation93_spill] sm:$0xff]  ;;  %v21809_v15 = vld [vmem:[#allocation94_spill] sm:$0xff]  ;;  %v21819_v26 = vld [vmem:[#allocation108_spill] sm:$0xff] }
 0x217   : > { %21792 = vst [vmem:[#allocation43_spill] sm:$0xff] %v17755_v30  ;;  %21793 = vst [vmem:[#allocation60_spill] sm:$0xff] %v17758_v24  ;;  %v21800_v20 = vpack.c.bf16 %v21798_v63, %v21799_v33  ;;  %v4759_v30 = vld [vmem:[#allocation2 + $0x178] sm:$0xf]  ;;  %v5922_v63 = vrot.slane %v17750_v22, 3  ;;  %v21808_v24 = vld [vmem:[#allocation95_spill] sm:$0xff] }
 0x218   : > { %13971 = vmatmul.mubr.bf16.gmra.mrb[80].mxu1 %v21796_v49  ;;  %14097 = vmatpush3.bf16.msra.mxu0 %v15148_v25  ;;  %v17781_v25 = vsel %vm3940_vm2, %v5918_v32, %v5920_v38  ;;  %v6301_v49 = vrot.slane %v4750_v27, 4  ;;  %v17788_v33 = vsel %vm4327_vm3, %v6298_v39, %v6299_v42  ;;  %v17798_v38 = vsel %vm4327_vm3, %v6303_v0, %v6304_v36 }
 0x219   : > { %13974 = vmatprep.mubr.bf16.mxu1 %v21800_v20  ;;  %14178 = vmatprep.subr.bf16.mxu0 %v17736_v6  ;;  %21801 = vst [vmem:[#allocation74_spill] sm:$0xff] %v17781_v25  ;;  %21802 = vst [vmem:[#allocation73_spill] sm:$0xff] %v17788_v33  ;;  %v6306_v20 = vrot.slane %v4753_v23, 4  ;;  %v5923_v32 = vrot.slane %v17763_v45, 3  ;;  %v21810_v39 = vpack.c.bf16 %v21808_v24, %v21809_v15  ;;  %v5928_v37 = vrot.slane %v17778_v28, 3  ;;  %v21816_v23 = vld [vmem:[#allocation100_spill] sm:$0xff] }
 0x21a   : > { %v17795_v27 = vsel %vm4327_vm3, %v6299_v42, %v6301_v49  ;;  %21807 = vst [vmem:[#allocation91_spill] sm:$0xff] %v17798_v38  ;;  %v5930_v24 = vrot.slane %v4759_v30, 3  ;;  %v6308_v0 = vrot.slane %v17750_v22, 4  ;;  %v3627_v15 = vrot.slane %v17425_v31, 2 }
 0x21b   : > { %14019 = vmatmul.mubr.bf16.gmra.mrb[112].mxu0 %v21805_v29  ;;  %21806 = vst [vmem:[#allocation93_spill] sm:$0xff] %v17795_v27  ;;  %v17807_v25 = vsel %vm4327_vm3, %v6304_v36, %v6306_v20  ;;  %v5927_v29 = vrot.slane %v17776_v8, 3  ;;  %v17814_v42 = vsel %vm3940_vm2, %v5922_v63, %v5923_v32  ;;  %v17817_v49 = vsel %vm3940_vm2, %v5923_v32, %v5925_v51  ;;  %v21815_v32 = vld [vmem:[#allocation101_spill] sm:$0xff] }
 0x21c   : > { %14022 = vmatprep.mubr.bf16.mxu0 %v21810_v39  ;;  %21811 = vst [vmem:[#allocation76_spill] sm:$0xff] %v17807_v25  ;;  %21812 = vst [vmem:[#allocation75_spill] sm:$0xff] %v17814_v42  ;;  %v6309_v20 = vrot.slane %v17763_v45, 4  ;;  %v17827_v39 = vsel %vm3940_vm2, %v5928_v37, %v5930_v24  ;;  %v6313_v63 = vrot.slane %v17776_v8, 4  ;;  %v6314_v51 = vrot.slane %v17778_v28, 4  ;;  %v6657_v24 = vld [vmem:[#allocation2 + $0x110] sm:$0xff] }
 0x21d   : > { %21813 = vst [vmem:[#allocation95_spill] sm:$0xff] %v17817_v49  ;;  %v17822_v36 = vsel %vm3940_vm2, %v5927_v29, %v5928_v37  ;;  %v21817_v38 = vpack.c.bf16 %v21815_v32, %v21816_v23  ;;  %v6316_v49 = vrot.slane %v4759_v30, 4  ;;  %v6656_v37 = vld [vmem:[#allocation2 + $0x108] sm:$0xff]  ;;  %v21820_v25 = vld [vmem:[#allocation106_spill] sm:$0xff]  ;;  %v3624_v31 = vrot.slane %v17410_v14, 2  ;;  %v21825_v30 = vld [vmem:[#allocation104_spill] sm:$0xff] }
 0x21e   : > { %21814 = vst [vmem:[#allocation94_spill] sm:$0xff] %v17822_v36  ;;  %v17838_v42 = vsel %vm4327_vm3, %v6308_v0, %v6309_v20  ;;  %v21821_v33 = vpack.c.bf16 %v21819_v26, %v21820_v25  ;;  %v17844_v27 = vsel %vm4327_vm3, %v6309_v20, %v6311_v9  ;;  %v21826_v32 = vld [vmem:[#allocation102_spill] sm:$0xff]  ;;  %v7817_v9 = vrot.slane %v6657_v24, 3  ;;  %v6658_v20 = vld [vmem:[#allocation2 + $0x118] sm:$0xf] }
 0x21f   : > { %21818 = vst [vmem:[#allocation101_spill] sm:$0xff] %v17838_v42  ;;  %21822 = vst [vmem:[#allocation100_spill] sm:$0xff] %v17844_v27  ;;  %v17853_v0 = vsel %vm4327_vm3, %v6314_v51, %v6316_v49  ;;  %v21827_v29 = vpack.c.bf16 %v21825_v30, %v21826_v32  ;;  %v21829_v26 = vld [vmem:[#allocation109_spill] sm:$0xff]  ;;  %v21831_v14 = vrot.slane %v17423_v58, 2  ;;  %v8202_v30 = vrot.slane %v6656_v37, 4 }
 0x220   : > { %13975 = vmatmul.mubr.bf16.gmra.mrb[84].mxu1 %v21817_v38  ;;  %v17847_v38 = vsel %vm4327_vm3, %v6313_v63, %v6314_v51  ;;  %21824 = vst [vmem:[#allocation106_spill] sm:$0xff] %v17853_v0  ;;  %v21828_v63 = vld [vmem:[#allocation110_spill] sm:$0xff]  ;;  %v4328_v32 = vrot.slane %v17355_v54, 4  ;;  %v3632_v58 = vrot.slane %v17480_v4, 2 }
 0x221   : > { %13978 = vmatprep.mubr.bf16.mxu1 %v21821_v33  ;;  %21823 = vst [vmem:[#allocation108_spill] sm:$0xff] %v17847_v38  ;;  %v7816_v33 = vrot.slane %v6656_v37, 3  ;;  %v21830_v36 = vpack.c.bf16 %v21828_v63, %v21829_v26  ;;  %v3626_v23 = vsel %vm1196_vm1, %v3624_v31, %v21831_v14  ;;  %v21832_v49 = vmov %v21831_v14  ;;  %v6663_v37 = vld [vmem:[#allocation2 + $0x140] sm:$0xff] }
 0x222   : > { %v3628_v51 = vsel %vm1196_vm1, %v21832_v49, %v3627_v15  ;;  %v4331_v38 = vrot.slane %v17420_v53, 4  ;;  %v8205_v26 = vrot.slane %v6658_v20, 4  ;;  %v3630_v31 = vrot.slane %v17478_v18, 2  ;;  %v6662_v15 = vld [vmem:[#allocation2 + $0x138] sm:$0xff] }
 0x223   : > { %14023 = vmatmul.mubr.bf16.gmra.mrb[116].mxu0 %v21827_v29  ;;  %v8203_v29 = vrot.slane %v6657_v24, 4  ;;  %v17871_v25 = vsel %vm3940_vm2, %v7816_v33, %v7817_v9  ;;  %v3680_v0 = vpack.c.bf16 %v3628_v51, %v3626_v23  ;;  %v21835_v24 = vld [vmem:[#allocation113_spill] sm:$0xff]  ;;  %v7826_v49 = vrot.slane %v6662_v15, 3  ;;  %v21839_v51 = vld [vmem:[#allocation116_spill] sm:$0xff] }
 0x224   : > { %14026 = vmatprep.mubr.bf16.mxu0 %v21830_v36  ;;  %21833 = vst [vmem:[#allocation104_spill] sm:$0xff] %v17871_v25  ;;  %v7819_v36 = vrot.slane %v6658_v20, 3  ;;  %v21836_v14 = vpack.c.bf16 %v17396_v43, %v21835_v24  ;;  %v3629_v20 = vrot.slane %v17464_v7, 2  ;;  %v4332_v23 = vsel %vm4327_vm3, %v4328_v32, %v4331_v38  ;;  %v21842_v24 = vld [vmem:[#allocation123_spill] sm:$0xff] }
 0x225   : > { %v17875_v63 = vsel %vm4327_vm3, %v8202_v30, %v8203_v29  ;;  %v17886_v53 = vsel %vm4327_vm3, %v8203_v29, %v8205_v26  ;;  %v7827_v43 = vrot.slane %v6663_v37, 3  ;;  %v21840_v30 = vld [vmem:[#allocation115_spill] sm:$0xff]  ;;  %v8213_v7 = vrot.slane %v6663_v37, 4 }
 0x226   : > { %21834 = vst [vmem:[#allocation102_spill] sm:$0xff] %v17875_v63  ;;  %v17883_v33 = vsel %vm3940_vm2, %v7817_v9, %v7819_v36  ;;  %21838 = vst [vmem:[#allocation109_spill] sm:$0xff] %v17886_v53  ;;  %v21841_v9 = vpack.c.bf16 %v21839_v51, %v21840_v30  ;;  %v3631_v29 = vsel %vm1196_vm1, %v3629_v20, %v3630_v31  ;;  %v8212_v36 = vrot.slane %v6662_v15, 4  ;;  %v6664_v26 = vld [vmem:[#allocation2 + $0x148] sm:$0xf]  ;;  %v21846_v63 = vld [vmem:[#allocation122_spill] sm:$0xff] }
 0x227   : > { %21837 = vst [vmem:[#allocation110_spill] sm:$0xff] %v17883_v33  ;;  %v17903_v4 = vsel %vm3940_vm2, %v7826_v49, %v7827_v43  ;;  %v4440_v38 = vpack.c.bf16 %v4332_v23, %v4328_v32  ;;  %v4336_v53 = vrot.slane %v21846_v63, 4  ;;  %v7829_v20 = vrot.slane %v6664_v26, 3  ;;  %v17994_v23 = vld [vmem:[#allocation2 + $0x68] sm:$0xff]  ;;  %v21885_v33 = vld [vmem:[#allocation50_spill] sm:$0xff] }
 0x228   : > { %13979 = vmatmul.mubr.bf16.gmra.mrb[88].mxu1 %v21836_v14  ;;  %v21843_v14 = vld [vmem:[#allocation121_spill] sm:$0xff]  ;;  %21845 = vst [vmem:[#allocation113_spill] sm:$0xff] %v17903_v4  ;;  %v17907_v51 = vsel %vm4327_vm3, %v8212_v36, %v8213_v7  ;;  %v4763_v15 = vpack.c.bf16 %v17355_v54, %v17355_v54  ;;  %v21850_v54 = vpack.c.bf16 %v17517_v44, %v17513_v34  ;;  %v4349_v34 = vrot.slane %v17541_v2, 4 }
 0x229   : > { %13982 = vmatprep.mubr.bf16.mxu1 %v3680_v0  ;;  %v3633_v0 = vsel %vm1196_vm1, %v3630_v31, %v3632_v58  ;;  %v21844_v18 = vpack.c.bf16 %v21842_v24, %v21843_v14  ;;  %21847 = vst [vmem:[#allocation116_spill] sm:$0xff] %v17907_v51  ;;  %v6668_v31 = vld [vmem:[#allocation2 + $0x168] sm:$0xff]  ;;  %v6669_v58 = vld [vmem:[#allocation2 + $0x170] sm:$0xff]  ;;  %v17912_v37 = vsel %vm3940_vm2, %v7827_v43, %v7829_v20  ;;  %v6670_v36 = vld [vmem:[#allocation2 + $0x178] sm:$0xf]  ;;  %v4351_v44 = vrot.slane %v17544_v10, 4 }
 0x22a   : > { %v3681_v30 = vpack.c.bf16 %v3633_v0, %v3631_v29  ;;  %21848 = vst [vmem:[#allocation115_spill] sm:$0xff] %v17912_v37  ;;  %v4337_v63 = vsel %vm4327_vm3, %v4328_v32, %v4336_v53  ;;  %v7836_v29 = vrot.slane %v6668_v31, 3  ;;  %v7837_v0 = vrot.slane %v6669_v58, 3  ;;  %v15156_v10 = vld [vmem:[%s21393_s3 + $0x1c8] sm:$0xff]   ;;  %v18049_v4 = vld [vmem:[#allocation2 + $0x98] sm:$0xff] }
 0x22b   : > { %14027 = vmatmul.mubr.bf16.gmra.mrb[120].mxu0 %v21841_v9  ;;  %v8215_v9 = vrot.slane %v6664_v26, 4  ;;  %v8222_v43 = vrot.slane %v6668_v31, 4  ;;  %v8223_v26 = vrot.slane %v6669_v58, 4  ;;  %v7839_v14 = vrot.slane %v6670_v36, 3  ;;  %v21855_v31 = vld [vmem:[#allocation5_spill] sm:$0xff]  ;;  %v21856_v58 = vld [vmem:[#allocation4_spill] sm:$0xff] }
 0x22c   : > { %14030 = vmatprep.mubr.bf16.mxu0 %v21844_v18  ;;  %v17926_v24 = vsel %vm3940_vm2, %v7836_v29, %v7837_v0  ;;  %v17950_v29 = vld [vmem:[#allocation2 + $0x38] sm:$0xff] }
 0x22d   : > { %v17915_v18 = vsel %vm4327_vm3, %v8213_v7, %v8215_v9  ;;  %v4441_v7 = vpack.c.bf16 %v4337_v63, %v4328_v32  ;;  %21851 = vst [vmem:[#allocation121_spill] sm:$0xff] %v17926_v24  ;;  %v17929_v53 = vsel %vm4327_vm3, %v8222_v43, %v8223_v26  ;;  %v17935_v20 = vsel %vm3940_vm2, %v7837_v0, %v7839_v14  ;;  %v17948_v63 = vld [vmem:[#allocation2 + $0x30] sm:$0xff]  ;;  %v17992_v32 = vld [vmem:[#allocation2 + $0x60] sm:$0xff]  ;;  %v21878_v37 = vld [vmem:[#allocation61_spill] sm:$0xff] }
 0x22e   : > { %21849 = vst [vmem:[#allocation123_spill] sm:$0xff] %v17915_v18  ;;  %21852 = vst [vmem:[#allocation122_spill] sm:$0xff] %v17929_v53  ;;  %v4764_v2 = vpack.c.bf16 %v17950_v29, %v17948_v63  ;;  %v4348_v43 = vrot.slane %v17562_v21, 4  ;;  %v4352_v14 = vsel %vm4327_vm3, %v4349_v34, %v4351_v44  ;;  %v15152_v21 = vld [vmem:[%s21393_s3 + $0x198] sm:$0xff]   ;;  %v21858_v44 = vld [vmem:[#allocation11_spill] sm:$0xff] }
 0x22f   : > { %21853 = vst [vmem:[#allocation133_spill] sm:$0xff] %v17935_v20  ;;  %v18047_v18 = vld [vmem:[#allocation2 + $0x90] sm:$0xff] }
 0x230   : > { %13983 = vmatmul.mubr.bf16.gmra.mrb[92].mxu1 %v3681_v30  ;;  %v8225_v30 = vrot.slane %v6670_v36, 4  ;;  %v17959_v36 = vld [vmem:[#allocation2 + $0x48] sm:$0xff] }
 0x231   : > { %14050 = vmatprep.mubr.bf16.mxu1 %v4440_v38  ;;  %v15150_v38 = vld [vmem:[%s21393_s3 + $0x188] sm:$0xff]  }
 0x232   : > { %v17942_v9 = vsel %vm4327_vm3, %v8223_v26, %v8225_v30  ;;  %v15151_v26 = vld [vmem:[%s21393_s3 + $0x190] sm:$0xff]   ;;  %v17972_v30 = vld [vmem:[#allocation2 + $0x120] sm:$0xff] }
 0x233   : > { %14031 = vmatmul.mubr.bf16.gmra.mrb[124].mxu0 %v21850_v54  ;;  %21854 = vst [vmem:[#allocation134_spill] sm:$0xff] %v17942_v9 }
 0x234   : > { %14098 = vmatprep.mubr.bf16.mxu0 %v4763_v15  ;;  %v21857_v15 = vpack.c.bf16 %v21855_v31, %v21856_v58  ;;  %v17974_v31 = vld [vmem:[#allocation2 + $0x128] sm:$0xff]  ;;  %v17976_v58 = vld [vmem:[#allocation2 + $0x130] sm:$0xf] }
 0x235   : > { %v7822_v0 = vrot.slane %v17974_v31, 3  ;;  %v7824_v49 = vrot.slane %v17976_v58, 3 }
 0x237   : > { %v18021_v53 = vsel %vm3940_vm2, %v7822_v0, %v7824_v49 }
 0x238   : > { %14051 = vmatmul.mubr.bf16.vlgmr.msra.gmra.mrb[96].mxu1 %v4441_v7  ;;  %v4350_v7 = vsel %vm4327_vm3, %v4348_v43, %v4349_v34  ;;  %v7821_v43 = vrot.slane %v17972_v30, 3  ;;  %21862 = vst [vmem:[#allocation4_spill] sm:$0xff] %v18021_v53 }
 0x239   : > { %14131 = vmatpush3.bf16.msra.mxu1 %v17705_v57  ;;  %14054 = vmatprep.mubr.bf16.mxu1 %v21857_v15  ;;  %v17961_v57 = vld [vmem:[#allocation2 + $0x50] sm:$0xff]  ;;  %v4444_v34 = vpack.c.bf16 %v4352_v14, %v4350_v7  ;;  %v18004_v14 = vld [vmem:[#allocation2 + $0x158] sm:$0xff] }
 0x23a   : > { %v4765_v54 = vpack.c.bf16 %v17961_v57, %v17959_v36  ;;  %14132 = vmatprep.subr.bf16.mxu1 %v15150_v38  ;;  %v15157_v15 = vld [vmem:[%s21393_s3 + $0x1d0] sm:$0xff]   ;;  %v7832_v20 = vrot.slane %v18004_v14, 3 }
 0x23b   : > { %14099 = vmatmul.mubr.bf16.vlgmr.msra.gmra.mrb[128].mxu0 %v4764_v2  ;;  %v21859_v2 = vld [vmem:[#allocation10_spill] sm:$0xff]  ;;  %v18002_v7 = vld [vmem:[#allocation2 + $0x150] sm:$0xff] }
 0x23c   : > { %14102 = vmatprep.mubr.bf16.mxu0 %v4765_v54  ;;  %14179 = vmatpush3.bf16.msra.mxu0 %v17736_v6  ;;  %v4354_v6 = vrot.slane %v17597_v40, 4  ;;  %v21860_v54 = vpack.c.bf16 %v21858_v44, %v21859_v2  ;;  %v4766_v40 = vpack.c.bf16 %v17994_v23, %v17992_v32  ;;  %v18006_v44 = vld [vmem:[#allocation2 + $0x78] sm:$0xff]  ;;  %v7831_v24 = vrot.slane %v18002_v7, 3 }
 0x23d   : > { %14133 = vmatpush3.bf16.msra.mxu1 %v15150_v38  ;;  %14180 = vmatprep.subr.bf16.mxu0 %v15156_v10  ;;  %v4356_v38 = vrot.slane %v17611_v11, 4  ;;  %v4353_v11 = vrot.slane %v17622_v47, 4  ;;  %v15153_v47 = vld [vmem:[%s21393_s3 + $0x1a0] sm:$0xff]  }
 0x23e   : > { %14134 = vmatprep.subr.bf16.mxu1 %v15151_v26 }
 0x23f   : > { %v4355_v9 = vsel %vm4327_vm3, %v4353_v11, %v4354_v6  ;;  %v4357_v51 = vsel %vm4327_vm3, %v4354_v6, %v4356_v38  ;;  %v15160_v6 = vld [vmem:[%s21393_s3 + $0x1e0] sm:$0xff]   ;;  %v21866_v11 = vld [vmem:[#allocation12_spill] sm:$0xff] }
 0x240   : > { %14055 = vmatmul.mubr.bf16.gmra.mrb[100].mxu1 %v21860_v54  ;;  %14181 = vmatpush3.bf16.msra.mxu0 %v15156_v10  ;;  %v15159_v10 = vld [vmem:[%s21393_s3 + $0x1d8] sm:$0xff]   ;;  %v18018_v54 = vsel %vm3940_vm2, %v7821_v43, %v7822_v0  ;;  %v4445_v49 = vpack.c.bf16 %v4357_v51, %v4355_v9  ;;  %v15155_v0 = vld [vmem:[%s21393_s3 + $0x1a8] sm:$0xff]   ;;  %v8210_v51 = vrot.slane %v17976_v58, 4 }
 0x241   : > { %14058 = vmatprep.mubr.bf16.mxu1 %v4444_v34  ;;  %14135 = vmatpush3.bf16.msra.mxu1 %v15151_v26  ;;  %v18008_v34 = vld [vmem:[#allocation2 + $0x80] sm:$0xff]  ;;  %21861 = vst [vmem:[#allocation5_spill] sm:$0xff] %v18018_v54  ;;  %v21865_v9 = vld [vmem:[#allocation13_spill] sm:$0xff] }
 0x242   : > { %v4767_v2 = vpack.c.bf16 %v18008_v34, %v18006_v44  ;;  %14136 = vmatprep.subr.bf16.mxu1 %v15152_v21  ;;  %14182 = vmatprep.subr.bf16.mxu0 %v15157_v15  ;;  %v18015_v26 = vld [vmem:[#allocation2 + $0x160] sm:$0xf] }
 0x243   : > { %14103 = vmatmul.mubr.bf16.gmra.mrb[132].mxu0 %v4766_v40  ;;  %v7834_v43 = vrot.slane %v18015_v26, 3 }
 0x244   : > { %14106 = vmatprep.mubr.bf16.mxu0 %v4767_v2  ;;  %14183 = vmatpush3.bf16.msra.mxu0 %v15157_v15  ;;  %v18037_v15 = vsel %vm3940_vm2, %v7831_v24, %v7832_v20  ;;  %v21867_v2 = vpack.c.bf16 %v21865_v9, %v21866_v11  ;;  %v4768_v24 = vpack.c.bf16 %v18049_v4, %v18047_v18  ;;  %v18063_v9 = vld [vmem:[#allocation2 + $0xb0] sm:$0xff] }
 0x245   : > { %14137 = vmatpush3.bf16.msra.mxu1 %v15152_v21  ;;  %14184 = vmatprep.subr.bf16.mxu0 %v15159_v10  ;;  %21863 = vst [vmem:[#allocation11_spill] sm:$0xff] %v18037_v15  ;;  %v18040_v38 = vsel %vm3940_vm2, %v7832_v20, %v7834_v43  ;;  %v15345_v21 = vld [vmem:[#allocation2 + $0xa0] sm:$0xf]  ;;  %v15162_v20 = vld [vmem:[%s21393_s3 + $0x1e8] sm:$0xff]   ;;  %v15163_v15 = vld [vmem:[%s21393_s3 + $0x1f0] sm:$0xff]  }
 0x246   : > { %14138 = vmatprep.subr.bf16.mxu1 %v15153_v47  ;;  %21864 = vst [vmem:[#allocation10_spill] sm:$0xff] %v18040_v38  ;;  %v8180_v40 = vrot.slane %v15345_v21, 4  ;;  %v18061_v21 = vld [vmem:[#allocation2 + $0xa8] sm:$0xff] }
 0x247   : > { %v4769_v11 = vpack.c.bf16 %v18063_v9, %v18061_v21  ;;  %v18092_v38 = vld [vmem:[#allocation2 + $0xc8] sm:$0xff] }
 0x248   : > { %14059 = vmatmul.mubr.bf16.gmra.mrb[104].mxu1 %v4445_v49  ;;  %14185 = vmatpush3.bf16.msra.mxu0 %v15159_v10  ;;  %v21868_v10 = vld [vmem:[#allocation63_spill] sm:$0xff] }
 0x249   : > { %14062 = vmatprep.mubr.bf16.mxu1 %v21867_v2  ;;  %14139 = vmatpush3.bf16.msra.mxu1 %v15153_v47  ;;  %v21869_v43 = vrot.slane %v21868_v10, 4  ;;  %v15158_v47 = vld [vmem:[%s21393_s3 + $0x1b0] sm:$0xff]   ;;  %v8208_v10 = vrot.slane %v17974_v31, 4  ;;  %v8220_v31 = vrot.slane %v18015_v26, 4  ;;  %v15164_v26 = vld [vmem:[%s21393_s3 + $0x1f8] sm:$0xff]  }
 0x24a   : > { %14140 = vmatprep.subr.bf16.mxu1 %v15155_v0  ;;  %14186 = vmatprep.subr.bf16.mxu0 %v15160_v6 }
 0x24b   : > { %v18059_v49 = vsel %vm4327_vm3, %v21869_v43, %v8180_v40  ;;  %14107 = vmatmul.mubr.bf16.gmra.mrb[136].mxu0 %v4768_v24  ;;  %v8207_v40 = vrot.slane %v17972_v30, 4  ;;  %v15161_v43 = vld [vmem:[%s21393_s3 + $0x1b8] sm:$0xff]   ;;  %v8218_v30 = vrot.slane %v18004_v14, 4 }
 0x24c   : > { %21870 = vst [vmem:[#allocation13_spill] sm:$0xff] %v18059_v49  ;;  %14110 = vmatprep.mubr.bf16.mxu0 %v4769_v11  ;;  %14187 = vmatpush3.bf16.msra.mxu0 %v15160_v6  ;;  %v21873_v6 = vld [vmem:[#allocation46_spill] sm:$0xff]  ;;  %v21874_v11 = vld [vmem:[#allocation45_spill] sm:$0xff] }
 0x24d   : > { %14141 = vmatpush3.bf16.msra.mxu1 %v15155_v0  ;;  %14188 = vmatprep.subr.bf16.mxu0 %v15162_v20  ;;  %v18082_v24 = vsel %vm4327_vm3, %v8207_v40, %v8208_v10  ;;  %v8217_v0 = vrot.slane %v18002_v7, 4  ;;  %v21875_v2 = vpack.c.bf16 %v21873_v6, %v21874_v11  ;;  %v18090_v49 = vld [vmem:[#allocation2 + $0xc0] sm:$0xff]  ;;  %v18097_v40 = vsel %vm4327_vm3, %v8208_v10, %v8210_v51  ;;  %v18113_v51 = vld [vmem:[#allocation2 + $0xd8] sm:$0xff] }
 0x24e   : > { %14142 = vmatprep.subr.bf16.mxu1 %v15158_v47  ;;  %21872 = vst [vmem:[#allocation12_spill] sm:$0xff] %v18082_v24  ;;  %v4770_v58 = vpack.c.bf16 %v18092_v38, %v18090_v49  ;;  %21876 = vst [vmem:[#allocation63_spill] sm:$0xff] %v18097_v40  ;;  %v21877_v7 = vld [vmem:[#allocation62_spill] sm:$0xff]  ;;  %v13920_v25 = vpop.f32.mrb[76].mxu0 }
 0x24f   : > { %v21879_v14 = vpack.c.bf16 %v21877_v7, %v21878_v37  ;;  %v18108_v11 = vsel %vm4327_vm3, %v8217_v0, %v8218_v30  ;;  %v18115_v10 = vld [vmem:[#allocation2 + $0xe0] sm:$0xff]  ;;  %v21882_v7 = vld [vmem:[#allocation68_spill] sm:$0xff] }
 0x250   : > { %14063 = vmatmul.mubr.bf16.gmra.mrb[108].mxu1 %v21875_v2  ;;  %14189 = vmatpush3.bf16.msra.mxu0 %v15162_v20  ;;  %v13872_v2 = vpop.f32.mrb[44].mxu1  ;;  %21880 = vst [vmem:[#allocation46_spill] sm:$0xff] %v18108_v11  ;;  %v18111_v20 = vsel %vm4327_vm3, %v8218_v30, %v8220_v31  ;;  %v4771_v37 = vpack.c.bf16 %v18115_v10, %v18113_v51  ;;  %v21883_v31 = vld [vmem:[#allocation47_spill] sm:$0xff]  ;;  %v21884_v40 = vld [vmem:[#allocation70_spill] sm:$0xff] }
 0x251   : > { %14066 = vmatprep.mubr.bf16.mxu1 %v21879_v14  ;;  %14143 = vmatpush3.bf16.msra.mxu1 %v15158_v47  ;;  %21881 = vst [vmem:[#allocation45_spill] sm:$0xff] %v18111_v20  ;;  %v18122_v47 = vld [vmem:[%s21393_s3 + $0x200] sm:$0xff]   ;;  %v3102_v0 = vadd.f32 %v13872_v2, %v21882_v7  ;;  %v3009_v14 = vpop.f32.mrb[45].mxu1  ;;  %v3443_v2 = vpop.f32.mrb[77].mxu0  ;;  %v18137_v7 = vld [vmem:[#allocation2 + $0xf8] sm:$0xff] }
 0x252   : > { %14144 = vmatprep.subr.bf16.mxu1 %v15161_v43  ;;  %14190 = vmatprep.subr.bf16.mxu0 %v15163_v15  ;;  %v3100_v6 = vadd.f32 %v3009_v14, %v21883_v31  ;;  %v13873_v24 = vpop.f32.mrb[46].mxu1  ;;  %v21889_v14 = vld [vmem:[#allocation98_spill] sm:$0xff]  ;;  %v21890_v31 = vld [vmem:[#allocation97_spill] sm:$0xff] }
 0x253   : > { %14111 = vmatmul.mubr.bf16.gmra.mrb[140].mxu0 %v4770_v58  ;;  %v3103_v54 = vadd.f32 %v13873_v24, %v21884_v40  ;;  %v3012_v53 = vpop.f32.mrb[47].mxu1  ;;  %v18130_v27 = vadd.f32 %v13920_v25, %v3102_v0  ;;  %v18135_v58 = vld [vmem:[%s21393_s3 + $0x240] sm:$0xff]   ;;  %v13921_v24 = vpop.f32.mrb[78].mxu0  ;;  %v21891_v30 = vpack.c.bf16 %v21889_v14, %v21890_v31 }
 0x254   : > { %14114 = vmatprep.mubr.bf16.mxu0 %v4771_v37  ;;  %14191 = vmatpush3.bf16.msra.mxu0 %v15163_v15  ;;  %v3101_v42 = vadd.f32 %v3012_v53, %v21885_v33  ;;  %v18140_v15 = vadd.f32 %v3443_v2, %v3100_v6  ;;  %v21886_v37 = vld [vmem:[#allocation78_spill] sm:$0xff]  ;;  %v21887_v33 = vld [vmem:[#allocation77_spill] sm:$0xff]  ;;  %v18147_v53 = vld [vmem:[#allocation2 + $0xf0] sm:$0xff] }
 0x255   : > { %14145 = vmatpush3.bf16.msra.mxu1 %v15161_v43  ;;  %14192 = vmatprep.subr.bf16.mxu0 %v15164_v26  ;;  %v18142_v40 = vadd.f32 %v13921_v24, %v3103_v54  ;;  %v3446_v43 = vpop.f32.mrb[79].mxu0  ;;  %v21888_v25 = vpack.c.bf16 %v21886_v37, %v21887_v33  ;;  %v4772_v6 = vpack.c.bf16 %v18137_v7, %v18147_v53  ;;  %v21892_v2 = vld [vmem:[#allocation112_spill] sm:$0xff]  ;;  %v21893_v24 = vld [vmem:[#allocation105_spill] sm:$0xff] }
 0x256   : > { %14226 = vmatprep.subr.bf16.mxu1 %v18122_v47  ;;  %v18149_v0 = vadd.f32 %v3446_v43, %v3101_v42  ;;  %v4773_v54 = vpack.c.bf16 %v17681_v5, %v17679_v52  ;;  %v21894_v37 = vpack.c.bf16 %v21892_v2, %v21893_v24  ;;  %v21895_v42 = vld [vmem:[#allocation119_spill] sm:$0xff]  ;;  %v4775_v33 = vpack.c.bf16 %v17720_v17, %v17718_v56  ;;  %v18171_v52 = vld [vmem:[#allocation2] sm:$0xff] }
 0x257   : > { %v5085_v14 = vrot.slane %v18171_v52, 1  ;;  %v5471_v56 = vrot.slane %v18171_v52, 2  ;;  %v15355_v24 = vld [vmem:[#allocation2 + $0x40] sm:$0xf] }
 0x258   : > { %14067 = vmatmul.mubr.bf16.gmra.mrb[112].mxu1 %v21888_v25  ;;  %14193 = vmatpush3.bf16.msra.mxu0 %v15164_v26  ;;  %v21896_v26 = vld [vmem:[#allocation118_spill] sm:$0xff]  ;;  %v18169_v25 = vld [vmem:[#allocation2 + $0x28] sm:$0xf] }
 0x259   : > { %14070 = vmatprep.mubr.bf16.mxu1 %v21891_v30  ;;  %14274 = vmatprep.subr.bf16.mxu0 %v18135_v58  ;;  %v21897_v43 = vpack.c.bf16 %v21895_v42, %v21896_v26  ;;  %v4774_v30 = vpack.c.bf16 %v17710_v41, %v17708_v59  ;;  %v5088_v31 = vrot.slane %v18169_v25, 1  ;;  %v21899_v59 = vpack.c.bf16 %v17548_v61, %v17533_v48  ;;  %v15356_v42 = vld [vmem:[#allocation2 + $0x58] sm:$0xf] }
 0x25a   : > { %v4776_v41 = vpack.c.bf16 %v17763_v45, %v17750_v22  ;;  %v5474_v17 = vrot.slane %v18169_v25, 2  ;;  %v5091_v45 = vrot.slane %v17950_v29, 1  ;;  %v5098_v26 = vrot.slane %v15356_v42, 1 }
 0x25b   : > { %14115 = vmatmul.mubr.bf16.gmra.mrb[144].mxu0 %v4772_v6  ;;  %v21898_v6 = vpack.c.bf16 %v17490_v62, %v17443_v46  ;;  %v5089_v2 = vsel %vm1019_vm0, %v5085_v14, %v5088_v31  ;;  %v18188_v46 = vld [vmem:[#allocation2 + $0x180] sm:$0xff]  ;;  %v18190_v62 = vld [vmem:[#allocation2 + $0x188] sm:$0xff]  ;;  %v5482_v31 = vrot.slane %v17961_v57, 2 }
 0x25c   : > { %14118 = vmatprep.mubr.bf16.mxu0 %v4773_v54  ;;  %v4777_v54 = vpack.c.bf16 %v17778_v28, %v17776_v8  ;;  %v5197_v48 = vpack.c.bf16 %v5089_v2, %v5085_v14  ;;  %v5475_v61 = vsel %vm1196_vm1, %v5471_v56, %v5474_v17  ;;  %v4778_v22 = vpack.c.bf16 %v18190_v62, %v18188_v46 }
 0x25d   : > { %v5096_v8 = vrot.slane %v17961_v57, 1  ;;  %v21900_v28 = vpack.c.bf16 %v17557_v19, %v17554_v60  ;;  %v5090_v14 = vrot.slane %v17948_v63, 1 }
 0x25f   : > { %v5092_v60 = vsel %vm1019_vm0, %v5090_v14, %v5091_v45  ;;  %v5099_v17 = vsel %vm1019_vm0, %v5096_v8, %v5098_v26 }
 0x260   : > { %14071 = vmatmul.mubr.bf16.gmra.mrb[116].mxu1 %v21894_v37  ;;  %v5093_v37 = vrot.slane %v15355_v24, 1 }
 0x261   : > { %14074 = vmatprep.mubr.bf16.mxu1 %v21897_v43  ;;  %v5583_v43 = vpack.c.bf16 %v5475_v61, %v5471_v56  ;;  %v5481_v56 = vrot.slane %v17959_v36, 2  ;;  %v15357_v61 = vld [vmem:[#allocation2 + $0x70] sm:$0xf] }
 0x262   : > { %v5094_v19 = vsel %vm1019_vm0, %v5091_v45, %v5093_v37  ;;  %v15358_v37 = vld [vmem:[#allocation2 + $0x88] sm:$0xf] }
 0x263   : > { %14119 = vmatmul.mubr.bf16.gmra.mrb[148].mxu0 %v4774_v30  ;;  %v5477_v30 = vrot.slane %v17950_v29, 2  ;;  %v5483_v2 = vsel %vm1196_vm1, %v5481_v56, %v5482_v31  ;;  %v5198_v45 = vpack.c.bf16 %v5094_v19, %v5092_v60  ;;  %v5492_v19 = vrot.slane %v18008_v34, 2  ;;  %v15167_v56 = vld [vmem:[%s21393_s3 + $0x210] sm:$0xff]  }
 0x264   : > { %14122 = vmatprep.mubr.bf16.mxu0 %v4775_v33  ;;  %v5479_v33 = vrot.slane %v15355_v24, 2  ;;  %v5106_v24 = vrot.slane %v18008_v34, 1 }
 0x266   : > { %v5480_v57 = vsel %vm1196_vm1, %v5477_v30, %v5479_v33 }
 0x268   : > { %14075 = vmatmul.mubr.bf16.gmra.mrb[120].mxu1 %v21898_v6  ;;  %v5484_v6 = vrot.slane %v15356_v42, 2  ;;  %v5100_v42 = vrot.slane %v17992_v32, 1 }
 0x269   : > { %14078 = vmatprep.mubr.bf16.mxu1 %v21899_v59  ;;  %v5095_v59 = vrot.slane %v17959_v36, 1  ;;  %v15166_v36 = vld [vmem:[%s21393_s3 + $0x208] sm:$0xff]  }
 0x26b   : > { %14123 = vmatmul.mubr.bf16.gmra.mrb[152].mxu0 %v4776_v41  ;;  %v5476_v41 = vrot.slane %v17948_v63, 2  ;;  %v5097_v29 = vsel %vm1019_vm0, %v5095_v59, %v5096_v8  ;;  %v5485_v63 = vsel %vm1196_vm1, %v5482_v31, %v5484_v6  ;;  %v5108_v8 = vrot.slane %v15358_v37, 1  ;;  %v15172_v59 = vld [vmem:[%s21393_s3 + $0x248] sm:$0xff]  }
 0x26c   : > { %14126 = vmatprep.mubr.bf16.mxu0 %v4777_v54  ;;  %v5487_v31 = vrot.slane %v17994_v23, 2  ;;  %v5489_v6 = vrot.slane %v15357_v61, 2 }
 0x26d   : > { %v5478_v54 = vsel %vm1196_vm1, %v5476_v41, %v5477_v30  ;;  %v5105_v30 = vrot.slane %v18006_v44, 1  ;;  %v5109_v60 = vsel %vm1019_vm0, %v5106_v24, %v5108_v8  ;;  %v5110_v8 = vrot.slane %v18047_v18, 1 }
 0x26e   : > { %v5584_v26 = vpack.c.bf16 %v5480_v57, %v5478_v54  ;;  %v5490_v34 = vsel %vm1196_vm1, %v5487_v31, %v5489_v6  ;;  %v15169_v6 = vld [vmem:[%s21393_s3 + $0x220] sm:$0xff]  }
 0x26f   : > { %v5107_v41 = vsel %vm1019_vm0, %v5105_v30, %v5106_v24  ;;  %v5497_v24 = vrot.slane %v18049_v4, 2  ;;  %v5496_v30 = vrot.slane %v18047_v18, 2 }
 0x270   : > { %14079 = vmatmul.mubr.bf16.gmra.mrb[124].mxu1 %v21900_v28  ;;  %v5199_v28 = vpack.c.bf16 %v5099_v17, %v5097_v29  ;;  %v5491_v17 = vrot.slane %v18006_v44, 2  ;;  %v5201_v54 = vpack.c.bf16 %v5109_v60, %v5107_v41  ;;  %v15168_v44 = vld [vmem:[%s21393_s3 + $0x218] sm:$0xff]  }
 0x271   : > { %14146 = vmatprep.mubr.bf16.mxu1 %v5197_v48  ;;  %v5101_v48 = vrot.slane %v17994_v23, 1  ;;  %v5486_v23 = vrot.slane %v17992_v32, 2  ;;  %v5111_v32 = vrot.slane %v18049_v4, 1  ;;  %v5498_v41 = vsel %vm1196_vm1, %v5496_v30, %v5497_v24 }
 0x272   : > { %v5126_v30 = vrot.slane %v18115_v10, 1 }
 0x273   : > { %14127 = vmatmul.mubr.bf16.gmra.mrb[156].mxu0 %v4778_v22  ;;  %v5103_v22 = vrot.slane %v15357_v61, 1  ;;  %v5102_v33 = vsel %vm1019_vm0, %v5100_v42, %v5101_v48  ;;  %v5488_v57 = vsel %vm1196_vm1, %v5486_v23, %v5487_v31 }
 0x274   : > { %14194 = vmatprep.mubr.bf16.mxu0 %v5583_v43  ;;  %v5585_v43 = vpack.c.bf16 %v5485_v63, %v5483_v2  ;;  %v5493_v2 = vsel %vm1196_vm1, %v5491_v17, %v5492_v19  ;;  %v5121_v17 = vrot.slane %v18092_v38, 1 }
 0x275   : > { %v5104_v14 = vsel %vm1019_vm0, %v5101_v48, %v5103_v22  ;;  %v15359_v48 = vld [vmem:[#allocation2 + $0xa0] sm:$0xf]  ;;  %v5116_v22 = vrot.slane %v18063_v9, 1 }
 0x276   : > { %v5200_v29 = vpack.c.bf16 %v5104_v14, %v5102_v33  ;;  %v5113_v61 = vrot.slane %v15359_v48, 1  ;;  %v15175_v33 = vld [vmem:[%s21393_s3 + $0x258] sm:$0xff]   ;;  %v5112_v14 = vsel %vm1019_vm0, %v5110_v8, %v5111_v32  ;;  %v5120_v8 = vrot.slane %v18090_v49, 1 }
 0x278   : > { %14147 = vmatmul.mubr.bf16.vlgmr.msra.gmra.mrb[128].mxu1 %v5198_v45  ;;  %v15360_v45 = vld [vmem:[#allocation2 + $0xb8] sm:$0xf]  ;;  %v5114_v31 = vsel %vm1019_vm0, %v5111_v32, %v5113_v61 }
 0x279   : > { %14227 = vmatpush3.bf16.msra.mxu1 %v18122_v47  ;;  %14150 = vmatprep.mubr.bf16.mxu1 %v5199_v28  ;;  %v5494_v47 = vrot.slane %v15358_v37, 2  ;;  %v5499_v37 = vrot.slane %v15359_v48, 2  ;;  %v5502_v28 = vrot.slane %v18063_v9, 2  ;;  %v5504_v42 = vrot.slane %v15360_v45, 2 }
 0x27a   : > { %14228 = vmatprep.subr.bf16.mxu1 %v15166_v36  ;;  %v5501_v9 = vrot.slane %v18061_v21, 2  ;;  %v5202_v32 = vpack.c.bf16 %v5114_v31, %v5112_v14  ;;  %v5507_v31 = vrot.slane %v18092_v38, 2  ;;  %v5125_v38 = vrot.slane %v18113_v51, 1 }
 0x27b   : > { %14195 = vmatmul.mubr.bf16.vlgmr.msra.gmra.mrb[160].mxu0 %v5584_v26  ;;  %v5495_v63 = vsel %vm1196_vm1, %v5492_v19, %v5494_v47  ;;  %v5586_v26 = vpack.c.bf16 %v5490_v34, %v5488_v57  ;;  %v5500_v60 = vsel %vm1196_vm1, %v5497_v24, %v5499_v37  ;;  %v21902_v34 = vld [vmem:[#allocation79_spill] sm:$0xff] }
 0x27c   : > { %14198 = vmatprep.mubr.bf16.mxu0 %v5585_v43  ;;  %14275 = vmatpush3.bf16.msra.mxu0 %v18135_v58  ;;  %v15173_v58 = vld [vmem:[%s21393_s3 + $0x250] sm:$0xff]   ;;  %v5115_v43 = vrot.slane %v18061_v21, 1  ;;  %v5587_v4 = vpack.c.bf16 %v5495_v63, %v5493_v2  ;;  %v5503_v47 = vsel %vm1196_vm1, %v5501_v9, %v5502_v28  ;;  %v5505_v21 = vsel %vm1196_vm1, %v5502_v28, %v5504_v42  ;;  %v21904_v28 = vld [vmem:[#allocation81_spill] sm:$0xff] }
 0x27d   : > { %14229 = vmatpush3.bf16.msra.mxu1 %v15166_v36  ;;  %14276 = vmatprep.subr.bf16.mxu0 %v15172_v59  ;;  %v5118_v36 = vrot.slane %v15360_v45, 1  ;;  %v5588_v61 = vpack.c.bf16 %v5500_v60, %v5498_v41  ;;  %v5589_v37 = vpack.c.bf16 %v5505_v21, %v5503_v47  ;;  %v15178_v21 = vld [vmem:[%s21393_s3 + $0x268] sm:$0xff]  }
 0x27e   : > { %14230 = vmatprep.subr.bf16.mxu1 %v15167_v56  ;;  %v5117_v18 = vsel %vm1019_vm0, %v5115_v43, %v5116_v22 }
 0x280   : > { %14151 = vmatmul.mubr.bf16.gmra.mrb[132].mxu1 %v5200_v29  ;;  %14277 = vmatpush3.bf16.msra.mxu0 %v15172_v59  ;;  %v5119_v59 = vsel %vm1019_vm0, %v5116_v22, %v5118_v36  ;;  %v13876_v19 = vpop.f32.mrb[48].mxu1  ;;  %v21903_v22 = vld [vmem:[#allocation90_spill] sm:$0xff] }
 0x281   : > { %14154 = vmatprep.mubr.bf16.mxu1 %v5201_v54  ;;  %14231 = vmatpush3.bf16.msra.mxu1 %v15167_v56  ;;  %v21901_v56 = vld [vmem:[#allocation87_spill] sm:$0xff]  ;;  %v3025_v29 = vpop.f32.mrb[49].mxu1  ;;  %v15361_v54 = vld [vmem:[#allocation2 + $0xd0] sm:$0xf]  ;;  %v5203_v48 = vpack.c.bf16 %v5119_v59, %v5117_v18  ;;  %v5122_v59 = vsel %vm1019_vm0, %v5120_v8, %v5121_v17 }
 0x282   : > { %14232 = vmatprep.subr.bf16.mxu1 %v15168_v44  ;;  %14278 = vmatprep.subr.bf16.mxu0 %v15173_v58  ;;  %v3106_v23 = vadd.f32 %v13876_v19, %v21901_v56  ;;  %v5123_v57 = vrot.slane %v15361_v54, 1  ;;  %v3104_v2 = vadd.f32 %v3025_v29, %v21902_v34  ;;  %v13877_v63 = vpop.f32.mrb[50].mxu1  ;;  %v5509_v60 = vrot.slane %v15361_v54, 2  ;;  %v15174_v29 = vld [vmem:[%s21393_s3 + $0x230] sm:$0xff]  }
 0x283   : > { %14199 = vmatmul.mubr.bf16.gmra.mrb[164].mxu0 %v5586_v26  ;;  %v3107_v45 = vadd.f32 %v13877_v63, %v21903_v22  ;;  %v3028_v36 = vpop.f32.mrb[51].mxu1  ;;  %v13924_v24 = vpop.f32.mrb[80].mxu0  ;;  %v5512_v56 = vrot.slane %v18115_v10, 2  ;;  %v5127_v54 = vsel %vm1019_vm0, %v5125_v38, %v5126_v30  ;;  %v5511_v10 = vrot.slane %v18113_v51, 2  ;;  %v15177_v51 = vld [vmem:[%s21393_s3 + $0x238] sm:$0xff]  }
 0x284   : > { %14202 = vmatprep.mubr.bf16.mxu0 %v5587_v4  ;;  %14279 = vmatpush3.bf16.msra.mxu0 %v15173_v58  ;;  %v15171_v58 = vld [vmem:[%s21393_s3 + $0x228] sm:$0xff]   ;;  %v3105_v42 = vadd.f32 %v3028_v36, %v21904_v28  ;;  %v18281_v26 = vadd.f32 %v13924_v24, %v3106_v23  ;;  %v3459_v43 = vpop.f32.mrb[81].mxu0  ;;  %v5124_v41 = vsel %vm1019_vm0, %v5121_v17, %v5123_v57  ;;  %v18302_v17 = vld [vmem:[#allocation2 + $0x100] sm:$0xf]  ;;  %v5136_v22 = vrot.slane %v17681_v5, 1 }
 0x285   : > { %14233 = vmatpush3.bf16.msra.mxu1 %v15168_v44  ;;  %14280 = vmatprep.subr.bf16.mxu0 %v15175_v33  ;;  %v15176_v44 = vld [vmem:[%s21393_s3 + $0x260] sm:$0xff]   ;;  %v15362_v4 = vld [vmem:[#allocation2 + $0xe8] sm:$0xf]  ;;  %v18285_v9 = vadd.f32 %v3459_v43, %v3104_v2  ;;  %v13925_v18 = vpop.f32.mrb[82].mxu0  ;;  %v5204_v34 = vpack.c.bf16 %v5124_v41, %v5122_v59  ;;  %v5510_v63 = vsel %vm1196_vm1, %v5507_v31, %v5509_v60  ;;  %v5130_v24 = vrot.slane %v18147_v53, 1 }
 0x286   : > { %14234 = vmatprep.subr.bf16.mxu1 %v15169_v6  ;;  %v5128_v14 = vrot.slane %v15362_v4, 1  ;;  %v18289_v19 = vadd.f32 %v13925_v18, %v3107_v45  ;;  %v3462_v47 = vpop.f32.mrb[83].mxu0  ;;  %v5514_v23 = vrot.slane %v15362_v4, 2  ;;  %v15179_v45 = vld [vmem:[%s21393_s3 + $0x270] sm:$0xff]   ;;  %v5519_v4 = vrot.slane %v18302_v17, 2 }
 0x287   : > { %v15364_v18 = vld [vmem:[#allocation2 + $0x110] sm:$0xff]  ;;  %v15365_v41 = vld [vmem:[#allocation2 + $0x118] sm:$0xf]  ;;  %v5516_v38 = vrot.slane %v18147_v53, 2 }
 0x288   : > { %14155 = vmatmul.mubr.bf16.gmra.mrb[136].mxu1 %v5202_v32  ;;  %14281 = vmatpush3.bf16.msra.mxu0 %v15175_v33  ;;  %v18296_v33 = vadd.f32 %v3462_v47, %v3105_v42  ;;  %v5129_v57 = vsel %vm1019_vm0, %v5126_v30, %v5128_v14  ;;  %v5131_v32 = vrot.slane %v18137_v7, 1  ;;  %v15180_v42 = vld [vmem:[%s21393_s3 + $0x278] sm:$0xff]   ;;  %v18333_v14 = vld [vmem:[%s21393_s3 + $0x280] sm:$0xff]   ;;  %v5522_v59 = vrot.slane %v15364_v18, 2  ;;  %v15366_v47 = vld [vmem:[#allocation2 + $0x128] sm:$0xff] }
 0x289   : > { %14158 = vmatprep.mubr.bf16.mxu1 %v5203_v48  ;;  %14235 = vmatpush3.bf16.msra.mxu1 %v15169_v6  ;;  %v5506_v6 = vrot.slane %v18090_v49, 2  ;;  %v5513_v49 = vsel %vm1196_vm1, %v5511_v10, %v5512_v56  ;;  %v5515_v48 = vsel %vm1196_vm1, %v5512_v56, %v5514_v23  ;;  %v5205_v36 = vpack.c.bf16 %v5129_v57, %v5127_v54  ;;  %v15367_v56 = vld [vmem:[#allocation2 + $0x130] sm:$0xf]  ;;  %v18340_v57 = vld [vmem:[%s21393_s3 + $0x2c0] sm:$0xff]  }
 0x28a   : > { %14236 = vmatprep.subr.bf16.mxu1 %v15171_v58  ;;  %14282 = vmatprep.subr.bf16.mxu0 %v15176_v44  ;;  %v5591_v8 = vpack.c.bf16 %v5515_v48, %v5513_v49  ;;  %v5132_v28 = vsel %vm1019_vm0, %v5130_v24, %v5131_v32  ;;  %v5524_v60 = vrot.slane %v15365_v41, 2  ;;  %v5143_v23 = vrot.slane %v15367_v56, 1 }
 0x28b   : > { %14203 = vmatmul.mubr.bf16.gmra.mrb[168].mxu0 %v5588_v61  ;;  %v5508_v2 = vsel %vm1196_vm1, %v5506_v6, %v5507_v31  ;;  %v5133_v61 = vrot.slane %v18302_v17, 1  ;;  %v15368_v6 = vld [vmem:[#allocation2 + $0x120] sm:$0xff]  ;;  %v5527_v24 = vrot.slane %v15366_v47, 2 }
 0x28c   : > { %14206 = vmatprep.mubr.bf16.mxu0 %v5589_v37  ;;  %14283 = vmatpush3.bf16.msra.mxu0 %v15176_v44  ;;  %v15363_v44 = vld [vmem:[#allocation2 + $0x108] sm:$0xff]  ;;  %v5590_v5 = vpack.c.bf16 %v5510_v63, %v5508_v2  ;;  %v5140_v54 = vrot.slane %v15368_v6, 1  ;;  %v5525_v49 = vsel %vm1196_vm1, %v5522_v59, %v5524_v60 }
 0x28d   : > { %14237 = vmatpush3.bf16.msra.mxu1 %v15171_v58  ;;  %14284 = vmatprep.subr.bf16.mxu0 %v15178_v21  ;;  %v5138_v58 = vrot.slane %v17689_v50, 1  ;;  %v5135_v37 = vrot.slane %v15363_v44, 1  ;;  %v5134_v43 = vsel %vm1019_vm0, %v5131_v32, %v5133_v61  ;;  %v5517_v50 = vrot.slane %v18137_v7, 2  ;;  %v15369_v61 = vld [vmem:[#allocation2 + $0x140] sm:$0xff] }
 0x28e   : > { %14238 = vmatprep.subr.bf16.mxu1 %v15174_v29  ;;  %v5206_v10 = vpack.c.bf16 %v5134_v43, %v5132_v28  ;;  %v15371_v28 = vld [vmem:[#allocation2 + $0x138] sm:$0xff] }
 0x28f   : > { %v5137_v30 = vsel %vm1019_vm0, %v5135_v37, %v5136_v22  ;;  %v5139_v31 = vsel %vm1019_vm0, %v5136_v22, %v5138_v58  ;;  %v5518_v2 = vsel %vm1196_vm1, %v5516_v38, %v5517_v50  ;;  %v5520_v63 = vsel %vm1196_vm1, %v5517_v50, %v5519_v4  ;;  %v15373_v38 = vld [vmem:[#allocation2 + $0x160] sm:$0xf] }
 0x290   : > { %14159 = vmatmul.mubr.bf16.gmra.mrb[140].mxu1 %v5204_v34  ;;  %14285 = vmatpush3.bf16.msra.mxu0 %v15178_v21  ;;  %v5141_v21 = vrot.slane %v15366_v47, 1  ;;  %v5207_v34 = vpack.c.bf16 %v5139_v31, %v5137_v30  ;;  %v5146_v22 = vrot.slane %v15369_v61, 1  ;;  %v5529_v58 = vrot.slane %v15367_v56, 2  ;;  %v15372_v47 = vld [vmem:[#allocation2 + $0x158] sm:$0xff] }
 0x291   : > { %14162 = vmatprep.mubr.bf16.mxu1 %v5205_v36  ;;  %14239 = vmatpush3.bf16.msra.mxu1 %v15174_v29  ;;  %v5521_v29 = vrot.slane %v15363_v44, 2  ;;  %v5592_v44 = vpack.c.bf16 %v5520_v63, %v5518_v2  ;;  %v5532_v37 = vrot.slane %v15369_v61, 2  ;;  %v5145_v43 = vrot.slane %v15371_v28, 1  ;;  %v15376_v63 = vld [vmem:[#allocation2 + $0x150] sm:$0xff] }
 0x292   : > { %14240 = vmatprep.subr.bf16.mxu1 %v15177_v51  ;;  %14286 = vmatprep.subr.bf16.mxu0 %v15179_v45  ;;  %v5142_v48 = vsel %vm1019_vm0, %v5140_v54, %v5141_v21  ;;  %v5526_v30 = vrot.slane %v15368_v6, 2  ;;  %v5531_v4 = vrot.slane %v15371_v28, 2  ;;  %v5153_v56 = vrot.slane %v15373_v38, 1  ;;  %v15375_v6 = vld [vmem:[#allocation2 + $0x178] sm:$0xf] }
 0x293   : > { %14207 = vmatmul.mubr.bf16.gmra.mrb[172].mxu0 %v5590_v5  ;;  %v5523_v32 = vsel %vm1196_vm1, %v5521_v29, %v5522_v59  ;;  %v5147_v31 = vsel %vm1019_vm0, %v5145_v43, %v5146_v22  ;;  %v5530_v59 = vsel %vm1196_vm1, %v5527_v24, %v5529_v58  ;;  %v5158_v54 = vrot.slane %v15375_v6, 1  ;;  %v18362_v43 = vld [vmem:[#allocation2 + $0x190] sm:$0xf] }
 0x294   : > { %14210 = vmatprep.mubr.bf16.mxu0 %v5591_v8  ;;  %14287 = vmatpush3.bf16.msra.mxu0 %v15179_v45  ;;  %v15370_v45 = vld [vmem:[#allocation2 + $0x148] sm:$0xf]  ;;  %v5593_v8 = vpack.c.bf16 %v5525_v49, %v5523_v32  ;;  %v5533_v41 = vsel %vm1196_vm1, %v5531_v4, %v5532_v37  ;;  %v5150_v32 = vrot.slane %v15376_v63, 1 }
 0x295   : > { %14241 = vmatpush3.bf16.msra.mxu1 %v15177_v51  ;;  %14288 = vmatprep.subr.bf16.mxu0 %v15180_v42  ;;  %v5144_v51 = vsel %vm1019_vm0, %v5141_v21, %v5143_v23  ;;  %v5148_v36 = vrot.slane %v15370_v45, 1  ;;  %v5534_v5 = vrot.slane %v15370_v45, 2  ;;  %v5151_v21 = vrot.slane %v15372_v47, 1  ;;  %v15374_v23 = vld [vmem:[#allocation2 + $0x170] sm:$0xff] }
 0x296   : > { %14322 = vmatprep.subr.bf16.mxu1 %v18333_v14  ;;  %v5208_v50 = vpack.c.bf16 %v5144_v51, %v5142_v48  ;;  %v5156_v29 = vrot.slane %v15374_v23, 1  ;;  %v5542_v49 = vrot.slane %v15374_v23, 2  ;;  %v5544_v48 = vrot.slane %v15375_v6, 2  ;;  %v21907_v6 = vld [vmem:[#allocation103_spill] sm:$0xff] }
 0x297   : > { %v5149_v18 = vsel %vm1019_vm0, %v5146_v22, %v5148_v36  ;;  %v5535_v60 = vsel %vm1196_vm1, %v5532_v37, %v5534_v5  ;;  %v15377_v22 = vld [vmem:[#allocation2 + $0x168] sm:$0xff]  ;;  %v5536_v45 = vrot.slane %v15376_v63, 2  ;;  %v5154_v58 = vsel %vm1019_vm0, %v5151_v21, %v5153_v56 }
 0x298   : > { %14163 = vmatmul.mubr.bf16.gmra.mrb[144].mxu1 %v5206_v10  ;;  %14289 = vmatpush3.bf16.msra.mxu0 %v15180_v42  ;;  %v5528_v42 = vsel %vm1196_vm1, %v5526_v30, %v5527_v24  ;;  %v5537_v10 = vrot.slane %v15372_v47, 2  ;;  %v5209_v2 = vpack.c.bf16 %v5149_v18, %v5147_v31  ;;  %v5155_v51 = vrot.slane %v15377_v22, 1  ;;  %v21906_v47 = vld [vmem:[#allocation92_spill] sm:$0xff] }
 0x299   : > { %14166 = vmatprep.mubr.bf16.mxu1 %v5207_v34  ;;  %14370 = vmatprep.subr.bf16.mxu0 %v18340_v57  ;;  %v5539_v34 = vrot.slane %v15373_v38, 2  ;;  %v5594_v61 = vpack.c.bf16 %v5530_v59, %v5528_v42  ;;  %v5595_v36 = vpack.c.bf16 %v5535_v60, %v5533_v41  ;;  %v5152_v24 = vsel %vm1019_vm0, %v5150_v32, %v5151_v21  ;;  %v21905_v42 = vld [vmem:[#allocation99_spill] sm:$0xff] }
 0x29a   : > { %v5157_v37 = vsel %vm1019_vm0, %v5155_v51, %v5156_v29  ;;  %v5159_v5 = vsel %vm1019_vm0, %v5156_v29, %v5158_v54  ;;  %v5545_v4 = vsel %vm1196_vm1, %v5542_v49, %v5544_v48  ;;  %v5160_v31 = vrot.slane %v18188_v46, 1 }
 0x29b   : > { %14211 = vmatmul.mubr.bf16.gmra.mrb[176].mxu0 %v5592_v44  ;;  %v5541_v44 = vrot.slane %v15377_v22, 2  ;;  %v5540_v28 = vsel %vm1196_vm1, %v5537_v10, %v5539_v34  ;;  %v5161_v18 = vrot.slane %v18190_v62, 1  ;;  %v5210_v60 = vpack.c.bf16 %v5154_v58, %v5152_v24 }
 0x29c   : > { %14214 = vmatprep.mubr.bf16.mxu0 %v5593_v8  ;;  %v5538_v8 = vsel %vm1196_vm1, %v5536_v45, %v5537_v10  ;;  %v5211_v56 = vpack.c.bf16 %v5159_v5, %v5157_v37  ;;  %v5163_v23 = vrot.slane %v18362_v43, 1  ;;  %v5857_v29 = vrot.slane %v18171_v52, 3 }
 0x29d   : > { %v5860_v32 = vrot.slane %v18169_v25, 3  ;;  %v5162_v51 = vsel %vm1019_vm0, %v5160_v31, %v5161_v18  ;;  %v5546_v45 = vrot.slane %v18188_v46, 2  ;;  %v5547_v58 = vrot.slane %v18190_v62, 2  ;;  %v6676_v31 = vld [vmem:[#allocation2 + $0x1a8] sm:$0xf] }
 0x29e   : > { %v6243_v37 = vrot.slane %v18171_v52, 4 }
 0x2a0   : > { %14167 = vmatmul.mubr.bf16.gmra.mrb[148].mxu1 %v5208_v50  ;;  %v5543_v50 = vsel %vm1196_vm1, %v5541_v44, %v5542_v49  ;;  %v21908_v49 = vld [vmem:[#allocation96_spill] sm:$0xff]  ;;  %v5549_v44 = vrot.slane %v18362_v43, 2 }
 0x2a1   : > { %14170 = vmatprep.mubr.bf16.mxu1 %v5209_v2  ;;  %v5596_v2 = vpack.c.bf16 %v5540_v28, %v5538_v8  ;;  %v5597_v63 = vpack.c.bf16 %v5545_v4, %v5543_v50  ;;  %v5164_v28 = vsel %vm1019_vm0, %v5161_v18, %v5163_v23  ;;  %v6674_v50 = vld [vmem:[#allocation2 + $0x198] sm:$0xff]  ;;  %v6675_v4 = vld [vmem:[#allocation2 + $0x1a0] sm:$0xff]  ;;  %v7849_v18 = vrot.slane %v6676_v31, 3 }
 0x2a2   : > { %v13880_v30 = vpop.f32.mrb[52].mxu1  ;;  %v8233_v52 = vrot.slane %v6675_v4, 4 }
 0x2a3   : > { %14215 = vmatmul.mubr.bf16.gmra.mrb[180].mxu0 %v5594_v61  ;;  %v3110_v59 = vadd.f32 %v13880_v30, %v21905_v42  ;;  %v3041_v41 = vpop.f32.mrb[53].mxu1  ;;  %v6246_v30 = vrot.slane %v18169_v25, 4 }
 0x2a4   : > { %14218 = vmatprep.mubr.bf16.mxu0 %v5595_v36  ;;  %v3108_v21 = vadd.f32 %v3041_v41, %v21906_v47  ;;  %v13881_v38 = vpop.f32.mrb[54].mxu1  ;;  %v7846_v41 = vrot.slane %v6674_v50, 3  ;;  %v8232_v47 = vrot.slane %v6674_v50, 4 }
 0x2a5   : > { %v3111_v54 = vadd.f32 %v13881_v38, %v21907_v6  ;;  %v3044_v10 = vpop.f32.mrb[55].mxu1  ;;  %v6247_v23 = vsel %vm4327_vm3, %v6243_v37, %v6246_v30 }
 0x2a6   : > { %v3109_v48 = vadd.f32 %v3044_v10, %v21908_v49  ;;  %v18396_v6 = vsel %vm4327_vm3, %v8232_v47, %v8233_v52  ;;  %v5550_v10 = vsel %vm1196_vm1, %v5547_v58, %v5549_v44 }
 0x2a7   : > { %v13928_v34 = vpop.f32.mrb[84].mxu0  ;;  %21910 = vst [vmem:[#allocation61_spill] sm:$0xff] %v18396_v6 }
 0x2a8   : > { %v18375_v61 = vadd.f32 %v13928_v34, %v3110_v59  ;;  %v3475_v22 = vpop.f32.mrb[85].mxu0  ;;  %14171 = vmatmul.mubr.bf16.gmra.mrb[152].mxu1 %v5210_v60  ;;  %v5861_v59 = vsel %vm3940_vm2, %v5857_v29, %v5860_v32  ;;  %v7847_v60 = vrot.slane %v6675_v4, 3  ;;  %v6355_v32 = vpack.c.bf16 %v6247_v23, %v6243_v37  ;;  %v15182_v4 = vld [vmem:[%s21393_s3 + $0x288] sm:$0xff]   ;;  %v21920_v23 = vld [vmem:[#allocation17_spill] sm:$0xff] }
 0x2a9   : > { %v18379_v36 = vadd.f32 %v3475_v22, %v3108_v21  ;;  %v13929_v24 = vpop.f32.mrb[86].mxu0  ;;  %14174 = vmatprep.mubr.bf16.mxu1 %v5211_v56  ;;  %v5212_v21 = vpack.c.bf16 %v5164_v28, %v5162_v51  ;;  %v8235_v56 = vrot.slane %v6676_v31, 4  ;;  %v5969_v25 = vpack.c.bf16 %v5861_v59, %v5857_v29  ;;  %v21913_v22 = vld [vmem:[#allocation114_spill] sm:$0xff]  ;;  %v21916_v37 = vld [vmem:[#allocation111_spill] sm:$0xff] }
 0x2aa   : > { %v18384_v5 = vadd.f32 %v13929_v24, %v3111_v54  ;;  %v3478_v8 = vpop.f32.mrb[87].mxu0  ;;  %v18392_v38 = vsel %vm3940_vm2, %v7846_v41, %v7847_v60  ;;  %v5548_v54 = vsel %vm1196_vm1, %v5546_v45, %v5547_v58  ;;  %v18401_v34 = vsel %vm3940_vm2, %v7847_v60, %v7849_v18  ;;  %v21914_v24 = vld [vmem:[#allocation107_spill] sm:$0xff] }
 0x2ab   : > { %v18388_v42 = vadd.f32 %v3478_v8, %v3109_v48  ;;  %14219 = vmatmul.mubr.bf16.gmra.mrb[184].mxu0 %v5596_v2  ;;  %21909 = vst [vmem:[#allocation62_spill] sm:$0xff] %v18392_v38  ;;  %21911 = vst [vmem:[#allocation68_spill] sm:$0xff] %v18401_v34  ;;  %v18404_v2 = vsel %vm4327_vm3, %v8233_v52, %v8235_v56  ;;  %v5598_v49 = vpack.c.bf16 %v5550_v10, %v5548_v54  ;;  %v21915_v8 = vld [vmem:[#allocation117_spill] sm:$0xff]  ;;  %v21917_v52 = vld [vmem:[#allocation15_spill] sm:$0xff] }
 0x2ac   : > { %14222 = vmatprep.mubr.bf16.mxu0 %v5597_v63  ;;  %21912 = vst [vmem:[#allocation47_spill] sm:$0xff] %v18404_v2  ;;  %v21921_v54 = vld [vmem:[#allocation16_spill] sm:$0xff] }
 0x2ad   : > { %v21922_v10 = vpack.c.bf16 %v21920_v23, %v21921_v54  ;;  %v21938_v54 = vld [vmem:[#allocation29_spill] sm:$0xff] }
 0x2b0   : > { %14175 = vmatmul.mubr.bf16.gmra.mrb[156].mxu1 %v5212_v21  ;;  %v21918_v21 = vld [vmem:[#allocation14_spill] sm:$0xff] }
 0x2b1   : > { %14242 = vmatprep.mubr.bf16.mxu1 %v5969_v25  ;;  %v21919_v18 = vpack.c.bf16 %v21917_v52, %v21918_v21  ;;  %v21935_v52 = vld [vmem:[#allocation25_spill] sm:$0xff]  ;;  %v21936_v21 = vld [vmem:[#allocation24_spill] sm:$0xff] }
 0x2b3   : > { %v13884_v48 = vpop.f32.mrb[56].mxu1  ;;  %14223 = vmatmul.mubr.bf16.gmra.mrb[188].mxu0 %v5598_v49 }
 0x2b4   : > { %v3114_v51 = vadd.f32 %v13884_v48, %v21913_v22  ;;  %v3057_v45 = vpop.f32.mrb[57].mxu1  ;;  %14290 = vmatprep.mubr.bf16.mxu0 %v6355_v32  ;;  %v15188_v32 = vld [vmem:[%s21393_s3 + $0x2c8] sm:$0xff]   ;;  %v15183_v48 = vld [vmem:[%s21393_s3 + $0x290] sm:$0xff]  }
 0x2b5   : > { %v3112_v58 = vadd.f32 %v3057_v45, %v21914_v24  ;;  %v13885_v44 = vpop.f32.mrb[58].mxu1  ;;  %v21923_v22 = vld [vmem:[#allocation19_spill] sm:$0xff]  ;;  %v21927_v24 = vld [vmem:[#allocation20_spill] sm:$0xff] }
 0x2b6   : > { %v3115_v28 = vadd.f32 %v13885_v44, %v21915_v8  ;;  %v3060_v30 = vpop.f32.mrb[59].mxu1  ;;  %v13932_v50 = vpop.f32.mrb[88].mxu0  ;;  %v15184_v44 = vld [vmem:[%s21393_s3 + $0x298] sm:$0xff]   ;;  %v15189_v8 = vld [vmem:[%s21393_s3 + $0x2d0] sm:$0xff]  }
 0x2b7   : > { %v3113_v31 = vadd.f32 %v3060_v30, %v21916_v37  ;;  %v18417_v59 = vadd.f32 %v13932_v50, %v3114_v51  ;;  %v3491_v41 = vpop.f32.mrb[89].mxu0  ;;  %v21924_v51 = vld [vmem:[#allocation18_spill] sm:$0xff]  ;;  %v21932_v37 = vld [vmem:[#allocation27_spill] sm:$0xff] }
 0x2b8   : > { %v18419_v60 = vadd.f32 %v3491_v41, %v3112_v58  ;;  %v13933_v47 = vpop.f32.mrb[90].mxu0  ;;  %14243 = vmatmul.mubr.bf16.vlgmr.msra.gmra.mrb[160].mxu1 %v21919_v18  ;;  %v21925_v45 = vpack.c.bf16 %v21923_v22, %v21924_v51  ;;  %v21930_v30 = vld [vmem:[#allocation22_spill] sm:$0xff]  ;;  %v21937_v18 = vpack.c.bf16 %v21935_v52, %v21936_v21  ;;  %v21946_v21 = vld [vmem:[#allocation49_spill] sm:$0xff] }
 0x2b9   : > { %v18424_v56 = vadd.f32 %v13933_v47, %v3115_v28  ;;  %14323 = vmatpush3.bf16.msra.mxu1 %v18333_v14  ;;  %v3494_v25 = vpop.f32.mrb[91].mxu0  ;;  %14246 = vmatprep.mubr.bf16.mxu1 %v21922_v10  ;;  %v21926_v14 = vld [vmem:[#allocation21_spill] sm:$0xff]  ;;  %v21929_v28 = vld [vmem:[#allocation23_spill] sm:$0xff]  ;;  %v21939_v10 = vld [vmem:[#allocation28_spill] sm:$0xff] }
 0x2ba   : > { %v18433_v49 = vadd.f32 %v3494_v25, %v3113_v31  ;;  %14324 = vmatprep.subr.bf16.mxu1 %v15182_v4  ;;  %v21928_v58 = vpack.c.bf16 %v21926_v14, %v21927_v24  ;;  %v21931_v50 = vpack.c.bf16 %v21929_v28, %v21930_v30  ;;  %v21933_v31 = vld [vmem:[#allocation26_spill] sm:$0xff]  ;;  %v21942_v28 = vld [vmem:[#allocation124_spill] sm:$0xff] }
 0x2bb   : > { %14291 = vmatmul.mubr.bf16.vlgmr.msra.gmra.mrb[192].mxu0 %v21925_v45  ;;  %v21934_v41 = vpack.c.bf16 %v21932_v37, %v21933_v31  ;;  %v21944_v31 = vld [vmem:[#allocation34_spill] sm:$0xff] }
 0x2bc   : > { %14294 = vmatprep.mubr.bf16.mxu0 %v21928_v58  ;;  %14371 = vmatpush3.bf16.msra.mxu0 %v18340_v57  ;;  %v15191_v57 = vld [vmem:[%s21393_s3 + $0x2d8] sm:$0xff]   ;;  %v15192_v58 = vld [vmem:[%s21393_s3 + $0x2e0] sm:$0xff]  }
 0x2bd   : > { %14325 = vmatpush3.bf16.msra.mxu1 %v15182_v4  ;;  %14372 = vmatprep.subr.bf16.mxu0 %v15188_v32  ;;  %v15185_v4 = vld [vmem:[%s21393_s3 + $0x2a0] sm:$0xff]  }
 0x2be   : > { %14326 = vmatprep.subr.bf16.mxu1 %v15183_v48 }
 0x2c0   : > { %14247 = vmatmul.mubr.bf16.gmra.mrb[164].mxu1 %v21931_v50  ;;  %14373 = vmatpush3.bf16.msra.mxu0 %v15188_v32  ;;  %v21940_v32 = vpack.c.bf16 %v21938_v54, %v21939_v10  ;;  %v15190_v10 = vld [vmem:[%s21393_s3 + $0x2b0] sm:$0xff]  }
 0x2c1   : > { %14250 = vmatprep.mubr.bf16.mxu1 %v21934_v41  ;;  %14327 = vmatpush3.bf16.msra.mxu1 %v15183_v48  ;;  %v21941_v48 = vld [vmem:[#allocation120_spill] sm:$0xff] }
 0x2c2   : > { %14328 = vmatprep.subr.bf16.mxu1 %v15184_v44  ;;  %14374 = vmatprep.subr.bf16.mxu0 %v15189_v8 }
 0x2c3   : > { %v13888_v47 = vpop.f32.mrb[60].mxu1  ;;  %14295 = vmatmul.mubr.bf16.gmra.mrb[196].mxu0 %v21937_v18  ;;  %v21947_v18 = vld [vmem:[#allocation48_spill] sm:$0xff] }
 0x2c4   : > { %v3118_v25 = vadd.f32 %v13888_v47, %v17508_v35  ;;  %v3073_v23 = vpop.f32.mrb[61].mxu1  ;;  %14298 = vmatprep.mubr.bf16.mxu0 %v21940_v32  ;;  %14375 = vmatpush3.bf16.msra.mxu0 %v15189_v8  ;;  %v15187_v35 = vld [vmem:[%s21393_s3 + $0x2a8] sm:$0xff]   ;;  %v21949_v32 = vld [vmem:[#allocation37_spill] sm:$0xff] }
 0x2c5   : > { %v3116_v22 = vadd.f32 %v3073_v23, %v21941_v48  ;;  %v13889_v51 = vpop.f32.mrb[62].mxu1  ;;  %14329 = vmatpush3.bf16.msra.mxu1 %v15184_v44  ;;  %14376 = vmatprep.subr.bf16.mxu0 %v15191_v57  ;;  %v21948_v23 = vpack.c.bf16 %v21946_v21, %v21947_v18  ;;  %v21950_v48 = vld [vmem:[#allocation36_spill] sm:$0xff] }
 0x2c6   : > { %v3119_v45 = vadd.f32 %v13889_v51, %v17521_v12  ;;  %v3076_v14 = vpop.f32.mrb[63].mxu1  ;;  %v13936_v24 = vpop.f32.mrb[92].mxu0  ;;  %14330 = vmatprep.subr.bf16.mxu1 %v15185_v4  ;;  %v21943_v12 = vld [vmem:[#allocation35_spill] sm:$0xff] }
 0x2c7   : > { %v3117_v8 = vadd.f32 %v3076_v14, %v21942_v28  ;;  %v18479_v30 = vadd.f32 %v13936_v24, %v3118_v25  ;;  %v3507_v50 = vpop.f32.mrb[93].mxu0  ;;  %v21945_v41 = vpack.c.bf16 %v21943_v12, %v21944_v31  ;;  %v15194_v25 = vld [vmem:[%s21393_s3 + $0x2e8] sm:$0xff]   ;;  %v15195_v31 = vld [vmem:[%s21393_s3 + $0x2f0] sm:$0xff]  }
 0x2c8   : > { %v18481_v44 = vadd.f32 %v3507_v50, %v3116_v22  ;;  %v13937_v37 = vpop.f32.mrb[94].mxu0  ;;  %14377 = vmatpush3.bf16.msra.mxu0 %v15191_v57  ;;  %v21951_v22 = vpack.c.bf16 %v21949_v32, %v21950_v48  ;;  %v21953_v14 = vld [vmem:[#allocation51_spill] sm:$0xff] }
 0x2c9   : > { %14251 = vmatmul.mubr.bf16.gmra.mrb[168].mxu1 %v21945_v41  ;;  %v18486_v47 = vadd.f32 %v13937_v37, %v3119_v45  ;;  %v3510_v52 = vpop.f32.mrb[95].mxu0  ;;  %14378 = vmatprep.subr.bf16.mxu0 %v15192_v58  ;;  %v21952_v45 = vld [vmem:[#allocation52_spill] sm:$0xff]  ;;  %v21955_v41 = vld [vmem:[#allocation125_spill] sm:$0xff] }
 0x2ca   : > { %14254 = vmatprep.mubr.bf16.mxu1 %v21948_v23  ;;  %14331 = vmatpush3.bf16.msra.mxu1 %v15185_v4  ;;  %v18494_v54 = vadd.f32 %v3510_v52, %v3117_v8  ;;  %v21954_v24 = vpack.c.bf16 %v21952_v45, %v21953_v14  ;;  %v21956_v23 = vld [vmem:[#allocation65_spill] sm:$0xff]  ;;  %v21960_v45 = vld [vmem:[#allocation80_spill] sm:$0xff]  ;;  %v5902_v14 = vrot.slane %v18147_v53, 3 }
 0x2cb   : > { %14332 = vmatprep.subr.bf16.mxu1 %v15187_v35  ;;  %v13956_v57 = vpop.f32.mrb[64].mxu1  ;;  %14299 = vmatmul.mubr.bf16.gmra.mrb[200].mxu0 %v21951_v22 }
 0x2cc   : > { %v3910_v51 = vadd.f32 %v13956_v57, %v17560_v55  ;;  %v3781_v4 = vpop.f32.mrb[65].mxu1  ;;  %14302 = vmatprep.mubr.bf16.mxu0 %v21954_v24  ;;  %14379 = vmatpush3.bf16.msra.mxu0 %v15192_v58  ;;  %v15193_v55 = vld [vmem:[%s21393_s3 + $0x2b8] sm:$0xff]   ;;  %v21957_v57 = vld [vmem:[#allocation64_spill] sm:$0xff] }
 0x2cd   : > { %v3908_v28 = vadd.f32 %v3781_v4, %v17568_v16  ;;  %v13957_v8 = vpop.f32.mrb[66].mxu1  ;;  %14380 = vmatprep.subr.bf16.mxu0 %v15194_v25  ;;  %v21958_v32 = vpack.c.bf16 %v21956_v23, %v21957_v57  ;;  %v21959_v4 = vld [vmem:[#allocation82_spill] sm:$0xff]  ;;  %v15196_v24 = vld [vmem:[%s21393_s3 + $0x2f8] sm:$0xff]   ;;  %v21966_v23 = vld [vmem:[#allocation83_spill] sm:$0xff] }
 0x2ce   : > { %14333 = vmatpush3.bf16.msra.mxu1 %v15187_v35  ;;  %v3911_v50 = vadd.f32 %v13957_v8, %v17580_v3  ;;  %v3784_v37 = vpop.f32.mrb[67].mxu1  ;;  %v14004_v12 = vpop.f32.mrb[96].mxu0  ;;  %v5903_v35 = vrot.slane %v18137_v7, 3  ;;  %v5905_v3 = vrot.slane %v18302_v17, 3  ;;  %v6289_v8 = vrot.slane %v18137_v7, 4 }
 0x2cf   : > { %14334 = vmatprep.subr.bf16.mxu1 %v15190_v10  ;;  %v3909_v58 = vadd.f32 %v3784_v37, %v21955_v41  ;;  %v18515_v52 = vadd.f32 %v14004_v12, %v3910_v51  ;;  %v4168_v16 = vpop.f32.mrb[97].mxu0  ;;  %v21961_v51 = vpack.c.bf16 %v21959_v4, %v21960_v45  ;;  %v21962_v12 = vld [vmem:[#allocation67_spill] sm:$0xff]  ;;  %v18556_v45 = vld [vmem:[%s21393_s3 + $0x340] sm:$0xff]  }
 0x2d0   : > { %v18519_v21 = vadd.f32 %v4168_v16, %v3908_v28  ;;  %v14005_v18 = vpop.f32.mrb[98].mxu0  ;;  %14381 = vmatpush3.bf16.msra.mxu0 %v15194_v25  ;;  %v6291_v25 = vrot.slane %v18302_v17, 4  ;;  %v5904_v16 = vsel %vm3940_vm2, %v5902_v14, %v5903_v35  ;;  %v21965_v17 = vld [vmem:[#allocation84_spill] sm:$0xff] }
 0x2d1   : > { %14255 = vmatmul.mubr.bf16.gmra.mrb[172].mxu1 %v21958_v32  ;;  %v18524_v48 = vadd.f32 %v14005_v18, %v3911_v50  ;;  %v4171_v22 = vpop.f32.mrb[99].mxu0  ;;  %14382 = vmatprep.subr.bf16.mxu0 %v15195_v31  ;;  %v18540_v50 = vld [vmem:[%s21393_s3 + $0x300] sm:$0xff]   ;;  %v21967_v57 = vpack.c.bf16 %v21965_v17, %v21966_v23  ;;  %v6288_v32 = vrot.slane %v18147_v53, 4 }
 0x2d2   : > { %14258 = vmatprep.mubr.bf16.mxu1 %v21961_v51  ;;  %14335 = vmatpush3.bf16.msra.mxu1 %v15190_v10  ;;  %v18533_v28 = vadd.f32 %v4171_v22, %v3909_v58  ;;  %v21963_v10 = vld [vmem:[#allocation66_spill] sm:$0xff]  ;;  %v5906_v58 = vsel %vm3940_vm2, %v5903_v35, %v5905_v3  ;;  %v21968_v35 = vld [vmem:[#allocation127_spill] sm:$0xff]  ;;  %v6292_v53 = vsel %vm4327_vm3, %v6289_v8, %v6291_v25 }
 0x2d3   : > { %14336 = vmatprep.subr.bf16.mxu1 %v15193_v55  ;;  %v13960_v37 = vpop.f32.mrb[68].mxu1  ;;  %v21964_v41 = vpack.c.bf16 %v21962_v12, %v21963_v10  ;;  %v5978_v14 = vpack.c.bf16 %v5906_v58, %v5904_v16  ;;  %v21970_v16 = vld [vmem:[#allocation58_spill] sm:$0xff] }
 0x2d4   : > { %v3914_v7 = vadd.f32 %v13960_v37, %v17619_v13  ;;  %v3797_v18 = vpop.f32.mrb[69].mxu1  ;;  %14383 = vmatpush3.bf16.msra.mxu0 %v15195_v31  ;;  %v6290_v37 = vsel %vm4327_vm3, %v6288_v32, %v6289_v8  ;;  %v21971_v58 = vld [vmem:[#allocation42_spill] sm:$0xff] }
 0x2d5   : > { %14303 = vmatmul.mubr.bf16.gmra.mrb[204].mxu0 %v21964_v41  ;;  %v3912_v22 = vadd.f32 %v3797_v18, %v17629_v1  ;;  %v13961_v4 = vpop.f32.mrb[70].mxu1  ;;  %14384 = vmatprep.subr.bf16.mxu0 %v15196_v24  ;;  %v21969_v1 = vld [vmem:[#allocation128_spill] sm:$0xff]  ;;  %v21972_v23 = vpack.c.bf16 %v21970_v16, %v21971_v58  ;;  %v6364_v8 = vpack.c.bf16 %v6292_v53, %v6290_v37 }
 0x2d6   : > { %14306 = vmatprep.mubr.bf16.mxu0 %v21967_v57  ;;  %14337 = vmatpush3.bf16.msra.mxu1 %v15193_v55  ;;  %v3915_v13 = vadd.f32 %v13961_v4, %v21968_v35  ;;  %v3800_v3 = vpop.f32.mrb[71].mxu1  ;;  %v14008_v51 = vpop.f32.mrb[100].mxu0  ;;  %v21973_v57 = vld [vmem:[#allocation129_spill] sm:$0xff]  ;;  %v21974_v4 = vld [vmem:[#allocation44_spill] sm:$0xff] }
 0x2d7   : > { %14418 = vmatprep.subr.bf16.mxu1 %v18540_v50  ;;  %v3913_v31 = vadd.f32 %v3800_v3, %v21969_v1  ;;  %v18563_v55 = vadd.f32 %v14008_v51, %v3914_v7  ;;  %v4184_v12 = vpop.f32.mrb[101].mxu0  ;;  %v21975_v35 = vld [vmem:[#allocation57_spill] sm:$0xff]  ;;  %v21979_v53 = vld [vmem:[#allocation132_spill] sm:$0xff] }
 0x2d8   : > { %v18565_v10 = vadd.f32 %v4184_v12, %v3912_v22  ;;  %v14009_v41 = vpop.f32.mrb[102].mxu0  ;;  %14385 = vmatpush3.bf16.msra.mxu0 %v15196_v24  ;;  %v21976_v24 = vpack.c.bf16 %v21974_v4, %v21975_v35  ;;  %v21983_v4 = vld [vmem:[#allocation74_spill] sm:$0xff]  ;;  %v21984_v35 = vld [vmem:[#allocation59_spill] sm:$0xff] }
 0x2d9   : > { %14259 = vmatmul.mubr.bf16.gmra.mrb[176].mxu1 %v5978_v14  ;;  %v18567_v18 = vadd.f32 %v14009_v41, %v3915_v13  ;;  %v4187_v17 = vpop.f32.mrb[103].mxu0  ;;  %14466 = vmatprep.subr.bf16.mxu0 %v18556_v45  ;;  %v21977_v13 = vld [vmem:[#allocation130_spill] sm:$0xff]  ;;  %v21978_v14 = vld [vmem:[#allocation131_spill] sm:$0xff] }
 0x2da   : > { %14262 = vmatprep.mubr.bf16.mxu1 %v21972_v23  ;;  %v18573_v25 = vadd.f32 %v4187_v17, %v3913_v31  ;;  %v21980_v23 = vld [vmem:[#allocation60_spill] sm:$0xff] }
 0x2db   : > { %v13964_v7 = vpop.f32.mrb[72].mxu1 }
 0x2dc   : > { %v3918_v32 = vadd.f32 %v13964_v7, %v21973_v57  ;;  %v3813_v22 = vpop.f32.mrb[73].mxu1 }
 0x2dd   : > { %14307 = vmatmul.mubr.bf16.gmra.mrb[208].mxu0 %v6364_v8  ;;  %v3916_v3 = vadd.f32 %v3813_v22, %v21977_v13  ;;  %v13965_v51 = vpop.f32.mrb[74].mxu1  ;;  %v21981_v8 = vld [vmem:[#allocation43_spill] sm:$0xff] }
 0x2de   : > { %14310 = vmatprep.mubr.bf16.mxu0 %v21976_v24  ;;  %v3919_v1 = vadd.f32 %v13965_v51, %v21978_v14  ;;  %v3816_v12 = vpop.f32.mrb[75].mxu1  ;;  %v14012_v37 = vpop.f32.mrb[104].mxu0  ;;  %v21982_v7 = vpack.c.bf16 %v21980_v23, %v21981_v8  ;;  %v21985_v24 = vpack.c.bf16 %v21983_v4, %v21984_v35  ;;  %v21987_v14 = vld [vmem:[#allocation73_spill] sm:$0xff] }
 0x2df   : > { %v3917_v41 = vadd.f32 %v3816_v12, %v21979_v53  ;;  %v18582_v31 = vadd.f32 %v14012_v37, %v3918_v32  ;;  %v4200_v17 = vpop.f32.mrb[105].mxu0  ;;  %v21986_v32 = vld [vmem:[#allocation93_spill] sm:$0xff]  ;;  %v21989_v53 = vld [vmem:[#allocation76_spill] sm:$0xff] }
 0x2e0   : > { %v18584_v16 = vadd.f32 %v4200_v17, %v3916_v3  ;;  %v14013_v58 = vpop.f32.mrb[106].mxu0  ;;  %v21988_v12 = vpack.c.bf16 %v21986_v32, %v21987_v14  ;;  %v21990_v17 = vld [vmem:[#allocation91_spill] sm:$0xff] }
 0x2e1   : > { %14263 = vmatmul.mubr.bf16.gmra.mrb[180].mxu1 %v21982_v7  ;;  %v18589_v57 = vadd.f32 %v14013_v58, %v3919_v1  ;;  %v4203_v22 = vpop.f32.mrb[107].mxu0  ;;  %v21991_v23 = vpack.c.bf16 %v21989_v53, %v21990_v17  ;;  %v18618_v53 = vld [vmem:[#allocation2 + $0x40] sm:$0xf] }
 0x2e2   : > { %14266 = vmatprep.mubr.bf16.mxu1 %v21985_v24  ;;  %v18594_v13 = vadd.f32 %v4203_v22, %v3917_v41  ;;  %v5932_v22 = vrot.slane %v18188_v46, 3 }
 0x2e3   : > { %v13968_v51 = vpop.f32.mrb[76].mxu1 }
 0x2e4   : > { %v3922_v3 = vadd.f32 %v13968_v51, %v18130_v27  ;;  %v3829_v37 = vpop.f32.mrb[77].mxu1  ;;  %v5933_v27 = vrot.slane %v18190_v62, 3  ;;  %v5935_v51 = vrot.slane %v18362_v43, 3 }
 0x2e5   : > { %14311 = vmatmul.mubr.bf16.gmra.mrb[212].mxu0 %v21988_v12  ;;  %v3920_v1 = vadd.f32 %v3829_v37, %v18140_v15  ;;  %v13969_v58 = vpop.f32.mrb[78].mxu1  ;;  %v21992_v15 = vld [vmem:[#allocation95_spill] sm:$0xff] }
 0x2e6   : > { %14314 = vmatprep.mubr.bf16.mxu0 %v21991_v23  ;;  %v3923_v8 = vadd.f32 %v13969_v58, %v18142_v40  ;;  %v3832_v7 = vpop.f32.mrb[79].mxu1  ;;  %v14016_v41 = vpop.f32.mrb[108].mxu0  ;;  %v21993_v12 = vld [vmem:[#allocation75_spill] sm:$0xff]  ;;  %v18616_v40 = vld [vmem:[#allocation2 + $0x38] sm:$0xff]  ;;  %v18627_v23 = vld [vmem:[#allocation2 + $0x30] sm:$0xff] }
 0x2e7   : > { %v3921_v4 = vadd.f32 %v3832_v7, %v18149_v0  ;;  %v18607_v35 = vadd.f32 %v14016_v41, %v3922_v3  ;;  %v4216_v24 = vpop.f32.mrb[109].mxu0  ;;  %v21994_v37 = vpack.c.bf16 %v21992_v15, %v21993_v12  ;;  %v21995_v3 = vld [vmem:[#allocation94_spill] sm:$0xff]  ;;  %v15379_v7 = vld [vmem:[#allocation2 + $0x188] sm:$0xff]  ;;  %v21997_v12 = vld [vmem:[#allocation100_spill] sm:$0xff] }
 0x2e8   : > { %v18611_v32 = vadd.f32 %v4216_v24, %v3920_v1  ;;  %v14017_v14 = vpop.f32.mrb[110].mxu0  ;;  %v21996_v17 = vpack.c.bf16 %v17827_v39, %v21995_v3  ;;  %v15378_v1 = vld [vmem:[#allocation2 + $0x180] sm:$0xff]  ;;  %v6319_v41 = vrot.slane %v15379_v7, 4  ;;  %v6321_v24 = vrot.slane %v18362_v43, 4  ;;  %v22001_v7 = vld [vmem:[#allocation108_spill] sm:$0xff] }
 0x2e9   : > { %14267 = vmatmul.mubr.bf16.gmra.mrb[184].mxu1 %v21994_v37  ;;  %v18620_v46 = vadd.f32 %v14017_v14, %v3923_v8  ;;  %v4219_v0 = vpop.f32.mrb[111].mxu0  ;;  %v6318_v58 = vrot.slane %v15378_v1, 4  ;;  %v21998_v37 = vld [vmem:[#allocation101_spill] sm:$0xff]  ;;  %v5934_v14 = vsel %vm3940_vm2, %v5932_v22, %v5933_v27  ;;  %v5936_v39 = vsel %vm3940_vm2, %v5933_v27, %v5935_v51  ;;  %v22000_v1 = vld [vmem:[#allocation106_spill] sm:$0xff] }
 0x2ea   : > { %14270 = vmatprep.mubr.bf16.mxu1 %v21996_v17  ;;  %v18625_v62 = vadd.f32 %v4219_v0, %v3921_v4  ;;  %v21999_v8 = vpack.c.bf16 %v21997_v12, %v21998_v37  ;;  %v7000_v4 = vrot.slane %v18616_v40, 1  ;;  %v7002_v0 = vrot.slane %v18618_v53, 1 }
 0x2eb   : > { %v13972_v15 = vpop.f32.mrb[80].mxu1  ;;  %v22002_v29 = vpack.c.bf16 %v22000_v1, %v22001_v7  ;;  %v6677_v12 = vpack.c.bf16 %v18616_v40, %v18627_v23  ;;  %v6999_v22 = vrot.slane %v18627_v23, 1 }
 0x2ec   : > { %v3926_v3 = vadd.f32 %v13972_v15, %v18281_v26  ;;  %v3845_v17 = vpop.f32.mrb[81].mxu1  ;;  %v6320_v26 = vsel %vm4327_vm3, %v6318_v58, %v6319_v41  ;;  %v6322_v15 = vsel %vm4327_vm3, %v6319_v41, %v6321_v24  ;;  %v7003_v7 = vsel %vm1019_vm0, %v7000_v4, %v7002_v0  ;;  %v18668_v0 = vld [vmem:[#allocation2 + $0x58] sm:$0xf] }
 0x2ed   : > { %14315 = vmatmul.mubr.bf16.gmra.mrb[216].mxu0 %v21999_v8  ;;  %v3924_v43 = vadd.f32 %v3845_v17, %v18285_v9  ;;  %v13973_v63 = vpop.f32.mrb[82].mxu1  ;;  %v5984_v8 = vpack.c.bf16 %v5936_v39, %v5934_v14  ;;  %v7001_v17 = vsel %vm1019_vm0, %v6999_v22, %v7000_v4  ;;  %v18663_v39 = vld [vmem:[#allocation2 + $0x60] sm:$0xff] }
 0x2ee   : > { %14318 = vmatprep.mubr.bf16.mxu0 %v22002_v29  ;;  %v3927_v27 = vadd.f32 %v13973_v63, %v18289_v19  ;;  %v3848_v51 = vpop.f32.mrb[83].mxu1  ;;  %v14020_v37 = vpop.f32.mrb[112].mxu0  ;;  %v18655_v19 = vld [vmem:[#allocation2 + $0x68] sm:$0xff]  ;;  %v18657_v63 = vld [vmem:[#allocation2 + $0x70] sm:$0xf]  ;;  %v7111_v14 = vpack.c.bf16 %v7003_v7, %v7001_v17 }
 0x2ef   : > { %v3925_v1 = vadd.f32 %v3848_v51, %v18296_v33  ;;  %v18649_v29 = vadd.f32 %v14020_v37, %v3926_v3  ;;  %v4232_v9 = vpop.f32.mrb[113].mxu0  ;;  %v6370_v33 = vpack.c.bf16 %v6322_v15, %v6320_v26  ;;  %v18665_v3 = vld [vmem:[#allocation2 + $0x50] sm:$0xff]  ;;  %v18674_v37 = vld [vmem:[#allocation2 + $0x48] sm:$0xff] }
 0x2f0   : > { %v18653_v6 = vadd.f32 %v4232_v9, %v3924_v43  ;;  %v14021_v2 = vpop.f32.mrb[114].mxu0  ;;  %v7005_v4 = vrot.slane %v18665_v3, 1  ;;  %v7007_v43 = vrot.slane %v18668_v0, 1  ;;  %v7009_v9 = vrot.slane %v18663_v39, 1 }
 0x2f1   : > { %14271 = vmatmul.mubr.bf16.gmra.mrb[188].mxu1 %v5984_v8  ;;  %v18659_v58 = vadd.f32 %v14021_v2, %v3927_v27  ;;  %v4235_v41 = vpop.f32.mrb[115].mxu0  ;;  %v7010_v2 = vrot.slane %v18655_v19, 1  ;;  %v7004_v8 = vrot.slane %v18674_v37, 1 }
 0x2f2   : > { %14338 = vmatprep.mubr.bf16.mxu1 %v6677_v12  ;;  %v18661_v24 = vadd.f32 %v4235_v41, %v3925_v1  ;;  %v7012_v12 = vrot.slane %v18657_v63, 1  ;;  %v6678_v1 = vpack.c.bf16 %v18665_v3, %v18674_v37 }
 0x2f3   : > { %v13976_v22 = vpop.f32.mrb[84].mxu1 }
 0x2f4   : > { %v3930_v27 = vadd.f32 %v13976_v22, %v18375_v61  ;;  %v3861_v51 = vpop.f32.mrb[85].mxu1  ;;  %v6679_v61 = vpack.c.bf16 %v18655_v19, %v18663_v39 }
 0x2f5   : > { %14319 = vmatmul.mubr.bf16.gmra.mrb[220].mxu0 %v6370_v33  ;;  %v3928_v26 = vadd.f32 %v3861_v51, %v18379_v36  ;;  %v13977_v15 = vpop.f32.mrb[86].mxu1  ;;  %v7006_v33 = vsel %vm1019_vm0, %v7004_v8, %v7005_v4  ;;  %v15198_v36 = vld [vmem:[%s21393_s3 + $0x308] sm:$0xff]  }
 0x2f6   : > { %14386 = vmatprep.mubr.bf16.mxu0 %v7111_v14  ;;  %v3931_v17 = vadd.f32 %v13977_v15, %v18384_v5  ;;  %v3864_v7 = vpop.f32.mrb[87].mxu1  ;;  %v14024_v41 = vpop.f32.mrb[116].mxu0  ;;  %v7008_v14 = vsel %vm1019_vm0, %v7005_v4, %v7007_v43  ;;  %v7011_v5 = vsel %vm1019_vm0, %v7009_v9, %v7010_v2  ;;  %v7013_v15 = vsel %vm1019_vm0, %v7010_v2, %v7012_v12  ;;  %v18704_v2 = vld [vmem:[#allocation2 + $0x80] sm:$0xff]  ;;  %v18707_v12 = vld [vmem:[#allocation2 + $0x88] sm:$0xf] }
 0x2f7   : > { %v3929_v22 = vadd.f32 %v3864_v7, %v18388_v42  ;;  %v18690_v51 = vadd.f32 %v14024_v41, %v3930_v27  ;;  %v4248_v11 = vpop.f32.mrb[117].mxu0  ;;  %v7112_v43 = vpack.c.bf16 %v7008_v14, %v7006_v33  ;;  %v15204_v42 = vld [vmem:[%s21393_s3 + $0x348] sm:$0xff]   ;;  %v7113_v9 = vpack.c.bf16 %v7013_v15, %v7011_v5  ;;  %22004 = vst [vmem:[#allocation50_spill] sm:$0xff] %v18704_v2  ;;  %v18716_v7 = vld [vmem:[#allocation2 + $0xa0] sm:$0xf]  ;;  %v18720_v14 = vld [vmem:[#allocation2 + $0x78] sm:$0xff] }
 0x2f8   : > { %v18694_v20 = vadd.f32 %v4248_v11, %v3928_v26  ;;  %v14025_v38 = vpop.f32.mrb[118].mxu0  ;;  %v7015_v11 = vrot.slane %v18704_v2, 1  ;;  %22005 = vst [vmem:[#allocation78_spill] sm:$0xff] %v18707_v12  ;;  %22007 = vst [vmem:[#allocation98_spill] sm:$0xff] %v18716_v7  ;;  %v7022_v41 = vrot.slane %v18716_v7, 1 }
 0x2f9   : > { %14339 = vmatmul.mubr.bf16.vlgmr.msra.gmra.mrb[192].mxu1 %v6678_v1  ;;  %v18696_v8 = vadd.f32 %v14025_v38, %v3931_v17  ;;  %v4251_v4 = vpop.f32.mrb[119].mxu0  ;;  %v7017_v38 = vrot.slane %v18707_v12, 1  ;;  %v18713_v1 = vld [vmem:[#allocation2 + $0x98] sm:$0xff]  ;;  %22008 = vst [vmem:[#allocation97_spill] sm:$0xff] %v18720_v14  ;;  %v18750_v12 = vld [vmem:[#allocation2 + $0xd0] sm:$0xf] }
 0x2fa   : > { %14419 = vmatpush3.bf16.msra.mxu1 %v18540_v50  ;;  %14342 = vmatprep.mubr.bf16.mxu1 %v6679_v61  ;;  %v18702_v27 = vadd.f32 %v4251_v4, %v3929_v22  ;;  %v15199_v50 = vld [vmem:[%s21393_s3 + $0x310] sm:$0xff]   ;;  %22006 = vst [vmem:[#allocation77_spill] sm:$0xff] %v18713_v1  ;;  %v7020_v17 = vrot.slane %v18713_v1, 1  ;;  %v7014_v22 = vrot.slane %v18720_v14, 1  ;;  %v6680_v4 = vpack.c.bf16 %v18704_v2, %v18720_v14 }
 0x2fb   : > { %14420 = vmatprep.subr.bf16.mxu1 %v15198_v36  ;;  %v13980_v26 = vpop.f32.mrb[88].mxu1  ;;  %22011 = vst [vmem:[#allocation119_spill] sm:$0xff] %v18750_v12 }
 0x2fc   : > { %22003 = vst [vmem:[#allocation70_spill] sm:$0xff] %v18702_v27  ;;  %v3934_v61 = vadd.f32 %v13980_v26, %v18417_v59  ;;  %v3877_v33 = vpop.f32.mrb[89].mxu1 }
 0x2fd   : > { %14387 = vmatmul.mubr.bf16.vlgmr.msra.gmra.mrb[224].mxu0 %v7112_v43  ;;  %v3932_v5 = vadd.f32 %v3877_v33, %v18419_v60  ;;  %v13981_v15 = vpop.f32.mrb[90].mxu1  ;;  %v18727_v43 = vld [vmem:[#allocation2 + $0x90] sm:$0xff]  ;;  %v7018_v60 = vsel %vm1019_vm0, %v7015_v11, %v7017_v38  ;;  %v18748_v38 = vld [vmem:[#allocation2 + $0xc8] sm:$0xff] }
 0x2fe   : > { %14390 = vmatprep.mubr.bf16.mxu0 %v7113_v9  ;;  %14467 = vmatpush3.bf16.msra.mxu0 %v18556_v45  ;;  %22009 = vst [vmem:[#allocation112_spill] sm:$0xff] %v18727_v43  ;;  %v7019_v34 = vrot.slane %v18727_v43, 1  ;;  %v3935_v59 = vadd.f32 %v13981_v15, %v18424_v56  ;;  %v3880_v9 = vpop.f32.mrb[91].mxu1  ;;  %v14028_v26 = vpop.f32.mrb[120].mxu0  ;;  %v6681_v7 = vpack.c.bf16 %v18713_v1, %v18727_v43  ;;  %v15205_v33 = vld [vmem:[%s21393_s3 + $0x350] sm:$0xff]   ;;  %22010 = vst [vmem:[#allocation105_spill] sm:$0xff] %v18748_v38 }
 0x2ff   : > { %14421 = vmatpush3.bf16.msra.mxu1 %v15198_v36  ;;  %14468 = vmatprep.subr.bf16.mxu0 %v15204_v42  ;;  %v7016_v45 = vsel %vm1019_vm0, %v7014_v22, %v7015_v11  ;;  %v15200_v36 = vld [vmem:[%s21393_s3 + $0x318] sm:$0xff]   ;;  %v3933_v56 = vadd.f32 %v3880_v9, %v18433_v49  ;;  %v18742_v15 = vadd.f32 %v14028_v26, %v3934_v61  ;;  %v4264_v14 = vpop.f32.mrb[121].mxu0  ;;  %v18759_v61 = vld [vmem:[#allocation2 + $0xc0] sm:$0xff]  ;;  %v18773_v26 = vld [vmem:[#allocation2 + $0xa8] sm:$0xff] }
 0x300   : > { %14422 = vmatprep.subr.bf16.mxu1 %v15199_v50  ;;  %v7021_v43 = vsel %vm1019_vm0, %v7019_v34, %v7020_v17  ;;  %v7023_v22 = vsel %vm1019_vm0, %v7020_v17, %v7022_v41  ;;  %v18746_v1 = vadd.f32 %v4264_v14, %v3932_v5  ;;  %v14029_v11 = vpop.f32.mrb[122].mxu0  ;;  %v7114_v49 = vpack.c.bf16 %v7018_v60, %v7016_v45  ;;  %v15207_v34 = vld [vmem:[%s21393_s3 + $0x358] sm:$0xff]   ;;  %v18761_v14 = vld [vmem:[#allocation2 + $0xb0] sm:$0xff] }
 0x301   : > { %14343 = vmatmul.mubr.bf16.gmra.mrb[196].mxu1 %v6680_v4  ;;  %v18752_v2 = vadd.f32 %v14029_v11, %v3935_v59  ;;  %v4267_v27 = vpop.f32.mrb[123].mxu0  ;;  %v7115_v41 = vpack.c.bf16 %v7023_v22, %v7021_v43  ;;  %22014 = vst [vmem:[#allocation79_spill] sm:$0xff] %v18759_v61  ;;  %v7025_v5 = vrot.slane %v18761_v14, 1  ;;  %v7032_v43 = vrot.slane %v18750_v12, 1  ;;  %22015 = vst [vmem:[#allocation90_spill] sm:$0xff] %v18773_v26 }
 0x302   : > { %14469 = vmatpush3.bf16.msra.mxu0 %v15204_v42  ;;  %14346 = vmatprep.mubr.bf16.mxu1 %v6681_v7  ;;  %v18757_v17 = vadd.f32 %v4267_v27, %v3933_v56  ;;  %v18764_v42 = vld [vmem:[#allocation2 + $0xb8] sm:$0xf]  ;;  %v7030_v27 = vrot.slane %v18748_v38, 1  ;;  %v7024_v45 = vrot.slane %v18773_v26, 1  ;;  %v6682_v22 = vpack.c.bf16 %v18761_v14, %v18773_v26  ;;  %v18800_v12 = vld [vmem:[#allocation2 + $0x100] sm:$0xf] }
 0x303   : > { %22012 = vst [vmem:[#allocation118_spill] sm:$0xff] %v18752_v2  ;;  %14423 = vmatpush3.bf16.msra.mxu1 %v15199_v50  ;;  %v7027_v4 = vrot.slane %v18764_v42, 1  ;;  %v15201_v50 = vld [vmem:[%s21393_s3 + $0x320] sm:$0xff]   ;;  %14470 = vmatprep.subr.bf16.mxu0 %v15205_v33  ;;  %v13984_v7 = vpop.f32.mrb[92].mxu1  ;;  %v7029_v11 = vrot.slane %v18759_v61, 1  ;;  %22017 = vst [vmem:[#allocation99_spill] sm:$0xff] %v18800_v12 }
 0x304   : > { %22013 = vst [vmem:[#allocation87_spill] sm:$0xff] %v18757_v17  ;;  %14424 = vmatprep.subr.bf16.mxu1 %v15200_v36  ;;  %v3938_v59 = vadd.f32 %v13984_v7, %v18479_v30  ;;  %v3893_v9 = vpop.f32.mrb[93].mxu1  ;;  %v7026_v17 = vsel %vm1019_vm0, %v7024_v45, %v7025_v5  ;;  %v7033_v45 = vsel %vm1019_vm0, %v7030_v27, %v7032_v43 }
 0x305   : > { %14391 = vmatmul.mubr.bf16.gmra.mrb[228].mxu0 %v7114_v49  ;;  %v3936_v60 = vadd.f32 %v3893_v9, %v18481_v44  ;;  %v13985_v56 = vpop.f32.mrb[94].mxu1  ;;  %v15203_v44 = vld [vmem:[%s21393_s3 + $0x328] sm:$0xff]  }
 0x306   : > { %14394 = vmatprep.mubr.bf16.mxu0 %v7115_v41  ;;  %14471 = vmatpush3.bf16.msra.mxu0 %v15205_v33  ;;  %v3939_v49 = vadd.f32 %v13985_v56, %v18486_v47  ;;  %v3896_v30 = vpop.f32.mrb[95].mxu1  ;;  %v14032_v7 = vpop.f32.mrb[124].mxu0  ;;  %v6683_v41 = vpack.c.bf16 %v18748_v38, %v18759_v61  ;;  %v7028_v33 = vsel %vm1019_vm0, %v7025_v5, %v7027_v4  ;;  %v18798_v4 = vld [vmem:[#allocation2 + $0xf8] sm:$0xff] }
 0x307   : > { %14425 = vmatpush3.bf16.msra.mxu1 %v15200_v36  ;;  %14472 = vmatprep.subr.bf16.mxu0 %v15207_v34  ;;  %v15208_v36 = vld [vmem:[%s21393_s3 + $0x360] sm:$0xff]   ;;  %v3937_v47 = vadd.f32 %v3896_v30, %v18494_v54  ;;  %v18792_v9 = vadd.f32 %v14032_v7, %v3938_v59  ;;  %v4280_v56 = vpop.f32.mrb[125].mxu0  ;;  %v7031_v61 = vsel %vm1019_vm0, %v7029_v11, %v7030_v27  ;;  %v15210_v59 = vld [vmem:[%s21393_s3 + $0x368] sm:$0xff]  }
 0x308   : > { %14426 = vmatprep.subr.bf16.mxu1 %v15201_v50  ;;  %v18796_v26 = vadd.f32 %v4280_v56, %v3936_v60  ;;  %v14033_v5 = vpop.f32.mrb[126].mxu0  ;;  %22016 = vst [vmem:[#allocation81_spill] sm:$0xff] %v18798_v4  ;;  %v7116_v54 = vpack.c.bf16 %v7028_v33, %v7026_v17  ;;  %v7117_v43 = vpack.c.bf16 %v7033_v45, %v7031_v61  ;;  %v18809_v60 = vld [vmem:[#allocation2 + $0xf0] sm:$0xff]  ;;  %v7042_v61 = vrot.slane %v18800_v12, 1 }
 0x309   : > { %14347 = vmatmul.mubr.bf16.gmra.mrb[200].mxu1 %v6682_v22  ;;  %v18802_v38 = vadd.f32 %v14033_v5, %v3939_v49  ;;  %v4283_v2 = vpop.f32.mrb[127].mxu0  ;;  %22019 = vst [vmem:[#allocation103_spill] sm:$0xff] %v18809_v60  ;;  %v18811_v22 = vld [vmem:[#allocation2 + $0xe0] sm:$0xff]  ;;  %v15206_v17 = vld [vmem:[%s21393_s3 + $0x330] sm:$0xff]   ;;  %v7039_v5 = vrot.slane %v18809_v60, 1 }
 0x30a   : > { %14473 = vmatpush3.bf16.msra.mxu0 %v15207_v34  ;;  %14350 = vmatprep.mubr.bf16.mxu1 %v6683_v41  ;;  %v18807_v27 = vadd.f32 %v4283_v2, %v3937_v47  ;;  %v7035_v11 = vrot.slane %v18811_v22, 1  ;;  %v18814_v34 = vld [vmem:[#allocation2 + $0xe8] sm:$0xf]  ;;  %v7040_v2 = vrot.slane %v18798_v4, 1  ;;  %v18823_v41 = vld [vmem:[#allocation2 + $0xd8] sm:$0xff] }
 0x30b   : > { %14427 = vmatpush3.bf16.msra.mxu1 %v15201_v50  ;;  %v7037_v49 = vrot.slane %v18814_v34, 1  ;;  %14474 = vmatprep.subr.bf16.mxu0 %v15208_v36  ;;  %v14052_v50 = vpop.f32.mrb[96].mxu1  ;;  %22020 = vst [vmem:[#allocation96_spill] sm:$0xff] %v18823_v41  ;;  %v7034_v33 = vrot.slane %v18823_v41, 1  ;;  %v6684_v45 = vpack.c.bf16 %v18811_v22, %v18823_v41 }
 0x30c   : > { %22018 = vst [vmem:[#allocation92_spill] sm:$0xff] %v18807_v27  ;;  %14428 = vmatprep.subr.bf16.mxu1 %v15203_v44  ;;  %v4684_v30 = vadd.f32 %v14052_v50, %v18515_v52  ;;  %v4555_v7 = vpop.f32.mrb[97].mxu1 }
 0x30d   : > { %14395 = vmatmul.mubr.bf16.gmra.mrb[232].mxu0 %v7116_v54  ;;  %v4682_v47 = vadd.f32 %v4555_v7, %v18519_v21  ;;  %v14053_v56 = vpop.f32.mrb[98].mxu1  ;;  %v7036_v12 = vsel %vm1019_vm0, %v7034_v33, %v7035_v11  ;;  %v15209_v21 = vld [vmem:[%s21393_s3 + $0x338] sm:$0xff]   ;;  %v7043_v33 = vsel %vm1019_vm0, %v7040_v2, %v7042_v61 }
 0x30e   : > { %14398 = vmatprep.mubr.bf16.mxu0 %v7117_v43  ;;  %14475 = vmatpush3.bf16.msra.mxu0 %v15208_v36  ;;  %v4685_v54 = vadd.f32 %v14053_v56, %v18524_v48  ;;  %v4558_v52 = vpop.f32.mrb[99].mxu1  ;;  %v14100_v50 = vpop.f32.mrb[128].mxu0  ;;  %v6685_v43 = vpack.c.bf16 %v18798_v4, %v18809_v60  ;;  %v7038_v36 = vsel %vm1019_vm0, %v7035_v11, %v7037_v49  ;;  %v18858_v61 = vld [vmem:[#allocation2 + $0x118] sm:$0xf] }
 0x30f   : > { %14429 = vmatpush3.bf16.msra.mxu1 %v15203_v44  ;;  %14476 = vmatprep.subr.bf16.mxu0 %v15210_v59  ;;  %v15211_v44 = vld [vmem:[%s21393_s3 + $0x370] sm:$0xff]   ;;  %v4683_v48 = vadd.f32 %v4558_v52, %v18533_v28  ;;  %v18842_v7 = vadd.f32 %v14100_v50, %v4684_v30  ;;  %v4878_v56 = vpop.f32.mrb[129].mxu0  ;;  %v7041_v60 = vsel %vm1019_vm0, %v7039_v5, %v7040_v2  ;;  %v15212_v28 = vld [vmem:[%s21393_s3 + $0x378] sm:$0xff]  }
 0x310   : > { %14430 = vmatprep.subr.bf16.mxu1 %v15206_v17  ;;  %v18846_v41 = vadd.f32 %v4878_v56, %v4682_v47  ;;  %v14101_v11 = vpop.f32.mrb[130].mxu0  ;;  %v7118_v27 = vpack.c.bf16 %v7038_v36, %v7036_v12  ;;  %v7119_v5 = vpack.c.bf16 %v7043_v33, %v7041_v60  ;;  %v18855_v52 = vld [vmem:[#allocation2 + $0x110] sm:$0xff]  ;;  %22023 = vst [vmem:[#allocation117_spill] sm:$0xff] %v18858_v61  ;;  %v18864_v12 = vld [vmem:[%s21393_s3 + $0x380] sm:$0xff]  }
 0x311   : > { %14351 = vmatmul.mubr.bf16.gmra.mrb[204].mxu1 %v6684_v45  ;;  %v18848_v49 = vadd.f32 %v14101_v11, %v4685_v54  ;;  %v4881_v4 = vpop.f32.mrb[131].mxu0  ;;  %22022 = vst [vmem:[#allocation107_spill] sm:$0xff] %v18855_v52  ;;  %v7045_v2 = vrot.slane %v18855_v52, 1  ;;  %v18869_v47 = vld [vmem:[#allocation2 + $0x130] sm:$0xf]  ;;  %v18879_v33 = vld [vmem:[#allocation2 + $0x120] sm:$0xff] }
 0x312   : > { %14477 = vmatpush3.bf16.msra.mxu0 %v15210_v59  ;;  %14354 = vmatprep.mubr.bf16.mxu1 %v6685_v43  ;;  %v18853_v30 = vadd.f32 %v4881_v4, %v4683_v48  ;;  %v7047_v59 = vrot.slane %v18858_v61, 1  ;;  %v18866_v4 = vld [vmem:[#allocation2 + $0x128] sm:$0xff]  ;;  %22024 = vst [vmem:[#allocation111_spill] sm:$0xff] %v18869_v47  ;;  %v7052_v45 = vrot.slane %v18869_v47, 1  ;;  %22026 = vst [vmem:[#allocation14_spill] sm:$0xff] %v18879_v33  ;;  %v7049_v11 = vrot.slane %v18879_v33, 1 }
 0x313   : > { %14431 = vmatpush3.bf16.msra.mxu1 %v15206_v17  ;;  %14478 = vmatprep.subr.bf16.mxu0 %v15211_v44  ;;  %v14056_v17 = vpop.f32.mrb[100].mxu1  ;;  %v7050_v60 = vrot.slane %v18866_v4, 1  ;;  %v18873_v43 = vld [vmem:[#allocation2 + $0x108] sm:$0xff] }
 0x314   : > { %22021 = vst [vmem:[#allocation114_spill] sm:$0xff] %v18853_v30  ;;  %14432 = vmatprep.subr.bf16.mxu1 %v15209_v21  ;;  %v4688_v54 = vadd.f32 %v14056_v17, %v18563_v55  ;;  %v4571_v50 = vpop.f32.mrb[101].mxu1  ;;  %22025 = vst [vmem:[#allocation15_spill] sm:$0xff] %v18873_v43  ;;  %v7044_v36 = vrot.slane %v18873_v43, 1  ;;  %v6686_v56 = vpack.c.bf16 %v18855_v52, %v18873_v43  ;;  %v18885_v55 = vld [vmem:[%s21393_s3 + $0x3c0] sm:$0xff]  }
 0x315   : > { %14399 = vmatmul.mubr.bf16.gmra.mrb[236].mxu0 %v7118_v27  ;;  %v4686_v48 = vadd.f32 %v4571_v50, %v18565_v10  ;;  %v14057_v27 = vpop.f32.mrb[102].mxu1  ;;  %v6687_v10 = vpack.c.bf16 %v18866_v4, %v18879_v33  ;;  %v7048_v43 = vsel %vm1019_vm0, %v7045_v2, %v7047_v59  ;;  %v7051_v30 = vsel %vm1019_vm0, %v7049_v11, %v7050_v60  ;;  %v18902_v59 = vld [vmem:[#allocation2 + $0x140] sm:$0xff] }
 0x316   : > { %14402 = vmatprep.mubr.bf16.mxu0 %v7119_v5  ;;  %14479 = vmatpush3.bf16.msra.mxu0 %v15211_v44  ;;  %v4689_v5 = vadd.f32 %v14057_v27, %v18567_v18  ;;  %v4574_v44 = vpop.f32.mrb[103].mxu1  ;;  %v14104_v17 = vpop.f32.mrb[132].mxu0  ;;  %v7046_v50 = vsel %vm1019_vm0, %v7044_v36, %v7045_v2  ;;  %v7053_v18 = vsel %vm1019_vm0, %v7050_v60, %v7052_v45  ;;  %v18911_v45 = vld [vmem:[#allocation2 + $0x158] sm:$0xff] }
 0x317   : > { %14433 = vmatpush3.bf16.msra.mxu1 %v15209_v21  ;;  %14480 = vmatprep.subr.bf16.mxu0 %v15212_v28  ;;  %v4687_v21 = vadd.f32 %v4574_v44, %v18573_v25  ;;  %v18894_v47 = vadd.f32 %v14104_v17, %v4688_v54  ;;  %v4894_v61 = vpop.f32.mrb[133].mxu0  ;;  %v7120_v2 = vpack.c.bf16 %v7048_v43, %v7046_v50  ;;  %v7055_v25 = vrot.slane %v18902_v59, 1  ;;  %v18905_v54 = vld [vmem:[#allocation2 + $0x148] sm:$0xf] }
 0x318   : > { %14514 = vmatprep.subr.bf16.mxu1 %v18864_v12  ;;  %v18898_v27 = vadd.f32 %v4894_v61, %v4686_v48  ;;  %v14105_v52 = vpop.f32.mrb[134].mxu0  ;;  %22028 = vst [vmem:[#allocation16_spill] sm:$0xff] %v18905_v54  ;;  %v7057_v11 = vrot.slane %v18905_v54, 1  ;;  %v7121_v60 = vpack.c.bf16 %v7053_v18, %v7051_v30  ;;  %22030 = vst [vmem:[#allocation18_spill] sm:$0xff] %v18911_v45 }
 0x319   : > { %14355 = vmatmul.mubr.bf16.gmra.mrb[208].mxu1 %v6686_v56  ;;  %v18900_v33 = vadd.f32 %v14105_v52, %v4689_v5  ;;  %v4897_v36 = vpop.f32.mrb[135].mxu0  ;;  %v18914_v52 = vld [vmem:[#allocation2 + $0x160] sm:$0xf]  ;;  %v18917_v56 = vld [vmem:[#allocation2 + $0x138] sm:$0xff] }
 0x31a   : > { %14481 = vmatpush3.bf16.msra.mxu0 %v15212_v28  ;;  %14358 = vmatprep.mubr.bf16.mxu1 %v6687_v10  ;;  %v18909_v61 = vadd.f32 %v4897_v36, %v4687_v21  ;;  %v7060_v28 = vrot.slane %v18911_v45, 1  ;;  %22031 = vst [vmem:[#allocation21_spill] sm:$0xff] %v18914_v52  ;;  %v7062_v43 = vrot.slane %v18914_v52, 1  ;;  %v7054_v5 = vrot.slane %v18917_v56, 1  ;;  %v18921_v10 = vld [vmem:[#allocation2 + $0x150] sm:$0xff] }
 0x31b   : > { %22027 = vst [vmem:[#allocation17_spill] sm:$0xff] %v18900_v33  ;;  %14562 = vmatprep.subr.bf16.mxu0 %v18885_v55  ;;  %v14060_v48 = vpop.f32.mrb[104].mxu1  ;;  %22032 = vst [vmem:[#allocation20_spill] sm:$0xff] %v18921_v10  ;;  %v7059_v30 = vrot.slane %v18921_v10, 1  ;;  %v7058_v36 = vsel %vm1019_vm0, %v7055_v25, %v7057_v11  ;;  %v18941_v11 = vld [vmem:[#allocation2 + $0x190] sm:$0xf] }
 0x31c   : > { %22029 = vst [vmem:[#allocation19_spill] sm:$0xff] %v18909_v61  ;;  %v4692_v44 = vadd.f32 %v14060_v48, %v18582_v31  ;;  %v4587_v17 = vpop.f32.mrb[105].mxu1  ;;  %v7056_v18 = vsel %vm1019_vm0, %v7054_v5, %v7055_v25  ;;  %v6688_v31 = vpack.c.bf16 %v18902_v59, %v18917_v56  ;;  %v7063_v48 = vsel %vm1019_vm0, %v7060_v28, %v7062_v43  ;;  %v18937_v25 = vld [vmem:[#allocation2 + $0x180] sm:$0xff] }
 0x31d   : > { %14403 = vmatmul.mubr.bf16.gmra.mrb[240].mxu0 %v7120_v2  ;;  %v4690_v50 = vadd.f32 %v4587_v17, %v18584_v16  ;;  %v14061_v21 = vpop.f32.mrb[106].mxu1  ;;  %v6689_v5 = vpack.c.bf16 %v18911_v45, %v18921_v10  ;;  %22034 = vst [vmem:[#allocation22_spill] sm:$0xff] %v18941_v11 }
 0x31e   : > { %14406 = vmatprep.mubr.bf16.mxu0 %v7121_v60  ;;  %v4693_v2 = vadd.f32 %v14061_v21, %v18589_v57  ;;  %v4590_v52 = vpop.f32.mrb[107].mxu1  ;;  %v14108_v61 = vpop.f32.mrb[136].mxu0  ;;  %v7061_v60 = vsel %vm1019_vm0, %v7059_v30, %v7060_v28  ;;  %v18939_v57 = vld [vmem:[#allocation2 + $0x188] sm:$0xff]  ;;  %v7122_v30 = vpack.c.bf16 %v7058_v36, %v7056_v18  ;;  %v7072_v18 = vrot.slane %v18941_v11, 1 }
 0x31f   : > { %v4691_v54 = vadd.f32 %v4590_v52, %v18594_v13  ;;  %v18933_v33 = vadd.f32 %v14108_v61, %v4692_v44  ;;  %v4910_v16 = vpop.f32.mrb[137].mxu0  ;;  %v7123_v61 = vpack.c.bf16 %v7063_v48, %v7061_v60  ;;  %v18947_v52 = vld [vmem:[#allocation2 + $0x170] sm:$0xff]  ;;  %v18950_v44 = vld [vmem:[#allocation2 + $0x178] sm:$0xf]  ;;  %v7388_v11 = vrot.slane %v18618_v53, 2 }
 0x320   : > { %v18943_v17 = vadd.f32 %v4910_v16, %v4690_v50  ;;  %v14109_v21 = vpop.f32.mrb[138].mxu0  ;;  %22037 = vst [vmem:[#allocation25_spill] sm:$0xff] %v18947_v52  ;;  %v7065_v43 = vrot.slane %v18947_v52, 1  ;;  %22038 = vst [vmem:[#allocation24_spill] sm:$0xff] %v18950_v44  ;;  %v7069_v50 = vrot.slane %v18937_v25, 1 }
 0x321   : > { %22033 = vst [vmem:[#allocation23_spill] sm:$0xff] %v18933_v33  ;;  %14359 = vmatmul.mubr.bf16.gmra.mrb[212].mxu1 %v6688_v31  ;;  %v18945_v28 = vadd.f32 %v14109_v21, %v4693_v2  ;;  %v4913_v13 = vpop.f32.mrb[139].mxu0  ;;  %v7067_v33 = vrot.slane %v18950_v44, 1  ;;  %v7070_v31 = vrot.slane %v18939_v57, 1  ;;  %v18958_v2 = vld [vmem:[#allocation2 + $0x168] sm:$0xff] }
 0x322   : > { %22035 = vst [vmem:[#allocation27_spill] sm:$0xff] %v18943_v17  ;;  %14362 = vmatprep.mubr.bf16.mxu1 %v6689_v5  ;;  %v18953_v10 = vadd.f32 %v4913_v13, %v4691_v54  ;;  %22040 = vst [vmem:[#allocation28_spill] sm:$0xff] %v18958_v2  ;;  %v7064_v60 = vrot.slane %v18958_v2, 1  ;;  %v7385_v5 = vrot.slane %v18627_v23, 2  ;;  %v7386_v54 = vrot.slane %v18616_v40, 2 }
 0x323   : > { %22036 = vst [vmem:[#allocation26_spill] sm:$0xff] %v18945_v28  ;;  %v14064_v36 = vpop.f32.mrb[108].mxu1  ;;  %v7073_v17 = vsel %vm1019_vm0, %v7070_v31, %v7072_v18 }
 0x324   : > { %22039 = vst [vmem:[#allocation29_spill] sm:$0xff] %v18953_v10  ;;  %v4696_v48 = vadd.f32 %v14064_v36, %v18607_v35  ;;  %v4603_v16 = vpop.f32.mrb[109].mxu1  ;;  %v6690_v10 = vpack.c.bf16 %v18947_v52, %v18958_v2  ;;  %v7071_v36 = vsel %vm1019_vm0, %v7069_v50, %v7070_v31  ;;  %v7771_v2 = vrot.slane %v18627_v23, 3  ;;  %v18989_v23 = vld [vmem:[#allocation2 + $0x198] sm:$0xff] }
 0x325   : > { %14407 = vmatmul.mubr.bf16.gmra.mrb[244].mxu0 %v7122_v30  ;;  %v4694_v21 = vadd.f32 %v4603_v16, %v18611_v32  ;;  %v14065_v13 = vpop.f32.mrb[110].mxu1  ;;  %v7066_v30 = vsel %vm1019_vm0, %v7064_v60, %v7065_v43  ;;  %v6691_v60 = vpack.c.bf16 %v18939_v57, %v18937_v25  ;;  %v7774_v50 = vrot.slane %v18618_v53, 3 }
 0x326   : > { %14410 = vmatprep.mubr.bf16.mxu0 %v7123_v61  ;;  %v4697_v28 = vadd.f32 %v14065_v13, %v18620_v46  ;;  %v4606_v44 = vpop.f32.mrb[111].mxu1  ;;  %v14112_v35 = vpop.f32.mrb[140].mxu0  ;;  %v7068_v61 = vsel %vm1019_vm0, %v7065_v43, %v7067_v33  ;;  %v7387_v33 = vsel %vm1196_vm1, %v7385_v5, %v7386_v54  ;;  %v7772_v43 = vrot.slane %v18616_v40, 3  ;;  %v18995_v5 = vld [vmem:[#allocation2 + $0x1a8] sm:$0xf] }
 0x327   : > { %v4695_v32 = vadd.f32 %v4606_v44, %v18625_v62  ;;  %v18974_v16 = vadd.f32 %v14112_v35, %v4696_v48  ;;  %v4926_v45 = vpop.f32.mrb[141].mxu0  ;;  %v7124_v44 = vpack.c.bf16 %v7068_v61, %v7066_v30  ;;  %v7125_v18 = vpack.c.bf16 %v7073_v17, %v7071_v36 }
 0x328   : > { %v18979_v52 = vadd.f32 %v4926_v45, %v4694_v21  ;;  %v14113_v46 = vpop.f32.mrb[142].mxu0  ;;  %v7389_v48 = vsel %vm1196_vm1, %v7386_v54, %v7388_v11  ;;  %v7074_v45 = vrot.slane %v18989_v23, 1  ;;  %v7077_v53 = vrot.slane %v18995_v5, 1 }
 0x329   : > { %14363 = vmatmul.mubr.bf16.gmra.mrb[216].mxu1 %v6690_v10  ;;  %v18984_v31 = vadd.f32 %v14113_v46, %v4697_v28  ;;  %v4929_v62 = vpop.f32.mrb[143].mxu0  ;;  %v18992_v10 = vld [vmem:[#allocation2 + $0x1a0] sm:$0xff]  ;;  %v7497_v11 = vpack.c.bf16 %v7389_v48, %v7387_v33  ;;  %v7773_v54 = vsel %vm3940_vm2, %v7771_v2, %v7772_v43  ;;  %v7775_v30 = vsel %vm3940_vm2, %v7772_v43, %v7774_v50 }
 0x32a   : > { %14366 = vmatprep.mubr.bf16.mxu1 %v6691_v60  ;;  %v18987_v13 = vadd.f32 %v4929_v62, %v4695_v32  ;;  %v7075_v40 = vrot.slane %v18992_v10, 1  ;;  %v7390_v36 = vrot.slane %v18674_v37, 2  ;;  %v7391_v32 = vrot.slane %v18665_v3, 2 }
 0x32b   : > { %v14068_v28 = vpop.f32.mrb[112].mxu1  ;;  %v7393_v60 = vrot.slane %v18668_v0, 2  ;;  %v6692_v33 = vpack.c.bf16 %v18992_v10, %v18989_v23  ;;  %v7396_v3 = vrot.slane %v18655_v19, 2  ;;  %v7398_v0 = vrot.slane %v18657_v63, 2 }
 0x32c   : > { %v4700_v17 = vadd.f32 %v14068_v28, %v18649_v29  ;;  %v4619_v21 = vpop.f32.mrb[113].mxu1  ;;  %v7076_v2 = vsel %vm1019_vm0, %v7074_v45, %v7075_v40  ;;  %v7078_v43 = vsel %vm1019_vm0, %v7075_v40, %v7077_v53  ;;  %v7392_v40 = vsel %vm1196_vm1, %v7390_v36, %v7391_v32 }
 0x32d   : > { %14411 = vmatmul.mubr.bf16.gmra.mrb[248].mxu0 %v7124_v44  ;;  %v4698_v35 = vadd.f32 %v4619_v21, %v18653_v6  ;;  %v14069_v61 = vpop.f32.mrb[114].mxu1  ;;  %v7126_v45 = vpack.c.bf16 %v7078_v43, %v7076_v2  ;;  %v7782_v21 = vrot.slane %v18655_v19, 3  ;;  %v7781_v36 = vrot.slane %v18663_v39, 3 }
 0x32e   : > { %14414 = vmatprep.mubr.bf16.mxu0 %v7125_v18  ;;  %v4701_v46 = vadd.f32 %v14069_v61, %v18659_v58  ;;  %v4622_v62 = vpop.f32.mrb[115].mxu1  ;;  %v14116_v29 = vpop.f32.mrb[144].mxu0  ;;  %v7883_v18 = vpack.c.bf16 %v7775_v30, %v7773_v54  ;;  %v7399_v30 = vsel %vm1196_vm1, %v7396_v3, %v7398_v0 }
 0x32f   : > { %v4699_v6 = vadd.f32 %v4622_v62, %v18661_v24  ;;  %v19011_v50 = vadd.f32 %v14116_v29, %v4700_v17  ;;  %v4942_v37 = vpop.f32.mrb[145].mxu0  ;;  %v7395_v24 = vrot.slane %v18663_v39, 2  ;;  %v7394_v17 = vsel %vm1196_vm1, %v7391_v32, %v7393_v60 }
 0x330   : > { %v19015_v44 = vadd.f32 %v4942_v37, %v4698_v35  ;;  %v14117_v58 = vpop.f32.mrb[146].mxu0  ;;  %v7784_v35 = vrot.slane %v18657_v63, 3  ;;  %v7498_v32 = vpack.c.bf16 %v7394_v17, %v7392_v40  ;;  %v7783_v2 = vsel %vm3940_vm2, %v7781_v36, %v7782_v21  ;;  %v22047_v36 = vld [vmem:[#allocation112_spill] sm:$0xff] }
 0x331   : > { %14367 = vmatmul.mubr.bf16.gmra.mrb[220].mxu1 %v6692_v33  ;;  %v19017_v48 = vadd.f32 %v14117_v58, %v4701_v46  ;;  %v4945_v28 = vpop.f32.mrb[147].mxu0  ;;  %v7397_v54 = vsel %vm1196_vm1, %v7395_v24, %v7396_v3  ;;  %v22042_v3 = vld [vmem:[#allocation50_spill] sm:$0xff] }
 0x332   : > { %14434 = vmatprep.mubr.bf16.mxu1 %v7497_v11  ;;  %v19021_v53 = vadd.f32 %v4945_v28, %v4699_v6  ;;  %v7499_v33 = vpack.c.bf16 %v7399_v30, %v7397_v54  ;;  %v7785_v43 = vsel %vm3940_vm2, %v7782_v21, %v7784_v35  ;;  %v22041_v6 = vld [vmem:[#allocation70_spill] sm:$0xff]  ;;  %v7401_v0 = vrot.slane %v22042_v3, 2  ;;  %v15220_v30 = vld [vmem:[%s21393_s3 + $0x3c8] sm:$0xff]  }
 0x333   : > { %v14072_v61 = vpop.f32.mrb[116].mxu1  ;;  %v22043_v58 = vld [vmem:[#allocation78_spill] sm:$0xff] }
 0x334   : > { %v4704_v11 = vadd.f32 %v14072_v61, %v18690_v51  ;;  %v4635_v46 = vpop.f32.mrb[117].mxu1  ;;  %v15214_v51 = vld [vmem:[%s21393_s3 + $0x388] sm:$0xff]   ;;  %v22045_v24 = vld [vmem:[#allocation98_spill] sm:$0xff]  ;;  %v22046_v61 = vld [vmem:[#allocation97_spill] sm:$0xff] }
 0x335   : > { %14415 = vmatmul.mubr.bf16.gmra.mrb[252].mxu0 %v7126_v45  ;;  %v4702_v62 = vadd.f32 %v4635_v46, %v18694_v20  ;;  %v14073_v29 = vpop.f32.mrb[118].mxu1  ;;  %v22044_v45 = vld [vmem:[#allocation77_spill] sm:$0xff]  ;;  %v7408_v17 = vrot.slane %v22045_v24, 2  ;;  %v7400_v54 = vrot.slane %v22046_v61, 2  ;;  %v7885_v46 = vpack.c.bf16 %v7785_v43, %v7783_v2 }
 0x336   : > { %14482 = vmatprep.mubr.bf16.mxu0 %v7883_v18  ;;  %v4705_v19 = vadd.f32 %v14073_v29, %v18696_v8  ;;  %v4638_v60 = vpop.f32.mrb[119].mxu1  ;;  %v14120_v63 = vpop.f32.mrb[148].mxu0  ;;  %v7403_v8 = vrot.slane %v22043_v58, 2  ;;  %v7406_v40 = vrot.slane %v22044_v45, 2  ;;  %v15215_v29 = vld [vmem:[%s21393_s3 + $0x390] sm:$0xff]   ;;  %v7411_v58 = vrot.slane %v18761_v14, 2 }
 0x337   : > { %v4703_v37 = vadd.f32 %v4638_v60, %v22041_v6  ;;  %v19038_v39 = vadd.f32 %v14120_v63, %v4704_v11  ;;  %v4958_v20 = vpop.f32.mrb[149].mxu0  ;;  %v7402_v63 = vsel %vm1196_vm1, %v7400_v54, %v7401_v0  ;;  %v15221_v14 = vld [vmem:[%s21393_s3 + $0x3d0] sm:$0xff]  }
 0x338   : > { %v19042_v18 = vadd.f32 %v4958_v20, %v4702_v62  ;;  %v14121_v28 = vpop.f32.mrb[150].mxu0  ;;  %v7405_v62 = vrot.slane %v22047_v36, 2  ;;  %v7409_v43 = vsel %vm1196_vm1, %v7406_v40, %v7408_v17  ;;  %v22055_v36 = vld [vmem:[#allocation90_spill] sm:$0xff] }
 0x339   : > { %14435 = vmatmul.mubr.bf16.vlgmr.msra.gmra.mrb[224].mxu1 %v7498_v32  ;;  %v19046_v21 = vadd.f32 %v14121_v28, %v4705_v19  ;;  %v4961_v35 = vpop.f32.mrb[151].mxu0  ;;  %v22049_v19 = vld [vmem:[#allocation30_spill] sm:$0xff]  ;;  %v7413_v28 = vrot.slane %v18764_v42, 2  ;;  %v22054_v42 = vld [vmem:[#allocation87_spill] sm:$0xff] }
 0x33a   : > { %14515 = vmatpush3.bf16.msra.mxu1 %v18864_v12  ;;  %14438 = vmatprep.mubr.bf16.mxu1 %v7499_v33  ;;  %v19053_v11 = vadd.f32 %v4961_v35, %v4703_v37  ;;  %v22048_v12 = vld [vmem:[#allocation32_spill] sm:$0xff]  ;;  %v7404_v33 = vsel %vm1196_vm1, %v7401_v0, %v7403_v8  ;;  %v7407_v2 = vsel %vm1196_vm1, %v7405_v62, %v7406_v40  ;;  %v22051_v0 = vld [vmem:[#allocation118_spill] sm:$0xff]  ;;  %v22052_v35 = vld [vmem:[#allocation105_spill] sm:$0xff]  ;;  %v7410_v62 = vrot.slane %v22055_v36, 2 }
 0x33b   : > { %14516 = vmatprep.subr.bf16.mxu1 %v15214_v51  ;;  %v14076_v32 = vpop.f32.mrb[120].mxu1  ;;  %v22050_v60 = vpack.c.bf16 %v22048_v12, %v22049_v19  ;;  %v7500_v24 = vpack.c.bf16 %v7404_v33, %v7402_v63  ;;  %v7416_v61 = vrot.slane %v22052_v35, 2  ;;  %v22053_v40 = vld [vmem:[#allocation119_spill] sm:$0xff] }
 0x33c   : > { %v4708_v6 = vadd.f32 %v14076_v32, %v18742_v15  ;;  %v4651_v37 = vpop.f32.mrb[121].mxu1  ;;  %v7418_v17 = vrot.slane %v22053_v40, 2  ;;  %v22056_v19 = vld [vmem:[#allocation79_spill] sm:$0xff] }
 0x33d   : > { %14483 = vmatmul.mubr.bf16.vlgmr.msra.gmra.mrb[0].mxu0 %v22050_v60  ;;  %v4706_v20 = vadd.f32 %v4651_v37, %v18746_v1  ;;  %v14077_v3 = vpop.f32.mrb[122].mxu1  ;;  %v15216_v1 = vld [vmem:[%s21393_s3 + $0x398] sm:$0xff]   ;;  %v7415_v60 = vrot.slane %v22056_v19, 2  ;;  %v7412_v37 = vsel %vm1196_vm1, %v7410_v62, %v7411_v58 }
 0x33e   : > { %14486 = vmatprep.mubr.bf16.mxu0 %v7885_v46  ;;  %14563 = vmatpush3.bf16.msra.mxu0 %v18885_v55  ;;  %v4709_v8 = vadd.f32 %v14077_v3, %v22051_v0  ;;  %v4654_v15 = vpop.f32.mrb[123].mxu1  ;;  %v14124_v45 = vpop.f32.mrb[152].mxu0  ;;  %v7501_v46 = vpack.c.bf16 %v7409_v43, %v7407_v2  ;;  %v7802_v2 = vrot.slane %v22052_v35, 3  ;;  %v15223_v43 = vld [vmem:[%s21393_s3 + $0x3d8] sm:$0xff]   ;;  %v7804_v0 = vrot.slane %v22053_v40, 3 }
 0x33f   : > { %14517 = vmatpush3.bf16.msra.mxu1 %v15214_v51  ;;  %14564 = vmatprep.subr.bf16.mxu0 %v15220_v30  ;;  %v4707_v55 = vadd.f32 %v4654_v15, %v22054_v42  ;;  %v19081_v51 = vadd.f32 %v14124_v45, %v4708_v6  ;;  %v4974_v54 = vpop.f32.mrb[153].mxu0  ;;  %v7414_v6 = vsel %vm1196_vm1, %v7411_v58, %v7413_v28  ;;  %v15217_v58 = vld [vmem:[%s21393_s3 + $0x3a0] sm:$0xff]   ;;  %v22057_v28 = vld [vmem:[#allocation40_spill] sm:$0xff]  ;;  %v7801_v45 = vrot.slane %v22056_v19, 3  ;;  %v22060_v42 = vld [vmem:[#allocation71_spill] sm:$0xff] }
 0x340   : > { %14518 = vmatprep.subr.bf16.mxu1 %v15215_v29  ;;  %v19084_v32 = vadd.f32 %v4974_v54, %v4706_v20  ;;  %v14125_v12 = vpop.f32.mrb[154].mxu0  ;;  %v7417_v3 = vsel %vm1196_vm1, %v7415_v60, %v7416_v61  ;;  %v7502_v40 = vpack.c.bf16 %v7414_v6, %v7412_v37  ;;  %v7421_v60 = vrot.slane %v18811_v22, 2 }
 0x341   : > { %14439 = vmatmul.mubr.bf16.gmra.mrb[228].mxu1 %v7500_v24  ;;  %v19087_v63 = vadd.f32 %v14125_v12, %v4709_v8  ;;  %v4977_v33 = vpop.f32.mrb[155].mxu0  ;;  %v22058_v8 = vld [vmem:[#allocation38_spill] sm:$0xff]  ;;  %v7803_v36 = vsel %vm3940_vm2, %v7801_v45, %v7802_v2 }
 0x342   : > { %14565 = vmatpush3.bf16.msra.mxu0 %v15220_v30  ;;  %14442 = vmatprep.mubr.bf16.mxu1 %v7501_v46  ;;  %v19095_v20 = vadd.f32 %v4977_v33, %v4707_v55  ;;  %v7419_v30 = vsel %vm1196_vm1, %v7416_v61, %v7418_v17  ;;  %v22059_v15 = vpack.c.bf16 %v22057_v28, %v22058_v8  ;;  %v22061_v61 = vld [vmem:[#allocation69_spill] sm:$0xff]  ;;  %v7423_v33 = vrot.slane %v18814_v34, 2 }
 0x343   : > { %14519 = vmatpush3.bf16.msra.mxu1 %v15215_v29  ;;  %14566 = vmatprep.subr.bf16.mxu0 %v15221_v14  ;;  %v14080_v29 = vpop.f32.mrb[124].mxu1  ;;  %v22062_v17 = vpack.c.bf16 %v22060_v42, %v22061_v61  ;;  %v7503_v46 = vpack.c.bf16 %v7419_v30, %v7417_v3  ;;  %v22064_v3 = vld [vmem:[#allocation81_spill] sm:$0xff]  ;;  %v22065_v30 = vld [vmem:[#allocation99_spill] sm:$0xff] }
 0x344   : > { %14520 = vmatprep.subr.bf16.mxu1 %v15216_v1  ;;  %v4712_v24 = vadd.f32 %v14080_v29, %v18792_v9  ;;  %v4667_v35 = vpop.f32.mrb[125].mxu1  ;;  %v7805_v9 = vsel %vm3940_vm2, %v7802_v2, %v7804_v0  ;;  %v7426_v2 = vrot.slane %v22064_v3, 2  ;;  %v7428_v22 = vrot.slane %v22065_v30, 2  ;;  %v22066_v29 = vld [vmem:[#allocation96_spill] sm:$0xff]  ;;  %v15226_v42 = vld [vmem:[%s21393_s3 + $0x3e8] sm:$0xff]  }
 0x345   : > { %14487 = vmatmul.mubr.bf16.gmra.mrb[4].mxu0 %v22059_v15  ;;  %v4710_v55 = vadd.f32 %v4667_v35, %v18796_v26  ;;  %v14081_v54 = vpop.f32.mrb[126].mxu1  ;;  %v15219_v26 = vld [vmem:[%s21393_s3 + $0x3a8] sm:$0xff]   ;;  %v7420_v28 = vrot.slane %v22066_v29, 2  ;;  %v7889_v45 = vpack.c.bf16 %v7805_v9, %v7803_v36 }
 0x346   : > { %14490 = vmatprep.mubr.bf16.mxu0 %v22062_v17  ;;  %14567 = vmatpush3.bf16.msra.mxu0 %v15221_v14  ;;  %v4713_v62 = vadd.f32 %v14081_v54, %v18802_v38  ;;  %v4670_v12 = vpop.f32.mrb[127].mxu1  ;;  %v14128_v19 = vpop.f32.mrb[156].mxu0  ;;  %v22063_v14 = vld [vmem:[#allocation92_spill] sm:$0xff]  ;;  %v22067_v35 = vld [vmem:[#allocation103_spill] sm:$0xff] }
 0x347   : > { %14521 = vmatpush3.bf16.msra.mxu1 %v15216_v1  ;;  %14568 = vmatprep.subr.bf16.mxu0 %v15223_v43  ;;  %v15224_v1 = vld [vmem:[%s21393_s3 + $0x3e0] sm:$0xff]   ;;  %v4711_v37 = vadd.f32 %v4670_v12, %v22063_v14  ;;  %v19124_v38 = vadd.f32 %v14128_v19, %v4712_v24  ;;  %v4990_v6 = vpop.f32.mrb[157].mxu0  ;;  %v7425_v24 = vrot.slane %v22067_v35, 2  ;;  %v7422_v17 = vsel %vm1196_vm1, %v7420_v28, %v7421_v60 }
 0x348   : > { %14522 = vmatprep.subr.bf16.mxu1 %v15217_v58  ;;  %v19128_v0 = vadd.f32 %v4990_v6, %v4710_v55  ;;  %v14129_v34 = vpop.f32.mrb[158].mxu0  ;;  %v15222_v55 = vld [vmem:[%s21393_s3 + $0x3b0] sm:$0xff]   ;;  %v7429_v12 = vsel %vm1196_vm1, %v7426_v2, %v7428_v22  ;;  %v7814_v19 = vrot.slane %v22065_v30, 3  ;;  %v22071_v22 = vld [vmem:[#allocation107_spill] sm:$0xff] }
 0x349   : > { %14443 = vmatmul.mubr.bf16.gmra.mrb[232].mxu1 %v7502_v40  ;;  %v19131_v8 = vadd.f32 %v14129_v34, %v4713_v62  ;;  %v4993_v15 = vpop.f32.mrb[159].mxu0  ;;  %v7424_v40 = vsel %vm1196_vm1, %v7421_v60, %v7423_v33  ;;  %v7427_v62 = vsel %vm1196_vm1, %v7425_v24, %v7426_v2  ;;  %v7811_v33 = vrot.slane %v22067_v35, 3  ;;  %v22073_v35 = vld [vmem:[#allocation117_spill] sm:$0xff] }
 0x34a   : > { %14569 = vmatpush3.bf16.msra.mxu0 %v15223_v43  ;;  %14446 = vmatprep.mubr.bf16.mxu1 %v7503_v46  ;;  %v19137_v61 = vadd.f32 %v4993_v15, %v4711_v37  ;;  %v7812_v43 = vrot.slane %v22064_v3, 3  ;;  %v22069_v46 = vld [vmem:[#allocation53_spill] sm:$0xff]  ;;  %v7504_v6 = vpack.c.bf16 %v7424_v40, %v7422_v17  ;;  %v7505_v2 = vpack.c.bf16 %v7429_v12, %v7427_v62  ;;  %v22075_v12 = vld [vmem:[#allocation15_spill] sm:$0xff] }
 0x34b   : > { %14523 = vmatpush3.bf16.msra.mxu1 %v15217_v58  ;;  %14570 = vmatprep.subr.bf16.mxu0 %v15224_v1  ;;  %v14148_v54 = vpop.f32.mrb[128].mxu1  ;;  %v22068_v58 = vld [vmem:[#allocation55_spill] sm:$0xff]  ;;  %v7433_v24 = vrot.slane %v22073_v35, 2 }
 0x34c   : > { %14524 = vmatprep.subr.bf16.mxu1 %v15219_v26  ;;  %v22070_v36 = vpack.c.bf16 %v22068_v58, %v22069_v46  ;;  %v5441_v9 = vadd.f32 %v14148_v54, %v18842_v7  ;;  %v5312_v60 = vpop.f32.mrb[129].mxu1  ;;  %v7813_v30 = vsel %vm3940_vm2, %v7811_v33, %v7812_v43  ;;  %v7431_v7 = vrot.slane %v22071_v22, 2  ;;  %v22074_v58 = vld [vmem:[#allocation111_spill] sm:$0xff]  ;;  %v22076_v33 = vld [vmem:[#allocation14_spill] sm:$0xff] }
 0x34d   : > { %v5439_v14 = vadd.f32 %v5312_v60, %v18846_v41  ;;  %v14149_v37 = vpop.f32.mrb[130].mxu1  ;;  %v15227_v41 = vld [vmem:[%s21393_s3 + $0x3f0] sm:$0xff]   ;;  %v7436_v54 = vrot.slane %v18866_v4, 2  ;;  %v7438_v46 = vrot.slane %v22074_v58, 2  ;;  %v19184_v4 = vld [vmem:[%s21393_s3 + $0x400] sm:$0xff]  }
 0x34e   : > { %14491 = vmatmul.mubr.bf16.gmra.mrb[8].mxu0 %v22070_v36  ;;  %v5442_v3 = vadd.f32 %v14149_v37, %v18848_v49  ;;  %v5315_v34 = vpop.f32.mrb[131].mxu1  ;;  %v14196_v29 = vpop.f32.mrb[160].mxu0  ;;  %v22077_v37 = vld [vmem:[#allocation88_spill] sm:$0xff] }
 0x34f   : > { %14494 = vmatprep.mubr.bf16.mxu0 %v7889_v45  ;;  %14571 = vmatpush3.bf16.msra.mxu0 %v15224_v1  ;;  %v15225_v1 = vld [vmem:[%s21393_s3 + $0x3b8] sm:$0xff]   ;;  %v19164_v15 = vadd.f32 %v14196_v29, %v5441_v9  ;;  %v5698_v49 = vpop.f32.mrb[161].mxu0  ;;  %v7815_v45 = vsel %vm3940_vm2, %v7812_v43, %v7814_v19  ;;  %v7430_v9 = vrot.slane %v22075_v12, 2  ;;  %v7439_v22 = vsel %vm1196_vm1, %v7436_v54, %v7438_v46  ;;  %v22081_v58 = vld [vmem:[#allocation16_spill] sm:$0xff] }
 0x350   : > { %14525 = vmatpush3.bf16.msra.mxu1 %v15219_v26  ;;  %14572 = vmatprep.subr.bf16.mxu0 %v15226_v42  ;;  %v22072_v26 = vld [vmem:[#allocation114_spill] sm:$0xff]  ;;  %v19168_v17 = vadd.f32 %v5698_v49, %v5439_v14  ;;  %v14197_v40 = vpop.f32.mrb[162].mxu0  ;;  %v15228_v43 = vld [vmem:[%s21393_s3 + $0x3f8] sm:$0xff]   ;;  %v7891_v60 = vpack.c.bf16 %v7815_v45, %v7813_v30  ;;  %v7435_v14 = vrot.slane %v22076_v33, 2 }
 0x351   : > { %14526 = vmatprep.subr.bf16.mxu1 %v15222_v55  ;;  %v5440_v28 = vadd.f32 %v5315_v34, %v22072_v26  ;;  %14447 = vmatmul.mubr.bf16.gmra.mrb[236].mxu1 %v7504_v6  ;;  %v19172_v36 = vadd.f32 %v14197_v40, %v5442_v3  ;;  %v5701_v62 = vpop.f32.mrb[163].mxu0  ;;  %v22078_v6 = vld [vmem:[#allocation85_spill] sm:$0xff]  ;;  %v7432_v3 = vsel %vm1196_vm1, %v7430_v9, %v7431_v7  ;;  %v19198_v49 = vld [vmem:[%s21393_s3 + $0x440] sm:$0xff]   ;;  %v7441_v40 = vrot.slane %v18902_v59, 2 }
 0x352   : > { %14450 = vmatprep.mubr.bf16.mxu1 %v7505_v2  ;;  %v7434_v34 = vsel %vm1196_vm1, %v7431_v7, %v7433_v24  ;;  %v7437_v30 = vsel %vm1196_vm1, %v7435_v14, %v7436_v54  ;;  %v22080_v7 = vld [vmem:[#allocation17_spill] sm:$0xff]  ;;  %v7443_v54 = vrot.slane %v22081_v58, 2  ;;  %v22083_v33 = vld [vmem:[#allocation18_spill] sm:$0xff] }
 0x353   : > { %14573 = vmatpush3.bf16.msra.mxu0 %v15226_v42  ;;  %v19178_v19 = vadd.f32 %v5701_v62, %v5440_v28  ;;  %v14152_v42 = vpop.f32.mrb[132].mxu1  ;;  %v7506_v24 = vpack.c.bf16 %v7434_v34, %v7432_v3  ;;  %v7507_v62 = vpack.c.bf16 %v7439_v22, %v7437_v30  ;;  %v7446_v14 = vrot.slane %v22083_v33, 2  ;;  %v22086_v30 = vld [vmem:[#allocation110_spill] sm:$0xff]  ;;  %v22087_v22 = vld [vmem:[#allocation104_spill] sm:$0xff] }
 0x354   : > { %14527 = vmatpush3.bf16.msra.mxu1 %v15222_v55  ;;  %14574 = vmatprep.subr.bf16.mxu0 %v15227_v41  ;;  %v22079_v55 = vpack.c.bf16 %v22077_v37, %v22078_v6  ;;  %v5445_v29 = vadd.f32 %v14152_v42, %v18894_v47  ;;  %v5328_v2 = vpop.f32.mrb[133].mxu1  ;;  %v22084_v42 = vld [vmem:[#allocation21_spill] sm:$0xff]  ;;  %v7444_v34 = vsel %vm1196_vm1, %v7441_v40, %v7443_v54  ;;  %v22094_v54 = vld [vmem:[#allocation27_spill] sm:$0xff]  ;;  %v22096_v33 = vld [vmem:[#allocation24_spill] sm:$0xff] }
 0x355   : > { %14528 = vmatprep.subr.bf16.mxu1 %v15225_v1  ;;  %v5443_v26 = vadd.f32 %v5328_v2, %v18898_v27  ;;  %v14153_v28 = vpop.f32.mrb[134].mxu1  ;;  %v22082_v27 = vld [vmem:[#allocation19_spill] sm:$0xff]  ;;  %v7448_v59 = vrot.slane %v22084_v42, 2  ;;  %v7453_v42 = vrot.slane %v22096_v33, 2  ;;  %v7842_v33 = vrot.slane %v18939_v57, 3 }
 0x356   : > { %14495 = vmatmul.mubr.bf16.gmra.mrb[12].mxu0 %v22079_v55  ;;  %v5446_v45 = vadd.f32 %v14153_v28, %v22080_v7  ;;  %v5331_v47 = vpop.f32.mrb[135].mxu1  ;;  %v14200_v35 = vpop.f32.mrb[164].mxu0 }
 0x357   : > { %14498 = vmatprep.mubr.bf16.mxu0 %v7891_v60  ;;  %14575 = vmatpush3.bf16.msra.mxu0 %v15227_v41  ;;  %v5444_v41 = vadd.f32 %v5331_v47, %v22082_v27  ;;  %v5714_v46 = vpop.f32.mrb[165].mxu0  ;;  %v7440_v60 = vrot.slane %v18917_v56, 2  ;;  %v22091_v47 = vld [vmem:[#allocation5_spill] sm:$0xff]  ;;  %v7449_v58 = vsel %vm1196_vm1, %v7446_v14, %v7448_v59 }
 0x358   : > { %14529 = vmatpush3.bf16.msra.mxu1 %v15225_v1  ;;  %14576 = vmatprep.subr.bf16.mxu0 %v15228_v43  ;;  %v19205_v1 = vadd.f32 %v14200_v35, %v5445_v29  ;;  %v19207_v12 = vadd.f32 %v5714_v46, %v5443_v26  ;;  %v14201_v9 = vpop.f32.mrb[166].mxu0  ;;  %v22085_v29 = vld [vmem:[#allocation20_spill] sm:$0xff]  ;;  %v22088_v26 = vpack.c.bf16 %v22086_v30, %v22087_v22  ;;  %v22093_v27 = vld [vmem:[#allocation25_spill] sm:$0xff]  ;;  %v7455_v22 = vrot.slane %v18937_v25, 2 }
 0x359   : > { %14610 = vmatprep.subr.bf16.mxu1 %v19184_v4  ;;  %14451 = vmatmul.mubr.bf16.gmra.mrb[240].mxu1 %v7506_v24  ;;  %v19212_v37 = vadd.f32 %v14201_v9, %v5446_v45  ;;  %v5717_v6 = vpop.f32.mrb[167].mxu0  ;;  %v7442_v3 = vsel %vm1196_vm1, %v7440_v60, %v7441_v40  ;;  %v7445_v2 = vrot.slane %v22085_v29, 2  ;;  %v22090_v45 = vld [vmem:[#allocation4_spill] sm:$0xff]  ;;  %v7451_v40 = vrot.slane %v22093_v27, 2  ;;  %v22099_v59 = vld [vmem:[#allocation29_spill] sm:$0xff] }
 0x35a   : > { %14454 = vmatprep.mubr.bf16.mxu1 %v7507_v62  ;;  %v19215_v55 = vadd.f32 %v5717_v6, %v5444_v41  ;;  %v22092_v35 = vpack.c.bf16 %v22090_v45, %v22091_v47  ;;  %v7508_v62 = vpack.c.bf16 %v7444_v34, %v7442_v3  ;;  %v22095_v9 = vld [vmem:[#allocation28_spill] sm:$0xff]  ;;  %v22097_v6 = vld [vmem:[#allocation26_spill] sm:$0xff] }
 0x35b   : > { %14577 = vmatpush3.bf16.msra.mxu0 %v15228_v43  ;;  %v14156_v56 = vpop.f32.mrb[136].mxu1  ;;  %v22089_v43 = vld [vmem:[#allocation23_spill] sm:$0xff]  ;;  %v7447_v24 = vsel %vm1196_vm1, %v7445_v2, %v7446_v14  ;;  %v7450_v60 = vrot.slane %v22095_v9, 2  ;;  %v7456_v2 = vrot.slane %v18939_v57, 2  ;;  %v7841_v9 = vrot.slane %v18937_v25, 3 }
 0x35c   : > { %14658 = vmatprep.subr.bf16.mxu0 %v19198_v49  ;;  %v5449_v28 = vadd.f32 %v14156_v56, %v22089_v43  ;;  %v5344_v7 = vpop.f32.mrb[137].mxu1  ;;  %v7509_v3 = vpack.c.bf16 %v7449_v58, %v7447_v24  ;;  %v22104_v25 = vld [vmem:[#allocation11_spill] sm:$0xff] }
 0x35d   : > { %v5447_v41 = vadd.f32 %v5344_v7, %v22094_v54  ;;  %v14157_v46 = vpop.f32.mrb[138].mxu1  ;;  %v7457_v24 = vsel %vm1196_vm1, %v7455_v22, %v7456_v2 }
 0x35e   : > { %14499 = vmatmul.mubr.bf16.gmra.mrb[16].mxu0 %v22088_v26  ;;  %v5450_v29 = vadd.f32 %v14157_v46, %v22097_v6  ;;  %v5347_v56 = vpop.f32.mrb[139].mxu1  ;;  %v14204_v30 = vpop.f32.mrb[168].mxu0  ;;  %v22098_v26 = vld [vmem:[#allocation22_spill] sm:$0xff]  ;;  %v7454_v46 = vsel %vm1196_vm1, %v7451_v40, %v7453_v42  ;;  %v22101_v6 = vld [vmem:[#allocation113_spill] sm:$0xff] }
 0x35f   : > { %14502 = vmatprep.mubr.bf16.mxu0 %v22092_v35  ;;  %v7458_v14 = vrot.slane %v22098_v26, 2  ;;  %v5448_v43 = vadd.f32 %v5347_v56, %v22099_v59  ;;  %v19238_v45 = vadd.f32 %v14204_v30, %v5449_v28  ;;  %v5730_v7 = vpop.f32.mrb[169].mxu0  ;;  %v7452_v35 = vsel %vm1196_vm1, %v7450_v60, %v7451_v40  ;;  %v22100_v60 = vld [vmem:[#allocation115_spill] sm:$0xff]  ;;  %v22103_v42 = vld [vmem:[#allocation10_spill] sm:$0xff] }
 0x360   : > { %v19240_v34 = vadd.f32 %v5730_v7, %v5447_v41  ;;  %v14205_v47 = vpop.f32.mrb[170].mxu0  ;;  %v7844_v41 = vrot.slane %v22098_v26, 3  ;;  %v22105_v30 = vpack.c.bf16 %v22103_v42, %v22104_v25  ;;  %v7510_v22 = vpack.c.bf16 %v7454_v46, %v7452_v35 }
 0x361   : > { %14455 = vmatmul.mubr.bf16.gmra.mrb[244].mxu1 %v7508_v62  ;;  %v19243_v27 = vadd.f32 %v14205_v47, %v5450_v29  ;;  %v5733_v54 = vpop.f32.mrb[171].mxu0  ;;  %v7459_v58 = vsel %vm1196_vm1, %v7456_v2, %v7458_v14  ;;  %v22102_v29 = vpack.c.bf16 %v22100_v60, %v22101_v6  ;;  %v7843_v7 = vsel %vm3940_vm2, %v7841_v9, %v7842_v33  ;;  %v15414_v9 = vld [vmem:[#allocation2 + $0x40] sm:$0xf]  ;;  %v15415_v6 = vld [vmem:[#allocation2 + $0x30] sm:$0xff] }
 0x362   : > { %14458 = vmatprep.mubr.bf16.mxu1 %v7509_v3  ;;  %v19248_v28 = vadd.f32 %v5733_v54, %v5448_v43  ;;  %v7511_v43 = vpack.c.bf16 %v7459_v58, %v7457_v24  ;;  %v7845_v3 = vsel %vm3940_vm2, %v7842_v33, %v7844_v41  ;;  %v7463_v35 = vrot.slane %v18995_v5, 2  ;;  %v15413_v24 = vld [vmem:[#allocation2 + $0x38] sm:$0xff] }
 0x363   : > { %v14160_v62 = vpop.f32.mrb[140].mxu1  ;;  %v8158_v58 = vrot.slane %v15413_v24, 4  ;;  %v8160_v60 = vrot.slane %v15414_v9, 4  ;;  %v7897_v41 = vpack.c.bf16 %v7845_v3, %v7843_v7  ;;  %v22107_v5 = vld [vmem:[#allocation121_spill] sm:$0xff]  ;;  %v15416_v24 = vld [vmem:[#allocation2 + $0x68] sm:$0xff] }
 0x364   : > { %v5453_v56 = vadd.f32 %v14160_v62, %v18974_v16  ;;  %v5360_v40 = vpop.f32.mrb[141].mxu1  ;;  %v7460_v16 = vrot.slane %v18989_v23, 2 }
 0x365   : > { %v5451_v57 = vadd.f32 %v5360_v40, %v18979_v52  ;;  %v14161_v59 = vpop.f32.mrb[142].mxu1  ;;  %v7461_v52 = vrot.slane %v18992_v10, 2 }
 0x366   : > { %14503 = vmatmul.mubr.bf16.gmra.mrb[20].mxu0 %v22102_v29  ;;  %v5454_v2 = vadd.f32 %v14161_v59, %v18984_v31  ;;  %v5363_v26 = vpop.f32.mrb[143].mxu1  ;;  %v14208_v14 = vpop.f32.mrb[172].mxu0  ;;  %v8157_v29 = vrot.slane %v15415_v6, 4  ;;  %v15418_v6 = vld [vmem:[#allocation2 + $0x60] sm:$0xff] }
 0x367   : > { %14506 = vmatprep.mubr.bf16.mxu0 %v22105_v30  ;;  %v5452_v47 = vadd.f32 %v5363_v26, %v18987_v13  ;;  %v19266_v54 = vadd.f32 %v14208_v14, %v5453_v56  ;;  %v5746_v62 = vpop.f32.mrb[173].mxu0  ;;  %v22106_v56 = vld [vmem:[#allocation133_spill] sm:$0xff]  ;;  %v7462_v42 = vsel %vm1196_vm1, %v7460_v16, %v7461_v52  ;;  %v7464_v25 = vsel %vm1196_vm1, %v7461_v52, %v7463_v35  ;;  %v19289_v52 = vld [vmem:[#allocation2 + $0x50] sm:$0xff] }
 0x368   : > { %v19270_v46 = vadd.f32 %v5746_v62, %v5451_v57  ;;  %v14209_v31 = vpop.f32.mrb[174].mxu0  ;;  %v22108_v40 = vpack.c.bf16 %v22106_v56, %v22107_v5  ;;  %v8159_v59 = vsel %vm4327_vm3, %v8157_v29, %v8158_v58  ;;  %v7512_v3 = vpack.c.bf16 %v7464_v25, %v7462_v42  ;;  %v22109_v56 = vld [vmem:[#allocation68_spill] sm:$0xff]  ;;  %v22110_v5 = vld [vmem:[#allocation62_spill] sm:$0xff] }
 0x369   : > { %14459 = vmatmul.mubr.bf16.gmra.mrb[248].mxu1 %v7510_v22  ;;  %v19272_v33 = vadd.f32 %v14209_v31, %v5454_v2  ;;  %v5749_v23 = vpop.f32.mrb[175].mxu0  ;;  %v8161_v22 = vsel %vm4327_vm3, %v8158_v58, %v8160_v60  ;;  %v15417_v58 = vld [vmem:[#allocation2 + $0x70] sm:$0xf]  ;;  %v8167_v29 = vrot.slane %v15418_v6, 4  ;;  %v15236_v6 = vld [vmem:[%s21393_s3 + $0x448] sm:$0xff]  }
 0x36a   : > { %14462 = vmatprep.mubr.bf16.mxu1 %v7511_v43  ;;  %v19274_v13 = vadd.f32 %v5749_v23, %v5452_v47  ;;  %v8170_v9 = vrot.slane %v15417_v58, 4  ;;  %v19295_v23 = vld [vmem:[#allocation2 + $0x48] sm:$0xff] }
 0x36b   : > { %v14164_v10 = vpop.f32.mrb[144].mxu1 }
 0x36c   : > { %v5457_v30 = vadd.f32 %v14164_v10, %v19011_v50  ;;  %v5376_v57 = vpop.f32.mrb[145].mxu1  ;;  %v8269_v50 = vpack.c.bf16 %v8161_v22, %v8159_v59 }
 0x36d   : > { %v5455_v43 = vadd.f32 %v5376_v57, %v19015_v44  ;;  %v14165_v2 = vpop.f32.mrb[146].mxu1  ;;  %v8168_v44 = vrot.slane %v15416_v24, 4  ;;  %v22113_v24 = vld [vmem:[#allocation31_spill] sm:$0xff] }
 0x36e   : > { %14507 = vmatmul.mubr.bf16.gmra.mrb[24].mxu0 %v22108_v40  ;;  %v5458_v26 = vadd.f32 %v14165_v2, %v19017_v48  ;;  %v5379_v14 = vpop.f32.mrb[147].mxu1  ;;  %v14212_v7 = vpop.f32.mrb[176].mxu0  ;;  %v22111_v40 = vpack.c.bf16 %v22109_v56, %v22110_v5 }
 0x36f   : > { %14510 = vmatprep.mubr.bf16.mxu0 %v7897_v41  ;;  %v5456_v16 = vadd.f32 %v5379_v14, %v19021_v53  ;;  %v19287_v47 = vadd.f32 %v14212_v7, %v5457_v30  ;;  %v5762_v62 = vpop.f32.mrb[177].mxu0  ;;  %v8592_v41 = vpack.c.bf16 %v19289_v52, %v19295_v23  ;;  %v8169_v30 = vsel %vm4327_vm3, %v8167_v29, %v8168_v44  ;;  %v15230_v14 = vld [vmem:[%s21393_s3 + $0x408] sm:$0xff]  }
 0x370   : > { %v19291_v35 = vadd.f32 %v5762_v62, %v5455_v43  ;;  %v14213_v31 = vpop.f32.mrb[178].mxu0  ;;  %v8171_v57 = vsel %vm4327_vm3, %v8168_v44, %v8170_v9  ;;  %v19315_v62 = vld [vmem:[#allocation2 + $0x80] sm:$0xff] }
 0x371   : > { %14463 = vmatmul.mubr.bf16.gmra.mrb[252].mxu1 %v7512_v3  ;;  %v19293_v48 = vadd.f32 %v14213_v31, %v5458_v26  ;;  %v5765_v60 = vpop.f32.mrb[179].mxu0  ;;  %v22112_v31 = vld [vmem:[#allocation33_spill] sm:$0xff]  ;;  %v19327_v9 = vld [vmem:[#allocation2 + $0x60] sm:$0xff] }
 0x372   : > { %14530 = vmatprep.mubr.bf16.mxu1 %v8269_v50  ;;  %v19297_v53 = vadd.f32 %v5765_v60, %v5456_v16  ;;  %v8271_v16 = vpack.c.bf16 %v8171_v57, %v8169_v30 }
 0x373   : > { %v14168_v10 = vpop.f32.mrb[148].mxu1 }
 0x374   : > { %v5461_v42 = vadd.f32 %v14168_v10, %v19038_v39  ;;  %v5392_v25 = vpop.f32.mrb[149].mxu1  ;;  %v15231_v10 = vld [vmem:[%s21393_s3 + $0x410] sm:$0xff]  }
 0x375   : > { %v5459_v59 = vadd.f32 %v5392_v25, %v19042_v18  ;;  %v14169_v22 = vpop.f32.mrb[150].mxu1 }
 0x376   : > { %14511 = vmatmul.mubr.bf16.gmra.mrb[28].mxu0 %v22111_v40  ;;  %v5462_v43 = vadd.f32 %v14169_v22, %v19046_v21  ;;  %v5395_v2 = vpop.f32.mrb[151].mxu1  ;;  %v14216_v26 = vpop.f32.mrb[180].mxu0  ;;  %v22114_v21 = vpack.c.bf16 %v22112_v31, %v22113_v24  ;;  %v19347_v22 = vld [vmem:[#allocation2 + $0x98] sm:$0xff]  ;;  %v15421_v31 = vld [vmem:[#allocation2 + $0xc8] sm:$0xff] }
 0x377   : > { %14578 = vmatprep.mubr.bf16.mxu0 %v8592_v41  ;;  %v5460_v7 = vadd.f32 %v5395_v2, %v19053_v11  ;;  %v19313_v39 = vadd.f32 %v14216_v26, %v5461_v42  ;;  %v5778_v3 = vpop.f32.mrb[181].mxu0  ;;  %v19325_v11 = vld [vmem:[#allocation2 + $0x68] sm:$0xff]  ;;  %v19331_v41 = vld [vmem:[#allocation2 + $0x78] sm:$0xff]  ;;  %v19358_v26 = vld [vmem:[#allocation2 + $0xb0] sm:$0xff]  ;;  %v8188_v24 = vrot.slane %v15421_v31, 4 }
 0x378   : > { %v19317_v50 = vadd.f32 %v5778_v3, %v5459_v59  ;;  %v14217_v18 = vpop.f32.mrb[182].mxu0  ;;  %v8593_v60 = vpack.c.bf16 %v19325_v11, %v19327_v9  ;;  %v22116_v3 = vld [vmem:[#allocation39_spill] sm:$0xff] }
 0x379   : > { %14531 = vmatmul.mubr.bf16.vlgmr.msra.gmra.mrb[0].mxu1 %v22114_v21  ;;  %v19322_v44 = vadd.f32 %v14217_v18, %v5462_v43  ;;  %v5781_v58 = vpop.f32.mrb[183].mxu0  ;;  %v19365_v18 = vld [vmem:[#allocation2 + $0x90] sm:$0xff] }
 0x37a   : > { %14611 = vmatpush3.bf16.msra.mxu1 %v19184_v4  ;;  %14534 = vmatprep.mubr.bf16.mxu1 %v8271_v16  ;;  %v19336_v29 = vadd.f32 %v5781_v58, %v5460_v7  ;;  %v8594_v4 = vpack.c.bf16 %v19315_v62, %v19331_v41  ;;  %v22115_v7 = vld [vmem:[#allocation41_spill] sm:$0xff]  ;;  %v15422_v21 = vld [vmem:[#allocation2 + $0xd0] sm:$0xf] }
 0x37b   : > { %14612 = vmatprep.subr.bf16.mxu1 %v15230_v14  ;;  %v14172_v56 = vpop.f32.mrb[152].mxu1  ;;  %v22117_v16 = vpack.c.bf16 %v22115_v7, %v22116_v3  ;;  %v8190_v58 = vrot.slane %v15422_v21, 4 }
 0x37c   : > { %v5465_v5 = vadd.f32 %v14172_v56, %v19081_v51  ;;  %v5408_v40 = vpop.f32.mrb[153].mxu1  ;;  %v15232_v51 = vld [vmem:[%s21393_s3 + $0x418] sm:$0xff]   ;;  %v22120_v56 = vld [vmem:[#allocation72_spill] sm:$0xff] }
 0x37d   : > { %v5463_v42 = vadd.f32 %v5408_v40, %v19084_v32  ;;  %v14173_v25 = vpop.f32.mrb[154].mxu1  ;;  %v8595_v40 = vpack.c.bf16 %v19347_v22, %v19365_v18  ;;  %v8191_v3 = vsel %vm4327_vm3, %v8188_v24, %v8190_v58 }
 0x37e   : > { %14579 = vmatmul.mubr.bf16.vlgmr.msra.gmra.mrb[32].mxu0 %v8593_v60  ;;  %14613 = vmatpush3.bf16.msra.mxu1 %v15230_v14  ;;  %v5466_v30 = vadd.f32 %v14173_v25, %v19087_v63  ;;  %v5411_v57 = vpop.f32.mrb[155].mxu1  ;;  %v14220_v59 = vpop.f32.mrb[184].mxu0  ;;  %v15239_v25 = vld [vmem:[%s21393_s3 + $0x458] sm:$0xff]  }
 0x37f   : > { %14582 = vmatprep.mubr.bf16.mxu0 %v8594_v4  ;;  %14659 = vmatpush3.bf16.msra.mxu0 %v19198_v49  ;;  %v15237_v49 = vld [vmem:[%s21393_s3 + $0x450] sm:$0xff]   ;;  %v5464_v32 = vadd.f32 %v5411_v57, %v19095_v20  ;;  %v19356_v43 = vadd.f32 %v14220_v59, %v5465_v5  ;;  %v5794_v2 = vpop.f32.mrb[185].mxu0  ;;  %v22119_v4 = vld [vmem:[#allocation13_spill] sm:$0xff] }
 0x380   : > { %14660 = vmatprep.subr.bf16.mxu0 %v15236_v6  ;;  %14614 = vmatprep.subr.bf16.mxu1 %v15231_v10  ;;  %v19360_v63 = vadd.f32 %v5794_v2, %v5463_v42  ;;  %v14221_v14 = vpop.f32.mrb[186].mxu0  ;;  %v22121_v5 = vpack.c.bf16 %v22119_v4, %v22120_v56  ;;  %v19374_v42 = vld [vmem:[#allocation2 + $0xa8] sm:$0xff]  ;;  %v15233_v2 = vld [vmem:[%s21393_s3 + $0x420] sm:$0xff]  }
 0x381   : > { %14535 = vmatmul.mubr.bf16.gmra.mrb[4].mxu1 %v22117_v16  ;;  %v19367_v20 = vadd.f32 %v14221_v14, %v5466_v30  ;;  %v5797_v60 = vpop.f32.mrb[187].mxu0  ;;  %v15423_v30 = vld [vmem:[#allocation2 + $0xc0] sm:$0xff]  ;;  %v19391_v56 = vld [vmem:[#allocation2 + $0xc8] sm:$0xff] }
 0x382   : > { %14538 = vmatprep.mubr.bf16.mxu1 %v22121_v5  ;;  %14615 = vmatpush3.bf16.msra.mxu1 %v15231_v10  ;;  %v19379_v57 = vadd.f32 %v5797_v60, %v5464_v32  ;;  %v8187_v59 = vrot.slane %v15423_v30, 4  ;;  %v22124_v30 = vld [vmem:[#allocation54_spill] sm:$0xff] }
 0x383   : > { %14661 = vmatpush3.bf16.msra.mxu0 %v15236_v6  ;;  %22118 = vst [vmem:[#allocation120_spill] sm:$0xff] %v19367_v20  ;;  %v8596_v6 = vpack.c.bf16 %v19358_v26, %v19374_v42  ;;  %14616 = vmatprep.subr.bf16.mxu1 %v15232_v51  ;;  %v14176_v14 = vpop.f32.mrb[156].mxu1 }
 0x384   : > { %22122 = vst [vmem:[#allocation124_spill] sm:$0xff] %v19379_v57  ;;  %14662 = vmatprep.subr.bf16.mxu0 %v15237_v49  ;;  %v5469_v10 = vadd.f32 %v14176_v14, %v19124_v38  ;;  %v5424_v7 = vpop.f32.mrb[157].mxu1  ;;  %v8189_v32 = vsel %vm4327_vm3, %v8187_v59, %v8188_v24  ;;  %v15235_v38 = vld [vmem:[%s21393_s3 + $0x428] sm:$0xff]   ;;  %v19409_v14 = vld [vmem:[#allocation2 + $0xc0] sm:$0xff] }
 0x385   : > { %v5467_v16 = vadd.f32 %v5424_v7, %v19128_v0  ;;  %v14177_v31 = vpop.f32.mrb[158].mxu1  ;;  %v8275_v58 = vpack.c.bf16 %v8191_v3, %v8189_v32  ;;  %v15424_v7 = vld [vmem:[#allocation2 + $0xf8] sm:$0xff]  ;;  %v15425_v57 = vld [vmem:[#allocation2 + $0x100] sm:$0xf]  ;;  %v8597_v32 = vpack.c.bf16 %v19391_v56, %v19409_v14 }
 0x386   : > { %14583 = vmatmul.mubr.bf16.gmra.mrb[36].mxu0 %v8595_v40  ;;  %14617 = vmatpush3.bf16.msra.mxu1 %v15232_v51  ;;  %v5470_v21 = vadd.f32 %v14177_v31, %v19131_v8  ;;  %v5427_v60 = vpop.f32.mrb[159].mxu1  ;;  %v14224_v4 = vpop.f32.mrb[188].mxu0  ;;  %v19402_v8 = vld [vmem:[#allocation2 + $0xe0] sm:$0xff]  ;;  %v8198_v31 = vrot.slane %v15424_v7, 4  ;;  %v8200_v20 = vrot.slane %v15425_v57, 4  ;;  %v19415_v3 = vld [vmem:[#allocation2 + $0xd8] sm:$0xff] }
 0x387   : > { %14586 = vmatprep.mubr.bf16.mxu0 %v8596_v6  ;;  %14663 = vmatpush3.bf16.msra.mxu0 %v15237_v49  ;;  %v15240_v49 = vld [vmem:[%s21393_s3 + $0x460] sm:$0xff]   ;;  %v5468_v0 = vadd.f32 %v5427_v60, %v19137_v61  ;;  %v19400_v24 = vadd.f32 %v14224_v4, %v5469_v10  ;;  %v5810_v51 = vpop.f32.mrb[189].mxu0  ;;  %v22123_v6 = vld [vmem:[#allocation56_spill] sm:$0xff]  ;;  %v8598_v57 = vpack.c.bf16 %v19402_v8, %v19415_v3 }
 0x388   : > { %14664 = vmatprep.subr.bf16.mxu0 %v15239_v25  ;;  %14618 = vmatprep.subr.bf16.mxu1 %v15233_v2  ;;  %v19404_v5 = vadd.f32 %v5810_v51, %v5467_v16  ;;  %v14225_v40 = vpop.f32.mrb[190].mxu0  ;;  %v22125_v59 = vpack.c.bf16 %v22123_v6, %v22124_v30  ;;  %v15242_v16 = vld [vmem:[%s21393_s3 + $0x468] sm:$0xff]   ;;  %v15238_v4 = vld [vmem:[%s21393_s3 + $0x430] sm:$0xff]  }
 0x389   : > { %v19411_v61 = vadd.f32 %v14225_v40, %v5470_v21  ;;  %v5813_v10 = vpop.f32.mrb[191].mxu0  ;;  %v8201_v40 = vsel %vm4327_vm3, %v8198_v31, %v8200_v20  ;;  %v15243_v20 = vld [vmem:[%s21393_s3 + $0x470] sm:$0xff]  }
 0x38a   : > { %14539 = vmatmul.mubr.bf16.gmra.mrb[8].mxu1 %v22125_v59  ;;  %v19420_v60 = vadd.f32 %v5813_v10, %v5468_v0 }
 0x38b   : > { %14665 = vmatpush3.bf16.msra.mxu0 %v15239_v25  ;;  %14542 = vmatprep.mubr.bf16.mxu1 %v8275_v58  ;;  %v15426_v25 = vld [vmem:[#allocation2 + $0xf0] sm:$0xff]  ;;  %v14244_v51 = vpop.f32.mrb[160].mxu1 }
 0x38c   : > { %14619 = vmatpush3.bf16.msra.mxu1 %v15233_v2  ;;  %22126 = vst [vmem:[#allocation35_spill] sm:$0xff] %v19420_v60  ;;  %v8197_v21 = vrot.slane %v15426_v25, 4  ;;  %14666 = vmatprep.subr.bf16.mxu0 %v15240_v49  ;;  %v6084_v2 = vpop.f32.mrb[161].mxu1  ;;  %v6213_v58 = vadd.f32 %v14244_v51, %v19164_v15  ;;  %v19432_v25 = vld [vmem:[#allocation2 + $0xf8] sm:$0xff]  ;;  %v22128_v51 = vld [vmem:[#allocation86_spill] sm:$0xff] }
 0x38d   : > { %14620 = vmatprep.subr.bf16.mxu1 %v15235_v38  ;;  %v14245_v6 = vpop.f32.mrb[162].mxu1  ;;  %v6211_v30 = vadd.f32 %v6084_v2, %v19168_v17  ;;  %v15241_v15 = vld [vmem:[%s21393_s3 + $0x438] sm:$0xff]  }
 0x38e   : > { %14587 = vmatmul.mubr.bf16.gmra.mrb[40].mxu0 %v8597_v32  ;;  %v8199_v0 = vsel %vm4327_vm3, %v8197_v21, %v8198_v31  ;;  %v6087_v59 = vpop.f32.mrb[163].mxu1  ;;  %v14292_v7 = vpop.f32.mrb[192].mxu0  ;;  %v6214_v10 = vadd.f32 %v14245_v6, %v19172_v36  ;;  %v19443_v32 = vld [vmem:[#allocation2 + $0x110] sm:$0xff]  ;;  %v22127_v21 = vld [vmem:[#allocation89_spill] sm:$0xff] }
 0x38f   : > { %14590 = vmatprep.mubr.bf16.mxu0 %v8598_v57  ;;  %14667 = vmatpush3.bf16.msra.mxu0 %v15240_v49  ;;  %v19440_v49 = vadd.f32 %v14292_v7, %v6213_v58  ;;  %v6470_v17 = vpop.f32.mrb[193].mxu0  ;;  %v8277_v31 = vpack.c.bf16 %v8201_v40, %v8199_v0  ;;  %v22129_v2 = vpack.c.bf16 %v22127_v21, %v22128_v51  ;;  %v19450_v6 = vld [vmem:[#allocation2 + $0xf0] sm:$0xff]  ;;  %v19456_v0 = vld [vmem:[#allocation2 + $0x108] sm:$0xff]  ;;  %v15244_v40 = vld [vmem:[%s21393_s3 + $0x478] sm:$0xff]  }
 0x390   : > { %14621 = vmatpush3.bf16.msra.mxu1 %v15235_v38  ;;  %14668 = vmatprep.subr.bf16.mxu0 %v15242_v16  ;;  %v6212_v38 = vadd.f32 %v6087_v59, %v19178_v19  ;;  %v19445_v36 = vadd.f32 %v6470_v17, %v6211_v30  ;;  %v14293_v57 = vpop.f32.mrb[194].mxu0  ;;  %v8599_v19 = vpack.c.bf16 %v19432_v25, %v19450_v6 }
 0x391   : > { %14622 = vmatprep.subr.bf16.mxu1 %v15238_v4  ;;  %v19452_v60 = vadd.f32 %v14293_v57, %v6214_v10  ;;  %v6473_v58 = vpop.f32.mrb[195].mxu0  ;;  %v8600_v59 = vpack.c.bf16 %v19443_v32, %v19456_v0 }
 0x392   : > { %14543 = vmatmul.mubr.bf16.gmra.mrb[12].mxu1 %v22129_v2  ;;  %v19461_v30 = vadd.f32 %v6473_v58, %v6212_v38  ;;  %v19478_v2 = vld [vmem:[#allocation2 + $0x128] sm:$0xff] }
 0x393   : > { %14669 = vmatpush3.bf16.msra.mxu0 %v15242_v16  ;;  %22130 = vst [vmem:[#allocation34_spill] sm:$0xff] %v19452_v60  ;;  %14546 = vmatprep.mubr.bf16.mxu1 %v8277_v31  ;;  %v19468_v16 = vld [vmem:[%s21393_s3 + $0x480] sm:$0xff]   ;;  %v14248_v7 = vpop.f32.mrb[164].mxu1 }
 0x394   : > { %14623 = vmatpush3.bf16.msra.mxu1 %v15238_v4  ;;  %22131 = vst [vmem:[#allocation49_spill] sm:$0xff] %v19461_v30  ;;  %14670 = vmatprep.subr.bf16.mxu0 %v15243_v20  ;;  %v6100_v10 = vpop.f32.mrb[165].mxu1  ;;  %v6217_v4 = vadd.f32 %v14248_v7, %v19205_v1  ;;  %v19475_v31 = vld [vmem:[%s21393_s3 + $0x4c0] sm:$0xff]  }
 0x395   : > { %14624 = vmatprep.subr.bf16.mxu1 %v15241_v15  ;;  %v14249_v17 = vpop.f32.mrb[166].mxu1  ;;  %v6215_v38 = vadd.f32 %v6100_v10, %v19207_v12  ;;  %v22136_v7 = vld [vmem:[#allocation102_spill] sm:$0xff] }
 0x396   : > { %14591 = vmatmul.mubr.bf16.gmra.mrb[44].mxu0 %v8599_v19  ;;  %v6103_v57 = vpop.f32.mrb[167].mxu1  ;;  %v14296_v21 = vpop.f32.mrb[196].mxu0  ;;  %v6218_v51 = vadd.f32 %v14249_v17, %v19212_v37  ;;  %v19491_v30 = vld [vmem:[#allocation2 + $0x120] sm:$0xff] }
 0x397   : > { %14594 = vmatprep.mubr.bf16.mxu0 %v8600_v59  ;;  %14671 = vmatpush3.bf16.msra.mxu0 %v15243_v20  ;;  %v19481_v1 = vadd.f32 %v14296_v21, %v6217_v4  ;;  %v6486_v20 = vpop.f32.mrb[197].mxu0  ;;  %v6216_v12 = vadd.f32 %v6103_v57, %v19215_v55  ;;  %v22135_v59 = vld [vmem:[#allocation109_spill] sm:$0xff]  ;;  %v22139_v4 = vld [vmem:[#allocation63_spill] sm:$0xff]  ;;  %v22140_v21 = vld [vmem:[#allocation12_spill] sm:$0xff]  ;;  %v8601_v55 = vpack.c.bf16 %v19478_v2, %v19491_v30 }
 0x398   : > { %14625 = vmatpush3.bf16.msra.mxu1 %v15241_v15  ;;  %14672 = vmatprep.subr.bf16.mxu0 %v15244_v40  ;;  %v19484_v15 = vld [vmem:[#allocation2 + $0x140] sm:$0xff]  ;;  %v19486_v58 = vadd.f32 %v6486_v20, %v6215_v38  ;;  %v14297_v19 = vpop.f32.mrb[198].mxu0  ;;  %v22137_v10 = vpack.c.bf16 %v22135_v59, %v22136_v7  ;;  %v19500_v38 = vld [vmem:[#allocation2 + $0x138] sm:$0xff] }
 0x399   : > { %14706 = vmatprep.subr.bf16.mxu1 %v19468_v16  ;;  %22132 = vst [vmem:[#allocation48_spill] sm:$0xff] %v19481_v1  ;;  %22133 = vst [vmem:[#allocation37_spill] sm:$0xff] %v19484_v15  ;;  %v19493_v37 = vadd.f32 %v14297_v19, %v6218_v51  ;;  %v6489_v17 = vpop.f32.mrb[199].mxu0  ;;  %v22141_v1 = vpack.c.bf16 %v22139_v4, %v22140_v21  ;;  %v8602_v20 = vpack.c.bf16 %v19484_v15, %v19500_v38  ;;  %v19510_v21 = vld [vmem:[#allocation2 + $0x158] sm:$0xff]  ;;  %v22154_v60 = vld [vmem:[#allocation46_spill] sm:$0xff] }
 0x39a   : > { %22134 = vst [vmem:[#allocation36_spill] sm:$0xff] %v19486_v58  ;;  %14547 = vmatmul.mubr.bf16.gmra.mrb[16].mxu1 %v22137_v10  ;;  %22142 = vst [vmem:[#allocation51_spill] sm:$0xff] %v19500_v38  ;;  %v19503_v57 = vadd.f32 %v6489_v17, %v6216_v12 }
 0x39b   : > { %14673 = vmatpush3.bf16.msra.mxu0 %v15244_v40  ;;  %22138 = vst [vmem:[#allocation52_spill] sm:$0xff] %v19493_v37  ;;  %14550 = vmatprep.mubr.bf16.mxu1 %v22141_v1  ;;  %22144 = vst [vmem:[#allocation65_spill] sm:$0xff] %v19510_v21  ;;  %v19515_v37 = vld [vmem:[#allocation2 + $0x170] sm:$0xff] }
 0x39c   : > { %14754 = vmatprep.subr.bf16.mxu0 %v19475_v31  ;;  %22143 = vst [vmem:[#allocation125_spill] sm:$0xff] %v19503_v57  ;;  %v14252_v40 = vpop.f32.mrb[168].mxu1  ;;  %22146 = vst [vmem:[#allocation82_spill] sm:$0xff] %v19515_v37 }
 0x39d   : > { %v6116_v51 = vpop.f32.mrb[169].mxu1  ;;  %v6221_v19 = vadd.f32 %v14252_v40, %v19238_v45  ;;  %v22148_v45 = vld [vmem:[#allocation123_spill] sm:$0xff]  ;;  %v22149_v40 = vld [vmem:[#allocation116_spill] sm:$0xff] }
 0x39e   : > { %14595 = vmatmul.mubr.bf16.gmra.mrb[48].mxu0 %v8601_v55  ;;  %v14253_v59 = vpop.f32.mrb[170].mxu1  ;;  %v6219_v1 = vadd.f32 %v6116_v51, %v19240_v34  ;;  %v14300_v10 = vpop.f32.mrb[200].mxu0  ;;  %v22150_v58 = vpack.c.bf16 %v22148_v45, %v22149_v40  ;;  %v19522_v34 = vld [vmem:[#allocation2 + $0x150] sm:$0xff]  ;;  %v15427_v51 = vld [vmem:[#allocation2 + $0x180] sm:$0xff]  ;;  %v19531_v45 = vld [vmem:[#allocation2 + $0x168] sm:$0xff] }
 0x39f   : > { %14598 = vmatprep.mubr.bf16.mxu0 %v8602_v20  ;;  %v6119_v7 = vpop.f32.mrb[171].mxu1  ;;  %v6222_v4 = vadd.f32 %v14253_v59, %v19243_v27  ;;  %v19512_v12 = vadd.f32 %v14300_v10, %v6221_v19  ;;  %v6502_v17 = vpop.f32.mrb[201].mxu0  ;;  %22151 = vst [vmem:[#allocation67_spill] sm:$0xff] %v19522_v34  ;;  %v8227_v27 = vrot.slane %v15427_v51, 4  ;;  %v15428_v59 = vld [vmem:[#allocation2 + $0x188] sm:$0xff]  ;;  %22156 = vst [vmem:[#allocation84_spill] sm:$0xff] %v19531_v45 }
 0x3a0   : > { %v6220_v57 = vadd.f32 %v6119_v7, %v19248_v28  ;;  %v19517_v55 = vadd.f32 %v6502_v17, %v6219_v1  ;;  %v14301_v20 = vpop.f32.mrb[202].mxu0  ;;  %v8228_v38 = vrot.slane %v15428_v59, 4  ;;  %v15429_v19 = vld [vmem:[#allocation2 + $0x190] sm:$0xf]  ;;  %v22153_v7 = vld [vmem:[#allocation45_spill] sm:$0xff]  ;;  %v8603_v17 = vpack.c.bf16 %v19510_v21, %v19522_v34 }
 0x3a1   : > { %22145 = vst [vmem:[#allocation64_spill] sm:$0xff] %v19512_v12  ;;  %v8230_v10 = vrot.slane %v15429_v19, 4  ;;  %v19524_v12 = vadd.f32 %v14301_v20, %v6222_v4  ;;  %v6505_v28 = vpop.f32.mrb[203].mxu0  ;;  %v22155_v1 = vpack.c.bf16 %v22153_v7, %v22154_v60  ;;  %v8604_v40 = vpack.c.bf16 %v19515_v37, %v19531_v45  ;;  %v19537_v51 = vld [vmem:[#allocation2 + $0x58] sm:$0xf]  ;;  %v19558_v45 = vld [vmem:[#allocation2 + $0x1a0] sm:$0xff] }
 0x3a2   : > { %22147 = vst [vmem:[#allocation80_spill] sm:$0xff] %v19517_v55  ;;  %14551 = vmatmul.mubr.bf16.gmra.mrb[20].mxu1 %v22150_v58  ;;  %v19533_v58 = vadd.f32 %v6505_v28, %v6220_v57  ;;  %22158 = vst [vmem:[#allocation127_spill] sm:$0xff] %v19537_v51  ;;  %v8229_v60 = vsel %vm4327_vm3, %v8227_v27, %v8228_v38  ;;  %v8915_v7 = vrot.slane %v19289_v52, 1  ;;  %v8917_v28 = vrot.slane %v19537_v51, 1  ;;  %v19551_v27 = vld [vmem:[#allocation2 + $0x70] sm:$0xf] }
 0x3a3   : > { %22152 = vst [vmem:[#allocation66_spill] sm:$0xff] %v19524_v12  ;;  %14554 = vmatprep.mubr.bf16.mxu1 %v22155_v1  ;;  %v8231_v19 = vsel %vm4327_vm3, %v8228_v38, %v8230_v10  ;;  %22160 = vst [vmem:[#allocation58_spill] sm:$0xff] %v19558_v45  ;;  %v22163_v37 = vld [vmem:[#allocation122_spill] sm:$0xff] }
 0x3a4   : > { %22157 = vst [vmem:[#allocation83_spill] sm:$0xff] %v19533_v58  ;;  %v14256_v59 = vpop.f32.mrb[172].mxu1 }
 0x3a5   : > { %v6132_v4 = vpop.f32.mrb[173].mxu1  ;;  %v6225_v20 = vadd.f32 %v14256_v59, %v19266_v54  ;;  %v8914_v54 = vrot.slane %v19295_v23, 1 }
 0x3a6   : > { %14599 = vmatmul.mubr.bf16.gmra.mrb[52].mxu0 %v8603_v17  ;;  %v14257_v1 = vpop.f32.mrb[174].mxu1  ;;  %v6223_v57 = vadd.f32 %v6132_v4, %v19270_v46  ;;  %v19546_v17 = vld [vmem:[#allocation2 + $0x180] sm:$0xff]  ;;  %v8283_v46 = vpack.c.bf16 %v8231_v19, %v8229_v60  ;;  %v19556_v4 = vld [vmem:[#allocation2 + $0x198] sm:$0xff]  ;;  %v9303_v60 = vrot.slane %v19537_v51, 2  ;;  %v9305_v19 = vrot.slane %v19327_v9, 2 }
 0x3a7   : > { %14602 = vmatprep.mubr.bf16.mxu0 %v8604_v40  ;;  %v6135_v58 = vpop.f32.mrb[175].mxu1  ;;  %v6226_v55 = vadd.f32 %v14257_v1, %v19272_v33  ;;  %v19548_v40 = vld [vmem:[#allocation2 + $0x188] sm:$0xff]  ;;  %v22162_v1 = vld [vmem:[#allocation134_spill] sm:$0xff]  ;;  %v8916_v15 = vsel %vm1019_vm0, %v8914_v54, %v8915_v7 }
 0x3a8   : > { %v14304_v12 = vpop.f32.mrb[204].mxu0  ;;  %v6224_v59 = vadd.f32 %v6135_v58, %v19274_v13  ;;  %v22164_v21 = vpack.c.bf16 %v22162_v1, %v22163_v37  ;;  %v8605_v13 = vpack.c.bf16 %v19548_v40, %v19546_v17  ;;  %v8918_v58 = vsel %vm1019_vm0, %v8915_v7, %v8917_v28  ;;  %v19582_v7 = vld [vmem:[#allocation2 + $0x88] sm:$0xf] }
 0x3a9   : > { %v19553_v38 = vadd.f32 %v14304_v12, %v6225_v20  ;;  %v6518_v10 = vpop.f32.mrb[205].mxu0  ;;  %v9301_v12 = vrot.slane %v19289_v52, 2  ;;  %v8922_v37 = vrot.slane %v19551_v27, 1  ;;  %v8606_v52 = vpack.c.bf16 %v19558_v45, %v19556_v4  ;;  %22167 = vst [vmem:[#allocation57_spill] sm:$0xff] %v19582_v7  ;;  %v22172_v45 = vld [vmem:[#allocation61_spill] sm:$0xff] }
 0x3aa   : > { %v19560_v34 = vadd.f32 %v6518_v10, %v6223_v57  ;;  %v14305_v33 = vpop.f32.mrb[206].mxu0  ;;  %14555 = vmatmul.mubr.bf16.gmra.mrb[24].mxu1 %v22164_v21  ;;  %v9308_v57 = vrot.slane %v19551_v27, 2  ;;  %v9300_v10 = vrot.slane %v19295_v23, 2 }
 0x3ab   : > { %22159 = vst [vmem:[#allocation128_spill] sm:$0xff] %v19553_v38  ;;  %v19567_v20 = vadd.f32 %v14305_v33, %v6226_v55  ;;  %v6521_v38 = vpop.f32.mrb[207].mxu0  ;;  %14558 = vmatprep.mubr.bf16.mxu1 %v8283_v46  ;;  %v9306_v55 = vrot.slane %v19325_v11, 2  ;;  %v9026_v33 = vpack.c.bf16 %v8918_v58, %v8916_v15  ;;  %v9311_v15 = vrot.slane %v19315_v62, 2 }
 0x3ac   : > { %22161 = vst [vmem:[#allocation42_spill] sm:$0xff] %v19560_v34  ;;  %v19575_v21 = vadd.f32 %v6521_v38, %v6224_v59  ;;  %v14260_v54 = vpop.f32.mrb[176].mxu1  ;;  %v8924_v38 = vrot.slane %v19331_v41, 1  ;;  %v9302_v11 = vsel %vm1196_vm1, %v9300_v10, %v9301_v12  ;;  %v9313_v58 = vrot.slane %v19582_v7, 2 }
 0x3ad   : > { %22165 = vst [vmem:[#allocation129_spill] sm:$0xff] %v19567_v20  ;;  %v6148_v28 = vpop.f32.mrb[177].mxu1  ;;  %v6229_v46 = vadd.f32 %v14260_v54, %v19287_v47  ;;  %v19590_v20 = vld [vmem:[#allocation2 + $0xa0] sm:$0xf]  ;;  %v8927_v47 = vrot.slane %v19582_v7, 1 }
 0x3ae   : > { %22166 = vst [vmem:[#allocation44_spill] sm:$0xff] %v19575_v21  ;;  %14603 = vmatmul.mubr.bf16.gmra.mrb[56].mxu0 %v8605_v13  ;;  %v14261_v59 = vpop.f32.mrb[178].mxu1  ;;  %v6227_v1 = vadd.f32 %v6148_v28, %v19291_v35  ;;  %v9304_v21 = vsel %vm1196_vm1, %v9301_v12, %v9303_v60  ;;  %v8925_v13 = vrot.slane %v19315_v62, 1  ;;  %v19599_v12 = vld [vmem:[#allocation2] sm:$0xff]  ;;  %v8930_v28 = vrot.slane %v19347_v22, 1 }
 0x3af   : > { %14606 = vmatprep.mubr.bf16.mxu0 %v8606_v52  ;;  %v6151_v23 = vpop.f32.mrb[179].mxu1  ;;  %v6230_v52 = vadd.f32 %v14261_v59, %v19293_v48  ;;  %22169 = vst [vmem:[#allocation131_spill] sm:$0xff] %v19599_v12  ;;  %v8607_v60 = vpack.c.bf16 %v19599_v12, %v19599_v12  ;;  %v22171_v59 = vld [vmem:[#allocation47_spill] sm:$0xff]  ;;  %v9412_v7 = vpack.c.bf16 %v9304_v21, %v9302_v11 }
 0x3b0   : > { %v14308_v34 = vpop.f32.mrb[208].mxu0  ;;  %v6228_v10 = vadd.f32 %v6151_v23, %v19297_v53  ;;  %v22173_v62 = vpack.c.bf16 %v22171_v59, %v22172_v45  ;;  %v8932_v53 = vrot.slane %v19590_v20, 1  ;;  %v8926_v12 = vsel %vm1019_vm0, %v8924_v38, %v8925_v13 }
 0x3b1   : > { %v19596_v54 = vadd.f32 %v14308_v34, %v6229_v46  ;;  %v6534_v35 = vpop.f32.mrb[209].mxu0  ;;  %v22174_v34 = vld [vmem:[#allocation6_spill] sm:$0xff]  ;;  %v8928_v21 = vsel %vm1019_vm0, %v8925_v13, %v8927_v47  ;;  %v9309_v11 = vsel %vm1196_vm1, %v9306_v55, %v9308_v57  ;;  %v9314_v38 = vsel %vm1196_vm1, %v9311_v15, %v9313_v58  ;;  %v22175_v47 = vld [vmem:[#allocation7_spill] sm:$0xff] }
 0x3b2   : > { %v19604_v51 = vadd.f32 %v6534_v35, %v6227_v1  ;;  %v14309_v48 = vpop.f32.mrb[210].mxu0  ;;  %14559 = vmatmul.mubr.bf16.gmra.mrb[28].mxu1 %v22173_v62  ;;  %v8923_v46 = vsel %vm1019_vm0, %v22174_v34, %v8922_v37  ;;  %v9310_v1 = vrot.slane %v19331_v41, 2  ;;  %v8929_v35 = vrot.slane %v19365_v18, 1 }
 0x3b3   : > { %22168 = vst [vmem:[#allocation130_spill] sm:$0xff] %v19596_v54  ;;  %v19612_v23 = vadd.f32 %v14309_v48, %v6230_v52  ;;  %v6537_v54 = vpop.f32.mrb[211].mxu0  ;;  %14626 = vmatprep.mubr.bf16.mxu1 %v9026_v33  ;;  %v9307_v37 = vsel %vm1196_vm1, %v9305_v19, %v9306_v55  ;;  %v8935_v19 = vrot.slane %v19358_v26, 1 }
 0x3b4   : > { %22170 = vst [vmem:[#allocation132_spill] sm:$0xff] %v19604_v51  ;;  %v19617_v51 = vld [vmem:[#allocation2 + $0xb8] sm:$0xf]  ;;  %v19619_v45 = vadd.f32 %v6537_v54, %v6228_v10  ;;  %v14264_v52 = vpop.f32.mrb[180].mxu1  ;;  %v9312_v33 = vsel %vm1196_vm1, %v9310_v1, %v9311_v15  ;;  %v19627_v41 = vsel %vm1019_vm0, %v8929_v35, %v8930_v28  ;;  %v19631_v10 = vsel %vm1019_vm0, %v8930_v28, %v8932_v53 }
 0x3b5   : > { %v6164_v48 = vpop.f32.mrb[181].mxu1  ;;  %v6233_v54 = vadd.f32 %v14264_v52, %v19313_v39  ;;  %v8937_v55 = vrot.slane %v19617_v51, 1  ;;  %v9028_v15 = vpack.c.bf16 %v8928_v21, %v8926_v12  ;;  %v9413_v58 = vpack.c.bf16 %v9309_v11, %v9307_v37  ;;  %v15246_v39 = vld [vmem:[%s21393_s3 + $0x488] sm:$0xff]  }
 0x3b6   : > { %14607 = vmatmul.mubr.bf16.gmra.mrb[60].mxu0 %v8607_v60  ;;  %v14265_v57 = vpop.f32.mrb[182].mxu1  ;;  %v6231_v13 = vadd.f32 %v6164_v48, %v19317_v50  ;;  %v9027_v60 = vpack.c.bf16 %v8923_v46, %v22175_v47  ;;  %v9414_v34 = vpack.c.bf16 %v9314_v38, %v9312_v33  ;;  %v8934_v28 = vrot.slane %v19374_v42, 1  ;;  %v19656_v33 = vld [vmem:[#allocation2 + $0xe8] sm:$0xf] }
 0x3b7   : > { %14674 = vmatprep.mubr.bf16.mxu0 %v9412_v7  ;;  %v6167_v59 = vpop.f32.mrb[183].mxu1  ;;  %v6234_v7 = vadd.f32 %v14265_v57, %v19322_v44  ;;  %v9316_v53 = vrot.slane %v19347_v22, 2  ;;  %v9029_v12 = vpack.c.bf16 %v19631_v10, %v19627_v41  ;;  %v9315_v35 = vrot.slane %v19365_v18, 2  ;;  %v19649_v44 = vld [vmem:[#allocation2 + $0xd0] sm:$0xf] }
 0x3b8   : > { %v14312_v62 = vpop.f32.mrb[212].mxu0  ;;  %v6232_v46 = vadd.f32 %v6167_v59, %v19336_v29  ;;  %v8936_v11 = vsel %vm1019_vm0, %v8934_v28, %v8935_v19  ;;  %v8938_v22 = vsel %vm1019_vm0, %v8935_v19, %v8937_v55  ;;  %v9318_v52 = vrot.slane %v19590_v20, 2 }
 0x3b9   : > { %v19643_v1 = vadd.f32 %v14312_v62, %v6233_v54  ;;  %v6550_v50 = vpop.f32.mrb[213].mxu0  ;;  %v9320_v18 = vrot.slane %v19374_v42, 2  ;;  %v9321_v41 = vrot.slane %v19358_v26, 2  ;;  %v9323_v48 = vrot.slane %v19617_v51, 2  ;;  %v15252_v54 = vld [vmem:[%s21393_s3 + $0x4c8] sm:$0xff]  }
 0x3ba   : > { %v19651_v21 = vadd.f32 %v6550_v50, %v6231_v13  ;;  %v14313_v37 = vpop.f32.mrb[214].mxu0  ;;  %14627 = vmatmul.mubr.bf16.vlgmr.msra.gmra.mrb[32].mxu1 %v9027_v60  ;;  %v9317_v19 = vsel %vm1196_vm1, %v9315_v35, %v9316_v53  ;;  %v8940_v55 = vrot.slane %v19391_v56, 1  ;;  %v8942_v42 = vrot.slane %v19649_v44, 1 }
 0x3bb   : > { %v19658_v29 = vadd.f32 %v14313_v37, %v6234_v7  ;;  %14707 = vmatpush3.bf16.msra.mxu1 %v19468_v16  ;;  %v6553_v38 = vpop.f32.mrb[215].mxu0  ;;  %14630 = vmatprep.mubr.bf16.mxu1 %v9028_v15  ;;  %v15247_v16 = vld [vmem:[%s21393_s3 + $0x490] sm:$0xff]   ;;  %v9030_v57 = vpack.c.bf16 %v8938_v22, %v8936_v11  ;;  %v8939_v13 = vrot.slane %v19409_v14, 1  ;;  %v8945_v47 = vrot.slane %v19402_v8, 1 }
 0x3bc   : > { %v19667_v10 = vadd.f32 %v6553_v38, %v6232_v46  ;;  %14708 = vmatprep.subr.bf16.mxu1 %v15246_v39  ;;  %v14268_v26 = vpop.f32.mrb[184].mxu1  ;;  %v8947_v60 = vrot.slane %v19656_v33, 1  ;;  %v9319_v62 = vsel %vm1196_vm1, %v9316_v53, %v9318_v52  ;;  %v9326_v7 = vrot.slane %v19391_v56, 2  ;;  %v22176_v53 = vld [vmem:[#allocation120_spill] sm:$0xff] }
 0x3bd   : > { %v6180_v15 = vpop.f32.mrb[185].mxu1  ;;  %v6237_v59 = vadd.f32 %v14268_v26, %v19356_v43  ;;  %v9328_v28 = vrot.slane %v19649_v44, 2  ;;  %v9322_v46 = vsel %vm1196_vm1, %v9320_v18, %v9321_v41  ;;  %v9324_v35 = vsel %vm1196_vm1, %v9321_v41, %v9323_v48  ;;  %v15253_v22 = vld [vmem:[%s21393_s3 + $0x4d0] sm:$0xff]  }
 0x3be   : > { %14675 = vmatmul.mubr.bf16.vlgmr.msra.gmra.mrb[64].mxu0 %v9413_v58  ;;  %v14269_v58 = vpop.f32.mrb[186].mxu1  ;;  %v6235_v50 = vadd.f32 %v6180_v15, %v19360_v63  ;;  %v19689_v56 = vsel %vm1019_vm0, %v8939_v13, %v8940_v55  ;;  %v9325_v63 = vrot.slane %v19409_v14, 2  ;;  %v22177_v18 = vld [vmem:[#allocation124_spill] sm:$0xff]  ;;  %v19718_v15 = vld [vmem:[#allocation2 + $0x100] sm:$0xf] }
 0x3bf   : > { %14678 = vmatprep.mubr.bf16.mxu0 %v9414_v34  ;;  %14755 = vmatpush3.bf16.msra.mxu0 %v19475_v31  ;;  %v8944_v34 = vrot.slane %v19415_v3, 1  ;;  %v6183_v43 = vpop.f32.mrb[187].mxu1  ;;  %v6238_v11 = vadd.f32 %v14269_v58, %v22176_v53  ;;  %v19692_v31 = vsel %vm1019_vm0, %v8940_v55, %v8942_v42  ;;  %v19708_v55 = vsel %vm1019_vm0, %v8945_v47, %v8947_v60 }
 0x3c0   : > { %14709 = vmatpush3.bf16.msra.mxu1 %v15246_v39  ;;  %14756 = vmatprep.subr.bf16.mxu0 %v15252_v54  ;;  %v14316_v37 = vpop.f32.mrb[216].mxu0  ;;  %v15248_v39 = vld [vmem:[%s21393_s3 + $0x498] sm:$0xff]   ;;  %v6236_v41 = vadd.f32 %v6183_v43, %v22177_v18  ;;  %v19713_v26 = vsel %vm1196_vm1, %v9325_v63, %v9326_v7  ;;  %v19716_v13 = vsel %vm1196_vm1, %v9326_v7, %v9328_v28  ;;  %v9331_v60 = vrot.slane %v19402_v8, 2  ;;  %v15249_v8 = vld [vmem:[%s21393_s3 + $0x4a0] sm:$0xff]  }
 0x3c1   : > { %14710 = vmatprep.subr.bf16.mxu1 %v15247_v16  ;;  %v19701_v52 = vadd.f32 %v14316_v37, %v6237_v59  ;;  %v6566_v38 = vpop.f32.mrb[217].mxu0  ;;  %v19705_v48 = vsel %vm1019_vm0, %v8944_v34, %v8945_v47  ;;  %v9415_v34 = vpack.c.bf16 %v9319_v62, %v9317_v19  ;;  %v9416_v47 = vpack.c.bf16 %v9324_v35, %v9322_v46 }
 0x3c2   : > { %v19710_v14 = vadd.f32 %v6566_v38, %v6235_v50  ;;  %v14317_v42 = vpop.f32.mrb[218].mxu0  ;;  %14631 = vmatmul.mubr.bf16.gmra.mrb[36].mxu1 %v9029_v12  ;;  %v19723_v50 = vld [vmem:[#allocation2 + $0x118] sm:$0xf]  ;;  %v9333_v28 = vrot.slane %v19656_v33, 2  ;;  %v8950_v19 = vrot.slane %v19432_v25, 1  ;;  %v9417_v62 = vpack.c.bf16 %v19716_v13, %v19713_v26 }
 0x3c3   : > { %14757 = vmatpush3.bf16.msra.mxu0 %v15252_v54  ;;  %v19720_v59 = vadd.f32 %v14317_v42, %v6238_v11  ;;  %v6569_v58 = vpop.f32.mrb[219].mxu0  ;;  %14634 = vmatprep.mubr.bf16.mxu1 %v9030_v57  ;;  %v15255_v12 = vld [vmem:[%s21393_s3 + $0x4d8] sm:$0xff]   ;;  %v9031_v54 = vpack.c.bf16 %v19692_v31, %v19689_v56  ;;  %v9032_v57 = vpack.c.bf16 %v19708_v55, %v19705_v48  ;;  %v9330_v46 = vrot.slane %v19415_v3, 2 }
 0x3c4   : > { %14711 = vmatpush3.bf16.msra.mxu1 %v15247_v16  ;;  %v19728_v7 = vadd.f32 %v6569_v58, %v6236_v41  ;;  %14758 = vmatprep.subr.bf16.mxu0 %v15253_v22  ;;  %v14272_v16 = vpop.f32.mrb[188].mxu1  ;;  %v8952_v35 = vrot.slane %v19718_v15, 1  ;;  %v8949_v53 = vrot.slane %v19450_v6, 1  ;;  %v8955_v11 = vrot.slane %v19443_v32, 1 }
 0x3c5   : > { %14712 = vmatprep.subr.bf16.mxu1 %v15248_v39  ;;  %v6196_v43 = vpop.f32.mrb[189].mxu1  ;;  %v6241_v37 = vadd.f32 %v14272_v16, %v19400_v24  ;;  %v8957_v56 = vrot.slane %v19723_v50, 1  ;;  %v9332_v38 = vsel %vm1196_vm1, %v9330_v46, %v9331_v60  ;;  %v8954_v3 = vrot.slane %v19456_v0, 1 }
 0x3c6   : > { %14679 = vmatmul.mubr.bf16.gmra.mrb[68].mxu0 %v9415_v34  ;;  %v14273_v31 = vpop.f32.mrb[190].mxu1  ;;  %v6239_v63 = vadd.f32 %v6196_v43, %v19404_v5  ;;  %v9336_v18 = vrot.slane %v19432_v25, 2  ;;  %v9334_v55 = vsel %vm1196_vm1, %v9331_v60, %v9333_v28  ;;  %v19754_v42 = vsel %vm1019_vm0, %v8949_v53, %v8950_v19  ;;  %v15251_v5 = vld [vmem:[%s21393_s3 + $0x4a8] sm:$0xff]   ;;  %v15256_v25 = vld [vmem:[%s21393_s3 + $0x4e0] sm:$0xff]  }
 0x3c7   : > { %14682 = vmatprep.mubr.bf16.mxu0 %v9416_v47  ;;  %14759 = vmatpush3.bf16.msra.mxu0 %v15253_v22  ;;  %v6199_v41 = vpop.f32.mrb[191].mxu1  ;;  %v6242_v48 = vadd.f32 %v14273_v31, %v19411_v61  ;;  %v9338_v22 = vrot.slane %v19718_v15, 2  ;;  %v22178_v61 = vld [vmem:[#allocation35_spill] sm:$0xff]  ;;  %v8953_v58 = vsel %vm1019_vm0, %v8950_v19, %v8952_v35  ;;  %v9335_v34 = vrot.slane %v19450_v6, 2  ;;  %v19779_v19 = vld [vmem:[#allocation2 + $0x130] sm:$0xf] }
 0x3c8   : > { %14713 = vmatpush3.bf16.msra.mxu1 %v15248_v39  ;;  %14760 = vmatprep.subr.bf16.mxu0 %v15255_v12  ;;  %v14320_v24 = vpop.f32.mrb[220].mxu0  ;;  %v6240_v13 = vadd.f32 %v6199_v41, %v22178_v61  ;;  %v19771_v28 = vsel %vm1019_vm0, %v8954_v3, %v8955_v11  ;;  %v8958_v16 = vsel %vm1019_vm0, %v8955_v11, %v8957_v56  ;;  %v15258_v6 = vld [vmem:[%s21393_s3 + $0x4e8] sm:$0xff]   ;;  %v8959_v41 = vrot.slane %v19491_v30, 1 }
 0x3c9   : > { %14714 = vmatprep.subr.bf16.mxu1 %v15249_v8  ;;  %v19763_v39 = vadd.f32 %v14320_v24, %v6241_v37  ;;  %v6582_v26 = vpop.f32.mrb[221].mxu0  ;;  %v9418_v37 = vpack.c.bf16 %v9334_v55, %v9332_v38  ;;  %v19777_v53 = vsel %vm1196_vm1, %v9335_v34, %v9336_v18  ;;  %22179 = vst [vmem:[#allocation60_spill] sm:$0xff] %v19779_v19  ;;  %v19791_v11 = vld [vmem:[#allocation2 + $0x148] sm:$0xf]  ;;  %v8960_v24 = vrot.slane %v19478_v2, 1 }
 0x3ca   : > { %v19768_v47 = vadd.f32 %v6582_v26, %v6239_v63  ;;  %v14321_v60 = vpop.f32.mrb[222].mxu0  ;;  %14635 = vmatmul.mubr.bf16.gmra.mrb[40].mxu1 %v9031_v54  ;;  %v19787_v35 = vsel %vm1196_vm1, %v9336_v18, %v9338_v22  ;;  %22180 = vst [vmem:[#allocation43_spill] sm:$0xff] %v19791_v11  ;;  %v9033_v63 = vpack.c.bf16 %v8953_v58, %v19754_v42  ;;  %v22181_v22 = vld [vmem:[#allocation37_spill] sm:$0xff] }
 0x3cb   : > { %14761 = vmatpush3.bf16.msra.mxu0 %v15255_v12  ;;  %v19774_v46 = vadd.f32 %v14321_v60, %v6242_v48  ;;  %v6585_v43 = vpop.f32.mrb[223].mxu0  ;;  %14638 = vmatprep.mubr.bf16.mxu1 %v9032_v57  ;;  %v9341_v12 = vrot.slane %v19443_v32, 2  ;;  %v9343_v57 = vrot.slane %v19723_v50, 2  ;;  %v9034_v38 = vpack.c.bf16 %v8958_v16, %v19771_v28  ;;  %v22183_v60 = vld [vmem:[#allocation51_spill] sm:$0xff]  ;;  %v15257_v28 = vld [vmem:[%s21393_s3 + $0x4b8] sm:$0xff]  }
 0x3cc   : > { %14715 = vmatpush3.bf16.msra.mxu1 %v15249_v8  ;;  %v19784_v54 = vadd.f32 %v6585_v43, %v6240_v13  ;;  %v15254_v8 = vld [vmem:[%s21393_s3 + $0x4b0] sm:$0xff]   ;;  %14762 = vmatprep.subr.bf16.mxu0 %v15256_v25  ;;  %v14340_v31 = vpop.f32.mrb[192].mxu1  ;;  %v9340_v32 = vrot.slane %v19456_v0, 2  ;;  %v8962_v48 = vrot.slane %v19779_v19, 1  ;;  %v9419_v42 = vpack.c.bf16 %v19787_v35, %v19777_v53  ;;  %v22184_v16 = vld [vmem:[#allocation49_spill] sm:$0xff] }
 0x3cd   : > { %14716 = vmatprep.subr.bf16.mxu1 %v15251_v5  ;;  %v6921_v3 = vadd.f32 %v14340_v31, %v19440_v49  ;;  %v6792_v18 = vpop.f32.mrb[193].mxu1  ;;  %v8965_v26 = vrot.slane %v22181_v22, 1  ;;  %v8967_v0 = vrot.slane %v19791_v11, 1  ;;  %v22182_v49 = vld [vmem:[#allocation34_spill] sm:$0xff]  ;;  %v9346_v35 = vrot.slane %v19478_v2, 2 }
 0x3ce   : > { %14683 = vmatmul.mubr.bf16.gmra.mrb[72].mxu0 %v9417_v62  ;;  %v6919_v55 = vadd.f32 %v6792_v18, %v19445_v36  ;;  %v14341_v62 = vpop.f32.mrb[194].mxu1  ;;  %v9342_v34 = vsel %vm1196_vm1, %v9340_v32, %v9341_v12  ;;  %v8964_v36 = vrot.slane %v22183_v60, 1  ;;  %v8961_v32 = vsel %vm1019_vm0, %v8959_v41, %v8960_v24 }
 0x3cf   : > { %14686 = vmatprep.mubr.bf16.mxu0 %v9418_v37  ;;  %14763 = vmatpush3.bf16.msra.mxu0 %v15256_v25  ;;  %v6922_v61 = vadd.f32 %v14341_v62, %v22182_v49  ;;  %v6795_v13 = vpop.f32.mrb[195].mxu1  ;;  %v9344_v25 = vsel %vm1196_vm1, %v9341_v12, %v9343_v57  ;;  %v9348_v12 = vrot.slane %v19779_v19, 2  ;;  %v8963_v18 = vsel %vm1019_vm0, %v8960_v24, %v8962_v48  ;;  %v19829_v49 = vld [vmem:[#allocation2 + $0x160] sm:$0xf]  ;;  %v19843_v48 = vld [vmem:[#allocation2 + $0x178] sm:$0xf] }
 0x3d0   : > { %14717 = vmatpush3.bf16.msra.mxu1 %v15251_v5  ;;  %14764 = vmatprep.subr.bf16.mxu0 %v15258_v6  ;;  %v14388_v58 = vpop.f32.mrb[224].mxu0  ;;  %v15259_v5 = vld [vmem:[%s21393_s3 + $0x4f0] sm:$0xff]   ;;  %v6920_v43 = vadd.f32 %v6795_v13, %v22184_v16  ;;  %v9345_v62 = vrot.slane %v19491_v30, 2  ;;  %22186 = vst [vmem:[#allocation59_spill] sm:$0xff] %v19829_v49  ;;  %v8966_v2 = vsel %vm1019_vm0, %v8964_v36, %v8965_v26  ;;  %v9353_v24 = vrot.slane %v19791_v11, 2 }
 0x3d1   : > { %14718 = vmatprep.subr.bf16.mxu1 %v15254_v8  ;;  %v19820_v37 = vadd.f32 %v14388_v58, %v6921_v3  ;;  %v7226_v53 = vpop.f32.mrb[225].mxu0  ;;  %v9351_v58 = vrot.slane %v22181_v22, 2  ;;  %v9420_v30 = vpack.c.bf16 %v9344_v25, %v9342_v34  ;;  %22189 = vst [vmem:[#allocation76_spill] sm:$0xff] %v19843_v48  ;;  %v8972_v34 = vrot.slane %v19829_v49, 1  ;;  %v22191_v25 = vld [vmem:[#allocation48_spill] sm:$0xff] }
 0x3d2   : > { %v19824_v57 = vadd.f32 %v7226_v53, %v6919_v55  ;;  %v14389_v31 = vpop.f32.mrb[226].mxu0  ;;  %14639 = vmatmul.mubr.bf16.gmra.mrb[44].mxu1 %v9033_v63  ;;  %v8968_v55 = vsel %vm1019_vm0, %v8965_v26, %v8967_v0  ;;  %v15260_v63 = vld [vmem:[%s21393_s3 + $0x4f8] sm:$0xff]   ;;  %v9347_v22 = vsel %vm1196_vm1, %v9345_v62, %v9346_v35  ;;  %v9349_v26 = vsel %vm1196_vm1, %v9346_v35, %v9348_v12  ;;  %v22192_v53 = vld [vmem:[#allocation82_spill] sm:$0xff] }
 0x3d3   : > { %14765 = vmatpush3.bf16.msra.mxu0 %v15258_v6  ;;  %v19831_v3 = vadd.f32 %v14389_v31, %v6922_v61  ;;  %v7229_v13 = vpop.f32.mrb[227].mxu0  ;;  %14642 = vmatprep.mubr.bf16.mxu1 %v9034_v38  ;;  %v9350_v6 = vrot.slane %v22183_v60, 2  ;;  %v19848_v38 = vld [vmem:[%s21393_s3 + $0x500] sm:$0xff]   ;;  %v22190_v0 = vld [vmem:[#allocation65_spill] sm:$0xff]  ;;  %v9035_v16 = vpack.c.bf16 %v8963_v18, %v8961_v32  ;;  %v8975_v31 = vrot.slane %v22192_v53, 1  ;;  %v22195_v32 = vld [vmem:[#allocation52_spill] sm:$0xff] }
 0x3d4   : > { %22185 = vst [vmem:[#allocation74_spill] sm:$0xff] %v19824_v57  ;;  %14719 = vmatpush3.bf16.msra.mxu1 %v15254_v8  ;;  %v19839_v41 = vadd.f32 %v7229_v13, %v6920_v43  ;;  %14766 = vmatprep.subr.bf16.mxu0 %v15259_v5  ;;  %v14344_v8 = vpop.f32.mrb[196].mxu1  ;;  %v8970_v61 = vrot.slane %v22190_v0, 1  ;;  %v9036_v43 = vpack.c.bf16 %v8968_v55, %v8966_v2  ;;  %v22193_v13 = vld [vmem:[#allocation36_spill] sm:$0xff]  ;;  %v8977_v12 = vrot.slane %v19843_v48, 1 }
 0x3d5   : > { %22187 = vst [vmem:[#allocation93_spill] sm:$0xff] %v19831_v3  ;;  %14720 = vmatprep.subr.bf16.mxu1 %v15257_v28  ;;  %v6925_v60 = vadd.f32 %v14344_v8, %v22191_v25  ;;  %v6808_v36 = vpop.f32.mrb[197].mxu1  ;;  %v9352_v62 = vsel %vm1196_vm1, %v9350_v6, %v9351_v58  ;;  %v9421_v55 = vpack.c.bf16 %v9349_v26, %v9347_v22  ;;  %v22196_v25 = vld [vmem:[#allocation84_spill] sm:$0xff] }
 0x3d6   : > { %22188 = vst [vmem:[#allocation73_spill] sm:$0xff] %v19839_v41  ;;  %14687 = vmatmul.mubr.bf16.gmra.mrb[76].mxu0 %v9419_v42  ;;  %v6923_v56 = vadd.f32 %v6808_v36, %v22193_v13  ;;  %v14345_v42 = vpop.f32.mrb[198].mxu1  ;;  %v22194_v41 = vld [vmem:[#allocation67_spill] sm:$0xff]  ;;  %v9354_v8 = vsel %vm1196_vm1, %v9351_v58, %v9353_v24  ;;  %v8974_v6 = vrot.slane %v22196_v25, 1  ;;  %v22197_v36 = vld [vmem:[#allocation125_spill] sm:$0xff]  ;;  %v8973_v57 = vsel %vm1019_vm0, %v8970_v61, %v8972_v34 }
 0x3d7   : > { %14690 = vmatprep.mubr.bf16.mxu0 %v9420_v30  ;;  %14767 = vmatpush3.bf16.msra.mxu0 %v15259_v5  ;;  %v8969_v35 = vrot.slane %v22194_v41, 1  ;;  %v19863_v30 = vld [vmem:[%s21393_s3 + $0x540] sm:$0xff]   ;;  %v6926_v18 = vadd.f32 %v14345_v42, %v22195_v32  ;;  %v6811_v2 = vpop.f32.mrb[199].mxu1  ;;  %v9356_v58 = vrot.slane %v22190_v0, 2  ;;  %v9358_v24 = vrot.slane %v19829_v49, 2 }
 0x3d8   : > { %14721 = vmatpush3.bf16.msra.mxu1 %v15257_v28  ;;  %14768 = vmatprep.subr.bf16.mxu0 %v15260_v63  ;;  %v14392_v5 = vpop.f32.mrb[228].mxu0  ;;  %v6924_v13 = vadd.f32 %v6811_v2, %v22197_v36  ;;  %v8976_v22 = vsel %vm1019_vm0, %v8974_v6, %v8975_v31  ;;  %v8978_v32 = vsel %vm1019_vm0, %v8975_v31, %v8977_v12  ;;  %v19896_v2 = vld [vmem:[#allocation2 + $0x190] sm:$0xf] }
 0x3d9   : > { %14802 = vmatprep.subr.bf16.mxu1 %v19848_v38  ;;  %v19870_v28 = vadd.f32 %v14392_v5, %v6925_v60  ;;  %v7242_v3 = vpop.f32.mrb[229].mxu0  ;;  %v8971_v11 = vsel %vm1019_vm0, %v8969_v35, %v8970_v61  ;;  %v9361_v35 = vrot.slane %v22192_v53, 2  ;;  %v9422_v34 = vpack.c.bf16 %v9354_v8, %v9352_v62  ;;  %22202 = vst [vmem:[#allocation100_spill] sm:$0xff] %v19896_v2  ;;  %v22203_v5 = vld [vmem:[#allocation64_spill] sm:$0xff] }
 0x3da   : > { %v19874_v19 = vadd.f32 %v7242_v3, %v6923_v56  ;;  %v14393_v42 = vpop.f32.mrb[230].mxu0  ;;  %14643 = vmatmul.mubr.bf16.gmra.mrb[48].mxu1 %v9035_v16  ;;  %v9363_v56 = vrot.slane %v19843_v48, 2  ;;  %v19885_v3 = vld [vmem:[#allocation2 + $0x60] sm:$0xff]  ;;  %v19891_v16 = vld [vmem:[#allocation2 + $0x68] sm:$0xff]  ;;  %v9037_v12 = vpack.c.bf16 %v8973_v57, %v8971_v11  ;;  %v9038_v62 = vpack.c.bf16 %v8978_v32, %v8976_v22 }
 0x3db   : > { %22198 = vst [vmem:[#allocation91_spill] sm:$0xff] %v19870_v28  ;;  %14769 = vmatpush3.bf16.msra.mxu0 %v15260_v63  ;;  %v19879_v26 = vadd.f32 %v14393_v42, %v6926_v18  ;;  %v7245_v60 = vpop.f32.mrb[231].mxu0  ;;  %14646 = vmatprep.mubr.bf16.mxu1 %v9036_v43  ;;  %v9355_v63 = vrot.slane %v22194_v41, 2  ;;  %v9360_v18 = vrot.slane %v22196_v25, 2  ;;  %v9359_v8 = vsel %vm1196_vm1, %v9356_v58, %v9358_v24  ;;  %v22205_v42 = vld [vmem:[#allocation80_spill] sm:$0xff]  ;;  %v22206_v25 = vld [vmem:[#allocation66_spill] sm:$0xff] }
 0x3dc   : > { %22199 = vst [vmem:[#allocation95_spill] sm:$0xff] %v19874_v19  ;;  %14850 = vmatprep.subr.bf16.mxu0 %v19863_v30  ;;  %v19888_v0 = vadd.f32 %v7245_v60, %v6924_v13  ;;  %v14348_v53 = vpop.f32.mrb[200].mxu1  ;;  %v19901_v13 = vld [vmem:[#allocation2 + $0x1a8] sm:$0xf]  ;;  %v9364_v57 = vsel %vm1196_vm1, %v9361_v35, %v9363_v56  ;;  %v8980_v22 = vrot.slane %v19548_v40, 1  ;;  %v8982_v32 = vrot.slane %v19896_v2, 1 }
 0x3dd   : > { %22200 = vst [vmem:[#allocation75_spill] sm:$0xff] %v19879_v26  ;;  %v6929_v6 = vadd.f32 %v14348_v53, %v22203_v5  ;;  %v6824_v36 = vpop.f32.mrb[201].mxu1  ;;  %v9357_v41 = vsel %vm1196_vm1, %v9355_v63, %v9356_v58  ;;  %22204 = vst [vmem:[#allocation101_spill] sm:$0xff] %v19901_v13  ;;  %v9362_v11 = vsel %vm1196_vm1, %v9360_v18, %v9361_v35  ;;  %v8984_v58 = vrot.slane %v19556_v4, 1  ;;  %v22207_v24 = vld [vmem:[#allocation83_spill] sm:$0xff]  ;;  %v22209_v18 = vld [vmem:[#allocation58_spill] sm:$0xff] }
 0x3de   : > { %22201 = vst [vmem:[#allocation94_spill] sm:$0xff] %v19888_v0  ;;  %14691 = vmatmul.mubr.bf16.gmra.mrb[80].mxu0 %v9421_v55  ;;  %v6927_v60 = vadd.f32 %v6824_v36, %v22205_v42  ;;  %v14349_v61 = vpop.f32.mrb[202].mxu1  ;;  %v8979_v55 = vrot.slane %v19546_v17, 1  ;;  %v8985_v31 = vrot.slane %v22209_v18, 1  ;;  %v8987_v35 = vrot.slane %v19901_v13, 1  ;;  %v19918_v48 = vld [vmem:[#allocation2 + $0x48] sm:$0xff] }
 0x3df   : > { %14694 = vmatprep.mubr.bf16.mxu0 %v9422_v34  ;;  %v6930_v53 = vadd.f32 %v14349_v61, %v22206_v25  ;;  %v6827_v5 = vpop.f32.mrb[203].mxu1  ;;  %v9423_v25 = vpack.c.bf16 %v9359_v8, %v9357_v41  ;;  %v9424_v43 = vpack.c.bf16 %v9364_v57, %v9362_v11  ;;  %v9686_v0 = vrot.slane %v19918_v48, 3  ;;  %v19931_v11 = vld [vmem:[#allocation2 + $0x1c0] sm:$0xf]  ;;  %v22218_v19 = vld [vmem:[#allocation44_spill] sm:$0xff] }
 0x3e0   : > { %v14396_v34 = vpop.f32.mrb[232].mxu0  ;;  %v6928_v63 = vadd.f32 %v6827_v5, %v22207_v24  ;;  %v9368_v24 = vrot.slane %v19896_v2, 2  ;;  %v8983_v41 = vsel %vm1019_vm0, %v8980_v22, %v8982_v32  ;;  %v9370_v8 = vrot.slane %v19556_v4, 2  ;;  %v22214_v32 = vld [vmem:[#allocation127_spill] sm:$0xff] }
 0x3e1   : > { %v19912_v36 = vadd.f32 %v14396_v34, %v6929_v6  ;;  %v7258_v42 = vpop.f32.mrb[233].mxu0  ;;  %v9365_v6 = vrot.slane %v19546_v17, 2  ;;  %v9366_v34 = vrot.slane %v19548_v40, 2  ;;  %v8988_v17 = vsel %vm1019_vm0, %v8985_v31, %v8987_v35 }
 0x3e2   : > { %v19916_v56 = vadd.f32 %v7258_v42, %v6927_v60  ;;  %v14397_v61 = vpop.f32.mrb[234].mxu0  ;;  %14647 = vmatmul.mubr.bf16.gmra.mrb[52].mxu1 %v9037_v12  ;;  %v8981_v12 = vsel %vm1019_vm0, %v8979_v55, %v8980_v22  ;;  %v9371_v40 = vrot.slane %v22209_v18, 2  ;;  %v15434_v55 = vld [vmem:[#allocation2 + $0x50] sm:$0xff]  ;;  %v9689_v4 = vrot.slane %v22214_v32, 3  ;;  %v22217_v18 = vld [vmem:[#allocation129_spill] sm:$0xff] }
 0x3e3   : > { %22208 = vst [vmem:[#allocation106_spill] sm:$0xff] %v19912_v36  ;;  %v19921_v26 = vadd.f32 %v14397_v61, %v6930_v53  ;;  %v7261_v5 = vpop.f32.mrb[235].mxu0  ;;  %14650 = vmatprep.mubr.bf16.mxu1 %v9038_v62  ;;  %v8986_v62 = vsel %vm1019_vm0, %v8984_v58, %v8985_v31  ;;  %v9373_v53 = vrot.slane %v19901_v13, 2  ;;  %v9687_v22 = vrot.slane %v15434_v55, 3  ;;  %v22216_v58 = vld [vmem:[#allocation131_spill] sm:$0xff] }
 0x3e4   : > { %22210 = vst [vmem:[#allocation108_spill] sm:$0xff] %v19916_v56  ;;  %v19926_v60 = vadd.f32 %v7261_v5, %v6928_v63  ;;  %v14352_v57 = vpop.f32.mrb[204].mxu1  ;;  %v22213_v63 = vld [vmem:[#allocation128_spill] sm:$0xff]  ;;  %v10073_v5 = vrot.slane %v15434_v55, 4  ;;  %v8989_v56 = vrot.slane %v22216_v58, 1  ;;  %v8992_v31 = vrot.slane %v19931_v11, 1 }
 0x3e5   : > { %22211 = vst [vmem:[#allocation70_spill] sm:$0xff] %v19921_v26  ;;  %v6933_v42 = vadd.f32 %v14352_v57, %v22213_v63  ;;  %v6840_v61 = vpop.f32.mrb[205].mxu1  ;;  %v9039_v26 = vpack.c.bf16 %v8983_v41, %v8981_v12  ;;  %v9040_v57 = vpack.c.bf16 %v8988_v17, %v8986_v62  ;;  %v9369_v63 = vsel %vm1196_vm1, %v9366_v34, %v9368_v24 }
 0x3e6   : > { %22212 = vst [vmem:[#allocation50_spill] sm:$0xff] %v19926_v60  ;;  %14695 = vmatmul.mubr.bf16.gmra.mrb[84].mxu0 %v9423_v25  ;;  %v22215_v60 = vld [vmem:[#allocation42_spill] sm:$0xff]  ;;  %v14353_v25 = vpop.f32.mrb[206].mxu1  ;;  %v9372_v12 = vsel %vm1196_vm1, %v9370_v8, %v9371_v40  ;;  %v9374_v41 = vsel %vm1196_vm1, %v9371_v40, %v9373_v53  ;;  %v9378_v62 = vrot.slane %v19931_v11, 2  ;;  %v10078_v24 = vrot.slane %v19891_v16, 4 }
 0x3e7   : > { %14698 = vmatprep.mubr.bf16.mxu0 %v9424_v43  ;;  %v6931_v2 = vadd.f32 %v6840_v61, %v22215_v60  ;;  %v6934_v35 = vadd.f32 %v14353_v25, %v22217_v18  ;;  %v6843_v13 = vpop.f32.mrb[207].mxu1  ;;  %v9367_v43 = vsel %vm1196_vm1, %v9365_v6, %v9366_v34  ;;  %v9375_v25 = vrot.slane %v22216_v58, 2 }
 0x3e8   : > { %v14400_v36 = vpop.f32.mrb[236].mxu0  ;;  %v6932_v28 = vadd.f32 %v6843_v13, %v22218_v19  ;;  %v10075_v6 = vrot.slane %v22214_v32, 4  ;;  %v9425_v13 = vpack.c.bf16 %v9369_v63, %v9367_v43  ;;  %v9688_v40 = vsel %vm3940_vm2, %v9686_v0, %v9687_v22  ;;  %v22222_v43 = vld [vmem:[#allocation132_spill] sm:$0xff] }
 0x3e9   : > { %v19946_v55 = vadd.f32 %v14400_v36, %v6933_v42  ;;  %v7274_v60 = vpop.f32.mrb[237].mxu0  ;;  %v8993_v36 = vsel %vm1019_vm0, %v8989_v56, %v8992_v31  ;;  %v9690_v53 = vsel %vm3940_vm2, %v9687_v22, %v9689_v4  ;;  %v22219_v42 = vrot.slane %v19891_v16, 3  ;;  %v22221_v31 = vld [vmem:[#allocation130_spill] sm:$0xff] }
 0x3ea   : > { %v19950_v61 = vadd.f32 %v7274_v60, %v6931_v2  ;;  %v14401_v49 = vpop.f32.mrb[238].mxu0  ;;  %14651 = vmatmul.mubr.bf16.gmra.mrb[56].mxu1 %v9039_v26  ;;  %v10080_v2 = vrot.slane %v19551_v27, 4  ;;  %v9426_v26 = vpack.c.bf16 %v9374_v41, %v9372_v12  ;;  %v22220_v32 = vrot.slane %v19327_v9, 3  ;;  %v15435_v4 = vld [vmem:[#allocation2 + $0x80] sm:$0xff] }
 0x3eb   : > { %v19955_v34 = vadd.f32 %v14401_v49, %v6934_v35  ;;  %v7277_v19 = vpop.f32.mrb[239].mxu0  ;;  %14654 = vmatprep.mubr.bf16.mxu1 %v9040_v57  ;;  %v10072_v49 = vrot.slane %v19918_v48, 4  ;;  %v9041_v35 = vpack.c.bf16 %v8993_v36, %v8989_v56  ;;  %v9379_v57 = vsel %vm1196_vm1, %v9375_v25, %v9378_v62  ;;  %v15436_v62 = vld [vmem:[#allocation2 + $0x78] sm:$0xff] }
 0x3ec   : > { %v19960_v8 = vadd.f32 %v7277_v19, %v6932_v28  ;;  %v14356_v17 = vpop.f32.mrb[208].mxu1  ;;  %v19970_v58 = vsel %vm3940_vm2, %v22220_v32, %v22219_v42  ;;  %v10076_v48 = vsel %vm4327_vm3, %v10073_v5, %v10075_v6  ;;  %v9697_v60 = vrot.slane %v15435_v4, 3 }
 0x3ed   : > { %v6937_v18 = vadd.f32 %v14356_v17, %v22221_v31  ;;  %v6856_v28 = vpop.f32.mrb[209].mxu1  ;;  %v10074_v22 = vsel %vm4327_vm3, %v10072_v49, %v10073_v5  ;;  %v22223_v19 = vrot.slane %v19551_v27, 3  ;;  %v9696_v36 = vrot.slane %v15436_v62, 3 }
 0x3ee   : > { %14699 = vmatmul.mubr.bf16.gmra.mrb[88].mxu0 %v9425_v13  ;;  %v6935_v0 = vadd.f32 %v6856_v28, %v22222_v43  ;;  %v14357_v63 = vpop.f32.mrb[210].mxu1  ;;  %v22224_v13 = vmov %v22219_v42  ;;  %v9798_v6 = vpack.c.bf16 %v9690_v53, %v9688_v40  ;;  %v9427_v32 = vpack.c.bf16 %v9379_v57, %v9375_v25 }
 0x3ef   : > { %14702 = vmatprep.mubr.bf16.mxu0 %v9426_v26  ;;  %v6938_v9 = vadd.f32 %v14357_v63, %v19612_v23  ;;  %v6859_v12 = vpop.f32.mrb[211].mxu1  ;;  %v9695_v56 = vsel %vm3940_vm2, %v22224_v13, %v22223_v19  ;;  %v22225_v26 = vld [vmem:[#allocation57_spill] sm:$0xff]  ;;  %v10184_v27 = vpack.c.bf16 %v10076_v48, %v10074_v22  ;;  %v22226_v16 = vrot.slane %v19885_v3, 4  ;;  %v20009_v19 = vld [vmem:[#allocation2 + $0xb0] sm:$0xff] }
 0x3f0   : > { %v14404_v41 = vpop.f32.mrb[240].mxu0  ;;  %v9699_v17 = vrot.slane %v22225_v26, 3  ;;  %v6936_v49 = vadd.f32 %v6859_v12, %v19619_v45  ;;  %v19995_v43 = vsel %vm4327_vm3, %v10078_v24, %v10080_v2  ;;  %v9698_v40 = vsel %vm3940_vm2, %v9696_v36, %v9697_v60  ;;  %v15437_v3 = vld [vmem:[#allocation2 + $0x98] sm:$0xff]  ;;  %v15438_v12 = vld [vmem:[#allocation2 + $0x90] sm:$0xff] }
 0x3f1   : > { %v19985_v42 = vadd.f32 %v14404_v41, %v6937_v18  ;;  %v7290_v5 = vpop.f32.mrb[241].mxu0  ;;  %v19992_v28 = vsel %vm4327_vm3, %v22226_v16, %v10078_v24  ;;  %v10083_v25 = vrot.slane %v15435_v4, 4  ;;  %v10085_v53 = vrot.slane %v22225_v26, 4 }
 0x3f2   : > { %v19987_v23 = vadd.f32 %v7290_v5, %v6935_v0  ;;  %v14405_v31 = vpop.f32.mrb[242].mxu0  ;;  %14655 = vmatmul.mubr.bf16.gmra.mrb[60].mxu1 %v9041_v35  ;;  %v9700_v35 = vsel %vm3940_vm2, %v9697_v60, %v9699_v17  ;;  %v9702_v57 = vrot.slane %v15437_v3, 3  ;;  %v9704_v0 = vrot.slane %v19590_v20, 3  ;;  %v15262_v5 = vld [vmem:[%s21393_s3 + $0x508] sm:$0xff]  }
 0x3f3   : > { %v19997_v63 = vadd.f32 %v14405_v31, %v6938_v9  ;;  %v7293_v45 = vpop.f32.mrb[243].mxu0  ;;  %14722 = vmatprep.mubr.bf16.mxu1 %v9798_v6  ;;  %v9799_v24 = vpack.c.bf16 %v9695_v56, %v19970_v58  ;;  %v10185_v2 = vpack.c.bf16 %v19995_v43, %v19992_v28  ;;  %v10082_v48 = vrot.slane %v15436_v62, 4 }
 0x3f4   : > { %v20001_v18 = vadd.f32 %v7293_v45, %v6936_v49  ;;  %v14360_v22 = vpop.f32.mrb[212].mxu1  ;;  %v9701_v41 = vrot.slane %v15438_v12, 3  ;;  %v9707_v60 = vrot.slane %v20009_v19, 3  ;;  %v9709_v13 = vrot.slane %v19617_v51, 3 }
 0x3f5   : > { %v6941_v4 = vadd.f32 %v14360_v22, %v19643_v1  ;;  %v6872_v9 = vpop.f32.mrb[213].mxu1  ;;  %v9800_v58 = vpack.c.bf16 %v9700_v35, %v9698_v40  ;;  %v10084_v56 = vsel %vm4327_vm3, %v10082_v48, %v10083_v25  ;;  %v10086_v62 = vsel %vm4327_vm3, %v10083_v25, %v10085_v53  ;;  %v15268_v22 = vld [vmem:[%s21393_s3 + $0x548] sm:$0xff]  }
 0x3f6   : > { %14703 = vmatmul.mubr.bf16.gmra.mrb[92].mxu0 %v9427_v32  ;;  %v6939_v36 = vadd.f32 %v6872_v9, %v19651_v21  ;;  %v14361_v26 = vpop.f32.mrb[214].mxu1  ;;  %v20021_v6 = vsel %vm3940_vm2, %v9701_v41, %v9702_v57  ;;  %v20024_v32 = vsel %vm3940_vm2, %v9702_v57, %v9704_v0  ;;  %v15440_v21 = vld [vmem:[#allocation2 + $0xa8] sm:$0xff]  ;;  %v10090_v43 = vrot.slane %v19590_v20, 4 }
 0x3f7   : > { %14770 = vmatprep.mubr.bf16.mxu0 %v10184_v27  ;;  %v6942_v1 = vadd.f32 %v14361_v26, %v19658_v29  ;;  %v6875_v17 = vpop.f32.mrb[215].mxu1  ;;  %v9706_v31 = vrot.slane %v15440_v21, 3  ;;  %v10088_v29 = vrot.slane %v15437_v3, 4  ;;  %v10186_v25 = vpack.c.bf16 %v10086_v62, %v10084_v56  ;;  %v20049_v9 = vld [vmem:[#allocation2 + $0xc8] sm:$0xff]  ;;  %v20056_v62 = vld [vmem:[#allocation2 + $0xe0] sm:$0xff] }
 0x3f8   : > { %v14408_v49 = vpop.f32.mrb[244].mxu0  ;;  %v6940_v27 = vadd.f32 %v6875_v17, %v19667_v10  ;;  %v9710_v35 = vsel %vm3940_vm2, %v9707_v60, %v9709_v13  ;;  %v10087_v0 = vrot.slane %v15438_v12, 4  ;;  %v10093_v3 = vrot.slane %v20009_v19, 4 }
 0x3f9   : > { %v20027_v16 = vadd.f32 %v14408_v49, %v6941_v4  ;;  %v7306_v28 = vpop.f32.mrb[245].mxu0  ;;  %v9708_v53 = vsel %vm3940_vm2, %v9706_v31, %v9707_v60  ;;  %v10095_v20 = vrot.slane %v19617_v51, 4  ;;  %v9801_v48 = vpack.c.bf16 %v20024_v32, %v20021_v6 }
 0x3fa   : > { %v20030_v45 = vadd.f32 %v7306_v28, %v6939_v36  ;;  %v14409_v40 = vpop.f32.mrb[246].mxu0  ;;  %14723 = vmatmul.mubr.bf16.vlgmr.msra.gmra.mrb[64].mxu1 %v9799_v24  ;;  %v10092_v4 = vrot.slane %v15440_v21, 4  ;;  %v9712_v12 = vrot.slane %v20049_v9, 3  ;;  %v9802_v41 = vpack.c.bf16 %v9710_v35, %v9708_v53  ;;  %v15444_v28 = vld [vmem:[#allocation2 + $0xd8] sm:$0xff] }
 0x3fb   : > { %v20034_v57 = vadd.f32 %v14409_v40, %v6942_v1  ;;  %14803 = vmatpush3.bf16.msra.mxu1 %v19848_v38  ;;  %v7309_v10 = vpop.f32.mrb[247].mxu0  ;;  %14726 = vmatprep.mubr.bf16.mxu1 %v9800_v58  ;;  %v15263_v38 = vld [vmem:[%s21393_s3 + $0x510] sm:$0xff]   ;;  %v10089_v19 = vsel %vm4327_vm3, %v10087_v0, %v10088_v29  ;;  %v10091_v60 = vsel %vm4327_vm3, %v10088_v29, %v10090_v43  ;;  %v9714_v13 = vrot.slane %v19649_v44, 3  ;;  %v15442_v58 = vld [vmem:[#allocation2 + $0xc0] sm:$0xff] }
 0x3fc   : > { %v20042_v24 = vadd.f32 %v7309_v10, %v6940_v27  ;;  %14804 = vmatprep.subr.bf16.mxu1 %v15262_v5  ;;  %v14364_v51 = vpop.f32.mrb[216].mxu1  ;;  %v9711_v56 = vrot.slane %v15442_v58, 3  ;;  %v9717_v1 = vrot.slane %v20056_v62, 3  ;;  %v9719_v17 = vrot.slane %v19656_v33, 3 }
 0x3fd   : > { %v6945_v36 = vadd.f32 %v14364_v51, %v19701_v52  ;;  %v6888_v26 = vpop.f32.mrb[217].mxu1  ;;  %v10094_v6 = vsel %vm4327_vm3, %v10092_v4, %v10093_v3  ;;  %v10096_v52 = vsel %vm4327_vm3, %v10093_v3, %v10095_v20  ;;  %v9716_v29 = vrot.slane %v15444_v28, 3 }
 0x3fe   : > { %14771 = vmatmul.mubr.bf16.vlgmr.msra.gmra.mrb[96].mxu0 %v10185_v2  ;;  %v6943_v2 = vadd.f32 %v6888_v26, %v19710_v14  ;;  %v14365_v49 = vpop.f32.mrb[218].mxu1  ;;  %v20066_v27 = vsel %vm3940_vm2, %v9711_v56, %v9712_v12  ;;  %v15264_v14 = vld [vmem:[%s21393_s3 + $0x518] sm:$0xff]   ;;  %v10100_v53 = vrot.slane %v19649_v44, 4  ;;  %v20088_v3 = vsel %vm3940_vm2, %v9717_v1, %v9719_v17  ;;  %v15445_v26 = vld [vmem:[#allocation2 + $0xf0] sm:$0xff] }
 0x3ff   : > { %14774 = vmatprep.mubr.bf16.mxu0 %v10186_v25  ;;  %14851 = vmatpush3.bf16.msra.mxu0 %v19863_v30  ;;  %v6946_v32 = vadd.f32 %v14365_v49, %v19720_v59  ;;  %v6891_v21 = vpop.f32.mrb[219].mxu1  ;;  %v10098_v30 = vrot.slane %v20049_v9, 4  ;;  %v20079_v25 = vsel %vm3940_vm2, %v9712_v12, %v9714_v13  ;;  %v20085_v0 = vsel %vm3940_vm2, %v9716_v29, %v9717_v1  ;;  %v15446_v17 = vld [vmem:[#allocation2 + $0xf8] sm:$0xff] }
 0x400   : > { %14805 = vmatpush3.bf16.msra.mxu1 %v15262_v5  ;;  %14852 = vmatprep.subr.bf16.mxu0 %v15268_v22  ;;  %v14412_v31 = vpop.f32.mrb[248].mxu0  ;;  %v15269_v5 = vld [vmem:[%s21393_s3 + $0x550] sm:$0xff]   ;;  %v6944_v59 = vadd.f32 %v6891_v21, %v19728_v7  ;;  %v10103_v7 = vrot.slane %v20056_v62, 4  ;;  %v10187_v9 = vpack.c.bf16 %v10091_v60, %v10089_v19  ;;  %v10097_v44 = vrot.slane %v15442_v58, 4  ;;  %v15447_v21 = vld [vmem:[#allocation2 + $0x108] sm:$0xff] }
 0x401   : > { %14806 = vmatprep.subr.bf16.mxu1 %v15263_v38  ;;  %v20076_v43 = vadd.f32 %v14412_v31, %v6945_v36  ;;  %v7322_v40 = vpop.f32.mrb[249].mxu0  ;;  %v10105_v12 = vrot.slane %v19656_v33, 4  ;;  %v10188_v13 = vpack.c.bf16 %v10096_v52, %v10094_v6  ;;  %v9803_v36 = vpack.c.bf16 %v20079_v25, %v20066_v27  ;;  %v15448_v27 = vld [vmem:[#allocation2 + $0x110] sm:$0xff] }
 0x402   : > { %v20082_v35 = vadd.f32 %v7322_v40, %v6943_v2  ;;  %v14413_v10 = vpop.f32.mrb[250].mxu0  ;;  %14727 = vmatmul.mubr.bf16.gmra.mrb[68].mxu1 %v9801_v48  ;;  %v15271_v48 = vld [vmem:[%s21393_s3 + $0x558] sm:$0xff]   ;;  %v9804_v33 = vpack.c.bf16 %v20088_v3, %v20085_v0  ;;  %v10099_v19 = vsel %vm4327_vm3, %v10097_v44, %v10098_v30  ;;  %v10101_v60 = vsel %vm4327_vm3, %v10098_v30, %v10100_v53 }
 0x403   : > { %14853 = vmatpush3.bf16.msra.mxu0 %v15268_v22  ;;  %v20091_v20 = vadd.f32 %v14413_v10, %v6946_v32  ;;  %v7325_v4 = vpop.f32.mrb[251].mxu0  ;;  %14730 = vmatprep.mubr.bf16.mxu1 %v9802_v41  ;;  %v10102_v22 = vrot.slane %v15444_v28, 4  ;;  %v15265_v41 = vld [vmem:[%s21393_s3 + $0x520] sm:$0xff]   ;;  %v9721_v58 = vrot.slane %v15445_v26, 3  ;;  %v9722_v2 = vrot.slane %v15446_v17, 3 }
 0x404   : > { %14807 = vmatpush3.bf16.msra.mxu1 %v15263_v38  ;;  %v20097_v51 = vadd.f32 %v7325_v4, %v6944_v59  ;;  %14854 = vmatprep.subr.bf16.mxu0 %v15269_v5  ;;  %v14368_v38 = vpop.f32.mrb[220].mxu1  ;;  %v9724_v49 = vrot.slane %v19718_v15, 3  ;;  %v10106_v32 = vsel %vm4327_vm3, %v10103_v7, %v10105_v12  ;;  %v9726_v31 = vrot.slane %v15447_v21, 3 }
 0x405   : > { %14808 = vmatprep.subr.bf16.mxu1 %v15264_v14  ;;  %v6949_v56 = vadd.f32 %v14368_v38, %v19763_v39  ;;  %v6904_v62 = vpop.f32.mrb[221].mxu1  ;;  %v10104_v1 = vsel %vm4327_vm3, %v10102_v22, %v10103_v7  ;;  %v9727_v28 = vrot.slane %v15448_v27, 3  ;;  %v10189_v59 = vpack.c.bf16 %v10101_v60, %v10099_v19 }
 0x406   : > { %14775 = vmatmul.mubr.bf16.gmra.mrb[100].mxu0 %v10187_v9  ;;  %v6947_v6 = vadd.f32 %v6904_v62, %v19768_v47  ;;  %v14369_v52 = vpop.f32.mrb[222].mxu1  ;;  %v9729_v40 = vrot.slane %v19723_v50, 3  ;;  %v10108_v25 = vrot.slane %v15446_v17, 4  ;;  %v15267_v47 = vld [vmem:[%s21393_s3 + $0x528] sm:$0xff]   ;;  %v10110_v10 = vrot.slane %v19718_v15, 4 }
 0x407   : > { %14778 = vmatprep.mubr.bf16.mxu0 %v10188_v13  ;;  %14855 = vmatpush3.bf16.msra.mxu0 %v15269_v5  ;;  %v6950_v39 = vadd.f32 %v14369_v52, %v19774_v46  ;;  %v6907_v29 = vpop.f32.mrb[223].mxu1  ;;  %v10113_v0 = vrot.slane %v15448_v27, 4  ;;  %v10190_v4 = vpack.c.bf16 %v10106_v32, %v10104_v1  ;;  %v9723_v9 = vsel %vm3940_vm2, %v9721_v58, %v9722_v2  ;;  %v15274_v15 = vld [vmem:[%s21393_s3 + $0x568] sm:$0xff]   ;;  %v22228_v32 = vld [vmem:[#allocation74_spill] sm:$0xff] }
 0x408   : > { %14809 = vmatpush3.bf16.msra.mxu1 %v15264_v14  ;;  %14856 = vmatprep.subr.bf16.mxu0 %v15271_v48  ;;  %v14416_v30 = vpop.f32.mrb[252].mxu0  ;;  %v15272_v14 = vld [vmem:[%s21393_s3 + $0x560] sm:$0xff]   ;;  %v6948_v5 = vadd.f32 %v6907_v29, %v19784_v54  ;;  %v10115_v44 = vrot.slane %v19723_v50, 4  ;;  %v9725_v54 = vsel %vm3940_vm2, %v9722_v2, %v9724_v49  ;;  %v10107_v22 = vrot.slane %v15445_v26, 4  ;;  %v20147_v58 = vld [vmem:[#allocation2 + $0x128] sm:$0xff]  ;;  %v22227_v2 = vld [vmem:[#allocation60_spill] sm:$0xff] }
 0x409   : > { %14810 = vmatprep.subr.bf16.mxu1 %v15265_v41  ;;  %v20122_v53 = vadd.f32 %v14416_v30, %v6949_v56  ;;  %v7338_v46 = vpop.f32.mrb[253].mxu0  ;;  %v10112_v38 = vrot.slane %v15447_v21, 4  ;;  %v9728_v19 = vsel %vm3940_vm2, %v9726_v31, %v9727_v28  ;;  %v9730_v50 = vsel %vm3940_vm2, %v9727_v28, %v9729_v40  ;;  %v15451_v28 = vld [vmem:[#allocation2 + $0x120] sm:$0xff]  ;;  %v22229_v29 = vld [vmem:[#allocation43_spill] sm:$0xff] }
 0x40a   : > { %v20125_v3 = vadd.f32 %v7338_v46, %v6947_v6  ;;  %v14417_v7 = vpop.f32.mrb[254].mxu0  ;;  %14731 = vmatmul.mubr.bf16.gmra.mrb[72].mxu1 %v9803_v36  ;;  %v10111_v60 = vsel %vm4327_vm3, %v10108_v25, %v10110_v10  ;;  %v9732_v56 = vrot.slane %v20147_v58, 3  ;;  %v10116_v17 = vsel %vm4327_vm3, %v10113_v0, %v10115_v44  ;;  %v20153_v6 = vld [vmem:[#allocation2 + $0x140] sm:$0xff]  ;;  %v15452_v10 = vld [vmem:[#allocation2 + $0x138] sm:$0xff] }
 0x40b   : > { %14857 = vmatpush3.bf16.msra.mxu0 %v15271_v48  ;;  %v20129_v12 = vadd.f32 %v14417_v7, %v6950_v39  ;;  %v7341_v13 = vpop.f32.mrb[255].mxu0  ;;  %14734 = vmatprep.mubr.bf16.mxu1 %v9804_v33  ;;  %v15270_v48 = vld [vmem:[%s21393_s3 + $0x530] sm:$0xff]   ;;  %v20145_v26 = vsel %vm4327_vm3, %v10112_v38, %v10113_v0  ;;  %v9734_v49 = vrot.slane %v22227_v2, 3  ;;  %v9737_v52 = vrot.slane %v20153_v6, 3 }
 0x40c   : > { %14811 = vmatpush3.bf16.msra.mxu1 %v15265_v41  ;;  %v20135_v36 = vadd.f32 %v7341_v13, %v6948_v5  ;;  %14858 = vmatprep.subr.bf16.mxu0 %v15272_v14  ;;  %v14436_v33 = vpop.f32.mrb[224].mxu1  ;;  %v10109_v41 = vsel %vm4327_vm3, %v10107_v22, %v10108_v25  ;;  %v9805_v27 = vpack.c.bf16 %v9725_v54, %v9723_v9  ;;  %v9731_v39 = vrot.slane %v15451_v28, 3  ;;  %v15275_v7 = vld [vmem:[%s21393_s3 + $0x570] sm:$0xff]  }
 0x40d   : > { %14812 = vmatprep.subr.bf16.mxu1 %v15267_v47  ;;  %v7741_v62 = vadd.f32 %v14436_v33, %v19820_v37  ;;  %v7612_v1 = vpop.f32.mrb[225].mxu1  ;;  %v9739_v30 = vrot.slane %v22229_v29, 3  ;;  %v22230_v37 = vld [vmem:[#allocation93_spill] sm:$0xff]  ;;  %v9806_v5 = vpack.c.bf16 %v9730_v50, %v9728_v19  ;;  %v10191_v46 = vpack.c.bf16 %v10111_v60, %v10109_v41 }
 0x40e   : > { %14779 = vmatmul.mubr.bf16.gmra.mrb[104].mxu0 %v10189_v59  ;;  %v7739_v21 = vadd.f32 %v7612_v1, %v22228_v32  ;;  %v14437_v31 = vpop.f32.mrb[226].mxu1  ;;  %v9736_v0 = vrot.slane %v15452_v10, 3  ;;  %v10192_v13 = vpack.c.bf16 %v10116_v17, %v20145_v26  ;;  %v9733_v54 = vsel %vm3940_vm2, %v9731_v39, %v9732_v56 }
 0x40f   : > { %14782 = vmatprep.mubr.bf16.mxu0 %v10190_v4  ;;  %14859 = vmatpush3.bf16.msra.mxu0 %v15272_v14  ;;  %v7742_v59 = vadd.f32 %v14437_v31, %v22230_v37  ;;  %v7615_v40 = vpop.f32.mrb[227].mxu1  ;;  %v15273_v14 = vld [vmem:[%s21393_s3 + $0x538] sm:$0xff]   ;;  %v9735_v19 = vsel %vm3940_vm2, %v9732_v56, %v9734_v49  ;;  %v10118_v33 = vrot.slane %v20147_v58, 4  ;;  %v10120_v26 = vrot.slane %v22227_v2, 4  ;;  %v20192_v2 = vld [vmem:[%s21393_s3 + $0x580] sm:$0xff]   ;;  %v15454_v37 = vld [vmem:[#allocation2 + $0x150] sm:$0xff] }
 0x410   : > { %14813 = vmatpush3.bf16.msra.mxu1 %v15267_v47  ;;  %14860 = vmatprep.subr.bf16.mxu0 %v15274_v15  ;;  %v14484_v25 = vpop.f32.mrb[0].mxu0  ;;  %v22231_v4 = vld [vmem:[#allocation73_spill] sm:$0xff]  ;;  %v9738_v50 = vsel %vm3940_vm2, %v9736_v0, %v9737_v52  ;;  %v10123_v1 = vrot.slane %v20153_v6, 4  ;;  %v10117_v49 = vrot.slane %v15451_v28, 4  ;;  %v9807_v6 = vpack.c.bf16 %v9735_v19, %v9733_v54 }
 0x411   : > { %14814 = vmatprep.subr.bf16.mxu1 %v15270_v48  ;;  %v7740_v47 = vadd.f32 %v7615_v40, %v22231_v4  ;;  %v20166_v9 = vadd.f32 %v14484_v25, %v7741_v62  ;;  %v7998_v44 = vpop.f32.mrb[1].mxu0  ;;  %v9740_v62 = vsel %vm3940_vm2, %v9737_v52, %v9739_v30  ;;  %v15276_v56 = vld [vmem:[%s21393_s3 + $0x578] sm:$0xff]   ;;  %v10122_v52 = vrot.slane %v15452_v10, 4  ;;  %v22234_v40 = vld [vmem:[#allocation95_spill] sm:$0xff]  ;;  %v20203_v10 = vld [vmem:[%s21393_s3 + $0x5c0] sm:$0xff]  }
 0x412   : > { %v20170_v22 = vadd.f32 %v7998_v44, %v7739_v21  ;;  %v14485_v38 = vpop.f32.mrb[2].mxu0  ;;  %14735 = vmatmul.mubr.bf16.gmra.mrb[76].mxu1 %v9805_v27  ;;  %v20186_v58 = vld [vmem:[#allocation2 + $0x158] sm:$0xff]  ;;  %v22232_v21 = vld [vmem:[#allocation59_spill] sm:$0xff]  ;;  %v10119_v30 = vsel %vm4327_vm3, %v10117_v49, %v10118_v33  ;;  %v10121_v0 = vsel %vm4327_vm3, %v10118_v33, %v10120_v26  ;;  %v22237_v26 = vld [vmem:[#allocation76_spill] sm:$0xff] }
 0x413   : > { %14861 = vmatpush3.bf16.msra.mxu0 %v15274_v15  ;;  %v20175_v41 = vadd.f32 %v14485_v38, %v7742_v59  ;;  %v8001_v60 = vpop.f32.mrb[3].mxu0  ;;  %14738 = vmatprep.mubr.bf16.mxu1 %v9806_v5  ;;  %v10125_v15 = vrot.slane %v22229_v29, 4  ;;  %v9742_v32 = vrot.slane %v20186_v58, 3  ;;  %v9744_v31 = vrot.slane %v22232_v21, 3  ;;  %v22233_v27 = vld [vmem:[#allocation91_spill] sm:$0xff]  ;;  %v15455_v38 = vld [vmem:[#allocation2 + $0x170] sm:$0xff] }
 0x414   : > { %14815 = vmatpush3.bf16.msra.mxu1 %v15270_v48  ;;  %v20183_v17 = vadd.f32 %v8001_v60, %v7740_v47  ;;  %14862 = vmatprep.subr.bf16.mxu0 %v15275_v7  ;;  %v14440_v48 = vpop.f32.mrb[228].mxu1  ;;  %v9808_v29 = vpack.c.bf16 %v9740_v62, %v9738_v50  ;;  %v9741_v59 = vrot.slane %v15454_v37, 3  ;;  %v22235_v4 = vld [vmem:[#allocation75_spill] sm:$0xff]  ;;  %v9747_v19 = vrot.slane %v15455_v38, 3  ;;  %v22236_v50 = vld [vmem:[#allocation94_spill] sm:$0xff] }
 0x415   : > { %14816 = vmatprep.subr.bf16.mxu1 %v15273_v14  ;;  %v7745_v28 = vadd.f32 %v14440_v48, %v22233_v27  ;;  %v7628_v39 = vpop.f32.mrb[229].mxu1  ;;  %v9745_v62 = vsel %vm3940_vm2, %v9742_v32, %v9744_v31  ;;  %v9749_v49 = vrot.slane %v22237_v26, 3  ;;  %v10133_v27 = vrot.slane %v15455_v38, 4 }
 0x416   : > { %14783 = vmatmul.mubr.bf16.gmra.mrb[108].mxu0 %v10191_v46  ;;  %v7743_v25 = vadd.f32 %v7628_v39, %v22234_v40  ;;  %v14441_v5 = vpop.f32.mrb[230].mxu1  ;;  %v10124_v46 = vsel %vm4327_vm3, %v10122_v52, %v10123_v1  ;;  %v9743_v54 = vsel %vm3940_vm2, %v9741_v59, %v9742_v32  ;;  %v15456_v40 = vld [vmem:[#allocation2 + $0x168] sm:$0xff]  ;;  %v10135_v32 = vrot.slane %v22237_v26, 4 }
 0x417   : > { %14786 = vmatprep.mubr.bf16.mxu0 %v10192_v13  ;;  %14863 = vmatpush3.bf16.msra.mxu0 %v15275_v7  ;;  %v7746_v47 = vadd.f32 %v14441_v5, %v22235_v4  ;;  %v7631_v44 = vpop.f32.mrb[231].mxu1  ;;  %v10126_v7 = vsel %vm4327_vm3, %v10123_v1, %v10125_v15  ;;  %v10128_v1 = vrot.slane %v20186_v58, 4  ;;  %v10130_v15 = vrot.slane %v22232_v21, 4 }
 0x418   : > { %14817 = vmatpush3.bf16.msra.mxu1 %v15273_v14  ;;  %14864 = vmatprep.subr.bf16.mxu0 %v15276_v56  ;;  %v14488_v13 = vpop.f32.mrb[4].mxu0  ;;  %v7744_v14 = vadd.f32 %v7631_v44, %v22236_v50  ;;  %v9746_v5 = vrot.slane %v15456_v40, 3  ;;  %v10132_v58 = vrot.slane %v15456_v40, 4  ;;  %v9809_v21 = vpack.c.bf16 %v9745_v62, %v9743_v54  ;;  %v15457_v54 = vld [vmem:[#allocation2 + $0x180] sm:$0xff] }
 0x419   : > { %14898 = vmatprep.subr.bf16.mxu1 %v20192_v2  ;;  %v20210_v33 = vadd.f32 %v14488_v13, %v7745_v28  ;;  %v8014_v60 = vpop.f32.mrb[5].mxu0  ;;  %v10193_v28 = vpack.c.bf16 %v10121_v0, %v10119_v30  ;;  %v10131_v13 = vsel %vm4327_vm3, %v10128_v1, %v10130_v15  ;;  %v10136_v50 = vsel %vm4327_vm3, %v10133_v27, %v10135_v32  ;;  %v22243_v15 = vld [vmem:[#allocation50_spill] sm:$0xff]  ;;  %v22245_v32 = vld [vmem:[#allocation101_spill] sm:$0xff] }
 0x41a   : > { %v20214_v48 = vadd.f32 %v8014_v60, %v7743_v25  ;;  %v14489_v52 = vpop.f32.mrb[6].mxu0  ;;  %14739 = vmatmul.mubr.bf16.gmra.mrb[80].mxu1 %v9807_v6  ;;  %v10194_v6 = vpack.c.bf16 %v10126_v7, %v10124_v46  ;;  %v10127_v25 = vrot.slane %v15454_v37, 4  ;;  %v10134_v38 = vsel %vm4327_vm3, %v10132_v58, %v10133_v27  ;;  %v22240_v46 = vld [vmem:[#allocation108_spill] sm:$0xff]  ;;  %v15458_v60 = vld [vmem:[#allocation2 + $0x188] sm:$0xff] }
 0x41b   : > { %14865 = vmatpush3.bf16.msra.mxu0 %v15276_v56  ;;  %v20218_v39 = vadd.f32 %v14489_v52, %v7746_v47  ;;  %v8017_v59 = vpop.f32.mrb[7].mxu0  ;;  %14742 = vmatprep.mubr.bf16.mxu1 %v9808_v29  ;;  %v9748_v56 = vsel %vm3940_vm2, %v9746_v5, %v9747_v19  ;;  %v9750_v47 = vsel %vm3940_vm2, %v9747_v19, %v9749_v49  ;;  %v22239_v29 = vld [vmem:[#allocation106_spill] sm:$0xff]  ;;  %v9752_v62 = vrot.slane %v15458_v60, 3  ;;  %v15459_v5 = vld [vmem:[#allocation2 + $0x198] sm:$0xff] }
 0x41c   : > { %14946 = vmatprep.subr.bf16.mxu0 %v20203_v10  ;;  %v20222_v31 = vadd.f32 %v8017_v59, %v7744_v14  ;;  %v14444_v4 = vpop.f32.mrb[232].mxu1  ;;  %v10129_v44 = vsel %vm4327_vm3, %v10127_v25, %v10128_v1  ;;  %v9751_v14 = vrot.slane %v15457_v54, 3  ;;  %v22241_v19 = vld [vmem:[#allocation70_spill] sm:$0xff]  ;;  %v9810_v59 = vpack.c.bf16 %v9750_v47, %v9748_v56 }
 0x41d   : > { %v7749_v30 = vadd.f32 %v14444_v4, %v22239_v29  ;;  %v7644_v0 = vpop.f32.mrb[233].mxu1  ;;  %v9756_v1 = vrot.slane %v15459_v5, 3  ;;  %v15460_v4 = vld [vmem:[#allocation2 + $0x1a0] sm:$0xff]  ;;  %v9759_v29 = vrot.slane %v22245_v32, 3 }
 0x41e   : > { %22238 = vst [vmem:[#allocation78_spill] sm:$0xff] %v20222_v31  ;;  %14787 = vmatmul.mubr.bf16.gmra.mrb[112].mxu0 %v10193_v28  ;;  %v7747_v37 = vadd.f32 %v7644_v0, %v22240_v46  ;;  %v14445_v7 = vpop.f32.mrb[234].mxu1  ;;  %v22242_v28 = vld [vmem:[#allocation100_spill] sm:$0xff]  ;;  %v9757_v27 = vrot.slane %v15460_v4, 3  ;;  %v9753_v31 = vsel %vm3940_vm2, %v9751_v14, %v9752_v62 }
 0x41f   : > { %14790 = vmatprep.mubr.bf16.mxu0 %v10194_v6  ;;  %v7750_v26 = vadd.f32 %v14445_v7, %v22241_v19  ;;  %v7647_v49 = vpop.f32.mrb[235].mxu1  ;;  %v9754_v40 = vrot.slane %v22242_v28, 3  ;;  %v10195_v7 = vpack.c.bf16 %v10131_v13, %v10129_v44  ;;  %v10196_v19 = vpack.c.bf16 %v10136_v50, %v10134_v38 }
 0x420   : > { %v7748_v6 = vadd.f32 %v7647_v49, %v22243_v15  ;;  %v10137_v49 = vrot.slane %v15457_v54, 4  ;;  %v9760_v44 = vsel %vm3940_vm2, %v9757_v27, %v9759_v29  ;;  %v10143_v13 = vrot.slane %v15460_v4, 4 }
 0x421   : > { %v14492_v52 = vpop.f32.mrb[8].mxu0  ;;  %v9755_v15 = vsel %vm3940_vm2, %v9752_v62, %v9754_v40  ;;  %v10145_v38 = vrot.slane %v22245_v32, 4 }
 0x422   : > { %v20235_v25 = vadd.f32 %v14492_v52, %v7749_v30  ;;  %v8030_v58 = vpop.f32.mrb[9].mxu0  ;;  %14743 = vmatmul.mubr.bf16.gmra.mrb[84].mxu1 %v9809_v21  ;;  %v10138_v30 = vrot.slane %v15458_v60, 4  ;;  %v9758_v21 = vsel %vm3940_vm2, %v9756_v1, %v9757_v27 }
 0x423   : > { %v20238_v0 = vadd.f32 %v8030_v58, %v7747_v37  ;;  %v14493_v46 = vpop.f32.mrb[10].mxu0  ;;  %14746 = vmatprep.mubr.bf16.mxu1 %v9810_v59  ;;  %v10142_v37 = vrot.slane %v15459_v5, 4  ;;  %v9812_v4 = vpack.c.bf16 %v9760_v44, %v9758_v21 }
 0x424   : > { %22244 = vst [vmem:[#allocation77_spill] sm:$0xff] %v20235_v25  ;;  %v20240_v56 = vadd.f32 %v14493_v46, %v7750_v26  ;;  %v8033_v47 = vpop.f32.mrb[11].mxu0  ;;  %v10140_v25 = vrot.slane %v22242_v28, 4  ;;  %v14448_v58 = vpop.f32.mrb[236].mxu1  ;;  %v10139_v62 = vsel %vm4327_vm3, %v10137_v49, %v10138_v30  ;;  %v20253_v26 = vld [vmem:[#allocation2] sm:$0xff]  ;;  %v9764_v28 = vrot.slane %v19931_v11, 3 }
 0x425   : > { %v20243_v52 = vadd.f32 %v8033_v47, %v7748_v6  ;;  %v7753_v50 = vadd.f32 %v14448_v58, %v19946_v55  ;;  %v7660_v54 = vpop.f32.mrb[237].mxu1  ;;  %v9761_v59 = vrot.slane %v20253_v26, 3  ;;  %v9811_v6 = vpack.c.bf16 %v9755_v15, %v9753_v31  ;;  %v20268_v47 = vld [vmem:[#allocation2 + $0x60] sm:$0xff] }
 0x426   : > { %14791 = vmatmul.mubr.bf16.gmra.mrb[116].mxu0 %v10195_v7  ;;  %v7751_v14 = vadd.f32 %v7660_v54, %v19950_v61  ;;  %v14449_v60 = vpop.f32.mrb[238].mxu1  ;;  %v10141_v55 = vsel %vm4327_vm3, %v10138_v30, %v10140_v25  ;;  %v10144_v29 = vsel %vm4327_vm3, %v10142_v37, %v10143_v13  ;;  %v10146_v46 = vsel %vm4327_vm3, %v10143_v13, %v10145_v38  ;;  %v20264_v7 = vld [vmem:[#allocation2 + $0x68] sm:$0xff] }
 0x427   : > { %14794 = vmatprep.mubr.bf16.mxu0 %v10196_v19  ;;  %v7754_v40 = vadd.f32 %v14449_v60, %v19955_v34  ;;  %v7663_v5 = vpop.f32.mrb[239].mxu1  ;;  %v10147_v31 = vrot.slane %v20253_v26, 4  ;;  %v10150_v25 = vrot.slane %v19931_v11, 4  ;;  %v10197_v15 = vpack.c.bf16 %v10141_v55, %v10139_v62  ;;  %v20289_v55 = vld [vmem:[#allocation2 + $0x88] sm:$0xf] }
 0x428   : > { %v7752_v27 = vadd.f32 %v7663_v5, %v19960_v8  ;;  %v20272_v8 = vld [vmem:[#allocation2 + $0x70] sm:$0xf]  ;;  %v9765_v37 = vsel %vm3940_vm2, %v9761_v59, %v9764_v28  ;;  %v10198_v21 = vpack.c.bf16 %v10146_v46, %v10144_v29  ;;  %v10830_v44 = vrot.slane %v20264_v7, 1  ;;  %v20297_v46 = vld [vmem:[#allocation2 + $0x98] sm:$0xff] }
 0x429   : > { %v14496_v1 = vpop.f32.mrb[12].mxu0  ;;  %v10829_v38 = vrot.slane %v20268_v47, 1  ;;  %v10832_v11 = vrot.slane %v20272_v8, 1  ;;  %v10151_v60 = vsel %vm4327_vm3, %v10147_v31, %v10150_v25 }
 0x42a   : > { %v20260_v61 = vadd.f32 %v14496_v1, %v7753_v50  ;;  %v8046_v32 = vpop.f32.mrb[13].mxu0  ;;  %14747 = vmatmul.mubr.bf16.gmra.mrb[88].mxu1 %v9811_v6  ;;  %v10507_v6 = vpack.c.bf16 %v20264_v7, %v20268_v47 }
 0x42b   : > { %v20266_v19 = vadd.f32 %v8046_v32, %v7751_v14  ;;  %v14497_v34 = vpop.f32.mrb[14].mxu0  ;;  %14750 = vmatprep.mubr.bf16.mxu1 %v9812_v4  ;;  %v9813_v14 = vpack.c.bf16 %v9765_v37, %v9761_v59  ;;  %v10831_v4 = vsel %vm1019_vm0, %v10829_v38, %v10830_v44  ;;  %v10199_v32 = vpack.c.bf16 %v10151_v60, %v10147_v31  ;;  %v20306_v31 = vld [vmem:[#allocation2 + $0x90] sm:$0xff]  ;;  %v20314_v60 = vld [vmem:[#allocation2 + $0x78] sm:$0xff] }
 0x42c   : > { %v20274_v49 = vadd.f32 %v14497_v34, %v7754_v40  ;;  %v8049_v30 = vpop.f32.mrb[15].mxu0  ;;  %v14452_v13 = vpop.f32.mrb[240].mxu1  ;;  %v20299_v34 = vld [vmem:[#allocation2 + $0xa0] sm:$0xf] }
 0x42d   : > { %v20277_v58 = vadd.f32 %v8049_v30, %v7752_v27  ;;  %v7757_v50 = vadd.f32 %v14452_v13, %v19985_v42  ;;  %v7676_v54 = vpop.f32.mrb[241].mxu1  ;;  %v10842_v13 = vrot.slane %v20299_v34, 1 }
 0x42e   : > { %14795 = vmatmul.mubr.bf16.gmra.mrb[120].mxu0 %v10197_v15  ;;  %v7755_v62 = vadd.f32 %v7676_v54, %v19987_v23  ;;  %v14453_v28 = vpop.f32.mrb[242].mxu1  ;;  %v10833_v23 = vsel %vm1019_vm0, %v10830_v44, %v10832_v11  ;;  %v10840_v44 = vrot.slane %v20297_v46, 1 }
 0x42f   : > { %14798 = vmatprep.mubr.bf16.mxu0 %v10198_v21  ;;  %v7758_v40 = vadd.f32 %v14453_v28, %v19997_v63  ;;  %v7679_v5 = vpop.f32.mrb[243].mxu1  ;;  %v10941_v37 = vpack.c.bf16 %v10833_v23, %v10831_v4  ;;  %v10839_v28 = vrot.slane %v20306_v31, 1  ;;  %v15278_v4 = vld [vmem:[%s21393_s3 + $0x588] sm:$0xff]  }
 0x430   : > { %v7756_v42 = vadd.f32 %v7679_v5, %v20001_v18  ;;  %v10837_v18 = vrot.slane %v20289_v55, 1 }
 0x431   : > { %v14500_v1 = vpop.f32.mrb[16].mxu0  ;;  %v10841_v23 = vsel %vm1019_vm0, %v10839_v28, %v10840_v44 }
 0x432   : > { %v20292_v27 = vadd.f32 %v14500_v1, %v7757_v50  ;;  %v8062_v59 = vpop.f32.mrb[17].mxu0  ;;  %14751 = vmatmul.mubr.bf16.gmra.mrb[92].mxu1 %v9813_v14  ;;  %v20312_v14 = vld [vmem:[#allocation2 + $0x80] sm:$0xff] }
 0x433   : > { %v20295_v29 = vadd.f32 %v8062_v59, %v7755_v62  ;;  %v14501_v63 = vpop.f32.mrb[18].mxu0  ;;  %14818 = vmatprep.mubr.bf16.mxu1 %v10507_v6  ;;  %v10508_v62 = vpack.c.bf16 %v20312_v14, %v20314_v60  ;;  %v22246_v6 = vld [vmem:[#allocation8_spill] sm:$0xff] }
 0x434   : > { %v20301_v25 = vadd.f32 %v14501_v63, %v7758_v40  ;;  %v8065_v30 = vpop.f32.mrb[19].mxu0  ;;  %v14456_v21 = vpop.f32.mrb[244].mxu1  ;;  %v20332_v63 = vld [vmem:[#allocation2 + $0xb0] sm:$0xff] }
 0x435   : > { %v20304_v15 = vadd.f32 %v8065_v30, %v7756_v42  ;;  %v7761_v38 = vadd.f32 %v14456_v21, %v20027_v16  ;;  %v7692_v11 = vpop.f32.mrb[245].mxu1  ;;  %v10509_v16 = vpack.c.bf16 %v20297_v46, %v20306_v31  ;;  %v20334_v30 = vld [vmem:[#allocation2 + $0xb8] sm:$0xf]  ;;  %v20338_v21 = vld [vmem:[#allocation2 + $0xc8] sm:$0xff] }
 0x436   : > { %14799 = vmatmul.mubr.bf16.gmra.mrb[124].mxu0 %v10199_v32  ;;  %v7759_v50 = vadd.f32 %v7692_v11, %v20030_v45  ;;  %v14457_v54 = vpop.f32.mrb[246].mxu1  ;;  %v10838_v45 = vsel %vm1019_vm0, %v22246_v6, %v10837_v18  ;;  %v20340_v11 = vld [vmem:[#allocation2 + $0xd0] sm:$0xf]  ;;  %v10850_v6 = vrot.slane %v20338_v21, 1 }
 0x437   : > { %14866 = vmatprep.mubr.bf16.mxu0 %v10941_v37  ;;  %v7762_v40 = vadd.f32 %v14457_v54, %v20034_v57  ;;  %v7695_v5 = vpop.f32.mrb[247].mxu1  ;;  %v10843_v57 = vsel %vm1019_vm0, %v10840_v44, %v10842_v13  ;;  %v22250_v54 = vld [vmem:[#allocation9_spill] sm:$0xff]  ;;  %v20346_v13 = vld [vmem:[#allocation2 + $0xa8] sm:$0xff] }
 0x438   : > { %v7760_v42 = vadd.f32 %v7695_v5, %v20042_v24  ;;  %v10942_v44 = vpack.c.bf16 %v10838_v45, %v22250_v54  ;;  %22251 = vst [vmem:[#allocation32_spill] sm:$0xff] %v20346_v13  ;;  %v20353_v5 = vld [vmem:[#allocation2 + $0xc0] sm:$0xff]  ;;  %v10852_v45 = vrot.slane %v20340_v11, 1 }
 0x439   : > { %v14504_v1 = vpop.f32.mrb[20].mxu0  ;;  %22253 = vst [vmem:[#allocation118_spill] sm:$0xff] %v20353_v5  ;;  %v10849_v54 = vrot.slane %v20353_v5, 1 }
 0x43a   : > { %v20328_v59 = vadd.f32 %v14504_v1, %v7761_v38  ;;  %v8078_v32 = vpop.f32.mrb[21].mxu0  ;;  %14819 = vmatmul.mubr.bf16.vlgmr.msra.gmra.mrb[96].mxu1 %v10508_v62  ;;  %v10943_v62 = vpack.c.bf16 %v10843_v57, %v10841_v23  ;;  %v15279_v1 = vld [vmem:[%s21393_s3 + $0x590] sm:$0xff]   ;;  %v10844_v23 = vrot.slane %v20346_v13, 1 }
 0x43b   : > { %v20336_v37 = vadd.f32 %v8078_v32, %v7759_v50  ;;  %v14505_v18 = vpop.f32.mrb[22].mxu0  ;;  %14899 = vmatpush3.bf16.msra.mxu1 %v20192_v2  ;;  %14822 = vmatprep.mubr.bf16.mxu1 %v10509_v16  ;;  %v15284_v50 = vld [vmem:[%s21393_s3 + $0x5c8] sm:$0xff]   ;;  %v10847_v2 = vrot.slane %v20334_v30, 1 }
 0x43c   : > { %22247 = vst [vmem:[#allocation98_spill] sm:$0xff] %v20328_v59  ;;  %v20342_v24 = vadd.f32 %v14505_v18, %v7762_v40  ;;  %v8081_v38 = vpop.f32.mrb[23].mxu0  ;;  %14900 = vmatprep.subr.bf16.mxu1 %v15278_v4  ;;  %v10845_v40 = vrot.slane %v20332_v63, 1  ;;  %v14460_v16 = vpop.f32.mrb[248].mxu1  ;;  %v20393_v59 = vld [vmem:[#allocation2 + $0x100] sm:$0xf] }
 0x43d   : > { %22248 = vst [vmem:[#allocation97_spill] sm:$0xff] %v20336_v37  ;;  %v20351_v28 = vadd.f32 %v8081_v38, %v7760_v42  ;;  %v7765_v42 = vadd.f32 %v14460_v16, %v20076_v43  ;;  %v7708_v32 = vpop.f32.mrb[249].mxu1  ;;  %v10510_v38 = vpack.c.bf16 %v20332_v63, %v20346_v13  ;;  %v20385_v37 = vld [vmem:[#allocation2 + $0xe0] sm:$0xff]  ;;  %v20391_v13 = vld [vmem:[#allocation2 + $0xf8] sm:$0xff]  ;;  %22257 = vst [vmem:[#allocation90_spill] sm:$0xff] %v20393_v59 }
 0x43e   : > { %22249 = vst [vmem:[#allocation112_spill] sm:$0xff] %v20342_v24  ;;  %14867 = vmatmul.mubr.bf16.vlgmr.msra.gmra.mrb[128].mxu0 %v10942_v44  ;;  %v7763_v57 = vadd.f32 %v7708_v32, %v20082_v35  ;;  %v14461_v18 = vpop.f32.mrb[250].mxu1  ;;  %v10846_v16 = vsel %vm1019_vm0, %v10844_v23, %v10845_v40  ;;  %v15280_v35 = vld [vmem:[%s21393_s3 + $0x598] sm:$0xff]   ;;  %v10851_v24 = vsel %vm1019_vm0, %v10849_v54, %v10850_v6  ;;  %22256 = vst [vmem:[#allocation87_spill] sm:$0xff] %v20391_v13 }
 0x43f   : > { %22252 = vst [vmem:[#allocation30_spill] sm:$0xff] %v20351_v28  ;;  %14870 = vmatprep.mubr.bf16.mxu0 %v10943_v62  ;;  %14947 = vmatpush3.bf16.msra.mxu0 %v20203_v10  ;;  %v7766_v44 = vadd.f32 %v14461_v18, %v20091_v20  ;;  %v7711_v28 = vpop.f32.mrb[251].mxu1  ;;  %v10511_v62 = vpack.c.bf16 %v20338_v21, %v20353_v5  ;;  %v20397_v54 = vld [vmem:[#allocation2 + $0xd8] sm:$0xff] }
 0x440   : > { %14901 = vmatpush3.bf16.msra.mxu1 %v15278_v4  ;;  %14948 = vmatprep.subr.bf16.mxu0 %v15284_v50  ;;  %v10848_v10 = vsel %vm1019_vm0, %v10845_v40, %v10847_v2  ;;  %v15285_v4 = vld [vmem:[%s21393_s3 + $0x5d0] sm:$0xff]   ;;  %v7764_v20 = vadd.f32 %v7711_v28, %v20097_v51  ;;  %v10853_v23 = vsel %vm1019_vm0, %v10850_v6, %v10852_v45  ;;  %v20387_v40 = vld [vmem:[#allocation2 + $0xe8] sm:$0xf]  ;;  %v15287_v6 = vld [vmem:[%s21393_s3 + $0x5d8] sm:$0xff]  }
 0x441   : > { %v14508_v43 = vpop.f32.mrb[24].mxu0  ;;  %14902 = vmatprep.subr.bf16.mxu1 %v15279_v1  ;;  %22259 = vst [vmem:[#allocation40_spill] sm:$0xff] %v20397_v54 }
 0x442   : > { %v20381_v32 = vadd.f32 %v14508_v43, %v7765_v42  ;;  %v8094_v18 = vpop.f32.mrb[25].mxu0  ;;  %14823 = vmatmul.mubr.bf16.gmra.mrb[100].mxu1 %v10510_v38  ;;  %v10944_v42 = vpack.c.bf16 %v10848_v10, %v10846_v16  ;;  %v20404_v38 = vld [vmem:[#allocation2 + $0xf0] sm:$0xff]  ;;  %v10855_v43 = vrot.slane %v20385_v37, 1  ;;  %v10854_v10 = vrot.slane %v20397_v54, 1 }
 0x443   : > { %v20389_v2 = vadd.f32 %v8094_v18, %v7763_v57  ;;  %v14509_v5 = vpop.f32.mrb[26].mxu0  ;;  %14949 = vmatpush3.bf16.msra.mxu0 %v15284_v50  ;;  %14826 = vmatprep.mubr.bf16.mxu1 %v10511_v62  ;;  %v10945_v57 = vpack.c.bf16 %v10853_v23, %v10851_v24  ;;  %22261 = vst [vmem:[#allocation71_spill] sm:$0xff] %v20404_v38  ;;  %v10857_v50 = vrot.slane %v20387_v40, 1  ;;  %v10862_v62 = vrot.slane %v20393_v59, 1 }
 0x444   : > { %22254 = vst [vmem:[#allocation105_spill] sm:$0xff] %v20381_v32  ;;  %v20395_v51 = vadd.f32 %v14509_v5, %v7766_v44  ;;  %v8097_v28 = vpop.f32.mrb[27].mxu0  ;;  %14903 = vmatpush3.bf16.msra.mxu1 %v15279_v1  ;;  %v15281_v5 = vld [vmem:[%s21393_s3 + $0x5a0] sm:$0xff]   ;;  %14950 = vmatprep.subr.bf16.mxu0 %v15285_v4  ;;  %v14464_v1 = vpop.f32.mrb[252].mxu1  ;;  %v10860_v44 = vrot.slane %v20391_v13, 1  ;;  %v10512_v23 = vpack.c.bf16 %v20385_v37, %v20397_v54  ;;  %v20445_v54 = vld [vmem:[#allocation2 + $0x108] sm:$0xff] }
 0x445   : > { %22255 = vst [vmem:[#allocation119_spill] sm:$0xff] %v20389_v2  ;;  %v20402_v45 = vadd.f32 %v8097_v28, %v7764_v20  ;;  %14904 = vmatprep.subr.bf16.mxu1 %v15280_v35  ;;  %v7769_v24 = vadd.f32 %v14464_v1, %v20122_v53  ;;  %v7724_v16 = vpop.f32.mrb[253].mxu1  ;;  %v10859_v28 = vrot.slane %v20404_v38, 1 }
 0x446   : > { %22258 = vst [vmem:[#allocation79_spill] sm:$0xff] %v20395_v51  ;;  %14871 = vmatmul.mubr.bf16.gmra.mrb[132].mxu0 %v10944_v42  ;;  %v7767_v20 = vadd.f32 %v7724_v16, %v20125_v3  ;;  %v14465_v18 = vpop.f32.mrb[254].mxu1  ;;  %v20419_v42 = vld [vmem:[#allocation2 + $0x110] sm:$0xff]  ;;  %v10858_v3 = vsel %vm1019_vm0, %v10855_v43, %v10857_v50  ;;  %v20426_v16 = vld [vmem:[#allocation2 + $0x118] sm:$0xf]  ;;  %v15283_v51 = vld [vmem:[%s21393_s3 + $0x5a8] sm:$0xff]  }
 0x447   : > { %22260 = vst [vmem:[#allocation38_spill] sm:$0xff] %v20402_v45  ;;  %14874 = vmatprep.mubr.bf16.mxu0 %v10945_v57  ;;  %14951 = vmatpush3.bf16.msra.mxu0 %v15285_v4  ;;  %v7770_v45 = vadd.f32 %v14465_v18, %v20129_v12  ;;  %v7727_v53 = vpop.f32.mrb[255].mxu1  ;;  %v10513_v57 = vpack.c.bf16 %v20391_v13, %v20404_v38  ;;  %v15288_v12 = vld [vmem:[%s21393_s3 + $0x5e0] sm:$0xff]   ;;  %v20439_v50 = vld [vmem:[#allocation2 + $0x128] sm:$0xff]  ;;  %v20441_v38 = vld [vmem:[#allocation2 + $0x130] sm:$0xf] }
 0x448   : > { %14905 = vmatpush3.bf16.msra.mxu1 %v15280_v35  ;;  %14952 = vmatprep.subr.bf16.mxu0 %v15287_v6  ;;  %v10856_v4 = vsel %vm1019_vm0, %v10854_v10, %v10855_v43  ;;  %v7768_v35 = vadd.f32 %v7727_v53, %v20135_v36  ;;  %v10861_v10 = vsel %vm1019_vm0, %v10859_v28, %v10860_v44  ;;  %v20449_v53 = vld [vmem:[#allocation2 + $0x120] sm:$0xff] }
 0x449   : > { %v14512_v1 = vpop.f32.mrb[28].mxu0  ;;  %14906 = vmatprep.subr.bf16.mxu1 %v15281_v5  ;;  %v10863_v43 = vsel %vm1019_vm0, %v10860_v44, %v10862_v62  ;;  %22263 = vst [vmem:[#allocation92_spill] sm:$0xff] %v20449_v53  ;;  %v10865_v44 = vrot.slane %v20419_v42, 1  ;;  %v10867_v62 = vrot.slane %v20426_v16, 1 }
 0x44a   : > { %v20435_v18 = vadd.f32 %v14512_v1, %v7769_v24  ;;  %v8110_v2 = vpop.f32.mrb[29].mxu0  ;;  %14827 = vmatmul.mubr.bf16.gmra.mrb[104].mxu1 %v10512_v23  ;;  %v10946_v24 = vpack.c.bf16 %v10858_v3, %v10856_v4  ;;  %v10947_v23 = vpack.c.bf16 %v10863_v43, %v10861_v10  ;;  %v10869_v4 = vrot.slane %v20449_v53, 1 }
 0x44b   : > { %v20443_v32 = vadd.f32 %v8110_v2, %v7767_v20  ;;  %v14513_v59 = vpop.f32.mrb[30].mxu0  ;;  %14953 = vmatpush3.bf16.msra.mxu0 %v15287_v6  ;;  %14830 = vmatprep.mubr.bf16.mxu1 %v10513_v57  ;;  %v15290_v2 = vld [vmem:[%s21393_s3 + $0x5e8] sm:$0xff]   ;;  %v10872_v6 = vrot.slane %v20441_v38, 1  ;;  %v10514_v10 = vpack.c.bf16 %v20419_v42, %v20445_v54 }
 0x44c   : > { %v20447_v13 = vadd.f32 %v14513_v59, %v7770_v45  ;;  %v8113_v36 = vpop.f32.mrb[31].mxu0  ;;  %14907 = vmatpush3.bf16.msra.mxu1 %v15281_v5  ;;  %v10870_v59 = vrot.slane %v20439_v50, 1  ;;  %v15286_v45 = vld [vmem:[%s21393_s3 + $0x5b0] sm:$0xff]   ;;  %14954 = vmatprep.subr.bf16.mxu0 %v15288_v12  ;;  %v14532_v28 = vpop.f32.mrb[0].mxu1  ;;  %v10864_v5 = vrot.slane %v20445_v54, 1 }
 0x44d   : > { %v20456_v20 = vadd.f32 %v8113_v36, %v7768_v35  ;;  %14908 = vmatprep.subr.bf16.mxu1 %v15283_v51  ;;  %v8513_v1 = vadd.f32 %v14532_v28, %v20166_v9  ;;  %v8384_v57 = vpop.f32.mrb[1].mxu1  ;;  %v10868_v9 = vsel %vm1019_vm0, %v10865_v44, %v10867_v62  ;;  %v20474_v28 = vld [vmem:[#allocation2 + $0x140] sm:$0xff]  ;;  %v10515_v62 = vpack.c.bf16 %v20439_v50, %v20449_v53 }
 0x44e   : > { %22262 = vst [vmem:[#allocation69_spill] sm:$0xff] %v20447_v13  ;;  %14875 = vmatmul.mubr.bf16.gmra.mrb[136].mxu0 %v10946_v24  ;;  %v8511_v3 = vadd.f32 %v8384_v57, %v20170_v22  ;;  %v14533_v35 = vpop.f32.mrb[2].mxu1  ;;  %v10866_v43 = vsel %vm1019_vm0, %v10864_v5, %v10865_v44  ;;  %v15289_v22 = vld [vmem:[%s21393_s3 + $0x5b8] sm:$0xff]   ;;  %v20491_v57 = vld [vmem:[#allocation2 + $0x160] sm:$0xf]  ;;  %v10875_v53 = vrot.slane %v20474_v28, 1 }
 0x44f   : > { %22264 = vst [vmem:[#allocation81_spill] sm:$0xff] %v20456_v20  ;;  %14878 = vmatprep.mubr.bf16.mxu0 %v10947_v23  ;;  %14955 = vmatpush3.bf16.msra.mxu0 %v15288_v12  ;;  %v8514_v36 = vadd.f32 %v14533_v35, %v20175_v41  ;;  %v8387_v24 = vpop.f32.mrb[3].mxu1  ;;  %v10871_v23 = vsel %vm1019_vm0, %v10869_v4, %v10870_v59  ;;  %22267 = vst [vmem:[#allocation103_spill] sm:$0xff] %v20491_v57  ;;  %v20495_v13 = vld [vmem:[#allocation2 + $0x138] sm:$0xff] }
 0x450   : > { %14909 = vmatpush3.bf16.msra.mxu1 %v15283_v51  ;;  %14956 = vmatprep.subr.bf16.mxu0 %v15290_v2  ;;  %v10873_v12 = vsel %vm1019_vm0, %v10870_v59, %v10872_v6  ;;  %v15291_v51 = vld [vmem:[%s21393_s3 + $0x5f0] sm:$0xff]   ;;  %v8512_v41 = vadd.f32 %v8387_v24, %v20183_v17  ;;  %v20487_v59 = vld [vmem:[#allocation2 + $0x158] sm:$0xff]  ;;  %v20489_v6 = vld [vmem:[#allocation2 + $0x148] sm:$0xf] }
 0x451   : > { %v14580_v20 = vpop.f32.mrb[32].mxu0  ;;  %14910 = vmatprep.subr.bf16.mxu1 %v15286_v45  ;;  %22266 = vst [vmem:[#allocation96_spill] sm:$0xff] %v20489_v6  ;;  %v10949_v24 = vpack.c.bf16 %v10873_v12, %v10871_v23 }
 0x452   : > { %v20483_v5 = vadd.f32 %v14580_v20, %v8513_v1  ;;  %v8707_v44 = vpop.f32.mrb[33].mxu0  ;;  %14831 = vmatmul.mubr.bf16.gmra.mrb[108].mxu1 %v10514_v10  ;;  %v10948_v1 = vpack.c.bf16 %v10868_v9, %v10866_v43  ;;  %v10877_v10 = vrot.slane %v20489_v6, 1  ;;  %v20513_v43 = vld [vmem:[%s21393_s3 + $0x600] sm:$0xff]   ;;  %v10874_v9 = vrot.slane %v20495_v13, 1  ;;  %v20538_v6 = vld [vmem:[#allocation2 + $0x188] sm:$0xff] }
 0x453   : > { %v20493_v4 = vadd.f32 %v8707_v44, %v8511_v3  ;;  %v14581_v35 = vpop.f32.mrb[34].mxu0  ;;  %14957 = vmatpush3.bf16.msra.mxu0 %v15290_v2  ;;  %14834 = vmatprep.mubr.bf16.mxu1 %v10515_v62  ;;  %v15292_v3 = vld [vmem:[%s21393_s3 + $0x5f8] sm:$0xff]   ;;  %v10880_v2 = vrot.slane %v20487_v59, 1 }
 0x454   : > { %22265 = vst [vmem:[#allocation99_spill] sm:$0xff] %v20483_v5  ;;  %v20497_v17 = vadd.f32 %v14581_v35, %v8514_v36  ;;  %v8710_v20 = vpop.f32.mrb[35].mxu0  ;;  %v20499_v5 = vld [vmem:[#allocation2 + $0x150] sm:$0xff]  ;;  %14911 = vmatpush3.bf16.msra.mxu1 %v15286_v45  ;;  %v10882_v36 = vrot.slane %v20491_v57, 1  ;;  %14958 = vmatprep.subr.bf16.mxu0 %v15291_v51  ;;  %v14536_v45 = vpop.f32.mrb[4].mxu1 }
 0x455   : > { %22268 = vst [vmem:[#allocation55_spill] sm:$0xff] %v20493_v4  ;;  %22270 = vst [vmem:[#allocation107_spill] sm:$0xff] %v20499_v5  ;;  %v20505_v44 = vadd.f32 %v8710_v20, %v8512_v41  ;;  %14912 = vmatprep.subr.bf16.mxu1 %v15289_v22  ;;  %v8517_v23 = vadd.f32 %v14536_v45, %v20210_v33  ;;  %v8400_v12 = vpop.f32.mrb[5].mxu1  ;;  %v10879_v41 = vrot.slane %v20499_v5, 1  ;;  %v22272_v4 = vld [vmem:[#allocation78_spill] sm:$0xff] }
 0x456   : > { %22269 = vst [vmem:[#allocation53_spill] sm:$0xff] %v20497_v17  ;;  %14879 = vmatmul.mubr.bf16.gmra.mrb[140].mxu0 %v10948_v1  ;;  %v8515_v62 = vadd.f32 %v8400_v12, %v20214_v48  ;;  %v14537_v35 = vpop.f32.mrb[6].mxu1  ;;  %v10516_v20 = vpack.c.bf16 %v20474_v28, %v20495_v13  ;;  %v20522_v17 = vld [vmem:[#allocation2 + $0x170] sm:$0xff]  ;;  %v10883_v48 = vsel %vm1019_vm0, %v10880_v2, %v10882_v36  ;;  %v20528_v12 = vld [vmem:[#allocation2 + $0x178] sm:$0xf]  ;;  %v20544_v36 = vld [vmem:[#allocation2 + $0x168] sm:$0xff] }
 0x457   : > { %22271 = vst [vmem:[#allocation114_spill] sm:$0xff] %v20505_v44  ;;  %14882 = vmatprep.mubr.bf16.mxu0 %v10949_v24  ;;  %14959 = vmatpush3.bf16.msra.mxu0 %v15291_v51  ;;  %v10876_v44 = vsel %vm1019_vm0, %v10874_v9, %v10875_v53  ;;  %v8518_v1 = vadd.f32 %v14537_v35, %v20218_v39  ;;  %v8403_v33 = vpop.f32.mrb[7].mxu1  ;;  %v20536_v35 = vld [vmem:[#allocation2 + $0x180] sm:$0xff] }
 0x458   : > { %14913 = vmatpush3.bf16.msra.mxu1 %v15289_v22  ;;  %14960 = vmatprep.subr.bf16.mxu0 %v15292_v3  ;;  %v10878_v24 = vsel %vm1019_vm0, %v10875_v53, %v10877_v10  ;;  %v10881_v51 = vsel %vm1019_vm0, %v10879_v41, %v10880_v2  ;;  %v8516_v9 = vadd.f32 %v8403_v33, %v22272_v4  ;;  %v20540_v53 = vld [vmem:[#allocation2 + $0x190] sm:$0xf]  ;;  %v10885_v4 = vrot.slane %v20522_v17, 1 }
 0x459   : > { %v14584_v45 = vpop.f32.mrb[36].mxu0  ;;  %14994 = vmatprep.subr.bf16.mxu1 %v20513_v43  ;;  %v10517_v39 = vpack.c.bf16 %v20487_v59, %v20499_v5  ;;  %22274 = vst [vmem:[#allocation111_spill] sm:$0xff] %v20540_v53  ;;  %v10950_v33 = vpack.c.bf16 %v10878_v24, %v10876_v44 }
 0x45a   : > { %v20532_v57 = vadd.f32 %v14584_v45, %v8517_v23  ;;  %v8723_v22 = vpop.f32.mrb[37].mxu0  ;;  %14835 = vmatmul.mubr.bf16.gmra.mrb[112].mxu1 %v10516_v20  ;;  %v10951_v45 = vpack.c.bf16 %v10883_v48, %v10881_v51  ;;  %v10892_v20 = vrot.slane %v20540_v53, 1 }
 0x45b   : > { %v20542_v10 = vadd.f32 %v8723_v22, %v8515_v62  ;;  %v14585_v2 = vpop.f32.mrb[38].mxu0  ;;  %14961 = vmatpush3.bf16.msra.mxu0 %v15292_v3  ;;  %14838 = vmatprep.mubr.bf16.mxu1 %v10517_v39  ;;  %v10889_v62 = vrot.slane %v20536_v35, 1  ;;  %v10890_v22 = vrot.slane %v20538_v6, 1  ;;  %v10884_v3 = vrot.slane %v20544_v36, 1 }
 0x45c   : > { %22273 = vst [vmem:[#allocation117_spill] sm:$0xff] %v20532_v57  ;;  %v20547_v23 = vadd.f32 %v14585_v2, %v8518_v1  ;;  %v8726_v41 = vpop.f32.mrb[39].mxu0  ;;  %v10887_v57 = vrot.slane %v20528_v12, 1  ;;  %v22278_v1 = vld [vmem:[#allocation77_spill] sm:$0xff] }
 0x45d   : > { %22275 = vst [vmem:[#allocation15_spill] sm:$0xff] %v20542_v10  ;;  %v20550_v5 = vadd.f32 %v8726_v41, %v8516_v9  ;;  %v14540_v10 = vpop.f32.mrb[8].mxu1  ;;  %v10886_v51 = vsel %vm1019_vm0, %v10884_v3, %v10885_v4  ;;  %v20576_v3 = vld [vmem:[#allocation2 + $0x1a8] sm:$0xf] }
 0x45e   : > { %22276 = vst [vmem:[#allocation14_spill] sm:$0xff] %v20547_v23  ;;  %14883 = vmatmul.mubr.bf16.gmra.mrb[144].mxu0 %v10950_v33  ;;  %v8521_v2 = vadd.f32 %v14540_v10, %v22278_v1  ;;  %v8416_v23 = vpop.f32.mrb[9].mxu1  ;;  %v10888_v48 = vsel %vm1019_vm0, %v10885_v4, %v10887_v57  ;;  %v10518_v33 = vpack.c.bf16 %v20522_v17, %v20544_v36  ;;  %v20565_v1 = vld [vmem:[#allocation2 + $0x1c0] sm:$0xf]  ;;  %22282 = vst [vmem:[#allocation19_spill] sm:$0xff] %v20576_v3 }
 0x45f   : > { %22277 = vst [vmem:[#allocation88_spill] sm:$0xff] %v20550_v5  ;;  %14886 = vmatprep.mubr.bf16.mxu0 %v10951_v45  ;;  %v8519_v44 = vadd.f32 %v8416_v23, %v20238_v0  ;;  %v14541_v24 = vpop.f32.mrb[10].mxu1  ;;  %v10891_v5 = vsel %vm1019_vm0, %v10889_v62, %v10890_v22  ;;  %v10893_v10 = vsel %vm1019_vm0, %v10890_v22, %v10892_v20  ;;  %22279 = vst [vmem:[#allocation85_spill] sm:$0xff] %v20565_v1  ;;  %v20574_v4 = vld [vmem:[#allocation2 + $0x1a0] sm:$0xff] }
 0x460   : > { %v8522_v9 = vadd.f32 %v14541_v24, %v20240_v56  ;;  %v8419_v39 = vpop.f32.mrb[11].mxu1  ;;  %v10519_v57 = vpack.c.bf16 %v20538_v6, %v20536_v35  ;;  %v20572_v56 = vld [vmem:[#allocation2 + $0x198] sm:$0xff]  ;;  %22281 = vst [vmem:[#allocation16_spill] sm:$0xff] %v20574_v4  ;;  %v10952_v22 = vpack.c.bf16 %v10888_v48, %v10886_v51  ;;  %v11216_v51 = vrot.slane %v20264_v7, 2 }
 0x461   : > { %v14588_v41 = vpop.f32.mrb[40].mxu0  ;;  %v8520_v0 = vadd.f32 %v8419_v39, %v20243_v52  ;;  %v20583_v39 = vrot.slane %v20253_v26, 1  ;;  %v10894_v53 = vrot.slane %v20572_v56, 1 }
 0x462   : > { %v20568_v23 = vadd.f32 %v14588_v41, %v8521_v2  ;;  %v8739_v45 = vpop.f32.mrb[41].mxu0  ;;  %14839 = vmatmul.mubr.bf16.gmra.mrb[116].mxu1 %v10518_v33  ;;  %v10953_v2 = vpack.c.bf16 %v10893_v10, %v10891_v5  ;;  %v10902_v41 = vrot.slane %v20565_v1, 1  ;;  %v11218_v10 = vrot.slane %v20272_v8, 2 }
 0x463   : > { %v20578_v24 = vadd.f32 %v8739_v45, %v8519_v44  ;;  %v14589_v62 = vpop.f32.mrb[42].mxu0  ;;  %14842 = vmatprep.mubr.bf16.mxu1 %v10519_v57  ;;  %v10895_v44 = vrot.slane %v20574_v4, 1  ;;  %v10897_v45 = vrot.slane %v20576_v3, 1  ;;  %v20601_v3 = vld [vmem:[#allocation2 + $0x1d8] sm:$0xf] }
 0x464   : > { %22280 = vst [vmem:[#allocation17_spill] sm:$0xff] %v20568_v23  ;;  %v20580_v20 = vadd.f32 %v14589_v62, %v8522_v9  ;;  %v8742_v52 = vpop.f32.mrb[43].mxu0  ;;  %v11215_v9 = vrot.slane %v20268_v47, 2 }
 0x465   : > { %22283 = vst [vmem:[#allocation18_spill] sm:$0xff] %v20578_v24  ;;  %v20586_v23 = vadd.f32 %v8742_v52, %v8520_v0  ;;  %v14544_v33 = vpop.f32.mrb[12].mxu1  ;;  %v11602_v0 = vrot.slane %v20264_v7, 3  ;;  %v10521_v52 = vpack.c.bf16 %v20253_v26, %v20253_v26  ;;  %v10896_v7 = vsel %vm1019_vm0, %v10894_v53, %v10895_v44 }
 0x466   : > { %22284 = vst [vmem:[#allocation21_spill] sm:$0xff] %v20580_v20  ;;  %14887 = vmatmul.mubr.bf16.gmra.mrb[148].mxu0 %v10952_v22  ;;  %v8525_v48 = vadd.f32 %v14544_v33, %v20260_v61  ;;  %v8432_v5 = vpop.f32.mrb[13].mxu1  ;;  %v10903_v22 = vsel %vm1019_vm0, %v20583_v39, %v10902_v41  ;;  %v11217_v41 = vsel %vm1196_vm1, %v11215_v9, %v11216_v51  ;;  %v11604_v20 = vrot.slane %v20272_v8, 3 }
 0x467   : > { %22285 = vst [vmem:[#allocation20_spill] sm:$0xff] %v20586_v23  ;;  %14890 = vmatprep.mubr.bf16.mxu0 %v10953_v2  ;;  %v8523_v57 = vadd.f32 %v8432_v5, %v20266_v19  ;;  %v14545_v62 = vpop.f32.mrb[14].mxu1  ;;  %v10520_v23 = vpack.c.bf16 %v20574_v4, %v20572_v56  ;;  %v10898_v19 = vsel %vm1019_vm0, %v10895_v44, %v10897_v45  ;;  %v10907_v53 = vrot.slane %v20601_v3, 1 }
 0x468   : > { %v8526_v61 = vadd.f32 %v14545_v62, %v20274_v49  ;;  %v8435_v2 = vpop.f32.mrb[15].mxu1  ;;  %v11219_v62 = vsel %vm1196_vm1, %v11216_v51, %v11218_v10  ;;  %v10955_v4 = vpack.c.bf16 %v10903_v22, %v20583_v39  ;;  %v11220_v44 = vrot.slane %v20314_v60, 2 }
 0x469   : > { %v14592_v33 = vpop.f32.mrb[44].mxu0  ;;  %v8524_v5 = vadd.f32 %v8435_v2, %v20277_v58  ;;  %v11601_v9 = vrot.slane %v20268_v47, 3  ;;  %v11606_v8 = vrot.slane %v20314_v60, 3  ;;  %v11609_v10 = vrot.slane %v20289_v55, 3 }
 0x46a   : > { %v20609_v1 = vadd.f32 %v14592_v33, %v8525_v48  ;;  %v8755_v26 = vpop.f32.mrb[45].mxu0  ;;  %14843 = vmatmul.mubr.bf16.gmra.mrb[120].mxu1 %v10520_v23  ;;  %v10954_v48 = vpack.c.bf16 %v10898_v19, %v10896_v7  ;;  %v11607_v23 = vrot.slane %v20312_v14, 3  ;;  %v11327_v2 = vpack.c.bf16 %v11219_v62, %v11217_v41  ;;  %v22286_v62 = vld [vmem:[#allocation126_spill] sm:$0xff] }
 0x46b   : > { %v20613_v24 = vadd.f32 %v8755_v26, %v8523_v57  ;;  %v14593_v49 = vpop.f32.mrb[46].mxu0  ;;  %14846 = vmatprep.mubr.bf16.mxu1 %v10521_v52  ;;  %v11223_v57 = vrot.slane %v20289_v55, 2  ;;  %v11605_v33 = vsel %vm3940_vm2, %v11602_v0, %v11604_v20  ;;  %v10908_v60 = vsel %vm1019_vm0, %v20583_v39, %v10907_v53 }
 0x46c   : > { %v20619_v58 = vadd.f32 %v14593_v49, %v8526_v61  ;;  %v8758_v45 = vpop.f32.mrb[47].mxu0  ;;  %v11603_v61 = vsel %vm3940_vm2, %v11601_v9, %v11602_v0  ;;  %v11225_v14 = vrot.slane %v20306_v31, 2  ;;  %v11226_v19 = vrot.slane %v20297_v46, 2 }
 0x46d   : > { %v20625_v51 = vadd.f32 %v8758_v45, %v8524_v5  ;;  %v14548_v22 = vpop.f32.mrb[16].mxu1  ;;  %v11228_v26 = vrot.slane %v20299_v34, 2  ;;  %v11612_v41 = vrot.slane %v20297_v46, 3  ;;  %v11614_v20 = vrot.slane %v20299_v34, 3 }
 0x46e   : > { %14891 = vmatmul.mubr.bf16.gmra.mrb[152].mxu0 %v10954_v48  ;;  %v8529_v7 = vadd.f32 %v14548_v22, %v20292_v27  ;;  %v8448_v47 = vpop.f32.mrb[17].mxu1  ;;  %v11713_v49 = vpack.c.bf16 %v11605_v33, %v11603_v61  ;;  %v11222_v53 = vsel %vm1196_vm1, %v11220_v44, %v22286_v62  ;;  %v11224_v45 = vsel %vm1196_vm1, %v22286_v62, %v11223_v57 }
 0x46f   : > { %14894 = vmatprep.mubr.bf16.mxu0 %v10955_v4  ;;  %v8527_v55 = vadd.f32 %v8448_v47, %v20295_v29  ;;  %v14549_v5 = vpop.f32.mrb[18].mxu1  ;;  %v10956_v46 = vpack.c.bf16 %v10908_v60, %v20583_v39  ;;  %v11611_v34 = vrot.slane %v20306_v31, 3  ;;  %v11227_v61 = vsel %vm1196_vm1, %v11225_v14, %v11226_v19 }
 0x470   : > { %v8530_v27 = vadd.f32 %v14549_v5, %v20301_v25  ;;  %v8451_v0 = vpop.f32.mrb[19].mxu1  ;;  %v11608_v44 = vsel %vm3940_vm2, %v11606_v8, %v11607_v23  ;;  %v11610_v33 = vsel %vm3940_vm2, %v11607_v23, %v11609_v10  ;;  %v11615_v31 = vsel %vm3940_vm2, %v11612_v41, %v11614_v20  ;;  %v22287_v10 = vld [vmem:[#allocation98_spill] sm:$0xff]  ;;  %v22288_v5 = vld [vmem:[#allocation32_spill] sm:$0xff] }
 0x471   : > { %v14596_v4 = vpop.f32.mrb[48].mxu0  ;;  %v8528_v29 = vadd.f32 %v8451_v0, %v20304_v15  ;;  %v11613_v39 = vsel %vm3940_vm2, %v11611_v34, %v11612_v41  ;;  %v11233_v60 = vrot.slane %v20334_v30, 2  ;;  %v11236_v8 = vrot.slane %v20338_v21, 2  ;;  %v22289_v41 = vld [vmem:[#allocation118_spill] sm:$0xff]  ;;  %v22291_v34 = vld [vmem:[#allocation112_spill] sm:$0xff] }
 0x472   : > { %v20645_v48 = vadd.f32 %v14596_v4, %v8529_v7  ;;  %v8771_v9 = vpop.f32.mrb[49].mxu0  ;;  %14847 = vmatmul.mubr.bf16.gmra.mrb[124].mxu1 %v10521_v52  ;;  %v11229_v7 = vsel %vm1196_vm1, %v11226_v19, %v11228_v26  ;;  %v11231_v52 = vrot.slane %v20332_v63, 2  ;;  %v11238_v23 = vrot.slane %v20340_v11, 2 }
 0x473   : > { %v20649_v22 = vadd.f32 %v8771_v9, %v8527_v55  ;;  %v14597_v25 = vpop.f32.mrb[50].mxu0  ;;  %14914 = vmatprep.mubr.bf16.mxu1 %v11327_v2  ;;  %v11328_v19 = vpack.c.bf16 %v11224_v45, %v11222_v53  ;;  %v11230_v26 = vrot.slane %v22288_v5, 2  ;;  %v11235_v20 = vrot.slane %v22289_v41, 2 }
 0x474   : > { %v20654_v57 = vadd.f32 %v14597_v25, %v8530_v27  ;;  %v8774_v15 = vpop.f32.mrb[51].mxu0  ;;  %v22290_v27 = vld [vmem:[#allocation97_spill] sm:$0xff]  ;;  %v11329_v62 = vpack.c.bf16 %v11229_v7, %v11227_v61  ;;  %v11715_v9 = vpack.c.bf16 %v11615_v31, %v11613_v39  ;;  %v11234_v53 = vsel %vm1196_vm1, %v11231_v52, %v11233_v60 }
 0x475   : > { %v20659_v47 = vadd.f32 %v8774_v15, %v8528_v29  ;;  %v14552_v14 = vpop.f32.mrb[20].mxu1  ;;  %v11714_v29 = vpack.c.bf16 %v11610_v33, %v11608_v44  ;;  %v20676_v45 = vsel %vm1196_vm1, %v11235_v20, %v11236_v8  ;;  %v11239_v33 = vsel %vm1196_vm1, %v11236_v8, %v11238_v23 }
 0x476   : > { %14895 = vmatmul.mubr.bf16.gmra.mrb[156].mxu0 %v10956_v46  ;;  %v8533_v2 = vadd.f32 %v14552_v14, %v22287_v10  ;;  %v8464_v55 = vpop.f32.mrb[21].mxu1  ;;  %v15294_v14 = vld [vmem:[%s21393_s3 + $0x608] sm:$0xff]   ;;  %v22292_v10 = vld [vmem:[#allocation30_spill] sm:$0xff]  ;;  %v11617_v7 = vrot.slane %v20332_v63, 3  ;;  %v11622_v60 = vrot.slane %v20338_v21, 3  ;;  %v11624_v8 = vrot.slane %v20340_v11, 3 }
 0x477   : > { %14962 = vmatprep.mubr.bf16.mxu0 %v11713_v49  ;;  %v8531_v0 = vadd.f32 %v8464_v55, %v22290_v27  ;;  %v14553_v4 = vpop.f32.mrb[22].mxu1  ;;  %v11232_v49 = vsel %vm1196_vm1, %v11230_v26, %v11231_v52  ;;  %v11616_v26 = vrot.slane %v22288_v5, 3  ;;  %v11619_v52 = vrot.slane %v20334_v30, 3  ;;  %v15295_v21 = vld [vmem:[%s21393_s3 + $0x610] sm:$0xff]   ;;  %v22294_v5 = vld [vmem:[#allocation87_spill] sm:$0xff] }
 0x478   : > { %v8534_v25 = vadd.f32 %v14553_v4, %v22291_v34  ;;  %v8467_v46 = vpop.f32.mrb[23].mxu1  ;;  %v11241_v63 = vrot.slane %v20385_v37, 2  ;;  %v11243_v23 = vrot.slane %v20387_v40, 2  ;;  %v11621_v30 = vrot.slane %v22289_v41, 3 }
 0x479   : > { %v14600_v15 = vpop.f32.mrb[52].mxu0  ;;  %v8532_v55 = vadd.f32 %v8467_v46, %v22292_v10  ;;  %v11331_v11 = vpack.c.bf16 %v11239_v33, %v20676_v45  ;;  %v11618_v4 = vsel %vm3940_vm2, %v11616_v26, %v11617_v7  ;;  %v11620_v41 = vsel %vm3940_vm2, %v11617_v7, %v11619_v52 }
 0x47a   : > { %v20679_v61 = vadd.f32 %v14600_v15, %v8533_v2  ;;  %v8787_v44 = vpop.f32.mrb[53].mxu0  ;;  %14915 = vmatmul.mubr.bf16.vlgmr.msra.gmra.mrb[128].mxu1 %v11328_v19  ;;  %v11330_v19 = vpack.c.bf16 %v11234_v53, %v11232_v49  ;;  %v22297_v15 = vld [vmem:[#allocation105_spill] sm:$0xff]  ;;  %v11623_v10 = vsel %vm3940_vm2, %v11621_v30, %v11622_v60  ;;  %v11625_v45 = vsel %vm3940_vm2, %v11622_v60, %v11624_v8  ;;  %v22301_v8 = vld [vmem:[#allocation38_spill] sm:$0xff] }
 0x47b   : > { %v20683_v39 = vadd.f32 %v8787_v44, %v8531_v0  ;;  %v14601_v31 = vpop.f32.mrb[54].mxu0  ;;  %14995 = vmatpush3.bf16.msra.mxu1 %v20513_v43  ;;  %14918 = vmatprep.mubr.bf16.mxu1 %v11329_v62  ;;  %v11246_v43 = vrot.slane %v22294_v5, 2  ;;  %v22295_v62 = vld [vmem:[#allocation40_spill] sm:$0xff]  ;;  %v20715_v26 = vsel %vm1196_vm1, %v11241_v63, %v11243_v23  ;;  %v11627_v30 = vrot.slane %v20385_v37, 3  ;;  %v15296_v60 = vld [vmem:[%s21393_s3 + $0x618] sm:$0xff]  }
 0x47c   : > { %v20688_v20 = vadd.f32 %v14601_v31, %v8534_v25  ;;  %v8790_v2 = vpop.f32.mrb[55].mxu0  ;;  %14996 = vmatprep.subr.bf16.mxu1 %v15294_v14  ;;  %v11240_v34 = vrot.slane %v22295_v62, 2  ;;  %v22296_v25 = vld [vmem:[#allocation90_spill] sm:$0xff]  ;;  %v22299_v31 = vld [vmem:[#allocation119_spill] sm:$0xff]  ;;  %v11716_v37 = vpack.c.bf16 %v11620_v41, %v11618_v4  ;;  %v11251_v4 = vrot.slane %v20419_v42, 2 }
 0x47d   : > { %v20694_v27 = vadd.f32 %v8790_v2, %v8532_v55  ;;  %v14556_v0 = vpop.f32.mrb[24].mxu1  ;;  %v11248_v46 = vrot.slane %v22296_v25, 2  ;;  %v22298_v55 = vld [vmem:[#allocation71_spill] sm:$0xff] }
 0x47e   : > { %14963 = vmatmul.mubr.bf16.vlgmr.msra.gmra.mrb[160].mxu0 %v11714_v29  ;;  %v8537_v49 = vadd.f32 %v14556_v0, %v22297_v15  ;;  %v8480_v53 = vpop.f32.mrb[25].mxu1  ;;  %v11245_v44 = vrot.slane %v22298_v55, 2  ;;  %v20712_v33 = vsel %vm1196_vm1, %v11240_v34, %v11241_v63  ;;  %v22300_v0 = vld [vmem:[#allocation79_spill] sm:$0xff] }
 0x47f   : > { %22293 = vst [vmem:[#allocation110_spill] sm:$0xff] %v20694_v27  ;;  %14966 = vmatprep.mubr.bf16.mxu0 %v11715_v9  ;;  %v8535_v29 = vadd.f32 %v8480_v53, %v22299_v31  ;;  %v14557_v2 = vpop.f32.mrb[26].mxu1  ;;  %14997 = vmatpush3.bf16.msra.mxu1 %v15294_v14  ;;  %v11629_v14 = vrot.slane %v20387_v40, 3  ;;  %v11249_v53 = vsel %vm1196_vm1, %v11246_v43, %v11248_v46  ;;  %v11632_v31 = vrot.slane %v22294_v5, 3 }
 0x480   : > { %v8538_v9 = vadd.f32 %v14557_v2, %v22300_v0  ;;  %v8483_v15 = vpop.f32.mrb[27].mxu1  ;;  %14998 = vmatprep.subr.bf16.mxu1 %v15295_v21  ;;  %v20719_v52 = vsel %vm1196_vm1, %v11245_v44, %v11246_v43  ;;  %v11717_v0 = vpack.c.bf16 %v11625_v45, %v11623_v10  ;;  %v11332_v5 = vpack.c.bf16 %v20715_v26, %v20712_v33 }
 0x481   : > { %v14604_v7 = vpop.f32.mrb[56].mxu0  ;;  %v8536_v34 = vadd.f32 %v8483_v15, %v22301_v8  ;;  %v11626_v15 = vrot.slane %v22295_v62, 3  ;;  %v11253_v46 = vrot.slane %v20426_v16, 2  ;;  %v11258_v45 = vrot.slane %v20441_v38, 2 }
 0x482   : > { %v20727_v63 = vadd.f32 %v14604_v7, %v8537_v49  ;;  %v8803_v23 = vpop.f32.mrb[57].mxu0  ;;  %14919 = vmatmul.mubr.bf16.gmra.mrb[132].mxu1 %v11330_v19  ;;  %v11631_v49 = vrot.slane %v22298_v55, 3  ;;  %v11634_v7 = vrot.slane %v22296_v25, 3  ;;  %v11333_v19 = vpack.c.bf16 %v11249_v53, %v20719_v52 }
 0x483   : > { %v20731_v2 = vadd.f32 %v8803_v23, %v8535_v29  ;;  %v14605_v44 = vpop.f32.mrb[58].mxu0  ;;  %14922 = vmatprep.mubr.bf16.mxu1 %v11331_v11  ;;  %14999 = vmatpush3.bf16.msra.mxu1 %v15295_v21  ;;  %v15297_v21 = vld [vmem:[%s21393_s3 + $0x620] sm:$0xff]   ;;  %v11628_v62 = vsel %vm3940_vm2, %v11626_v15, %v11627_v30  ;;  %v11630_v25 = vsel %vm3940_vm2, %v11627_v30, %v11629_v14  ;;  %v11250_v55 = vrot.slane %v20445_v54, 2  ;;  %v22302_v14 = vld [vmem:[#allocation69_spill] sm:$0xff] }
 0x484   : > { %v20733_v40 = vadd.f32 %v14605_v44, %v8538_v9  ;;  %v8806_v27 = vpop.f32.mrb[59].mxu0  ;;  %15000 = vmatprep.subr.bf16.mxu1 %v15296_v60  ;;  %v11256_v29 = vrot.slane %v20439_v50, 2  ;;  %v11635_v9 = vsel %vm3940_vm2, %v11632_v31, %v11634_v7  ;;  %v11637_v52 = vrot.slane %v20419_v42, 3  ;;  %v22303_v44 = vld [vmem:[#allocation92_spill] sm:$0xff] }
 0x485   : > { %v20738_v43 = vadd.f32 %v8806_v27, %v8536_v34  ;;  %v14560_v11 = vpop.f32.mrb[28].mxu1  ;;  %v11633_v27 = vsel %vm3940_vm2, %v11631_v49, %v11632_v31  ;;  %v11639_v30 = vrot.slane %v20426_v16, 3  ;;  %v11718_v23 = vpack.c.bf16 %v11630_v25, %v11628_v62  ;;  %v22304_v31 = vld [vmem:[#allocation81_spill] sm:$0xff] }
 0x486   : > { %14967 = vmatmul.mubr.bf16.gmra.mrb[164].mxu0 %v11716_v37  ;;  %v8541_v41 = vadd.f32 %v14560_v11, %v20435_v18  ;;  %v8496_v10 = vpop.f32.mrb[29].mxu1  ;;  %v11252_v53 = vsel %vm1196_vm1, %v11250_v55, %v11251_v4  ;;  %v11255_v37 = vrot.slane %v22303_v44, 2  ;;  %v11254_v16 = vsel %vm1196_vm1, %v11251_v4, %v11253_v46 }
 0x487   : > { %14970 = vmatprep.mubr.bf16.mxu0 %v11717_v0  ;;  %v8539_v33 = vadd.f32 %v8496_v10, %v20443_v32  ;;  %v14561_v26 = vpop.f32.mrb[30].mxu1  ;;  %15001 = vmatpush3.bf16.msra.mxu1 %v15296_v60  ;;  %v15298_v32 = vld [vmem:[%s21393_s3 + $0x628] sm:$0xff]   ;;  %v11636_v15 = vrot.slane %v20445_v54, 3  ;;  %v11719_v11 = vpack.c.bf16 %v11635_v9, %v11633_v27  ;;  %v11259_v25 = vsel %vm1196_vm1, %v11256_v29, %v11258_v45 }
 0x488   : > { %v8542_v18 = vadd.f32 %v14561_v26, %v22302_v14  ;;  %v8499_v8 = vpop.f32.mrb[31].mxu1  ;;  %15002 = vmatprep.subr.bf16.mxu1 %v15297_v21  ;;  %v11257_v62 = vsel %vm1196_vm1, %v11255_v37, %v11256_v29  ;;  %v11640_v26 = vsel %vm3940_vm2, %v11637_v52, %v11639_v30  ;;  %v11642_v4 = vrot.slane %v20439_v50, 3  ;;  %v15299_v29 = vld [vmem:[%s21393_s3 + $0x630] sm:$0xff]  }
 0x489   : > { %v14608_v34 = vpop.f32.mrb[60].mxu0  ;;  %v8540_v60 = vadd.f32 %v8499_v8, %v22304_v31  ;;  %v11334_v46 = vpack.c.bf16 %v11254_v16, %v11252_v53  ;;  %v11261_v27 = vrot.slane %v20474_v28, 2  ;;  %v11335_v45 = vpack.c.bf16 %v11259_v25, %v11257_v62  ;;  %v22307_v8 = vld [vmem:[#allocation103_spill] sm:$0xff] }
 0x48a   : > { %v20766_v0 = vadd.f32 %v14608_v34, %v8541_v41  ;;  %v8819_v42 = vpop.f32.mrb[61].mxu0  ;;  %14923 = vmatmul.mubr.bf16.gmra.mrb[136].mxu1 %v11332_v5  ;;  %v11638_v41 = vsel %vm3940_vm2, %v11636_v15, %v11637_v52  ;;  %v11644_v5 = vrot.slane %v20441_v38, 3  ;;  %v11260_v50 = vrot.slane %v20495_v13, 2  ;;  %v22306_v52 = vld [vmem:[#allocation99_spill] sm:$0xff] }
 0x48b   : > { %v20770_v49 = vadd.f32 %v8819_v42, %v8539_v33  ;;  %v14609_v7 = vpop.f32.mrb[62].mxu0  ;;  %14926 = vmatprep.mubr.bf16.mxu1 %v11333_v19  ;;  %15003 = vmatpush3.bf16.msra.mxu1 %v15297_v21  ;;  %v11641_v33 = vrot.slane %v22303_v44, 3  ;;  %v22305_v21 = vld [vmem:[#allocation96_spill] sm:$0xff]  ;;  %v11720_v38 = vpack.c.bf16 %v11640_v26, %v11638_v41  ;;  %v11268_v34 = vrot.slane %v22307_v8, 2  ;;  %v22308_v53 = vld [vmem:[#allocation55_spill] sm:$0xff]  ;;  %v22309_v42 = vld [vmem:[#allocation53_spill] sm:$0xff] }
 0x48c   : > { %v20774_v10 = vadd.f32 %v14609_v7, %v8542_v18  ;;  %v8822_v55 = vpop.f32.mrb[63].mxu0  ;;  %15004 = vmatprep.subr.bf16.mxu1 %v15298_v32  ;;  %v11263_v9 = vrot.slane %v22305_v21, 2  ;;  %v11266_v18 = vrot.slane %v20487_v59, 2  ;;  %v11647_v44 = vrot.slane %v20474_v28, 3  ;;  %v22310_v25 = vld [vmem:[#allocation107_spill] sm:$0xff]  ;;  %v15300_v41 = vld [vmem:[%s21393_s3 + $0x638] sm:$0xff]  }
 0x48d   : > { %v20779_v54 = vadd.f32 %v8822_v55, %v8540_v60  ;;  %v14628_v19 = vpop.f32.mrb[32].mxu1  ;;  %v11649_v60 = vrot.slane %v22305_v21, 3  ;;  %v11262_v62 = vsel %vm1196_vm1, %v11260_v50, %v11261_v27  ;;  %v11265_v55 = vrot.slane %v22310_v25, 2  ;;  %v22311_v26 = vld [vmem:[#allocation114_spill] sm:$0xff] }
 0x48e   : > { %14971 = vmatmul.mubr.bf16.gmra.mrb[168].mxu0 %v11718_v23  ;;  %v9270_v30 = vadd.f32 %v14628_v19, %v22306_v52  ;;  %v9141_v14 = vpop.f32.mrb[33].mxu1  ;;  %v11643_v23 = vsel %vm3940_vm2, %v11641_v33, %v11642_v4  ;;  %v11264_v33 = vsel %vm1196_vm1, %v11261_v27, %v11263_v9  ;;  %v11646_v21 = vrot.slane %v20495_v13, 3 }
 0x48f   : > { %14974 = vmatprep.mubr.bf16.mxu0 %v11719_v11  ;;  %v9268_v37 = vadd.f32 %v9141_v14, %v22308_v53  ;;  %v14629_v31 = vpop.f32.mrb[34].mxu1  ;;  %15005 = vmatpush3.bf16.msra.mxu1 %v15298_v32  ;;  %v11645_v11 = vsel %vm3940_vm2, %v11642_v4, %v11644_v5  ;;  %v11267_v5 = vsel %vm1196_vm1, %v11265_v55, %v11266_v18  ;;  %v11652_v14 = vrot.slane %v20487_v59, 3 }
 0x490   : > { %v9271_v16 = vadd.f32 %v14629_v31, %v22309_v42  ;;  %v9144_v15 = vpop.f32.mrb[35].mxu1  ;;  %15006 = vmatprep.subr.bf16.mxu1 %v15299_v29  ;;  %v11269_v50 = vsel %vm1196_vm1, %v11266_v18, %v11268_v34  ;;  %v11650_v27 = vsel %vm3940_vm2, %v11647_v44, %v11649_v60  ;;  %v11654_v13 = vrot.slane %v22307_v8, 3  ;;  %v22312_v42 = vld [vmem:[#allocation117_spill] sm:$0xff] }
 0x491   : > { %v14676_v7 = vpop.f32.mrb[64].mxu0  ;;  %v9269_v28 = vadd.f32 %v9144_v15, %v22311_v26  ;;  %v11336_v18 = vpack.c.bf16 %v11264_v33, %v11262_v62  ;;  %v11337_v34 = vpack.c.bf16 %v11269_v50, %v11267_v5  ;;  %v11651_v59 = vrot.slane %v22310_v25, 3  ;;  %v22314_v62 = vld [vmem:[#allocation14_spill] sm:$0xff]  ;;  %v22315_v33 = vld [vmem:[#allocation111_spill] sm:$0xff] }
 0x492   : > { %v20804_v19 = vadd.f32 %v14676_v7, %v9270_v30  ;;  %v9527_v32 = vpop.f32.mrb[65].mxu0  ;;  %14927 = vmatmul.mubr.bf16.gmra.mrb[140].mxu1 %v11334_v46  ;;  %v11648_v30 = vsel %vm3940_vm2, %v11646_v21, %v11647_v44  ;;  %v11721_v46 = vpack.c.bf16 %v11645_v11, %v11643_v23  ;;  %v11271_v44 = vrot.slane %v20522_v17, 2 }
 0x493   : > { %v20808_v52 = vadd.f32 %v9527_v32, %v9268_v37  ;;  %v14677_v4 = vpop.f32.mrb[66].mxu0  ;;  %14930 = vmatprep.mubr.bf16.mxu1 %v11335_v45  ;;  %15007 = vmatpush3.bf16.msra.mxu1 %v15299_v29  ;;  %v11722_v15 = vpack.c.bf16 %v11650_v27, %v11648_v30  ;;  %v11273_v8 = vrot.slane %v20528_v12, 2  ;;  %v22313_v29 = vld [vmem:[#allocation15_spill] sm:$0xff]  ;;  %v11653_v23 = vsel %vm3940_vm2, %v11651_v59, %v11652_v14 }
 0x494   : > { %v20813_v53 = vadd.f32 %v14677_v4, %v9271_v16  ;;  %v9530_v31 = vpop.f32.mrb[67].mxu0  ;;  %15008 = vmatprep.subr.bf16.mxu1 %v15300_v41  ;;  %v11270_v11 = vrot.slane %v20544_v36, 2  ;;  %v11276_v32 = vrot.slane %v20538_v6, 2  ;;  %v11278_v21 = vrot.slane %v22315_v33, 2  ;;  %v22316_v4 = vld [vmem:[#allocation88_spill] sm:$0xff] }
 0x495   : > { %v20818_v9 = vadd.f32 %v9530_v31, %v9269_v28  ;;  %v14632_v37 = vpop.f32.mrb[36].mxu1  ;;  %v11275_v28 = vrot.slane %v20536_v35, 2  ;;  %v11657_v30 = vrot.slane %v20522_v17, 3  ;;  %v11664_v17 = vrot.slane %v22315_v33, 3 }
 0x496   : > { %14975 = vmatmul.mubr.bf16.gmra.mrb[172].mxu0 %v11720_v38  ;;  %v9274_v16 = vadd.f32 %v14632_v37, %v22312_v42  ;;  %v9157_v45 = vpop.f32.mrb[37].mxu1  ;;  %v11655_v38 = vsel %vm3940_vm2, %v11652_v14, %v11654_v13  ;;  %v11656_v14 = vrot.slane %v20544_v36, 3  ;;  %v11272_v13 = vsel %vm1196_vm1, %v11270_v11, %v11271_v44  ;;  %v22318_v11 = vld [vmem:[#allocation18_spill] sm:$0xff] }
 0x497   : > { %14978 = vmatprep.mubr.bf16.mxu0 %v11721_v46  ;;  %v9272_v60 = vadd.f32 %v9157_v45, %v22313_v29  ;;  %v14633_v7 = vpop.f32.mrb[38].mxu1  ;;  %15009 = vmatpush3.bf16.msra.mxu1 %v15300_v41  ;;  %v11274_v46 = vsel %vm1196_vm1, %v11271_v44, %v11273_v8  ;;  %v11659_v37 = vrot.slane %v20528_v12, 3  ;;  %v11662_v36 = vrot.slane %v20538_v6, 3  ;;  %v22317_v12 = vld [vmem:[#allocation17_spill] sm:$0xff] }
 0x498   : > { %v9275_v25 = vadd.f32 %v14633_v7, %v22314_v62  ;;  %v9160_v55 = vpop.f32.mrb[39].mxu1  ;;  %v11723_v29 = vpack.c.bf16 %v11655_v38, %v11653_v23  ;;  %v11280_v33 = vrot.slane %v20572_v56, 2 }
 0x499   : > { %v14680_v26 = vpop.f32.mrb[68].mxu0  ;;  %v9273_v5 = vadd.f32 %v9160_v55, %v22316_v4  ;;  %v11660_v6 = vsel %vm3940_vm2, %v11657_v30, %v11659_v37  ;;  %v11665_v38 = vsel %vm3940_vm2, %v11662_v36, %v11664_v17 }
 0x49a   : > { %v20833_v50 = vadd.f32 %v14680_v26, %v9274_v16  ;;  %v9543_v31 = vpop.f32.mrb[69].mxu0  ;;  %14931 = vmatmul.mubr.bf16.gmra.mrb[144].mxu1 %v11336_v18  ;;  %v11661_v16 = vrot.slane %v20536_v35, 3  ;;  %v11277_v18 = vsel %vm1196_vm1, %v11275_v28, %v11276_v32  ;;  %v11658_v35 = vsel %vm3940_vm2, %v11656_v14, %v11657_v30  ;;  %v22319_v26 = vld [vmem:[#allocation21_spill] sm:$0xff]  ;;  %v22321_v14 = vld [vmem:[#allocation20_spill] sm:$0xff] }
 0x49b   : > { %v20837_v41 = vadd.f32 %v9543_v31, %v9272_v60  ;;  %v14681_v27 = vpop.f32.mrb[70].mxu0  ;;  %14934 = vmatprep.mubr.bf16.mxu1 %v11337_v34  ;;  %v11279_v60 = vsel %vm1196_vm1, %v11276_v32, %v11278_v21  ;;  %v11338_v34 = vpack.c.bf16 %v11274_v46, %v11272_v13  ;;  %v20859_v21 = vld [vmem:[#allocation2] sm:$0xff]  ;;  %v22322_v46 = vld [vmem:[#allocation16_spill] sm:$0xff] }
 0x49c   : > { %v20842_v59 = vadd.f32 %v14681_v27, %v9275_v25  ;;  %v9546_v42 = vpop.f32.mrb[71].mxu0  ;;  %v11339_v55 = vpack.c.bf16 %v11279_v60, %v11277_v18  ;;  %v11663_v23 = vsel %vm3940_vm2, %v11661_v16, %v11662_v36  ;;  %v20862_v4 = vrot.slane %v20859_v21, 2 }
 0x49d   : > { %v20847_v45 = vadd.f32 %v9546_v42, %v9273_v5  ;;  %v14636_v44 = vpop.f32.mrb[40].mxu1  ;;  %v22320_v5 = vld [vmem:[#allocation85_spill] sm:$0xff]  ;;  %v11281_v37 = vrot.slane %v22322_v46, 2  ;;  %v22323_v42 = vld [vmem:[#allocation19_spill] sm:$0xff]  ;;  %v11725_v18 = vpack.c.bf16 %v11665_v38, %v11663_v23  ;;  %v11666_v60 = vrot.slane %v20572_v56, 3 }
 0x49e   : > { %14979 = vmatmul.mubr.bf16.gmra.mrb[176].mxu0 %v11722_v15  ;;  %v9278_v8 = vadd.f32 %v14636_v44, %v22317_v12  ;;  %v9173_v7 = vpop.f32.mrb[41].mxu1  ;;  %v11288_v31 = vrot.slane %v22320_v5, 2  ;;  %v11283_v16 = vrot.slane %v22323_v42, 2  ;;  %v11293_v38 = vrot.slane %v20601_v3, 2 }
 0x49f   : > { %14982 = vmatprep.mubr.bf16.mxu0 %v11723_v29  ;;  %v9276_v62 = vadd.f32 %v9173_v7, %v22318_v11  ;;  %v14637_v25 = vpop.f32.mrb[42].mxu1  ;;  %v11724_v29 = vpack.c.bf16 %v11660_v6, %v11658_v35  ;;  %v20877_v7 = vrot.slane %v20859_v21, 3  ;;  %v11674_v11 = vrot.slane %v22320_v5, 3 }
 0x4a0   : > { %v9279_v28 = vadd.f32 %v14637_v25, %v22319_v26  ;;  %v9176_v15 = vpop.f32.mrb[43].mxu1  ;;  %v11282_v56 = vsel %vm1196_vm1, %v11280_v33, %v11281_v37  ;;  %v11284_v6 = vsel %vm1196_vm1, %v11281_v37, %v11283_v16  ;;  %v15465_v37 = vld [vmem:[#allocation2 + $0x68] sm:$0xff] }
 0x4a1   : > { %v14684_v32 = vpop.f32.mrb[72].mxu0  ;;  %v9277_v30 = vadd.f32 %v9176_v15, %v22321_v14  ;;  %v11340_v14 = vpack.c.bf16 %v11284_v6, %v11282_v56 }
 0x4a2   : > { %v20866_v27 = vadd.f32 %v14684_v32, %v9278_v8  ;;  %v9559_v13 = vpop.f32.mrb[73].mxu0  ;;  %14935 = vmatmul.mubr.bf16.gmra.mrb[148].mxu1 %v11338_v34  ;;  %v11667_v8 = vrot.slane %v22322_v46, 3  ;;  %v11289_v34 = vsel %vm1196_vm1, %v20862_v4, %v11288_v31  ;;  %v11675_v32 = vsel %vm3940_vm2, %v20877_v7, %v11674_v11 }
 0x4a3   : > { %v20870_v36 = vadd.f32 %v9559_v13, %v9276_v62  ;;  %v14685_v17 = vpop.f32.mrb[74].mxu0  ;;  %14938 = vmatprep.mubr.bf16.mxu1 %v11339_v55  ;;  %v11669_v62 = vrot.slane %v22323_v42, 3  ;;  %v11341_v15 = vpack.c.bf16 %v11289_v34, %v20862_v4  ;;  %v11988_v42 = vrot.slane %v15465_v37, 4 }
 0x4a4   : > { %v20873_v44 = vadd.f32 %v14685_v17, %v9279_v28  ;;  %v9562_v12 = vpop.f32.mrb[75].mxu0 }
 0x4a5   : > { %v20880_v25 = vadd.f32 %v9562_v12, %v9277_v30  ;;  %v14640_v35 = vpop.f32.mrb[44].mxu1  ;;  %v11668_v30 = vsel %vm3940_vm2, %v11666_v60, %v11667_v8  ;;  %v11679_v12 = vrot.slane %v20601_v3, 3 }
 0x4a6   : > { %14983 = vmatmul.mubr.bf16.gmra.mrb[180].mxu0 %v11724_v29  ;;  %v9282_v55 = vadd.f32 %v14640_v35, %v20609_v1  ;;  %v9189_v23 = vpop.f32.mrb[45].mxu1  ;;  %v11670_v1 = vsel %vm3940_vm2, %v11667_v8, %v11669_v62  ;;  %v15466_v29 = vld [vmem:[#allocation2 + $0x70] sm:$0xf]  ;;  %v15467_v62 = vld [vmem:[#allocation2 + $0x60] sm:$0xff] }
 0x4a7   : > { %14986 = vmatprep.mubr.bf16.mxu0 %v11725_v18  ;;  %v9280_v26 = vadd.f32 %v9189_v23, %v20613_v24  ;;  %v14641_v28 = vpop.f32.mrb[46].mxu1  ;;  %v11727_v18 = vpack.c.bf16 %v11675_v32, %v20877_v7  ;;  %v11726_v11 = vpack.c.bf16 %v11670_v1, %v11668_v30  ;;  %v11987_v34 = vrot.slane %v15467_v62, 4  ;;  %v15468_v32 = vld [vmem:[#allocation2 + $0x80] sm:$0xff] }
 0x4a8   : > { %v9283_v5 = vadd.f32 %v14641_v28, %v20619_v58  ;;  %v9192_v31 = vpop.f32.mrb[47].mxu1  ;;  %v11990_v58 = vrot.slane %v15466_v29, 4  ;;  %v11680_v28 = vsel %vm3940_vm2, %v20877_v7, %v11679_v12  ;;  %v15472_v12 = vld [vmem:[#allocation2 + $0x78] sm:$0xff] }
 0x4a9   : > { %v14688_v33 = vpop.f32.mrb[76].mxu0  ;;  %v9281_v13 = vadd.f32 %v9192_v31, %v20625_v51  ;;  %v11294_v51 = vsel %vm1196_vm1, %v20862_v4, %v11293_v38  ;;  %v11989_v6 = vsel %vm4327_vm3, %v11987_v34, %v11988_v42  ;;  %v15469_v31 = vld [vmem:[#allocation2 + $0x88] sm:$0xf]  ;;  %v11728_v37 = vpack.c.bf16 %v11680_v28, %v20877_v7 }
 0x4aa   : > { %v20897_v46 = vadd.f32 %v14688_v33, %v9282_v55  ;;  %v9575_v24 = vpop.f32.mrb[77].mxu0  ;;  %14939 = vmatmul.mubr.bf16.gmra.mrb[152].mxu1 %v11340_v14  ;;  %v11342_v3 = vpack.c.bf16 %v11294_v51, %v20862_v4  ;;  %v11995_v33 = vrot.slane %v15469_v31, 4  ;;  %v15473_v51 = vld [vmem:[#allocation2 + $0x90] sm:$0xff] }
 0x4ab   : > { %v20899_v16 = vadd.f32 %v9575_v24, %v9280_v26  ;;  %v14689_v17 = vpop.f32.mrb[78].mxu0  ;;  %14942 = vmatprep.mubr.bf16.mxu1 %v11341_v15  ;;  %v11991_v26 = vsel %vm4327_vm3, %v11988_v42, %v11990_v58  ;;  %v15471_v58 = vld [vmem:[#allocation2 + $0xa0] sm:$0xf]  ;;  %v11997_v62 = vrot.slane %v15473_v51, 4 }
 0x4ac   : > { %v20903_v60 = vadd.f32 %v14689_v17, %v9283_v5  ;;  %v9578_v8 = vpop.f32.mrb[79].mxu0  ;;  %v11993_v5 = vrot.slane %v15468_v32, 4  ;;  %v12099_v24 = vpack.c.bf16 %v11991_v26, %v11989_v6  ;;  %v15470_v17 = vld [vmem:[#allocation2 + $0x98] sm:$0xff]  ;;  %v15479_v51 = vld [vmem:[#allocation2 + $0xc0] sm:$0xff] }
 0x4ad   : > { %v20907_v35 = vadd.f32 %v9578_v8, %v9281_v13  ;;  %v14644_v56 = vpop.f32.mrb[48].mxu1  ;;  %v11998_v29 = vrot.slane %v15470_v17, 4 }
 0x4ae   : > { %14987 = vmatmul.mubr.bf16.gmra.mrb[184].mxu0 %v11726_v11  ;;  %v9286_v55 = vadd.f32 %v14644_v56, %v20645_v48  ;;  %v9205_v23 = vpop.f32.mrb[49].mxu1  ;;  %v11996_v56 = vsel %vm4327_vm3, %v11993_v5, %v11995_v33 }
 0x4af   : > { %14990 = vmatprep.mubr.bf16.mxu0 %v11727_v18  ;;  %v9284_v38 = vadd.f32 %v9205_v23, %v20649_v22  ;;  %v14645_v15 = vpop.f32.mrb[50].mxu1  ;;  %v12000_v18 = vrot.slane %v15471_v58, 4  ;;  %v11999_v23 = vsel %vm4327_vm3, %v11997_v62, %v11998_v29  ;;  %v12007_v62 = vrot.slane %v15479_v51, 4 }
 0x4b0   : > { %v9287_v14 = vadd.f32 %v14645_v15, %v20654_v57  ;;  %v9208_v30 = vpop.f32.mrb[51].mxu1  ;;  %v11992_v57 = vrot.slane %v15472_v12, 4  ;;  %v15478_v12 = vld [vmem:[#allocation2 + $0xa8] sm:$0xff] }
 0x4b1   : > { %v14692_v48 = vpop.f32.mrb[80].mxu0  ;;  %v9285_v1 = vadd.f32 %v9208_v30, %v20659_v47 }
 0x4b2   : > { %v20918_v4 = vadd.f32 %v14692_v48, %v9286_v55  ;;  %v9591_v13 = vpop.f32.mrb[81].mxu0  ;;  %14943 = vmatmul.mubr.bf16.gmra.mrb[156].mxu1 %v11342_v3  ;;  %v11994_v7 = vsel %vm4327_vm3, %v11992_v57, %v11993_v5  ;;  %v12001_v3 = vsel %vm4327_vm3, %v11998_v29, %v12000_v18  ;;  %v22324_v48 = vld [vmem:[#allocation110_spill] sm:$0xff]  ;;  %v12002_v57 = vrot.slane %v15478_v12, 4 }
 0x4b3   : > { %v20921_v42 = vadd.f32 %v9591_v13, %v9284_v38  ;;  %v14693_v22 = vpop.f32.mrb[82].mxu0  ;;  %15010 = vmatprep.mubr.bf16.mxu1 %v12099_v24  ;;  %v12100_v31 = vpack.c.bf16 %v11996_v56, %v11994_v7  ;;  %v12101_v33 = vpack.c.bf16 %v12001_v3, %v11999_v23  ;;  %v15475_v13 = vld [vmem:[#allocation2 + $0xb8] sm:$0xf] }
 0x4b4   : > { %v20923_v8 = vadd.f32 %v14693_v22, %v9287_v14  ;;  %v9594_v11 = vpop.f32.mrb[83].mxu0  ;;  %v15474_v14 = vld [vmem:[#allocation2 + $0xb0] sm:$0xff]  ;;  %v12005_v24 = vrot.slane %v15475_v13, 4 }
 0x4b5   : > { %v20925_v47 = vadd.f32 %v9594_v11, %v9285_v1  ;;  %v14648_v34 = vpop.f32.mrb[52].mxu1  ;;  %v12003_v30 = vrot.slane %v15474_v14, 4  ;;  %v15480_v14 = vld [vmem:[#allocation2 + $0xe0] sm:$0xff] }
 0x4b6   : > { %14991 = vmatmul.mubr.bf16.gmra.mrb[188].mxu0 %v11728_v37  ;;  %v9290_v6 = vadd.f32 %v14648_v34, %v20679_v61  ;;  %v9221_v55 = vpop.f32.mrb[53].mxu1 }
 0x4b7   : > { %v9288_v26 = vadd.f32 %v9221_v55, %v20683_v39  ;;  %v14649_v28 = vpop.f32.mrb[54].mxu1  ;;  %v15476_v39 = vld [vmem:[#allocation2 + $0xc8] sm:$0xff]  ;;  %v12004_v7 = vsel %vm4327_vm3, %v12002_v57, %v12003_v30  ;;  %v12006_v56 = vsel %vm4327_vm3, %v12003_v30, %v12005_v24  ;;  %v15485_v57 = vld [vmem:[#allocation2 + $0xf0] sm:$0xff] }
 0x4b8   : > { %v9291_v38 = vadd.f32 %v14649_v28, %v20688_v20  ;;  %v9224_v15 = vpop.f32.mrb[55].mxu1  ;;  %v12008_v17 = vrot.slane %v15476_v39, 4  ;;  %v15477_v20 = vld [vmem:[#allocation2 + $0xd0] sm:$0xf]  ;;  %v12017_v51 = vrot.slane %v15485_v57, 4 }
 0x4b9   : > { %v14696_v32 = vpop.f32.mrb[84].mxu0  ;;  %v9289_v1 = vadd.f32 %v9224_v15, %v22324_v48  ;;  %v12010_v29 = vrot.slane %v15477_v20, 4  ;;  %v12013_v48 = vrot.slane %v15480_v14, 4 }
 0x4ba   : > { %v20935_v5 = vadd.f32 %v14696_v32, %v9290_v6  ;;  %v9607_v61 = vpop.f32.mrb[85].mxu0  ;;  %15011 = vmatmul.mubr.bf16.vlgmr.msra.gmra.mrb[160].mxu1 %v12100_v31  ;;  %v12009_v23 = vsel %vm4327_vm3, %v12007_v62, %v12008_v17  ;;  %v12102_v31 = vpack.c.bf16 %v12006_v56, %v12004_v7 }
 0x4bb   : > { %v20937_v37 = vadd.f32 %v9607_v61, %v9288_v26  ;;  %v14697_v22 = vpop.f32.mrb[86].mxu0  ;;  %15014 = vmatprep.mubr.bf16.mxu1 %v12101_v33  ;;  %v12011_v3 = vsel %vm4327_vm3, %v12008_v17, %v12010_v29  ;;  %v15481_v33 = vld [vmem:[#allocation2 + $0xe8] sm:$0xf] }
 0x4bc   : > { %v20939_v58 = vadd.f32 %v14697_v22, %v9291_v38  ;;  %v9610_v18 = vpop.f32.mrb[87].mxu0  ;;  %v12103_v61 = vpack.c.bf16 %v12011_v3, %v12009_v23  ;;  %v12015_v13 = vrot.slane %v15481_v33, 4 }
 0x4bd   : > { %v20941_v11 = vadd.f32 %v9610_v18, %v9289_v1  ;;  %v14652_v34 = vpop.f32.mrb[56].mxu1  ;;  %v15484_v18 = vld [vmem:[#allocation2 + $0xd8] sm:$0xff] }
 0x4be   : > { %v9294_v6 = vadd.f32 %v14652_v34, %v20727_v63  ;;  %v9237_v55 = vpop.f32.mrb[57].mxu1  ;;  %v12016_v7 = vsel %vm4327_vm3, %v12013_v48, %v12015_v13 }
 0x4bf   : > { %v9292_v26 = vadd.f32 %v9237_v55, %v20731_v2  ;;  %v14653_v28 = vpop.f32.mrb[58].mxu1  ;;  %v15482_v2 = vld [vmem:[#allocation2 + $0xf8] sm:$0xff] }
 0x4c0   : > { %v9295_v38 = vadd.f32 %v14653_v28, %v20733_v40  ;;  %v9240_v15 = vpop.f32.mrb[59].mxu1  ;;  %v12018_v39 = vrot.slane %v15482_v2, 4  ;;  %v15483_v40 = vld [vmem:[#allocation2 + $0x100] sm:$0xf] }
 0x4c1   : > { %v14700_v32 = vpop.f32.mrb[88].mxu0  ;;  %v9293_v1 = vadd.f32 %v9240_v15, %v20738_v43  ;;  %v12020_v17 = vrot.slane %v15483_v40, 4  ;;  %v12012_v43 = vrot.slane %v15484_v18, 4 }
 0x4c2   : > { %v20951_v30 = vadd.f32 %v14700_v32, %v9294_v6  ;;  %v9623_v63 = vpop.f32.mrb[89].mxu0  ;;  %15015 = vmatmul.mubr.bf16.gmra.mrb[164].mxu1 %v12102_v31  ;;  %v12019_v55 = vsel %vm4327_vm3, %v12017_v51, %v12018_v39  ;;  %v15486_v31 = vld [vmem:[#allocation2 + $0x110] sm:$0xff] }
 0x4c3   : > { %v20953_v24 = vadd.f32 %v9623_v63, %v9292_v26  ;;  %v14701_v22 = vpop.f32.mrb[90].mxu0  ;;  %15018 = vmatprep.mubr.bf16.mxu1 %v12103_v61  ;;  %v12014_v34 = vsel %vm4327_vm3, %v12012_v43, %v12013_v48  ;;  %v12021_v23 = vsel %vm4327_vm3, %v12018_v39, %v12020_v17  ;;  %v12023_v14 = vrot.slane %v15486_v31, 4  ;;  %v15487_v61 = vld [vmem:[#allocation2 + $0x118] sm:$0xf]  ;;  %v15491_v43 = vld [vmem:[#allocation2 + $0x120] sm:$0xff] }
 0x4c4   : > { %v20955_v20 = vadd.f32 %v14701_v22, %v9295_v38  ;;  %v9626_v29 = vpop.f32.mrb[91].mxu0  ;;  %v12104_v32 = vpack.c.bf16 %v12016_v7, %v12014_v34  ;;  %v12105_v63 = vpack.c.bf16 %v12021_v23, %v12019_v55  ;;  %v12025_v33 = vrot.slane %v15487_v61, 4 }
 0x4c5   : > { %v20957_v12 = vadd.f32 %v9626_v29, %v9293_v1  ;;  %v14656_v62 = vpop.f32.mrb[60].mxu1  ;;  %v15490_v29 = vld [vmem:[#allocation2 + $0x108] sm:$0xff]  ;;  %v12027_v57 = vrot.slane %v15491_v43, 4 }
 0x4c6   : > { %v9298_v56 = vadd.f32 %v14656_v62, %v20766_v0  ;;  %v9253_v6 = vpop.f32.mrb[61].mxu1  ;;  %v12026_v34 = vsel %vm4327_vm3, %v12023_v14, %v12025_v33 }
 0x4c7   : > { %v9296_v3 = vadd.f32 %v9253_v6, %v20770_v49  ;;  %v14657_v26 = vpop.f32.mrb[62].mxu1  ;;  %v15488_v49 = vld [vmem:[#allocation2 + $0x128] sm:$0xff] }
 0x4c8   : > { %v9299_v28 = vadd.f32 %v14657_v26, %v20774_v10  ;;  %v9256_v38 = vpop.f32.mrb[63].mxu1  ;;  %v12028_v2 = vrot.slane %v15488_v49, 4  ;;  %v15489_v10 = vld [vmem:[#allocation2 + $0x130] sm:$0xf] }
 0x4c9   : > { %v14704_v15 = vpop.f32.mrb[92].mxu0  ;;  %v9297_v1 = vadd.f32 %v9256_v38, %v20779_v54  ;;  %v12030_v39 = vrot.slane %v15489_v10, 4  ;;  %v12022_v54 = vrot.slane %v15490_v29, 4  ;;  %v15496_v10 = vld [vmem:[#allocation2 + $0x160] sm:$0xf] }
 0x4ca   : > { %v20967_v48 = vadd.f32 %v14704_v15, %v9298_v56  ;;  %v9639_v0 = vpop.f32.mrb[93].mxu0  ;;  %15019 = vmatmul.mubr.bf16.gmra.mrb[168].mxu1 %v12104_v32  ;;  %v12029_v6 = vsel %vm4327_vm3, %v12027_v57, %v12028_v2  ;;  %v15492_v32 = vld [vmem:[#allocation2 + $0x140] sm:$0xff]  ;;  %v15497_v57 = vld [vmem:[#allocation2 + $0x150] sm:$0xff] }
 0x4cb   : > { %v20969_v13 = vadd.f32 %v9639_v0, %v9296_v3  ;;  %v14705_v22 = vpop.f32.mrb[94].mxu0  ;;  %15022 = vmatprep.mubr.bf16.mxu1 %v12105_v63  ;;  %v12024_v62 = vsel %vm4327_vm3, %v12022_v54, %v12023_v14  ;;  %v12031_v55 = vsel %vm4327_vm3, %v12028_v2, %v12030_v39  ;;  %v12033_v31 = vrot.slane %v15492_v32, 4 }
 0x4cc   : > { %v20971_v40 = vadd.f32 %v14705_v22, %v9299_v28  ;;  %v9642_v17 = vpop.f32.mrb[95].mxu0  ;;  %v12106_v15 = vpack.c.bf16 %v12026_v34, %v12024_v62  ;;  %v12107_v61 = vpack.c.bf16 %v12031_v55, %v12029_v6  ;;  %v12040_v39 = vrot.slane %v15496_v10, 4 }
 0x4cd   : > { %v20973_v18 = vadd.f32 %v9642_v17, %v9297_v1  ;;  %v14724_v51 = vpop.f32.mrb[64].mxu1  ;;  %v15493_v1 = vld [vmem:[#allocation2 + $0x148] sm:$0xf] }
 0x4ce   : > { %v10042_v7 = vadd.f32 %v14724_v51, %v20804_v19  ;;  %v9913_v56 = vpop.f32.mrb[65].mxu1  ;;  %v12035_v0 = vrot.slane %v15493_v1, 4  ;;  %v12037_v51 = vrot.slane %v15497_v57, 4 }
 0x4cf   : > { %v10040_v23 = vadd.f32 %v9913_v56, %v20808_v52  ;;  %v14725_v3 = vpop.f32.mrb[66].mxu1  ;;  %v15494_v52 = vld [vmem:[#allocation2 + $0x138] sm:$0xff] }
 0x4d0   : > { %v10043_v26 = vadd.f32 %v14725_v3, %v20813_v53  ;;  %v9916_v28 = vpop.f32.mrb[67].mxu1  ;;  %v12032_v49 = vrot.slane %v15494_v52, 4  ;;  %v15495_v53 = vld [vmem:[#allocation2 + $0x158] sm:$0xff]  ;;  %v12036_v43 = vsel %vm4327_vm3, %v12033_v31, %v12035_v0  ;;  %v15500_v0 = vld [vmem:[#allocation2 + $0x180] sm:$0xff] }
 0x4d1   : > { %v14772_v38 = vpop.f32.mrb[96].mxu0  ;;  %v10041_v14 = vadd.f32 %v9916_v28, %v20818_v9  ;;  %v12038_v2 = vrot.slane %v15495_v53, 4 }
 0x4d2   : > { %v20983_v19 = vadd.f32 %v14772_v38, %v10042_v7  ;;  %v10299_v63 = vpop.f32.mrb[97].mxu0  ;;  %15023 = vmatmul.mubr.bf16.gmra.mrb[172].mxu1 %v12106_v15  ;;  %v12034_v9 = vsel %vm4327_vm3, %v12032_v49, %v12033_v31  ;;  %v15499_v38 = vld [vmem:[#allocation2 + $0x178] sm:$0xf] }
 0x4d3   : > { %v20985_v33 = vadd.f32 %v10299_v63, %v10040_v23  ;;  %v14773_v22 = vpop.f32.mrb[98].mxu0  ;;  %15026 = vmatprep.mubr.bf16.mxu1 %v12107_v61  ;;  %v12039_v56 = vsel %vm4327_vm3, %v12037_v51, %v12038_v2  ;;  %v12041_v6 = vsel %vm4327_vm3, %v12038_v2, %v12040_v39  ;;  %v12108_v3 = vpack.c.bf16 %v12036_v43, %v12034_v9  ;;  %v15502_v61 = vld [vmem:[#allocation2 + $0x190] sm:$0xf]  ;;  %v15503_v2 = vld [vmem:[#allocation2 + $0x168] sm:$0xff] }
 0x4d4   : > { %v20987_v17 = vadd.f32 %v14773_v22, %v10043_v26  ;;  %v10302_v29 = vpop.f32.mrb[99].mxu0  ;;  %v15498_v26 = vld [vmem:[#allocation2 + $0x170] sm:$0xff]  ;;  %v12045_v15 = vrot.slane %v15499_v38, 4  ;;  %v12050_v22 = vrot.slane %v15502_v61, 4  ;;  %v12109_v53 = vpack.c.bf16 %v12041_v6, %v12039_v56  ;;  %v15507_v61 = vld [vmem:[#allocation2 + $0x1a8] sm:$0xf] }
 0x4d5   : > { %v20989_v54 = vadd.f32 %v10302_v29, %v10041_v14  ;;  %v14728_v62 = vpop.f32.mrb[68].mxu1  ;;  %v12043_v28 = vrot.slane %v15498_v26, 4  ;;  %v12047_v14 = vrot.slane %v15500_v0, 4  ;;  %v12042_v10 = vrot.slane %v15503_v2, 4 }
 0x4d6   : > { %v10046_v34 = vadd.f32 %v14728_v62, %v20833_v50  ;;  %v9929_v7 = vpop.f32.mrb[69].mxu1  ;;  %v15501_v50 = vld [vmem:[#allocation2 + $0x188] sm:$0xff] }
 0x4d7   : > { %v10044_v55 = vadd.f32 %v9929_v7, %v20837_v41  ;;  %v14729_v23 = vpop.f32.mrb[70].mxu1  ;;  %v12048_v63 = vrot.slane %v15501_v50, 4  ;;  %v12044_v43 = vsel %vm4327_vm3, %v12042_v10, %v12043_v28 }
 0x4d8   : > { %v10047_v32 = vadd.f32 %v14729_v23, %v20842_v59  ;;  %v9932_v31 = vpop.f32.mrb[71].mxu1 }
 0x4d9   : > { %v14776_v1 = vpop.f32.mrb[100].mxu0  ;;  %v10045_v52 = vadd.f32 %v9932_v31, %v20847_v45  ;;  %v12046_v45 = vsel %vm4327_vm3, %v12043_v28, %v12045_v15  ;;  %v12049_v51 = vsel %vm4327_vm3, %v12047_v14, %v12048_v63  ;;  %v12051_v62 = vsel %vm4327_vm3, %v12048_v63, %v12050_v22  ;;  %v15504_v31 = vld [vmem:[#allocation2 + $0x198] sm:$0xff]  ;;  %v15505_v15 = vld [vmem:[#allocation2 + $0x1c0] sm:$0xf] }
 0x4da   : > { %v20999_v49 = vadd.f32 %v14776_v1, %v10046_v34  ;;  %v10315_v41 = vpop.f32.mrb[101].mxu0  ;;  %15027 = vmatmul.mubr.bf16.gmra.mrb[176].mxu1 %v12108_v3  ;;  %v12110_v23 = vpack.c.bf16 %v12046_v45, %v12044_v43  ;;  %v12111_v3 = vpack.c.bf16 %v12051_v62, %v12049_v51  ;;  %v12052_v1 = vrot.slane %v15504_v31, 4  ;;  %v15506_v63 = vld [vmem:[#allocation2 + $0x1a0] sm:$0xff] }
 0x4db   : > { %v21001_v39 = vadd.f32 %v10315_v41, %v10044_v55  ;;  %v14777_v29 = vpop.f32.mrb[102].mxu0  ;;  %15030 = vmatprep.mubr.bf16.mxu1 %v12109_v53  ;;  %v12057_v28 = vrot.slane %v20859_v21, 4  ;;  %v12060_v0 = vrot.slane %v15505_v15, 4  ;;  %v12055_v22 = vrot.slane %v15507_v61, 4 }
 0x4dc   : > { %v21003_v59 = vadd.f32 %v14777_v29, %v10047_v32  ;;  %v10318_v9 = vpop.f32.mrb[103].mxu0 }
 0x4dd   : > { %v21006_v57 = vadd.f32 %v10318_v9, %v10045_v52  ;;  %v14732_v34 = vpop.f32.mrb[72].mxu1  ;;  %v12061_v2 = vsel %vm4327_vm3, %v12057_v28, %v12060_v0 }
 0x4de   : > { %v10050_v7 = vadd.f32 %v14732_v34, %v20866_v27  ;;  %v9945_v56 = vpop.f32.mrb[73].mxu1  ;;  %v12113_v62 = vpack.c.bf16 %v12061_v2, %v12057_v28  ;;  %v15508_v34 = vld [vmem:[#allocation2 + $0x1d8] sm:$0xf] }
 0x4df   : > { %v10048_v6 = vadd.f32 %v9945_v56, %v20870_v36  ;;  %v14733_v55 = vpop.f32.mrb[74].mxu1  ;;  %v12053_v36 = vrot.slane %v15506_v63, 4 }
 0x4e0   : > { %v10051_v26 = vadd.f32 %v14733_v55, %v20873_v44  ;;  %v9948_v38 = vpop.f32.mrb[75].mxu1 }
 0x4e1   : > { %v14780_v32 = vpop.f32.mrb[104].mxu0  ;;  %v10049_v14 = vadd.f32 %v9948_v38, %v20880_v25  ;;  %v12054_v10 = vsel %vm4327_vm3, %v12052_v1, %v12053_v36  ;;  %v12056_v29 = vsel %vm4327_vm3, %v12053_v36, %v12055_v22 }
 0x4e2   : > { %v21016_v50 = vadd.f32 %v14780_v32, %v10050_v7  ;;  %v10331_v27 = vpop.f32.mrb[105].mxu0  ;;  %15031 = vmatmul.mubr.bf16.gmra.mrb[180].mxu1 %v12110_v23  ;;  %v12065_v7 = vrot.slane %v15508_v34, 4  ;;  %v12112_v23 = vpack.c.bf16 %v12056_v29, %v12054_v10 }
 0x4e3   : > { %v21018_v52 = vadd.f32 %v10331_v27, %v10048_v6  ;;  %v14781_v44 = vpop.f32.mrb[106].mxu0  ;;  %15034 = vmatprep.mubr.bf16.mxu1 %v12111_v3 }
 0x4e4   : > { %v21020_v41 = vadd.f32 %v14781_v44, %v10051_v26  ;;  %v10334_v53 = vpop.f32.mrb[107].mxu0  ;;  %v12066_v1 = vsel %vm4327_vm3, %v12057_v28, %v12065_v7 }
 0x4e5   : > { %v21022_v21 = vadd.f32 %v10334_v53, %v10049_v14  ;;  %v14736_v25 = vpop.f32.mrb[76].mxu1 }
 0x4e6   : > { %v10054_v9 = vadd.f32 %v14736_v25, %v20897_v46  ;;  %v9961_v43 = vpop.f32.mrb[77].mxu1 }
 0x4e7   : > { %v10052_v45 = vadd.f32 %v9961_v43, %v20899_v16  ;;  %v14737_v51 = vpop.f32.mrb[78].mxu1 }
 0x4e8   : > { %v10055_v56 = vadd.f32 %v14737_v51, %v20903_v60  ;;  %v9964_v6 = vpop.f32.mrb[79].mxu1 }
 0x4e9   : > { %v14784_v55 = vpop.f32.mrb[108].mxu0  ;;  %v10053_v3 = vadd.f32 %v9964_v6, %v20907_v35  ;;  %v12114_v35 = vpack.c.bf16 %v12066_v1, %v12057_v28 }
 0x4ea   : > { %v21031_v26 = vadd.f32 %v14784_v55, %v10054_v9  ;;  %v10347_v38 = vpop.f32.mrb[109].mxu0  ;;  %15035 = vmatmul.mubr.bf16.gmra.mrb[184].mxu1 %v12112_v23 }
 0x4eb   : > { %v21033_v32 = vadd.f32 %v10347_v38, %v10052_v45  ;;  %v14785_v46 = vpop.f32.mrb[110].mxu0  ;;  %15038 = vmatprep.mubr.bf16.mxu1 %v12113_v62 }
 0x4ec   : > { %v21035_v31 = vadd.f32 %v14785_v46, %v10055_v56  ;;  %v10350_v16 = vpop.f32.mrb[111].mxu0 }
 0x4ed   : > { %v21038_v15 = vadd.f32 %v10350_v16, %v10053_v3  ;;  %v14740_v60 = vpop.f32.mrb[80].mxu1 }
 0x4ee   : > { %v10058_v0 = vadd.f32 %v14740_v60, %v20918_v4  ;;  %v9977_v14 = vpop.f32.mrb[81].mxu1 }
 0x4ef   : > { %v10056_v27 = vadd.f32 %v9977_v14, %v20921_v42  ;;  %v14741_v63 = vpop.f32.mrb[82].mxu1 }
 0x4f0   : > { %v10059_v36 = vadd.f32 %v14741_v63, %v20923_v8  ;;  %v9980_v61 = vpop.f32.mrb[83].mxu1 }
 0x4f1   : > { %v14788_v22 = vpop.f32.mrb[112].mxu0  ;;  %v10057_v44 = vadd.f32 %v9980_v61, %v20925_v47 }
 0x4f2   : > { %v21044_v53 = vadd.f32 %v14788_v22, %v10058_v0  ;;  %v10363_v2 = vpop.f32.mrb[113].mxu0  ;;  %15039 = vmatmul.mubr.bf16.gmra.mrb[188].mxu1 %v12114_v35 }
 0x4f3   : > { %v21046_v25 = vadd.f32 %v10363_v2, %v10056_v27  ;;  %v14789_v10 = vpop.f32.mrb[114].mxu0 }
 0x4f4   : > { %v21048_v29 = vadd.f32 %v14789_v10, %v10059_v36  ;;  %v10366_v4 = vpop.f32.mrb[115].mxu0 }
 0x4f5   : > { %v21050_v28 = vadd.f32 %v10366_v4, %v10057_v44  ;;  %v14744_v42 = vpop.f32.mrb[84].mxu1 }
 0x4f6   : > { %v10062_v9 = vadd.f32 %v14744_v42, %v20935_v5  ;;  %v9993_v8 = vpop.f32.mrb[85].mxu1 }
 0x4f7   : > { %v10060_v43 = vadd.f32 %v9993_v8, %v20937_v37  ;;  %v14745_v45 = vpop.f32.mrb[86].mxu1 }
 0x4f8   : > { %v10063_v47 = vadd.f32 %v14745_v45, %v20939_v58  ;;  %v9996_v51 = vpop.f32.mrb[87].mxu1 }
 0x4f9   : > { %v14792_v62 = vpop.f32.mrb[116].mxu0  ;;  %v10061_v34 = vadd.f32 %v9996_v51, %v20941_v11 }
 0x4fa   : > { %v21056_v7 = vadd.f32 %v14792_v62, %v10062_v9  ;;  %v10379_v56 = vpop.f32.mrb[117].mxu0 }
 0x4fb   : > { %v21058_v6 = vadd.f32 %v10379_v56, %v10060_v43  ;;  %v14793_v55 = vpop.f32.mrb[118].mxu0 }
 0x4fc   : > { %v21060_v23 = vadd.f32 %v14793_v55, %v10063_v47  ;;  %v10382_v3 = vpop.f32.mrb[119].mxu0 }
 0x4fd   : > { %v21062_v5 = vadd.f32 %v10382_v3, %v10061_v34  ;;  %v14748_v38 = vpop.f32.mrb[88].mxu1 }
 0x4fe   : > { %v10066_v37 = vadd.f32 %v14748_v38, %v20951_v30  ;;  %v10009_v46 = vpop.f32.mrb[89].mxu1 }
 0x4ff   : > { %v10064_v58 = vadd.f32 %v10009_v46, %v20953_v24  ;;  %v14749_v16 = vpop.f32.mrb[90].mxu1 }
 0x500   : > { %v10067_v11 = vadd.f32 %v14749_v16, %v20955_v20  ;;  %v10012_v1 = vpop.f32.mrb[91].mxu1 }
 0x501   : > { %v14796_v60 = vpop.f32.mrb[120].mxu0  ;;  %v10065_v0 = vadd.f32 %v10012_v1, %v20957_v12 }
 0x502   : > { %v21068_v14 = vadd.f32 %v14796_v60, %v10066_v37  ;;  %v10395_v35 = vpop.f32.mrb[121].mxu0 }
 0x503   : > { %v21070_v27 = vadd.f32 %v10395_v35, %v10064_v58  ;;  %v14797_v63 = vpop.f32.mrb[122].mxu0 }
 0x504   : > { %v21072_v36 = vadd.f32 %v14797_v63, %v10067_v11  ;;  %v10398_v61 = vpop.f32.mrb[123].mxu0 }
 0x505   : > { %v21074_v30 = vadd.f32 %v10398_v61, %v10065_v0  ;;  %v14752_v22 = vpop.f32.mrb[92].mxu1 }
 0x506   : > { %v10070_v24 = vadd.f32 %v14752_v22, %v20967_v48  ;;  %v10025_v44 = vpop.f32.mrb[93].mxu1 }
 0x507   : > { %v10068_v20 = vadd.f32 %v10025_v44, %v20969_v13  ;;  %v14753_v2 = vpop.f32.mrb[94].mxu1 }
 0x508   : > { %v10071_v12 = vadd.f32 %v14753_v2, %v20971_v40  ;;  %v10028_v10 = vpop.f32.mrb[95].mxu1 }
 0x509   : > { %v14800_v4 = vpop.f32.mrb[124].mxu0  ;;  %v10069_v42 = vadd.f32 %v10028_v10, %v20973_v18 }
 0x50a   : > { %v21080_v9 = vadd.f32 %v14800_v4, %v10070_v24  ;;  %v10411_v8 = vpop.f32.mrb[125].mxu0 }
 0x50b   : > { %v21082_v43 = vadd.f32 %v10411_v8, %v10068_v20  ;;  %v14801_v45 = vpop.f32.mrb[126].mxu0 }
 0x50c   : > { %v21084_v47 = vadd.f32 %v14801_v45, %v10071_v12  ;;  %v10414_v51 = vpop.f32.mrb[127].mxu0 }
 0x50d   : > { %v21086_v48 = vadd.f32 %v10414_v51, %v10069_v42  ;;  %v14820_v62 = vpop.f32.mrb[96].mxu1 }
 0x50e   : > { %v10751_v13 = vadd.f32 %v14820_v62, %v20983_v19  ;;  %v10622_v34 = vpop.f32.mrb[97].mxu1 }
 0x50f   : > { %v10749_v40 = vadd.f32 %v10622_v34, %v20985_v33  ;;  %v14821_v56 = vpop.f32.mrb[98].mxu1 }
 0x510   : > { %v10752_v18 = vadd.f32 %v14821_v56, %v20987_v17  ;;  %v10625_v55 = vpop.f32.mrb[99].mxu1 }
 0x511   : > { %v14868_v3 = vpop.f32.mrb[128].mxu0  ;;  %v10750_v38 = vadd.f32 %v10625_v55, %v20989_v54 }
 0x512   : > { %v21092_v37 = vadd.f32 %v14868_v3, %v10751_v13  ;;  %v11056_v46 = vpop.f32.mrb[129].mxu0 }
 0x513   : > { %v21094_v58 = vadd.f32 %v11056_v46, %v10749_v40  ;;  %v14869_v16 = vpop.f32.mrb[130].mxu0 }
 0x514   : > { %v21096_v11 = vadd.f32 %v14869_v16, %v10752_v18  ;;  %v11059_v1 = vpop.f32.mrb[131].mxu0 }
 0x515   : > { %v21098_v19 = vadd.f32 %v11059_v1, %v10750_v38  ;;  %v14824_v60 = vpop.f32.mrb[100].mxu1 }
 0x516   : > { %v10755_v33 = vadd.f32 %v14824_v60, %v20999_v49  ;;  %v10638_v0 = vpop.f32.mrb[101].mxu1 }
 0x517   : > { %v10753_v17 = vadd.f32 %v10638_v0, %v21001_v39  ;;  %v14825_v35 = vpop.f32.mrb[102].mxu1 }
 0x518   : > { %v10756_v54 = vadd.f32 %v14825_v35, %v21003_v59  ;;  %v10641_v63 = vpop.f32.mrb[103].mxu1 }
 0x519   : > { %v14872_v61 = vpop.f32.mrb[132].mxu0  ;;  %v10754_v22 = vadd.f32 %v10641_v63, %v21006_v57 }
 0x51a   : > { %v21104_v24 = vadd.f32 %v14872_v61, %v10755_v33  ;;  %v11072_v44 = vpop.f32.mrb[133].mxu0 }
 0x51b   : > { %v21106_v20 = vadd.f32 %v11072_v44, %v10753_v17  ;;  %v14873_v2 = vpop.f32.mrb[134].mxu0 }
 0x51c   : > { %v21108_v12 = vadd.f32 %v14873_v2, %v10756_v54  ;;  %v11075_v10 = vpop.f32.mrb[135].mxu0 }
 0x51d   : > { %v21110_v49 = vadd.f32 %v11075_v10, %v10754_v22  ;;  %v14828_v4 = vpop.f32.mrb[104].mxu1 }
 0x51e   : > { %v10759_v39 = vadd.f32 %v14828_v4, %v21016_v50  ;;  %v10654_v42 = vpop.f32.mrb[105].mxu1 }
 0x51f   : > { %v10757_v59 = vadd.f32 %v10654_v42, %v21018_v52  ;;  %v14829_v8 = vpop.f32.mrb[106].mxu1 }
 0x520   : > { %v10760_v57 = vadd.f32 %v14829_v8, %v21020_v41  ;;  %v10657_v45 = vpop.f32.mrb[107].mxu1 }
 0x521   : > { %v14876_v51 = vpop.f32.mrb[136].mxu0  ;;  %v10758_v62 = vadd.f32 %v10657_v45, %v21022_v21 }
 0x522   : > { %v21116_v13 = vadd.f32 %v14876_v51, %v10759_v39  ;;  %v11088_v34 = vpop.f32.mrb[137].mxu0 }
 0x523   : > { %v21118_v40 = vadd.f32 %v11088_v34, %v10757_v59  ;;  %v14877_v56 = vpop.f32.mrb[138].mxu0 }
 0x524   : > { %v21120_v18 = vadd.f32 %v14877_v56, %v10760_v57  ;;  %v11091_v55 = vpop.f32.mrb[139].mxu0 }
 0x525   : > { %v21122_v50 = vadd.f32 %v11091_v55, %v10758_v62  ;;  %v14832_v3 = vpop.f32.mrb[108].mxu1 }
 0x526   : > { %v10763_v52 = vadd.f32 %v14832_v3, %v21031_v26  ;;  %v10670_v38 = vpop.f32.mrb[109].mxu1 }
 0x527   : > { %v10761_v41 = vadd.f32 %v10670_v38, %v21033_v32  ;;  %v14833_v46 = vpop.f32.mrb[110].mxu1 }
 0x528   : > { %v10764_v21 = vadd.f32 %v14833_v46, %v21035_v31  ;;  %v10673_v16 = vpop.f32.mrb[111].mxu1 }
 0x529   : > { %v14880_v1 = vpop.f32.mrb[140].mxu0  ;;  %v10762_v60 = vadd.f32 %v10673_v16, %v21038_v15 }
 0x52a   : > { %v21128_v33 = vadd.f32 %v14880_v1, %v10763_v52  ;;  %v11104_v0 = vpop.f32.mrb[141].mxu0 }
 0x52b   : > { %v21130_v17 = vadd.f32 %v11104_v0, %v10761_v41  ;;  %v14881_v35 = vpop.f32.mrb[142].mxu0 }
 0x52c   : > { %v21132_v54 = vadd.f32 %v14881_v35, %v10764_v21  ;;  %v11107_v63 = vpop.f32.mrb[143].mxu0 }
 0x52d   : > { %v21134_v26 = vadd.f32 %v11107_v63, %v10762_v60  ;;  %v14836_v61 = vpop.f32.mrb[112].mxu1 }
 0x52e   : > { %v10767_v32 = vadd.f32 %v14836_v61, %v21044_v53  ;;  %v10686_v22 = vpop.f32.mrb[113].mxu1 }
 0x52f   : > { %v10765_v31 = vadd.f32 %v10686_v22, %v21046_v25  ;;  %v14837_v44 = vpop.f32.mrb[114].mxu1 }
 0x530   : > { %v10768_v15 = vadd.f32 %v14837_v44, %v21048_v29  ;;  %v10689_v2 = vpop.f32.mrb[115].mxu1 }
 0x531   : > { %v14884_v10 = vpop.f32.mrb[144].mxu0  ;;  %v10766_v4 = vadd.f32 %v10689_v2, %v21050_v28 }
 0x532   : > { %v21140_v39 = vadd.f32 %v14884_v10, %v10767_v32  ;;  %v11120_v42 = vpop.f32.mrb[145].mxu0 }
 0x533   : > { %v21142_v59 = vadd.f32 %v11120_v42, %v10765_v31  ;;  %v14885_v8 = vpop.f32.mrb[146].mxu0 }
 0x534   : > { %v21144_v57 = vadd.f32 %v14885_v8, %v10768_v15  ;;  %v11123_v45 = vpop.f32.mrb[147].mxu0 }
 0x535   : > { %v21146_v53 = vadd.f32 %v11123_v45, %v10766_v4  ;;  %v14840_v51 = vpop.f32.mrb[116].mxu1 }
 0x536   : > { %v10771_v25 = vadd.f32 %v14840_v51, %v21056_v7  ;;  %v10702_v62 = vpop.f32.mrb[117].mxu1 }
 0x537   : > { %v10769_v29 = vadd.f32 %v10702_v62, %v21058_v6  ;;  %v14841_v34 = vpop.f32.mrb[118].mxu1 }
 0x538   : > { %v10772_v28 = vadd.f32 %v14841_v34, %v21060_v23  ;;  %v10705_v56 = vpop.f32.mrb[119].mxu1 }
 0x539   : > { %v14888_v55 = vpop.f32.mrb[148].mxu0  ;;  %v10770_v3 = vadd.f32 %v10705_v56, %v21062_v5 }
 0x53a   : > { %v21152_v52 = vadd.f32 %v14888_v55, %v10771_v25  ;;  %v11136_v38 = vpop.f32.mrb[149].mxu0 }
 0x53b   : > { %v21154_v41 = vadd.f32 %v11136_v38, %v10769_v29  ;;  %v14889_v46 = vpop.f32.mrb[150].mxu0 }
 0x53c   : > { %v21156_v21 = vadd.f32 %v14889_v46, %v10772_v28  ;;  %v11139_v16 = vpop.f32.mrb[151].mxu0 }
 0x53d   : > { %v21158_v7 = vadd.f32 %v11139_v16, %v10770_v3  ;;  %v14844_v1 = vpop.f32.mrb[120].mxu1 }
 0x53e   : > { %v10775_v6 = vadd.f32 %v14844_v1, %v21068_v14  ;;  %v10718_v60 = vpop.f32.mrb[121].mxu1 }
 0x53f   : > { %v10773_v23 = vadd.f32 %v10718_v60, %v21070_v27  ;;  %v14845_v0 = vpop.f32.mrb[122].mxu1 }
 0x540   : > { %v10776_v5 = vadd.f32 %v14845_v0, %v21072_v36  ;;  %v10721_v35 = vpop.f32.mrb[123].mxu1 }
 0x541   : > { %v14892_v63 = vpop.f32.mrb[152].mxu0  ;;  %v10774_v61 = vadd.f32 %v10721_v35, %v21074_v30 }
 0x542   : > { %v21164_v32 = vadd.f32 %v14892_v63, %v10775_v6  ;;  %v11152_v22 = vpop.f32.mrb[153].mxu0 }
 0x543   : > { %v21166_v31 = vadd.f32 %v11152_v22, %v10773_v23  ;;  %v14893_v44 = vpop.f32.mrb[154].mxu0 }
 0x544   : > { %v21168_v15 = vadd.f32 %v14893_v44, %v10776_v5  ;;  %v11155_v2 = vpop.f32.mrb[155].mxu0 }
 0x545   : > { %v21170_v14 = vadd.f32 %v11155_v2, %v10774_v61  ;;  %v14848_v10 = vpop.f32.mrb[124].mxu1 }
 0x546   : > { %v10779_v27 = vadd.f32 %v14848_v10, %v21080_v9  ;;  %v10734_v4 = vpop.f32.mrb[125].mxu1 }
 0x547   : > { %v10777_v36 = vadd.f32 %v10734_v4, %v21082_v43  ;;  %v14849_v42 = vpop.f32.mrb[126].mxu1 }
 0x548   : > { %v10780_v30 = vadd.f32 %v14849_v42, %v21084_v47  ;;  %v10737_v8 = vpop.f32.mrb[127].mxu1 }
 0x549   : > { %v14896_v45 = vpop.f32.mrb[156].mxu0  ;;  %v10778_v51 = vadd.f32 %v10737_v8, %v21086_v48 }
 0x54a   : > { %v21176_v25 = vadd.f32 %v14896_v45, %v10779_v27  ;;  %v11168_v62 = vpop.f32.mrb[157].mxu0 }
 0x54b   : > { %v21178_v29 = vadd.f32 %v11168_v62, %v10777_v36  ;;  %v14897_v34 = vpop.f32.mrb[158].mxu0 }
 0x54c   : > { %v21180_v28 = vadd.f32 %v14897_v34, %v10780_v30  ;;  %v11171_v56 = vpop.f32.mrb[159].mxu0 }
 0x54d   : > { %v21182_v9 = vadd.f32 %v11171_v56, %v10778_v51  ;;  %v14916_v55 = vpop.f32.mrb[128].mxu1 }
 0x54e   : > { %v11571_v43 = vadd.f32 %v14916_v55, %v21092_v37  ;;  %v11442_v3 = vpop.f32.mrb[129].mxu1 }
 0x54f   : > { %v11569_v47 = vadd.f32 %v11442_v3, %v21094_v58  ;;  %v14917_v38 = vpop.f32.mrb[130].mxu1 }
 0x550   : > { %v11572_v48 = vadd.f32 %v14917_v38, %v21096_v11  ;;  %v11445_v46 = vpop.f32.mrb[131].mxu1 }
 0x551   : > { %v14964_v16 = vpop.f32.mrb[160].mxu0  ;;  %v11570_v1 = vadd.f32 %v11445_v46, %v21098_v19 }
 0x552   : > { %v21188_v6 = vadd.f32 %v14964_v16, %v11571_v43  ;;  %v11828_v60 = vpop.f32.mrb[161].mxu0 }
 0x553   : > { %v21190_v23 = vadd.f32 %v11828_v60, %v11569_v47  ;;  %v14965_v0 = vpop.f32.mrb[162].mxu0 }
 0x554   : > { %v21192_v5 = vadd.f32 %v14965_v0, %v11572_v48  ;;  %v11831_v35 = vpop.f32.mrb[163].mxu0 }
 0x555   : > { %v21194_v37 = vadd.f32 %v11831_v35, %v11570_v1  ;;  %v14920_v63 = vpop.f32.mrb[132].mxu1 }
 0x556   : > { %v11575_v58 = vadd.f32 %v14920_v63, %v21104_v24  ;;  %v11458_v61 = vpop.f32.mrb[133].mxu1 }
 0x557   : > { %v11573_v11 = vadd.f32 %v11458_v61, %v21106_v20  ;;  %v14921_v22 = vpop.f32.mrb[134].mxu1 }
 0x558   : > { %v11576_v19 = vadd.f32 %v14921_v22, %v21108_v12  ;;  %v11461_v44 = vpop.f32.mrb[135].mxu1 }
 0x559   : > { %v14968_v2 = vpop.f32.mrb[164].mxu0  ;;  %v11574_v10 = vadd.f32 %v11461_v44, %v21110_v49 }
 0x55a   : > { %v21200_v27 = vadd.f32 %v14968_v2, %v11575_v58  ;;  %v11844_v4 = vpop.f32.mrb[165].mxu0 }
 0x55b   : > { %v21202_v36 = vadd.f32 %v11844_v4, %v11573_v11  ;;  %v14969_v42 = vpop.f32.mrb[166].mxu0 }
 0x55c   : > { %v21204_v30 = vadd.f32 %v14969_v42, %v11576_v19  ;;  %v11847_v8 = vpop.f32.mrb[167].mxu0 }
 0x55d   : > { %v21206_v24 = vadd.f32 %v11847_v8, %v11574_v10  ;;  %v14924_v45 = vpop.f32.mrb[136].mxu1 }
 0x55e   : > { %v11579_v20 = vadd.f32 %v14924_v45, %v21116_v13  ;;  %v11474_v51 = vpop.f32.mrb[137].mxu1 }
 0x55f   : > { %v11577_v12 = vadd.f32 %v11474_v51, %v21118_v40  ;;  %v14925_v62 = vpop.f32.mrb[138].mxu1 }
 0x560   : > { %v11580_v49 = vadd.f32 %v14925_v62, %v21120_v18  ;;  %v11477_v34 = vpop.f32.mrb[139].mxu1 }
 0x561   : > { %v14972_v56 = vpop.f32.mrb[168].mxu0  ;;  %v11578_v55 = vadd.f32 %v11477_v34, %v21122_v50 }
 0x562   : > { %v21212_v43 = vadd.f32 %v14972_v56, %v11579_v20  ;;  %v11860_v3 = vpop.f32.mrb[169].mxu0 }
 0x563   : > { %v21214_v47 = vadd.f32 %v11860_v3, %v11577_v12  ;;  %v14973_v38 = vpop.f32.mrb[170].mxu0 }
 0x564   : > { %v21216_v48 = vadd.f32 %v14973_v38, %v11580_v49  ;;  %v11863_v46 = vpop.f32.mrb[171].mxu0 }
 0x565   : > { %v21218_v13 = vadd.f32 %v11863_v46, %v11578_v55  ;;  %v14928_v16 = vpop.f32.mrb[140].mxu1 }
 0x566   : > { %v11583_v40 = vadd.f32 %v14928_v16, %v21128_v33  ;;  %v11490_v1 = vpop.f32.mrb[141].mxu1 }
 0x567   : > { %v11581_v18 = vadd.f32 %v11490_v1, %v21130_v17  ;;  %v14929_v60 = vpop.f32.mrb[142].mxu1 }
 0x568   : > { %v11584_v50 = vadd.f32 %v14929_v60, %v21132_v54  ;;  %v11493_v0 = vpop.f32.mrb[143].mxu1 }
 0x569   : > { %v14976_v35 = vpop.f32.mrb[172].mxu0  ;;  %v11582_v63 = vadd.f32 %v11493_v0, %v21134_v26 }
 0x56a   : > { %v21224_v58 = vadd.f32 %v14976_v35, %v11583_v40  ;;  %v11876_v61 = vpop.f32.mrb[173].mxu0 }
 0x56b   : > { %v21226_v11 = vadd.f32 %v11876_v61, %v11581_v18  ;;  %v14977_v22 = vpop.f32.mrb[174].mxu0 }
 0x56c   : > { %v21228_v19 = vadd.f32 %v14977_v22, %v11584_v50  ;;  %v11879_v44 = vpop.f32.mrb[175].mxu0 }
 0x56d   : > { %v21230_v33 = vadd.f32 %v11879_v44, %v11582_v63  ;;  %v14932_v2 = vpop.f32.mrb[144].mxu1 }
 0x56e   : > { %v11587_v17 = vadd.f32 %v14932_v2, %v21140_v39  ;;  %v11506_v10 = vpop.f32.mrb[145].mxu1 }
 0x56f   : > { %v11585_v54 = vadd.f32 %v11506_v10, %v21142_v59  ;;  %v14933_v4 = vpop.f32.mrb[146].mxu1 }
 0x570   : > { %v11588_v26 = vadd.f32 %v14933_v4, %v21144_v57  ;;  %v11509_v42 = vpop.f32.mrb[147].mxu1 }
 0x571   : > { %v14980_v8 = vpop.f32.mrb[176].mxu0  ;;  %v11586_v45 = vadd.f32 %v11509_v42, %v21146_v53 }
 0x572   : > { %v21236_v20 = vadd.f32 %v14980_v8, %v11587_v17  ;;  %v11892_v51 = vpop.f32.mrb[177].mxu0 }
 0x573   : > { %v21238_v12 = vadd.f32 %v11892_v51, %v11585_v54  ;;  %v14981_v62 = vpop.f32.mrb[178].mxu0 }
 0x574   : > { %v21240_v49 = vadd.f32 %v14981_v62, %v11588_v26  ;;  %v11895_v34 = vpop.f32.mrb[179].mxu0 }
 0x575   : > { %v21242_v39 = vadd.f32 %v11895_v34, %v11586_v45  ;;  %v14936_v56 = vpop.f32.mrb[148].mxu1 }
 0x576   : > { %v11591_v59 = vadd.f32 %v14936_v56, %v21152_v52  ;;  %v11522_v55 = vpop.f32.mrb[149].mxu1 }
 0x577   : > { %v11589_v57 = vadd.f32 %v11522_v55, %v21154_v41  ;;  %v14937_v3 = vpop.f32.mrb[150].mxu1 }
 0x578   : > { %v11592_v53 = vadd.f32 %v14937_v3, %v21156_v21  ;;  %v11525_v38 = vpop.f32.mrb[151].mxu1 }
 0x579   : > { %v14984_v46 = vpop.f32.mrb[180].mxu0  ;;  %v11590_v16 = vadd.f32 %v11525_v38, %v21158_v7 }
 0x57a   : > { %v21248_v40 = vadd.f32 %v14984_v46, %v11591_v59  ;;  %v11908_v1 = vpop.f32.mrb[181].mxu0 }
 0x57b   : > { %v21250_v18 = vadd.f32 %v11908_v1, %v11589_v57  ;;  %v14985_v60 = vpop.f32.mrb[182].mxu0 }
 0x57c   : > { %v21252_v50 = vadd.f32 %v14985_v60, %v11592_v53  ;;  %v11911_v0 = vpop.f32.mrb[183].mxu0 }
 0x57d   : > { %v21254_v52 = vadd.f32 %v11911_v0, %v11590_v16  ;;  %v14940_v35 = vpop.f32.mrb[152].mxu1 }
 0x57e   : > { %v11595_v41 = vadd.f32 %v14940_v35, %v21164_v32  ;;  %v11538_v63 = vpop.f32.mrb[153].mxu1 }
 0x57f   : > { %v11593_v21 = vadd.f32 %v11538_v63, %v21166_v31  ;;  %v14941_v61 = vpop.f32.mrb[154].mxu1 }
 0x580   : > { %v11596_v7 = vadd.f32 %v14941_v61, %v21168_v15  ;;  %v11541_v22 = vpop.f32.mrb[155].mxu1 }
 0x581   : > { %v14988_v44 = vpop.f32.mrb[184].mxu0  ;;  %v11594_v2 = vadd.f32 %v11541_v22, %v21170_v14 }
 0x582   : > { %v21260_v17 = vadd.f32 %v14988_v44, %v11595_v41  ;;  %v11924_v10 = vpop.f32.mrb[185].mxu0 }
 0x583   : > { %v21262_v54 = vadd.f32 %v11924_v10, %v11593_v21  ;;  %v14989_v4 = vpop.f32.mrb[186].mxu0 }
 0x584   : > { %v21264_v26 = vadd.f32 %v14989_v4, %v11596_v7  ;;  %v11927_v42 = vpop.f32.mrb[187].mxu0 }
 0x585   : > { %v21266_v32 = vadd.f32 %v11927_v42, %v11594_v2  ;;  %v14944_v8 = vpop.f32.mrb[156].mxu1 }
 0x586   : > { %v11599_v31 = vadd.f32 %v14944_v8, %v21176_v25  ;;  %v11554_v45 = vpop.f32.mrb[157].mxu1 }
 0x587   : > { %v11597_v15 = vadd.f32 %v11554_v45, %v21178_v29  ;;  %v14945_v51 = vpop.f32.mrb[158].mxu1  ;;  %v21283_v29 = vld [vmem:[%s21395_s5] ss:$0 sm:$0xff] }
 0x588   : > { %v11600_v14 = vadd.f32 %v14945_v51, %v21180_v28  ;;  %v11557_v62 = vpop.f32.mrb[159].mxu1 }
 0x589   : > { %v14992_v34 = vpop.f32.mrb[188].mxu0  ;;  %v11598_v56 = vadd.f32 %v11557_v62, %v21182_v9 }
 0x58a   : > { %v21272_v59 = vadd.f32 %v14992_v34, %v11599_v31  ;;  %v11940_v55 = vpop.f32.mrb[189].mxu0 }
 0x58b   : > { %v21274_v57 = vadd.f32 %v11940_v55, %v11597_v15  ;;  %v14993_v3 = vpop.f32.mrb[190].mxu0 }
 0x58c   : > { %v21276_v53 = vadd.f32 %v14993_v3, %v11600_v14  ;;  %v11943_v25 = vpop.f32.mrb[191].mxu0 }
 0x58d   : > { %v21278_v38 = vadd.f32 %v11943_v25, %v11598_v56  ;;  %v15012_v46 = vpop.f32.mrb[160].mxu1 }
 0x58e   : > { %v12343_v28 = vadd.f32 %v15012_v46, %v21188_v6  ;;  %v12214_v9 = vpop.f32.mrb[161].mxu1 }
 0x58f   : > { %v12341_v16 = vadd.f32 %v12214_v9, %v21190_v23  ;;  %v15013_v1 = vpop.f32.mrb[162].mxu1 }
 0x590   : > { %v12382_v60 = vadd.f32 %v21283_v29, %v12343_v28  ;;  %v12344_v0 = vadd.f32 %v15013_v1, %v21192_v5  ;;  %v12217_v35 = vpop.f32.mrb[163].mxu1 }
 0x591   : > { %v12380_v6 = vadd.f32 %v21283_v29, %v12341_v16  ;;  %v12342_v41 = vadd.f32 %v12217_v35, %v21194_v37 }
 0x592   : > { %v12414_v23 = vmax.f32 %v12382_v60, 0.0  ;;  %v12383_v63 = vadd.f32 %v21283_v29, %v12344_v0 }
 0x593   : > { %v12412_v21 = vmax.f32 %v12380_v6, 0.0  ;;  %v12381_v5 = vadd.f32 %v21283_v29, %v12342_v41 }
 0x594   : > { %12446 = vst [vmem:[%s21293_s26 + $0x10] sm:$0xff] %v12414_v23  ;;  %v12415_v61 = vmax.f32 %v12383_v63, 0.0 }
 0x595   : > { %12444 = vst [vmem:[%s21293_s26] sm:$0xff] %v12412_v21  ;;  %v12413_v7 = vmax.f32 %v12381_v5, 0.0  ;;  %v15016_v22 = vpop.f32.mrb[164].mxu1 }
 0x596   : > { %12447 = vst [vmem:[%s21293_s26 + $0x18] sm:$0xff] %v12415_v61  ;;  %v12347_v44 = vadd.f32 %v15016_v22, %v21200_v27  ;;  %v12230_v2 = vpop.f32.mrb[165].mxu1 }
 0x597   : > { %12445 = vst [vmem:[%s21293_s26 + $0x8] sm:$0xff] %v12413_v7  ;;  %v12345_v37 = vadd.f32 %v12230_v2, %v21202_v36  ;;  %v15017_v10 = vpop.f32.mrb[166].mxu1 }
 0x598   : > { %v12386_v4 = vadd.f32 %v21283_v29, %v12347_v44  ;;  %v12348_v42 = vadd.f32 %v15017_v10, %v21204_v30  ;;  %v12233_v8 = vpop.f32.mrb[167].mxu1 }
 0x599   : > { %v12384_v31 = vadd.f32 %v21283_v29, %v12345_v37  ;;  %v12346_v45 = vadd.f32 %v12233_v8, %v21206_v24 }
 0x59a   : > { %v12418_v15 = vmax.f32 %v12386_v4, 0.0  ;;  %v12387_v27 = vadd.f32 %v21283_v29, %v12348_v42 }
 0x59b   : > { %v12416_v51 = vmax.f32 %v12384_v31, 0.0  ;;  %v12385_v14 = vadd.f32 %v21283_v29, %v12346_v45 }
 0x59c   : > { %12450 = vst [vmem:[%s21293_s26 + $0x30] sm:$0xff] %v12418_v15  ;;  %v12419_v36 = vmax.f32 %v12387_v27, 0.0 }
 0x59d   : > { %12448 = vst [vmem:[%s21293_s26 + $0x20] sm:$0xff] %v12416_v51  ;;  %v12417_v62 = vmax.f32 %v12385_v14, 0.0  ;;  %v15020_v34 = vpop.f32.mrb[168].mxu1 }
 0x59e   : > { %12451 = vst [vmem:[%s21293_s26 + $0x38] sm:$0xff] %v12419_v36  ;;  %v12351_v30 = vadd.f32 %v15020_v34, %v21212_v43  ;;  %v12246_v56 = vpop.f32.mrb[169].mxu1 }
 0x59f   : > { %12449 = vst [vmem:[%s21293_s26 + $0x28] sm:$0xff] %v12417_v62  ;;  %v12349_v24 = vadd.f32 %v12246_v56, %v21214_v47  ;;  %v15021_v55 = vpop.f32.mrb[170].mxu1 }
 0x5a0   : > { %v12390_v3 = vadd.f32 %v21283_v29, %v12351_v30  ;;  %v12352_v25 = vadd.f32 %v15021_v55, %v21216_v48  ;;  %v12249_v46 = vpop.f32.mrb[171].mxu1 }
 0x5a1   : > { %v12388_v28 = vadd.f32 %v21283_v29, %v12349_v24  ;;  %v12350_v9 = vadd.f32 %v12249_v46, %v21218_v13 }
 0x5a2   : > { %v12422_v16 = vmax.f32 %v12390_v3, 0.0  ;;  %v12391_v43 = vadd.f32 %v21283_v29, %v12352_v25 }
 0x5a3   : > { %v12420_v1 = vmax.f32 %v12388_v28, 0.0  ;;  %v12389_v60 = vadd.f32 %v21283_v29, %v12350_v9 }
 0x5a4   : > { %12454 = vst [vmem:[%s21293_s26 + $0x50] sm:$0xff] %v12422_v16  ;;  %v12423_v47 = vmax.f32 %v12391_v43, 0.0 }
 0x5a5   : > { %12452 = vst [vmem:[%s21293_s26 + $0x40] sm:$0xff] %v12420_v1  ;;  %v12421_v0 = vmax.f32 %v12389_v60, 0.0  ;;  %v15024_v35 = vpop.f32.mrb[172].mxu1 }
 0x5a6   : > { %12455 = vst [vmem:[%s21293_s26 + $0x58] sm:$0xff] %v12423_v47  ;;  %v12355_v48 = vadd.f32 %v15024_v35, %v21224_v58  ;;  %v12262_v6 = vpop.f32.mrb[173].mxu1 }
 0x5a7   : > { %12453 = vst [vmem:[%s21293_s26 + $0x48] sm:$0xff] %v12421_v0  ;;  %v12353_v13 = vadd.f32 %v12262_v6, %v21226_v11  ;;  %v15025_v41 = vpop.f32.mrb[174].mxu1 }
 0x5a8   : > { %v12394_v23 = vadd.f32 %v21283_v29, %v12355_v48  ;;  %v12356_v63 = vadd.f32 %v15025_v41, %v21228_v19  ;;  %v12265_v21 = vpop.f32.mrb[175].mxu1 }
 0x5a9   : > { %v12392_v5 = vadd.f32 %v21283_v29, %v12353_v13  ;;  %v12354_v61 = vadd.f32 %v12265_v21, %v21230_v33 }
 0x5aa   : > { %v12426_v7 = vmax.f32 %v12394_v23, 0.0  ;;  %v12395_v58 = vadd.f32 %v21283_v29, %v12356_v63 }
 0x5ab   : > { %v12424_v22 = vmax.f32 %v12392_v5, 0.0  ;;  %v12393_v44 = vadd.f32 %v21283_v29, %v12354_v61 }
 0x5ac   : > { %12458 = vst [vmem:[%s21293_s26 + $0x70] sm:$0xff] %v12426_v7  ;;  %v12427_v11 = vmax.f32 %v12395_v58, 0.0 }
 0x5ad   : > { %12456 = vst [vmem:[%s21293_s26 + $0x60] sm:$0xff] %v12424_v22  ;;  %v12425_v2 = vmax.f32 %v12393_v44, 0.0  ;;  %v15028_v37 = vpop.f32.mrb[176].mxu1 }
 0x5ae   : > { %12459 = vst [vmem:[%s21293_s26 + $0x78] sm:$0xff] %v12427_v11  ;;  %v12359_v19 = vadd.f32 %v15028_v37, %v21236_v20  ;;  %v12278_v10 = vpop.f32.mrb[177].mxu1 }
 0x5af   : > { %12457 = vst [vmem:[%s21293_s26 + $0x68] sm:$0xff] %v12425_v2  ;;  %v12357_v33 = vadd.f32 %v12278_v10, %v21238_v12  ;;  %v15029_v4 = vpop.f32.mrb[178].mxu1 }
 0x5b0   : > { %v12398_v42 = vadd.f32 %v21283_v29, %v12359_v19  ;;  %v12360_v8 = vadd.f32 %v15029_v4, %v21240_v49  ;;  %v12281_v31 = vpop.f32.mrb[179].mxu1 }
 0x5b1   : > { %v12396_v45 = vadd.f32 %v21283_v29, %v12357_v33  ;;  %v12358_v15 = vadd.f32 %v12281_v31, %v21242_v39 }
 0x5b2   : > { %v12430_v27 = vmax.f32 %v12398_v42, 0.0  ;;  %v12399_v20 = vadd.f32 %v21283_v29, %v12360_v8 }
 0x5b3   : > { %v12428_v51 = vmax.f32 %v12396_v45, 0.0  ;;  %v12397_v14 = vadd.f32 %v21283_v29, %v12358_v15 }
 0x5b4   : > { %12462 = vst [vmem:[%s21293_s26 + $0x90] sm:$0xff] %v12430_v27  ;;  %v12431_v12 = vmax.f32 %v12399_v20, 0.0 }
 0x5b5   : > { %12460 = vst [vmem:[%s21293_s26 + $0x80] sm:$0xff] %v12428_v51  ;;  %v12429_v36 = vmax.f32 %v12397_v14, 0.0  ;;  %v15032_v62 = vpop.f32.mrb[180].mxu1 }
 0x5b6   : > { %12463 = vst [vmem:[%s21293_s26 + $0x98] sm:$0xff] %v12431_v12  ;;  %v12363_v49 = vadd.f32 %v15032_v62, %v21248_v40  ;;  %v12294_v34 = vpop.f32.mrb[181].mxu1 }
 0x5b7   : > { %12461 = vst [vmem:[%s21293_s26 + $0x88] sm:$0xff] %v12429_v36  ;;  %v12361_v39 = vadd.f32 %v12294_v34, %v21250_v18  ;;  %v15033_v30 = vpop.f32.mrb[182].mxu1 }
 0x5b8   : > { %v12402_v56 = vadd.f32 %v21283_v29, %v12363_v49  ;;  %v12364_v24 = vadd.f32 %v15033_v30, %v21252_v50  ;;  %v12297_v55 = vpop.f32.mrb[183].mxu1 }
 0x5b9   : > { %v12400_v3 = vadd.f32 %v21283_v29, %v12361_v39  ;;  %v12362_v25 = vadd.f32 %v12297_v55, %v21254_v52 }
 0x5ba   : > { %v12434_v46 = vmax.f32 %v12402_v56, 0.0  ;;  %v12403_v40 = vadd.f32 %v21283_v29, %v12364_v24 }
 0x5bb   : > { %v12432_v28 = vmax.f32 %v12400_v3, 0.0  ;;  %v12401_v9 = vadd.f32 %v21283_v29, %v12362_v25 }
 0x5bc   : > { %12466 = vst [vmem:[%s21293_s26 + $0xb0] sm:$0xff] %v12434_v46  ;;  %v12435_v18 = vmax.f32 %v12403_v40, 0.0 }
 0x5bd   : > { %12464 = vst [vmem:[%s21293_s26 + $0xa0] sm:$0xff] %v12432_v28  ;;  %v12433_v16 = vmax.f32 %v12401_v9, 0.0  ;;  %v15036_v43 = vpop.f32.mrb[184].mxu1 }
 0x5be   : > { %12467 = vst [vmem:[%s21293_s26 + $0xb8] sm:$0xff] %v12435_v18  ;;  %v12367_v50 = vadd.f32 %v15036_v43, %v21260_v17  ;;  %v12310_v1 = vpop.f32.mrb[185].mxu1 }
 0x5bf   : > { %12465 = vst [vmem:[%s21293_s26 + $0xa8] sm:$0xff] %v12433_v16  ;;  %v12365_v52 = vadd.f32 %v12310_v1, %v21262_v54  ;;  %v15037_v60 = vpop.f32.mrb[186].mxu1 }
 0x5c0   : > { %v12406_v47 = vadd.f32 %v21283_v29, %v12367_v50  ;;  %v12368_v0 = vadd.f32 %v15037_v60, %v21264_v26  ;;  %v12313_v35 = vpop.f32.mrb[187].mxu1 }
 0x5c1   : > { %v12404_v48 = vadd.f32 %v21283_v29, %v12365_v52  ;;  %v12366_v6 = vadd.f32 %v12313_v35, %v21266_v32 }
 0x5c2   : > { %v12438_v13 = vmax.f32 %v12406_v47, 0.0  ;;  %v12407_v17 = vadd.f32 %v21283_v29, %v12368_v0 }
 0x5c3   : > { %v12436_v41 = vmax.f32 %v12404_v48, 0.0  ;;  %v12405_v23 = vadd.f32 %v21283_v29, %v12366_v6 }
 0x5c4   : > { %12470 = vst [vmem:[%s21293_s26 + $0xd0] sm:$0xff] %v12438_v13  ;;  %v12439_v54 = vmax.f32 %v12407_v17, 0.0 }
 0x5c5   : > { %12468 = vst [vmem:[%s21293_s26 + $0xc0] sm:$0xff] %v12436_v41  ;;  %v12437_v63 = vmax.f32 %v12405_v23, 0.0  ;;  %v15040_v21 = vpop.f32.mrb[188].mxu1 }
 0x5c6   : > { %12471 = vst [vmem:[%s21293_s26 + $0xd8] sm:$0xff] %v12439_v54  ;;  %v12371_v26 = vadd.f32 %v15040_v21, %v21272_v59  ;;  %v12326_v5 = vpop.f32.mrb[189].mxu1 }
 0x5c7   : > { %12469 = vst [vmem:[%s21293_s26 + $0xc8] sm:$0xff] %v12437_v63  ;;  %v12369_v32 = vadd.f32 %v12326_v5, %v21274_v57  ;;  %v15041_v61 = vpop.f32.mrb[190].mxu1 }
 0x5c8   : > { %v12410_v7 = vadd.f32 %v21283_v29, %v12371_v26  ;;  %v12372_v58 = vadd.f32 %v15041_v61, %v21276_v53  ;;  %v12329_v22 = vpop.f32.mrb[191].mxu1 }
 0x5c9   : > { %v12408_v44 = vadd.f32 %v21283_v29, %v12369_v32  ;;  %v12370_v11 = vadd.f32 %v12329_v22, %v21278_v38 }
 0x5ca   : > { %v12442_v2 = vmax.f32 %v12410_v7, 0.0  ;;  %v12411_v59 = vadd.f32 %v21283_v29, %v12372_v58 }
 0x5cb   : > { %v12440_v37 = vmax.f32 %v12408_v44, 0.0  ;;  %v12409_v19 = vadd.f32 %v21283_v29, %v12370_v11 }
 0x5cc   : > { %12474 = vst [vmem:[%s21293_s26 + $0xf0] sm:$0xff] %v12442_v2  ;;  %v12443_v10 = vmax.f32 %v12411_v59, 0.0 }
 0x5cd   : > { %12472 = vst [vmem:[%s21293_s26 + $0xe0] sm:$0xff] %v12440_v37  ;;  %v12441_v57 = vmax.f32 %v12409_v19, 0.0 }
 0x5ce   : > { %12475 = vst [vmem:[%s21293_s26 + $0xf8] sm:$0xff] %v12443_v10 }
 0x5cf   : > { %12473 = vst [vmem:[%s21293_s26 + $0xe8] sm:$0xff] %v12441_v57 }
 0x5d0 PF: > { %s16_s21 = sadd.s32 1, %s15515_s21  }
 0x5d1   : > { %p13_p4 = scmp.ge.s32.totalorder %s16_s21, 4  }
 0x5d3   :  { %15 = sbr.rel (!%p13_p4) target bundleno = 1 (0x1), region = 106 }

</bundles_post_ra>
